<compile_context>
chip_gen: v7x
topology: tpu7x:2x2x1
jax: 0.10.0
libtpu: 0.0.40
codegen_flags: <defaults>
</compile_context>

<pallas_src>
import functools

import numpy as np
import jax
import jax.numpy as jnp
from jax import lax
from jax.experimental import pallas as pl
from jax.experimental.pallas import tpu as pltpu


def _shift_rows(a, r):
    """out[i] = a[i + r] along axis 0, zero-filled outside [0, rows)."""
    if r == 0:
        return a
    rows, c = a.shape
    zeros = jnp.zeros((abs(r), c), a.dtype)
    if r > 0:
        return jnp.concatenate([a[r:], zeros], axis=0)
    return jnp.concatenate([zeros, a[:rows + r]], axis=0)


def basic_block_kernel(x_ref, w1_ref, b1_ref, w2_ref, b2_ref, o_ref, *, W):
    # x_ref : (1, H*W, Cin)   flattened NHWC input block (also the residual), f32
    # w1_ref: (9*Cin, Cout)   conv1 weights, im2col layout, BN1 scale folded (compute dtype)
    # b1_ref: (1, Cout)       BN1 bias, f32
    # w2_ref: (9*Cout, Cout)  conv2 weights, im2col layout, BN2 scale folded (compute dtype)
    # b2_ref: (1, Cout)       BN2 bias, f32
    # o_ref : (1, H*W, Cout)  f32
    HW = x_ref.shape[1]
    cdt = w1_ref.dtype                       # MXU operand dtype (bf16 default, f32 optional)

    # Column-edge masks; row edges are handled by the zero fill of _shift_rows.
    col = lax.broadcasted_iota(jnp.int32, (HW, 1), 0) % W
    not_first_col = col >= 1
    not_last_col = col <= W - 2

    def im2col(src):
        """src (H*W, C) in compute dtype -> patch (H*W, 9*C): taps ordered (dy, dx, c)."""
        zeros = jnp.zeros_like(src)
        # dx-shifted bases: x[h, w-1], x[h, w], x[h, w+1] (zero outside the image).
        cols = (jnp.where(not_first_col, _shift_rows(src, -1), zeros),
                src,
                jnp.where(not_last_col, _shift_rows(src, 1), zeros))
        # dy shifts are whole-row (multiple of W) flat shifts with zero fill.
        pieces = [_shift_rows(cols[dx], (dy - 1) * W)
                  for dy in range(3) for dx in range(3)]
        return jnp.concatenate(pieces, axis=1)

    x_f32 = x_ref[0]                          # (H*W, Cin) residual stays in f32

    # ---- conv1 (BN1 scale already in weights) -> +bias -> ReLU ------------------------------
    y1 = jnp.maximum(
        jnp.dot(im2col(x_f32.astype(cdt)), w1_ref[...],
                preferred_element_type=jnp.float32) + b1_ref[...],
        0.0)

    # ---- conv2 (BN2 scale already in weights) -> +bias -> +residual -> ReLU -----------------
    y2 = (jnp.dot(im2col(y1.astype(cdt)), w2_ref[...],
                  preferred_element_type=jnp.float32)
          + b2_ref[...] + x_f32)
    o_ref[0] = jnp.maximum(y2, 0.0).astype(o_ref.dtype)


def _const_spec(shape, single_buffer):
    """BlockSpec for grid-invariant operands; single-buffered when supported."""
    index_map = lambda n: (0,) * len(shape)
    if single_buffer and hasattr(pl, "Buffered"):
        try:
            return pl.BlockSpec(shape, index_map, pipeline_mode=pl.Buffered(1))
        except (TypeError, ValueError):       # older jax without pipeline_mode / Buffered(1)
            pass
    return pl.BlockSpec(shape, index_map)


def basic_block_3x3(x_nchw, w1, gamma1, beta1, mean1, var1,
                    w2, gamma2, beta2, mean2, var2,
                    eps=1e-5, compute_dtype=jnp.bfloat16):
    """Forward pass of BasicBlock3x3 (stride=1, downsample=None). NCHW in/out.

    compute_dtype: dtype of the MXU matmul operands (weights / im2col patches). Accumulation,
    BN bias, residual add and ReLU stay in f32.
    """
    x = jnp.transpose(x_nchw, (0, 2, 3, 1)).astype(jnp.float32)     # -> NHWC
    N, H, W, Cin = x.shape
    Cout = w1.shape[0]
    assert Cin == Cout, "no-downsample basic block requires inplanes == planes"
    HW = H * W
    x_flat = x.reshape(N, HW, Cin)

    # Fold BN (inference mode): per-output-channel scale goes into the conv weights;
    # only the bias is applied inside the kernel. Weights go to im2col layout (9*Cin, Cout),
    # rows ordered (dy, dx, cin) to match the kernel's patch construction.
    inv1 = (gamma1 / jnp.sqrt(var1 + eps)).astype(jnp.float32)
    inv2 = (gamma2 / jnp.sqrt(var2 + eps)).astype(jnp.float32)
    # torch conv weight layout (Cout, Cin, kh, kw) -> (kh, kw, Cin, Cout) -> (9*Cin, Cout)
    w1m = (jnp.transpose(w1, (2, 3, 1, 0)).astype(jnp.float32) * inv1
           ).reshape(9 * Cin, Cout).astype(compute_dtype)
    w2m = (jnp.transpose(w2, (2, 3, 1, 0)).astype(jnp.float32) * inv2
           ).reshape(9 * Cout, Cout).astype(compute_dtype)
    b1 = (beta1 - mean1 * inv1).reshape(1, Cout).astype(jnp.float32)
    b2 = (beta2 - mean2 * inv2).reshape(1, Cout).astype(jnp.float32)

    # Explicit VMEM footprint estimate (double-buffered in/out blocks, single-buffered weights,
    # im2col patches + f32 activations held as values), clamped to [32, 64] MiB.
    cbytes = jnp.dtype(compute_dtype).itemsize
    footprint = (2 * HW * Cin * 4 + 2 * HW * Cout * 4            # pipelined in/out blocks
                 + (9 * Cin + 9 * Cout) * Cout * cbytes          # weights (single-buffered)
                 + 4 * Cout * 4                                  # biases (double-buffered)
                 + 2 * 9 * HW * max(Cin, Cout) * cbytes          # im2col patches
                 + 2 * HW * Cout * 4)                            # f32 conv results
    vmem_limit = int(min(64 * 1024 * 1024, max(32 * 1024 * 1024, 2 * footprint)))

    def call(single_buffer_weights):
        grid_spec = pltpu.PrefetchScalarGridSpec(
            num_scalar_prefetch=0,
            grid=(N,),
            in_specs=[
                pl.BlockSpec((1, HW, Cin), lambda n: (n, 0, 0)),
                _const_spec((9 * Cin, Cout), single_buffer_weights),
                pl.BlockSpec((1, Cout), lambda n: (0, 0)),
                _const_spec((9 * Cout, Cout), single_buffer_weights),
                pl.BlockSpec((1, Cout), lambda n: (0, 0)),
            ],
            out_specs=pl.BlockSpec((1, HW, Cout), lambda n: (n, 0, 0)),
        )
        return pl.pallas_call(
            functools.partial(basic_block_kernel, W=W),
            out_shape=jax.ShapeDtypeStruct((N, HW, Cout), jnp.float32),
            grid_spec=grid_spec,
            compiler_params=pltpu.CompilerParams(
                dimension_semantics=("parallel",),       # batch axis -> 2 TCs on v7x
                vmem_limit_bytes=vmem_limit),
        )(x_flat, w1m, b1, w2m, b2)

    try:
        out_flat = call(True)
    except Exception:   # fallback if single-buffered weight specs are rejected by this jax build
        out_flat = call(False)

    return jnp.transpose(out_flat.reshape(N, H, W, Cout), (0, 3, 1, 2))   # -> NCHW


def _reference(x, w1, g1, be1, m1, v1, w2, g2, be2, m2, v2, eps=1e-5):
    """Pure-JAX NCHW reference for correctness checking."""
    def conv(a, w):
        return lax.conv_general_dilated(
            a, w, window_strides=(1, 1), padding=((1, 1), (1, 1)),
            dimension_numbers=("NCHW", "OIHW", "NCHW"))

    def bn(a, g, b, m, v):
        inv = g / jnp.sqrt(v + eps)
        return a * inv[None, :, None, None] + (b - m * inv)[None, :, None, None]

    out = jax.nn.relu(bn(conv(x, w1), g1, be1, m1, v1))
    out = bn(conv(out, w2), g2, be2, m2, v2)
    return jax.nn.relu(out + x)


if __name__ == "__main__":
    # small shapes consistent with the module: inplanes = planes = 4
    N, C, H, W = 2, 4, 16, 16

    key = jax.random.PRNGKey(0)
    kx, kw1, kw2 = jax.random.split(key, 3)

    x = jax.random.normal(kx, (N, C, H, W), dtype=jnp.float32)
    w1 = 0.1 * jax.random.normal(kw1, (C, C, 3, 3), dtype=jnp.float32)
    w2 = 0.1 * jax.random.normal(kw2, (C, C, 3, 3), dtype=jnp.float32)

    # deterministic BN parameters (running stats, affine)
    gamma1 = 1.0 + 0.1 * jnp.arange(C, dtype=jnp.float32)
    beta1 = 0.05 * jnp.arange(C, dtype=jnp.float32)
    mean1 = 0.02 * jnp.arange(C, dtype=jnp.float32)
    var1 = 1.0 + 0.05 * jnp.arange(C, dtype=jnp.float32)
    gamma2 = 1.0 - 0.05 * jnp.arange(C, dtype=jnp.float32)
    beta2 = -0.03 * jnp.arange(C, dtype=jnp.float32)
    mean2 = -0.01 * jnp.arange(C, dtype=jnp.float32)
    var2 = 1.0 + 0.1 * jnp.arange(C, dtype=jnp.float32)

    ref = _reference(x, w1, gamma1, beta1, mean1, var1,
                     w2, gamma2, beta2, mean2, var2)

    # f32 matmul path: semantics check at tight-ish tolerance.
    out_f32 = basic_block_3x3(x, w1, gamma1, beta1, mean1, var1,
                              w2, gamma2, beta2, mean2, var2,
                              compute_dtype=jnp.float32)
    out_f32 = jax.block_until_ready(out_f32)
    np.testing.assert_allclose(np.asarray(out_f32), np.asarray(ref),
                               rtol=1e-3, atol=1e-3)

    # bf16 matmul path (default, fast MXU path): f32 accumulation, looser tolerance.
    out_bf16 = basic_block_3x3(x, w1, gamma1, beta1, mean1, var1,
                               w2, gamma2, beta2, mean2, var2)
    out_bf16 = jax.block_until_ready(out_bf16)
    np.testing.assert_allclose(np.asarray(out_bf16), np.asarray(ref),
                               rtol=5e-2, atol=5e-2)

    print("KERNEL_OK")
</pallas_src>

<mosaic_0001>
module attributes {stable_mosaic.version = 11 : i64} {
  func.func @basic_block_kernel(%arg0: i32, %arg1: memref<1x256x4xf32, #tpu.memory_space<vmem>>, %arg2: memref<36x4xf32, #tpu.memory_space<vmem>>, %arg3: memref<1x4xf32, #tpu.memory_space<vmem>>, %arg4: memref<36x4xf32, #tpu.memory_space<vmem>>, %arg5: memref<1x4xf32, #tpu.memory_space<vmem>>, %arg6: memref<1x256x4xf32, #tpu.memory_space<vmem>>) attributes {dimension_semantics = [#tpu.dimension_semantics<parallel>], iteration_bounds = array<i64: 2>, scalar_prefetch = 0 : i64, scratch_operands = 0 : i64, tpu.core_type = #tpu.core_type<tc>, window_params = [{transform_indices = @transform_0, window_bounds = array<i64: 1, 256, 4>}, {pipeline_mode = #tpu.pipeline_mode<synchronous>, transform_indices = @transform_1, window_bounds = array<i64: 36, 4>}, {pipeline_mode = #tpu.pipeline_mode<synchronous>, transform_indices = @transform_2, window_bounds = array<i64: 1, 4>}, {pipeline_mode = #tpu.pipeline_mode<synchronous>, transform_indices = @transform_3, window_bounds = array<i64: 36, 4>}, {pipeline_mode = #tpu.pipeline_mode<synchronous>, transform_indices = @transform_4, window_bounds = array<i64: 1, 4>}, {transform_indices = @transform_5, window_bounds = array<i64: 1, 256, 4>}]} {
    %0 = tpu.iota {dimensions = array<i32: 0>} : vector<256x1xi32>
    %c16_i32 = arith.constant 16 : i32
    %c0_i32 = arith.constant 0 : i32
    %1 = arith.cmpi eq, %c16_i32, %c0_i32 : i32
    %c1_i32 = arith.constant 1 : i32
    %2 = arith.select %1, %c1_i32, %c16_i32 : i32
    %3 = vector.broadcast %2 : i32 to vector<256x1xi32>
    %4 = arith.remsi %0, %3 : vector<256x1xi32>
    %c0_i32_0 = arith.constant 0 : i32
    %5 = vector.broadcast %c0_i32_0 : i32 to vector<256x1xi32>
    %6 = arith.cmpi ne, %4, %5 : vector<256x1xi32>
    %c0_i32_1 = arith.constant 0 : i32
    %7 = vector.broadcast %c0_i32_1 : i32 to vector<256x1xi32>
    %8 = arith.cmpi slt, %4, %7 : vector<256x1xi32>
    %c0_i32_2 = arith.constant 0 : i32
    %9 = arith.cmpi slt, %2, %c0_i32_2 : i32
    %10 = vector.broadcast %9 : i1 to vector<256x1xi1>
    %11 = vector.broadcast %10 : vector<256x1xi1> to vector<256x1xi1>
    %12 = arith.xori %8, %11 : vector<256x1xi1>
    %13 = arith.andi %12, %6 : vector<256x1xi1>
    %14 = vector.broadcast %2 : i32 to vector<256x1xi32>
    %15 = arith.addi %4, %14 : vector<256x1xi32>
    %16 = arith.select %13, %15, %4 : vector<256x1xi1>, vector<256x1xi32>
    %c1_i32_3 = arith.constant 1 : i32
    %17 = vector.broadcast %c1_i32_3 : i32 to vector<256x1xi32>
    %18 = arith.cmpi sge, %16, %17 : vector<256x1xi32>
    %c14_i32 = arith.constant 14 : i32
    %19 = vector.broadcast %c14_i32 : i32 to vector<256x1xi32>
    %20 = arith.cmpi sle, %16, %19 : vector<256x1xi32>
    %c0 = arith.constant 0 : index
    %c0_4 = arith.constant 0 : index
    %c0_5 = arith.constant 0 : index
    %21 = vector.load %arg1[%c0, %c0_4, %c0_5] : memref<1x256x4xf32, #tpu.memory_space<vmem>>, vector<1x256x4xf32>
    %22 = vector.shape_cast %21 : vector<1x256x4xf32> to vector<256x4xf32>
    %cst = arith.constant 0.000000e+00 : f32
    %23 = vector.broadcast %cst : f32 to vector<256x4xf32>
    %cst_6 = arith.constant 0.000000e+00 : f32
    %24 = vector.broadcast %cst_6 : f32 to vector<1x4xf32>
    %25 = vector.extract_strided_slice %22 {offsets = [0, 0], sizes = [255, 4], strides = [1, 1]} : vector<256x4xf32> to vector<255x4xf32>
    %26 = tpu.concatenate %24, %25 in 0 : vector<1x4xf32>, vector<255x4xf32> -> vector<256x4xf32>
    %27 = vector.shape_cast %18 : vector<256x1xi1> to vector<256x1xi1>
    %28 = vector.broadcast %27 : vector<256x1xi1> to vector<256x4xi1>
    %29 = arith.select %28, %26, %23 : vector<256x4xi1>, vector<256x4xf32>
    %cst_7 = arith.constant 0.000000e+00 : f32
    %30 = vector.broadcast %cst_7 : f32 to vector<1x4xf32>
    %31 = vector.extract_strided_slice %22 {offsets = [1, 0], sizes = [255, 4], strides = [1, 1]} : vector<256x4xf32> to vector<255x4xf32>
    %32 = tpu.concatenate %31, %30 in 0 : vector<255x4xf32>, vector<1x4xf32> -> vector<256x4xf32>
    %33 = vector.shape_cast %20 : vector<256x1xi1> to vector<256x1xi1>
    %34 = vector.broadcast %33 : vector<256x1xi1> to vector<256x4xi1>
    %35 = arith.select %34, %32, %23 : vector<256x4xi1>, vector<256x4xf32>
    %cst_8 = arith.constant 0.000000e+00 : f32
    %36 = vector.broadcast %cst_8 : f32 to vector<16x4xf32>
    %37 = vector.extract_strided_slice %29 {offsets = [0, 0], sizes = [240, 4], strides = [1, 1]} : vector<256x4xf32> to vector<240x4xf32>
    %38 = tpu.concatenate %36, %37 in 0 : vector<16x4xf32>, vector<240x4xf32> -> vector<256x4xf32>
    %cst_9 = arith.constant 0.000000e+00 : f32
    %39 = vector.broadcast %cst_9 : f32 to vector<16x4xf32>
    %40 = vector.extract_strided_slice %22 {offsets = [0, 0], sizes = [240, 4], strides = [1, 1]} : vector<256x4xf32> to vector<240x4xf32>
    %41 = tpu.concatenate %39, %40 in 0 : vector<16x4xf32>, vector<240x4xf32> -> vector<256x4xf32>
    %cst_10 = arith.constant 0.000000e+00 : f32
    %42 = vector.broadcast %cst_10 : f32 to vector<16x4xf32>
    %43 = vector.extract_strided_slice %35 {offsets = [0, 0], sizes = [240, 4], strides = [1, 1]} : vector<256x4xf32> to vector<240x4xf32>
    %44 = tpu.concatenate %42, %43 in 0 : vector<16x4xf32>, vector<240x4xf32> -> vector<256x4xf32>
    %cst_11 = arith.constant 0.000000e+00 : f32
    %45 = vector.broadcast %cst_11 : f32 to vector<16x4xf32>
    %46 = vector.extract_strided_slice %29 {offsets = [16, 0], sizes = [240, 4], strides = [1, 1]} : vector<256x4xf32> to vector<240x4xf32>
    %47 = tpu.concatenate %46, %45 in 0 : vector<240x4xf32>, vector<16x4xf32> -> vector<256x4xf32>
    %cst_12 = arith.constant 0.000000e+00 : f32
    %48 = vector.broadcast %cst_12 : f32 to vector<16x4xf32>
    %49 = vector.extract_strided_slice %22 {offsets = [16, 0], sizes = [240, 4], strides = [1, 1]} : vector<256x4xf32> to vector<240x4xf32>
    %50 = tpu.concatenate %49, %48 in 0 : vector<240x4xf32>, vector<16x4xf32> -> vector<256x4xf32>
    %cst_13 = arith.constant 0.000000e+00 : f32
    %51 = vector.broadcast %cst_13 : f32 to vector<16x4xf32>
    %52 = vector.extract_strided_slice %35 {offsets = [16, 0], sizes = [240, 4], strides = [1, 1]} : vector<256x4xf32> to vector<240x4xf32>
    %53 = tpu.concatenate %52, %51 in 0 : vector<240x4xf32>, vector<16x4xf32> -> vector<256x4xf32>
    %54 = tpu.concatenate %38, %41, %44, %29, %22, %35, %47, %50, %53 in 1 : vector<256x4xf32>, vector<256x4xf32>, vector<256x4xf32>, vector<256x4xf32>, vector<256x4xf32>, vector<256x4xf32>, vector<256x4xf32>, vector<256x4xf32>, vector<256x4xf32> -> vector<256x36xf32>
    %c0_14 = arith.constant 0 : index
    %c0_15 = arith.constant 0 : index
    %55 = vector.load %arg2[%c0_14, %c0_15] : memref<36x4xf32, #tpu.memory_space<vmem>>, vector<36x4xf32>
    %cst_16 = arith.constant dense<0.000000e+00> : vector<256x4xf32>
    %56 = tpu.matmul %54, %55, %cst_16 {dimension_numbers = #tpu.dot_dimension_numbers<[1], [0], [0], [1], [0, 0, 1, 1], [], []>} : vector<256x36xf32>, vector<36x4xf32>, vector<256x4xf32> -> vector<256x4xf32>
    %c0_17 = arith.constant 0 : index
    %c0_18 = arith.constant 0 : index
    %57 = vector.load %arg3[%c0_17, %c0_18] : memref<1x4xf32, #tpu.memory_space<vmem>>, vector<1x4xf32>
    %58 = vector.broadcast %57 : vector<1x4xf32> to vector<256x4xf32>
    %59 = arith.addf %56, %58 : vector<256x4xf32>
    %cst_19 = arith.constant 0.000000e+00 : f32
    %60 = vector.broadcast %cst_19 : f32 to vector<256x4xf32>
    %61 = arith.maximumf %59, %60 : vector<256x4xf32>
    %cst_20 = arith.constant 0.000000e+00 : f32
    %62 = vector.broadcast %cst_20 : f32 to vector<256x4xf32>
    %cst_21 = arith.constant 0.000000e+00 : f32
    %63 = vector.broadcast %cst_21 : f32 to vector<1x4xf32>
    %64 = vector.extract_strided_slice %61 {offsets = [0, 0], sizes = [255, 4], strides = [1, 1]} : vector<256x4xf32> to vector<255x4xf32>
    %65 = tpu.concatenate %63, %64 in 0 : vector<1x4xf32>, vector<255x4xf32> -> vector<256x4xf32>
    %66 = vector.shape_cast %18 : vector<256x1xi1> to vector<256x1xi1>
    %67 = vector.broadcast %66 : vector<256x1xi1> to vector<256x4xi1>
    %68 = arith.select %67, %65, %62 : vector<256x4xi1>, vector<256x4xf32>
    %cst_22 = arith.constant 0.000000e+00 : f32
    %69 = vector.broadcast %cst_22 : f32 to vector<1x4xf32>
    %70 = vector.extract_strided_slice %61 {offsets = [1, 0], sizes = [255, 4], strides = [1, 1]} : vector<256x4xf32> to vector<255x4xf32>
    %71 = tpu.concatenate %70, %69 in 0 : vector<255x4xf32>, vector<1x4xf32> -> vector<256x4xf32>
    %72 = vector.shape_cast %20 : vector<256x1xi1> to vector<256x1xi1>
    %73 = vector.broadcast %72 : vector<256x1xi1> to vector<256x4xi1>
    %74 = arith.select %73, %71, %62 : vector<256x4xi1>, vector<256x4xf32>
    %cst_23 = arith.constant 0.000000e+00 : f32
    %75 = vector.broadcast %cst_23 : f32 to vector<16x4xf32>
    %76 = vector.extract_strided_slice %68 {offsets = [0, 0], sizes = [240, 4], strides = [1, 1]} : vector<256x4xf32> to vector<240x4xf32>
    %77 = tpu.concatenate %75, %76 in 0 : vector<16x4xf32>, vector<240x4xf32> -> vector<256x4xf32>
    %cst_24 = arith.constant 0.000000e+00 : f32
    %78 = vector.broadcast %cst_24 : f32 to vector<16x4xf32>
    %79 = vector.extract_strided_slice %61 {offsets = [0, 0], sizes = [240, 4], strides = [1, 1]} : vector<256x4xf32> to vector<240x4xf32>
    %80 = tpu.concatenate %78, %79 in 0 : vector<16x4xf32>, vector<240x4xf32> -> vector<256x4xf32>
    %cst_25 = arith.constant 0.000000e+00 : f32
    %81 = vector.broadcast %cst_25 : f32 to vector<16x4xf32>
    %82 = vector.extract_strided_slice %74 {offsets = [0, 0], sizes = [240, 4], strides = [1, 1]} : vector<256x4xf32> to vector<240x4xf32>
    %83 = tpu.concatenate %81, %82 in 0 : vector<16x4xf32>, vector<240x4xf32> -> vector<256x4xf32>
    %cst_26 = arith.constant 0.000000e+00 : f32
    %84 = vector.broadcast %cst_26 : f32 to vector<16x4xf32>
    %85 = vector.extract_strided_slice %68 {offsets = [16, 0], sizes = [240, 4], strides = [1, 1]} : vector<256x4xf32> to vector<240x4xf32>
    %86 = tpu.concatenate %85, %84 in 0 : vector<240x4xf32>, vector<16x4xf32> -> vector<256x4xf32>
    %cst_27 = arith.constant 0.000000e+00 : f32
    %87 = vector.broadcast %cst_27 : f32 to vector<16x4xf32>
    %88 = vector.extract_strided_slice %61 {offsets = [16, 0], sizes = [240, 4], strides = [1, 1]} : vector<256x4xf32> to vector<240x4xf32>
    %89 = tpu.concatenate %88, %87 in 0 : vector<240x4xf32>, vector<16x4xf32> -> vector<256x4xf32>
    %cst_28 = arith.constant 0.000000e+00 : f32
    %90 = vector.broadcast %cst_28 : f32 to vector<16x4xf32>
    %91 = vector.extract_strided_slice %74 {offsets = [16, 0], sizes = [240, 4], strides = [1, 1]} : vector<256x4xf32> to vector<240x4xf32>
    %92 = tpu.concatenate %91, %90 in 0 : vector<240x4xf32>, vector<16x4xf32> -> vector<256x4xf32>
    %93 = tpu.concatenate %77, %80, %83, %68, %61, %74, %86, %89, %92 in 1 : vector<256x4xf32>, vector<256x4xf32>, vector<256x4xf32>, vector<256x4xf32>, vector<256x4xf32>, vector<256x4xf32>, vector<256x4xf32>, vector<256x4xf32>, vector<256x4xf32> -> vector<256x36xf32>
    %c0_29 = arith.constant 0 : index
    %c0_30 = arith.constant 0 : index
    %94 = vector.load %arg4[%c0_29, %c0_30] : memref<36x4xf32, #tpu.memory_space<vmem>>, vector<36x4xf32>
    %cst_31 = arith.constant dense<0.000000e+00> : vector<256x4xf32>
    %95 = tpu.matmul %93, %94, %cst_31 {dimension_numbers = #tpu.dot_dimension_numbers<[1], [0], [0], [1], [0, 0, 1, 1], [], []>} : vector<256x36xf32>, vector<36x4xf32>, vector<256x4xf32> -> vector<256x4xf32>
    %c0_32 = arith.constant 0 : index
    %c0_33 = arith.constant 0 : index
    %96 = vector.load %arg5[%c0_32, %c0_33] : memref<1x4xf32, #tpu.memory_space<vmem>>, vector<1x4xf32>
    %97 = vector.broadcast %96 : vector<1x4xf32> to vector<256x4xf32>
    %98 = arith.addf %95, %97 : vector<256x4xf32>
    %99 = arith.addf %98, %22 : vector<256x4xf32>
    %cst_34 = arith.constant 0.000000e+00 : f32
    %100 = vector.broadcast %cst_34 : f32 to vector<256x4xf32>
    %101 = arith.maximumf %99, %100 : vector<256x4xf32>
    %c0_35 = arith.constant 0 : index
    %c0_36 = arith.constant 0 : index
    %c0_37 = arith.constant 0 : index
    %102 = vector.load %arg6[%c0_35, %c0_36, %c0_37] : memref<1x256x4xf32, #tpu.memory_space<vmem>>, vector<1x256x4xf32>
    %103 = vector.shape_cast %102 : vector<1x256x4xf32> to vector<256x4xf32>
    %104 = vector.shape_cast %101 : vector<256x4xf32> to vector<1x256x4xf32>
    tpu.vector_store %arg6[%c0_35, %c0_36, %c0_37], %104 {strides = array<i32>} : memref<1x256x4xf32, #tpu.memory_space<vmem>>, vector<1x256x4xf32>,
    return
  }
  func.func @transform_0(%arg0: i32) -> (i32, i32, i32) {
    %c0_i32 = arith.constant 0 : i32
    %c0_i32_0 = arith.constant 0 : i32
    %c0_i32_1 = arith.constant 0 : i32
    return %arg0, %c0_i32, %c0_i32_0 : i32, i32, i32
  }
  func.func @transform_1(%arg0: i32) -> (i32, i32) {
    %c0_i32 = arith.constant 0 : i32
    %c0_i32_0 = arith.constant 0 : i32
    %c0_i32_1 = arith.constant 0 : i32
    return %c0_i32, %c0_i32_0 : i32, i32
  }
  func.func @transform_2(%arg0: i32) -> (i32, i32) {
    %c0_i32 = arith.constant 0 : i32
    %c0_i32_0 = arith.constant 0 : i32
    %c0_i32_1 = arith.constant 0 : i32
    return %c0_i32, %c0_i32_0 : i32, i32
  }
  func.func @transform_3(%arg0: i32) -> (i32, i32) {
    %c0_i32 = arith.constant 0 : i32
    %c0_i32_0 = arith.constant 0 : i32
    %c0_i32_1 = arith.constant 0 : i32
    return %c0_i32, %c0_i32_0 : i32, i32
  }
  func.func @transform_4(%arg0: i32) -> (i32, i32) {
    %c0_i32 = arith.constant 0 : i32
    %c0_i32_0 = arith.constant 0 : i32
    %c0_i32_1 = arith.constant 0 : i32
    return %c0_i32, %c0_i32_0 : i32, i32
  }
  func.func @transform_5(%arg0: i32) -> (i32, i32, i32) {
    %c0_i32 = arith.constant 0 : i32
    %c0_i32_0 = arith.constant 0 : i32
    %c0_i32_1 = arith.constant 0 : i32
    return %arg0, %c0_i32, %c0_i32_0 : i32, i32, i32
  }
}

module attributes {stable_mosaic.version = 11 : i64} {
  func.func @basic_block_kernel(%arg0: i32, %arg1: memref<1x256x4xf32, #tpu.memory_space<vmem>>, %arg2: memref<36x4xf32, #tpu.memory_space<vmem>>, %arg3: memref<1x4xf32, #tpu.memory_space<vmem>>, %arg4: memref<36x4xf32, #tpu.memory_space<vmem>>, %arg5: memref<1x4xf32, #tpu.memory_space<vmem>>, %arg6: memref<1x256x4xf32, #tpu.memory_space<vmem>>) attributes {dimension_semantics = [#tpu.dimension_semantics<parallel>], iteration_bounds = array<i64: 2>, scalar_prefetch = 0 : i64, scratch_operands = 0 : i64, tpu.core_type = #tpu.core_type<tc>, window_params = [{transform_indices = @transform_0, window_bounds = array<i64: 1, 256, 4>}, {pipeline_mode = #tpu.pipeline_mode<synchronous>, transform_indices = @transform_1, window_bounds = array<i64: 36, 4>}, {pipeline_mode = #tpu.pipeline_mode<synchronous>, transform_indices = @transform_2, window_bounds = array<i64: 1, 4>}, {pipeline_mode = #tpu.pipeline_mode<synchronous>, transform_indices = @transform_3, window_bounds = array<i64: 36, 4>}, {pipeline_mode = #tpu.pipeline_mode<synchronous>, transform_indices = @transform_4, window_bounds = array<i64: 1, 4>}, {transform_indices = @transform_5, window_bounds = array<i64: 1, 256, 4>}]} {
    %0 = tpu.iota {dimensions = array<i32: 0>} : vector<256x1xi32>
    %c16_i32 = arith.constant 16 : i32
    %c0_i32 = arith.constant 0 : i32
    %1 = arith.cmpi eq, %c16_i32, %c0_i32 : i32
    %c1_i32 = arith.constant 1 : i32
    %2 = arith.select %1, %c1_i32, %c16_i32 : i32
    %3 = vector.broadcast %2 : i32 to vector<256x1xi32>
    %4 = arith.remsi %0, %3 : vector<256x1xi32>
    %c0_i32_0 = arith.constant 0 : i32
    %5 = vector.broadcast %c0_i32_0 : i32 to vector<256x1xi32>
    %6 = arith.cmpi ne, %4, %5 : vector<256x1xi32>
    %c0_i32_1 = arith.constant 0 : i32
    %7 = vector.broadcast %c0_i32_1 : i32 to vector<256x1xi32>
    %8 = arith.cmpi slt, %4, %7 : vector<256x1xi32>
    %c0_i32_2 = arith.constant 0 : i32
    %9 = arith.cmpi slt, %2, %c0_i32_2 : i32
    %10 = vector.broadcast %9 : i1 to vector<256x1xi1>
    %11 = vector.broadcast %10 : vector<256x1xi1> to vector<256x1xi1>
    %12 = arith.xori %8, %11 : vector<256x1xi1>
    %13 = arith.andi %12, %6 : vector<256x1xi1>
    %14 = vector.broadcast %2 : i32 to vector<256x1xi32>
    %15 = arith.addi %4, %14 : vector<256x1xi32>
    %16 = arith.select %13, %15, %4 : vector<256x1xi1>, vector<256x1xi32>
    %c1_i32_3 = arith.constant 1 : i32
    %17 = vector.broadcast %c1_i32_3 : i32 to vector<256x1xi32>
    %18 = arith.cmpi sge, %16, %17 : vector<256x1xi32>
    %c14_i32 = arith.constant 14 : i32
    %19 = vector.broadcast %c14_i32 : i32 to vector<256x1xi32>
    %20 = arith.cmpi sle, %16, %19 : vector<256x1xi32>
    %c0 = arith.constant 0 : index
    %c0_4 = arith.constant 0 : index
    %c0_5 = arith.constant 0 : index
    %21 = vector.load %arg1[%c0, %c0_4, %c0_5] : memref<1x256x4xf32, #tpu.memory_space<vmem>>, vector<1x256x4xf32>
    %22 = vector.shape_cast %21 : vector<1x256x4xf32> to vector<256x4xf32>
    %cst = arith.constant 0.000000e+00 : f32
    %23 = vector.broadcast %cst : f32 to vector<256x4xf32>
    %cst_6 = arith.constant 0.000000e+00 : f32
    %24 = vector.broadcast %cst_6 : f32 to vector<1x4xf32>
    %25 = vector.extract_strided_slice %22 {offsets = [0, 0], sizes = [255, 4], strides = [1, 1]} : vector<256x4xf32> to vector<255x4xf32>
    %26 = tpu.concatenate %24, %25 in 0 : vector<1x4xf32>, vector<255x4xf32> -> vector<256x4xf32>
    %27 = vector.shape_cast %18 : vector<256x1xi1> to vector<256x1xi1>
    %28 = vector.broadcast %27 : vector<256x1xi1> to vector<256x4xi1>
    %29 = arith.select %28, %26, %23 : vector<256x4xi1>, vector<256x4xf32>
    %cst_7 = arith.constant 0.000000e+00 : f32
    %30 = vector.broadcast %cst_7 : f32 to vector<1x4xf32>
    %31 = vector.extract_strided_slice %22 {offsets = [1, 0], sizes = [255, 4], strides = [1, 1]} : vector<256x4xf32> to vector<255x4xf32>
    %32 = tpu.concatenate %31, %30 in 0 : vector<255x4xf32>, vector<1x4xf32> -> vector<256x4xf32>
    %33 = vector.shape_cast %20 : vector<256x1xi1> to vector<256x1xi1>
    %34 = vector.broadcast %33 : vector<256x1xi1> to vector<256x4xi1>
    %35 = arith.select %34, %32, %23 : vector<256x4xi1>, vector<256x4xf32>
    %cst_8 = arith.constant 0.000000e+00 : f32
    %36 = vector.broadcast %cst_8 : f32 to vector<16x4xf32>
    %37 = vector.extract_strided_slice %29 {offsets = [0, 0], sizes = [240, 4], strides = [1, 1]} : vector<256x4xf32> to vector<240x4xf32>
    %38 = tpu.concatenate %36, %37 in 0 : vector<16x4xf32>, vector<240x4xf32> -> vector<256x4xf32>
    %cst_9 = arith.constant 0.000000e+00 : f32
    %39 = vector.broadcast %cst_9 : f32 to vector<16x4xf32>
    %40 = vector.extract_strided_slice %22 {offsets = [0, 0], sizes = [240, 4], strides = [1, 1]} : vector<256x4xf32> to vector<240x4xf32>
    %41 = tpu.concatenate %39, %40 in 0 : vector<16x4xf32>, vector<240x4xf32> -> vector<256x4xf32>
    %cst_10 = arith.constant 0.000000e+00 : f32
    %42 = vector.broadcast %cst_10 : f32 to vector<16x4xf32>
    %43 = vector.extract_strided_slice %35 {offsets = [0, 0], sizes = [240, 4], strides = [1, 1]} : vector<256x4xf32> to vector<240x4xf32>
    %44 = tpu.concatenate %42, %43 in 0 : vector<16x4xf32>, vector<240x4xf32> -> vector<256x4xf32>
    %cst_11 = arith.constant 0.000000e+00 : f32
    %45 = vector.broadcast %cst_11 : f32 to vector<16x4xf32>
    %46 = vector.extract_strided_slice %29 {offsets = [16, 0], sizes = [240, 4], strides = [1, 1]} : vector<256x4xf32> to vector<240x4xf32>
    %47 = tpu.concatenate %46, %45 in 0 : vector<240x4xf32>, vector<16x4xf32> -> vector<256x4xf32>
    %cst_12 = arith.constant 0.000000e+00 : f32
    %48 = vector.broadcast %cst_12 : f32 to vector<16x4xf32>
    %49 = vector.extract_strided_slice %22 {offsets = [16, 0], sizes = [240, 4], strides = [1, 1]} : vector<256x4xf32> to vector<240x4xf32>
    %50 = tpu.concatenate %49, %48 in 0 : vector<240x4xf32>, vector<16x4xf32> -> vector<256x4xf32>
    %cst_13 = arith.constant 0.000000e+00 : f32
    %51 = vector.broadcast %cst_13 : f32 to vector<16x4xf32>
    %52 = vector.extract_strided_slice %35 {offsets = [16, 0], sizes = [240, 4], strides = [1, 1]} : vector<256x4xf32> to vector<240x4xf32>
    %53 = tpu.concatenate %52, %51 in 0 : vector<240x4xf32>, vector<16x4xf32> -> vector<256x4xf32>
    %54 = tpu.concatenate %38, %41, %44, %29, %22, %35, %47, %50, %53 in 1 : vector<256x4xf32>, vector<256x4xf32>, vector<256x4xf32>, vector<256x4xf32>, vector<256x4xf32>, vector<256x4xf32>, vector<256x4xf32>, vector<256x4xf32>, vector<256x4xf32> -> vector<256x36xf32>
    %c0_14 = arith.constant 0 : index
    %c0_15 = arith.constant 0 : index
    %55 = vector.load %arg2[%c0_14, %c0_15] : memref<36x4xf32, #tpu.memory_space<vmem>>, vector<36x4xf32>
    %cst_16 = arith.constant dense<0.000000e+00> : vector<256x4xf32>
    %56 = tpu.matmul %54, %55, %cst_16 {dimension_numbers = #tpu.dot_dimension_numbers<[1], [0], [0], [1], [0, 0, 1, 1], [], []>} : vector<256x36xf32>, vector<36x4xf32>, vector<256x4xf32> -> vector<256x4xf32>
    %c0_17 = arith.constant 0 : index
    %c0_18 = arith.constant 0 : index
    %57 = vector.load %arg3[%c0_17, %c0_18] : memref<1x4xf32, #tpu.memory_space<vmem>>, vector<1x4xf32>
    %58 = vector.broadcast %57 : vector<1x4xf32> to vector<256x4xf32>
    %59 = arith.addf %56, %58 : vector<256x4xf32>
    %cst_19 = arith.constant 0.000000e+00 : f32
    %60 = vector.broadcast %cst_19 : f32 to vector<256x4xf32>
    %61 = arith.maximumf %59, %60 : vector<256x4xf32>
    %cst_20 = arith.constant 0.000000e+00 : f32
    %62 = vector.broadcast %cst_20 : f32 to vector<256x4xf32>
    %cst_21 = arith.constant 0.000000e+00 : f32
    %63 = vector.broadcast %cst_21 : f32 to vector<1x4xf32>
    %64 = vector.extract_strided_slice %61 {offsets = [0, 0], sizes = [255, 4], strides = [1, 1]} : vector<256x4xf32> to vector<255x4xf32>
    %65 = tpu.concatenate %63, %64 in 0 : vector<1x4xf32>, vector<255x4xf32> -> vector<256x4xf32>
    %66 = vector.shape_cast %18 : vector<256x1xi1> to vector<256x1xi1>
    %67 = vector.broadcast %66 : vector<256x1xi1> to vector<256x4xi1>
    %68 = arith.select %67, %65, %62 : vector<256x4xi1>, vector<256x4xf32>
    %cst_22 = arith.constant 0.000000e+00 : f32
    %69 = vector.broadcast %cst_22 : f32 to vector<1x4xf32>
    %70 = vector.extract_strided_slice %61 {offsets = [1, 0], sizes = [255, 4], strides = [1, 1]} : vector<256x4xf32> to vector<255x4xf32>
    %71 = tpu.concatenate %70, %69 in 0 : vector<255x4xf32>, vector<1x4xf32> -> vector<256x4xf32>
    %72 = vector.shape_cast %20 : vector<256x1xi1> to vector<256x1xi1>
    %73 = vector.broadcast %72 : vector<256x1xi1> to vector<256x4xi1>
    %74 = arith.select %73, %71, %62 : vector<256x4xi1>, vector<256x4xf32>
    %cst_23 = arith.constant 0.000000e+00 : f32
    %75 = vector.broadcast %cst_23 : f32 to vector<16x4xf32>
    %76 = vector.extract_strided_slice %68 {offsets = [0, 0], sizes = [240, 4], strides = [1, 1]} : vector<256x4xf32> to vector<240x4xf32>
    %77 = tpu.concatenate %75, %76 in 0 : vector<16x4xf32>, vector<240x4xf32> -> vector<256x4xf32>
    %cst_24 = arith.constant 0.000000e+00 : f32
    %78 = vector.broadcast %cst_24 : f32 to vector<16x4xf32>
    %79 = vector.extract_strided_slice %61 {offsets = [0, 0], sizes = [240, 4], strides = [1, 1]} : vector<256x4xf32> to vector<240x4xf32>
    %80 = tpu.concatenate %78, %79 in 0 : vector<16x4xf32>, vector<240x4xf32> -> vector<256x4xf32>
    %cst_25 = arith.constant 0.000000e+00 : f32
    %81 = vector.broadcast %cst_25 : f32 to vector<16x4xf32>
    %82 = vector.extract_strided_slice %74 {offsets = [0, 0], sizes = [240, 4], strides = [1, 1]} : vector<256x4xf32> to vector<240x4xf32>
    %83 = tpu.concatenate %81, %82 in 0 : vector<16x4xf32>, vector<240x4xf32> -> vector<256x4xf32>
    %cst_26 = arith.constant 0.000000e+00 : f32
    %84 = vector.broadcast %cst_26 : f32 to vector<16x4xf32>
    %85 = vector.extract_strided_slice %68 {offsets = [16, 0], sizes = [240, 4], strides = [1, 1]} : vector<256x4xf32> to vector<240x4xf32>
    %86 = tpu.concatenate %85, %84 in 0 : vector<240x4xf32>, vector<16x4xf32> -> vector<256x4xf32>
    %cst_27 = arith.constant 0.000000e+00 : f32
    %87 = vector.broadcast %cst_27 : f32 to vector<16x4xf32>
    %88 = vector.extract_strided_slice %61 {offsets = [16, 0], sizes = [240, 4], strides = [1, 1]} : vector<256x4xf32> to vector<240x4xf32>
    %89 = tpu.concatenate %88, %87 in 0 : vector<240x4xf32>, vector<16x4xf32> -> vector<256x4xf32>
    %cst_28 = arith.constant 0.000000e+00 : f32
    %90 = vector.broadcast %cst_28 : f32 to vector<16x4xf32>
    %91 = vector.extract_strided_slice %74 {offsets = [16, 0], sizes = [240, 4], strides = [1, 1]} : vector<256x4xf32> to vector<240x4xf32>
    %92 = tpu.concatenate %91, %90 in 0 : vector<240x4xf32>, vector<16x4xf32> -> vector<256x4xf32>
    %93 = tpu.concatenate %77, %80, %83, %68, %61, %74, %86, %89, %92 in 1 : vector<256x4xf32>, vector<256x4xf32>, vector<256x4xf32>, vector<256x4xf32>, vector<256x4xf32>, vector<256x4xf32>, vector<256x4xf32>, vector<256x4xf32>, vector<256x4xf32> -> vector<256x36xf32>
    %c0_29 = arith.constant 0 : index
    %c0_30 = arith.constant 0 : index
    %94 = vector.load %arg4[%c0_29, %c0_30] : memref<36x4xf32, #tpu.memory_space<vmem>>, vector<36x4xf32>
    %cst_31 = arith.constant dense<0.000000e+00> : vector<256x4xf32>
    %95 = tpu.matmul %93, %94, %cst_31 {dimension_numbers = #tpu.dot_dimension_numbers<[1], [0], [0], [1], [0, 0, 1, 1], [], []>} : vector<256x36xf32>, vector<36x4xf32>, vector<256x4xf32> -> vector<256x4xf32>
    %c0_32 = arith.constant 0 : index
    %c0_33 = arith.constant 0 : index
    %96 = vector.load %arg5[%c0_32, %c0_33] : memref<1x4xf32, #tpu.memory_space<vmem>>, vector<1x4xf32>
    %97 = vector.broadcast %96 : vector<1x4xf32> to vector<256x4xf32>
    %98 = arith.addf %95, %97 : vector<256x4xf32>
    %99 = arith.addf %98, %22 : vector<256x4xf32>
    %cst_34 = arith.constant 0.000000e+00 : f32
    %100 = vector.broadcast %cst_34 : f32 to vector<256x4xf32>
    %101 = arith.maximumf %99, %100 : vector<256x4xf32>
    %c0_35 = arith.constant 0 : index
    %c0_36 = arith.constant 0 : index
    %c0_37 = arith.constant 0 : index
    %102 = vector.load %arg6[%c0_35, %c0_36, %c0_37] : memref<1x256x4xf32, #tpu.memory_space<vmem>>, vector<1x256x4xf32>
    %103 = vector.shape_cast %102 : vector<1x256x4xf32> to vector<256x4xf32>
    %104 = vector.shape_cast %101 : vector<256x4xf32> to vector<1x256x4xf32>
    tpu.vector_store %arg6[%c0_35, %c0_36, %c0_37], %104 {strides = array<i32>} : memref<1x256x4xf32, #tpu.memory_space<vmem>>, vector<1x256x4xf32>,
    return
  }
  func.func @transform_0(%arg0: i32) -> (i32, i32, i32) {
    %c0_i32 = arith.constant 0 : i32
    %c0_i32_0 = arith.constant 0 : i32
    %c0_i32_1 = arith.constant 0 : i32
    return %arg0, %c0_i32, %c0_i32_0 : i32, i32, i32
  }
  func.func @transform_1(%arg0: i32) -> (i32, i32) {
    %c0_i32 = arith.constant 0 : i32
    %c0_i32_0 = arith.constant 0 : i32
    %c0_i32_1 = arith.constant 0 : i32
    return %c0_i32, %c0_i32_0 : i32, i32
  }
  func.func @transform_2(%arg0: i32) -> (i32, i32) {
    %c0_i32 = arith.constant 0 : i32
    %c0_i32_0 = arith.constant 0 : i32
    %c0_i32_1 = arith.constant 0 : i32
    return %c0_i32, %c0_i32_0 : i32, i32
  }
  func.func @transform_3(%arg0: i32) -> (i32, i32) {
    %c0_i32 = arith.constant 0 : i32
    %c0_i32_0 = arith.constant 0 : i32
    %c0_i32_1 = arith.constant 0 : i32
    return %c0_i32, %c0_i32_0 : i32, i32
  }
  func.func @transform_4(%arg0: i32) -> (i32, i32) {
    %c0_i32 = arith.constant 0 : i32
    %c0_i32_0 = arith.constant 0 : i32
    %c0_i32_1 = arith.constant 0 : i32
    return %c0_i32, %c0_i32_0 : i32, i32
  }
  func.func @transform_5(%arg0: i32) -> (i32, i32, i32) {
    %c0_i32 = arith.constant 0 : i32
    %c0_i32_0 = arith.constant 0 : i32
    %c0_i32_1 = arith.constant 0 : i32
    return %arg0, %c0_i32, %c0_i32_0 : i32, i32, i32
  }
}

</mosaic_0001>

<bundles_post_ra>
// kernel: tpu_custom_call.1
= control target key start
LH: loop header
LB: loop body
LE: loop exit
PB: predicated region body
PF: predicated region fallthrough
CT: control target
= control target key end

     0   :  { %s4847_s18 = smov 0   ;;  %s8476_s0 = inlined_call_operand.vmem [shape: f32[2,256,4], index: 0, kind: input, shape index: {}]   ;;  %s8477_s1 = inlined_call_operand.vmem [shape: f32[36,4], index: 1, kind: input, shape index: {}]   ;;  %s8478_s2 = inlined_call_operand.vmem [shape: f32[1,4], index: 2, kind: input, shape index: {}]   ;;  %s8479_s3 = inlined_call_operand.vmem [shape: f32[36,4], index: 3, kind: input, shape index: {}]   ;;  %s8480_s4 = inlined_call_operand.vmem [shape: f32[1,4], index: 4, kind: input, shape index: {}]   ;;  %s8481_s5 = inlined_call_operand.vmem [shape: f32[2,256,4], index: 5, kind: output, shape index: {}]  }
   0x1 LB: > { %s4435_s19 = sadd.s32 4294967295, %s4806_s18   ;;  %p4439_p0 = scmp.ge.s32.totalorder %s4806_s18, 1  ;;  %s4806_s18 = sphi %s4847_s18, %s15_s18  }
   0x2   : > { %p187_p1 = scmp.lt.s32.totalorder %s4806_s18, 3 }
   0x4   : > { %p188_p2 = pnand %p4439_p0, %p187_p1 }
   0x6   : > { %191 = sbr.rel (%p188_p2) target bundleno = 1616 (0x650), region = 40 }
   0xd   : > { %p215_p3 = scmp.lt.s32.totalorder %s4435_s19, 1  ;;  %v8482_v0 = vmov 0.0   ;;  %s4809_s20 = smov 4   ;;  %v225_v25 = vlaneseq  ;;  %vm8524_vm0 = vcmask 1046528   ;;  %v8702_v42 = vmov 0 }
   0xe   : > { %1157 = vrot.lane.b32.xlu0 %v8482_v0, %s4809_s20  ;;  %s4810_s25 = smov 8   ;;  %v8705_v50 = vmov 0  ;;  %v8708_v58 = vmov 0  ;;  %s4811_s26 = smov 12  }
   0xf   : > { %s10048_s19 = smov (!%p215_p3, %s4435_s19), 1  ;;  %v4993_v28 = vshrl.u32 %v225_v25, 7  ;;  %s4812_s27 = smov 16  }
  0x10   : > { %s4514_s21 = sshll.u32 %s10048_s19, 8  ;;  %s4813_s28 = smov 20  }
  0x11   : > { %s4865_s24 = scalar_lea.vmem %s8476_s0, %s4514_s21  ;;  %v227_v31 = vadd.s32 8, %v4993_v28  ;;  %v229_v38 = vadd.s32 24, %v4993_v28  ;;  %v231_v41 = vadd.s32 40, %v4993_v28  ;;  %v233_v49 = vadd.s32 56, %v4993_v28  ;;  %s4814_s29 = smov 24  }
  0x12   : > { %v4868_v1 = vld [vmem:[%s4865_s24 + $0x8] sm:$0xff]  ;;  %v4871_v2 = vld [vmem:[%s4865_s24] sm:$0xff]  ;;  %v4878_v3 = vld [vmem:[%s4865_s24 + $0x10] sm:$0xff]  ;;  %v235_v57 = vadd.s32 72, %v4993_v28  ;;  %s4815_s15 = smov 28   ;;  %s4816_s16 = smov 32  }
  0x13   : > { %1161 = vrot.lane.b32.xlu1 %v4868_v1, %s4809_s20  ;;  %1159 = vrot.lane.b32.xlu0 %v4871_v2, %s4809_s20  ;;  %v4881_v4 = vld [vmem:[%s4865_s24 + $0x18] sm:$0xff]  ;;  %v4888_v5 = vld [vmem:[%s4865_s24 + $0x20] sm:$0xff]  ;;  %v964_v34 = vrot.slane %v4871_v2, 1  ;;  %v965_v35 = vrot.slane %v4868_v1, 1  ;;  %v269_v36 = vand.u32 15, %v227_v31  ;;  %v967_v37 = vrot.slane %v4878_v3, 1  ;;  %s8210_s12 = scalar_lea.vmem %s8481_s5, %s4514_s21 }
  0x14   : > { %v4891_v6 = vld [vmem:[%s4865_s24 + $0x28] sm:$0xff]  ;;  %v4898_v7 = vld [vmem:[%s4865_s24 + $0x30] sm:$0xff]  ;;  %v4901_v8 = vld [vmem:[%s4865_s24 + $0x38] sm:$0xff]  ;;  %v969_v40 = vrot.slane %v4881_v4, 1  ;;  %v283_v44 = vand.u32 15, %v229_v38  ;;  %v971_v45 = vrot.slane %v4888_v5, 1 }
  0x15   : > { %v4908_v9 = vld [vmem:[%s4865_s24 + $0x40] sm:$0xff]  ;;  %v4911_v10 = vld [vmem:[%s4865_s24 + $0x48] sm:$0xff]  ;;  %v4918_v11 = vld [vmem:[%s4865_s24 + $0x50] sm:$0xff]  ;;  %v5025_v39 = vsel %vm8524_vm0, %v964_v34, %v965_v35  ;;  %vm5029_vm1 = vcmp.le.s32.totalorder %v269_v36, 14  ;;  %v968_v43 = vsel %vm8524_vm0, %v965_v35, %v967_v37  ;;  %v973_v48 = vrot.slane %v4891_v6, 1 }
  0x16   : > { %v4921_v12 = vld [vmem:[%s4865_s24 + $0x58] sm:$0xff]  ;;  %v4928_v13 = vld [vmem:[%s4865_s24 + $0x60] sm:$0xff]  ;;  %v4931_v14 = vld [vmem:[%s4865_s24 + $0x68] sm:$0xff]  ;;  %v8703_v42 = vsel %vm5029_vm1, 4294967295, %v8702_v42  ;;  %v5041_v46 = vsel %vm5029_vm1, %v968_v43, 0.0  ;;  %v5044_v47 = vsel %vm8524_vm0, %v967_v37, %v969_v40  ;;  %vm5048_vm2 = vcmp.le.s32.totalorder %v283_v44, 14 }
  0x17   : > { %1163 = vrot.lane.b32.xlu1 %v4878_v3, %s4809_s20  ;;  %1165 = vrot.lane.b32.xlu0 %v4881_v4, %s4809_s20  ;;  %v4938_v15 = vld [vmem:[%s4865_s24 + $0x70] sm:$0xff]  ;;  %v4941_v16 = vld [vmem:[%s4865_s24 + $0x78] sm:$0xff]  ;;  %8704 = vst [vmem:[#allocation2_spill] sm:$0xff] %v8703_v42  ;;  %v8706_v50 = vsel %vm5048_vm2, 4294967295, %v8705_v50  ;;  %v972_v51 = vsel %vm8524_vm0, %v969_v40, %v971_v45  ;;  %v297_v52 = vand.u32 15, %v231_v41  ;;  %v975_v53 = vrot.slane %v4898_v7, 1 }
  0x18   : > { %v4948_v17 = vld [vmem:[%s4865_s24 + $0x80] sm:$0xff]  ;;  %v4951_v18 = vld [vmem:[%s4865_s24 + $0x88] sm:$0xff]  ;;  %v4958_v19 = vld [vmem:[%s4865_s24 + $0x90] sm:$0xff]  ;;  %8707 = vst [vmem:[#allocation3_spill] sm:$0xff] %v8706_v50  ;;  %v5060_v54 = vsel %vm5048_vm2, %v972_v51, 0.0  ;;  %v5063_v55 = vsel %vm8524_vm0, %v971_v45, %v973_v48  ;;  %v977_v56 = vrot.slane %v4901_v8, 1 }
  0x19   : > { %v4961_v20 = vld [vmem:[%s4865_s24 + $0x98] sm:$0xff]  ;;  %v4968_v21 = vld [vmem:[%s4865_s24 + $0xa0] sm:$0xff]  ;;  %v4971_v22 = vld [vmem:[%s4865_s24 + $0xa8] sm:$0xff]  ;;  %vm5067_vm3 = vcmp.le.s32.totalorder %v297_v52, 14  ;;  %v976_v59 = vsel %vm8524_vm0, %v973_v48, %v975_v53  ;;  %v311_v60 = vand.u32 15, %v233_v49  ;;  %v979_v61 = vrot.slane %v4908_v9, 1 }
  0x1a   : > { %v4978_v23 = vld [vmem:[%s4865_s24 + $0xb0] sm:$0xff]  ;;  %v4981_v24 = vld [vmem:[%s4865_s24 + $0xb8] sm:$0xff]  ;;  %v4988_v26 = vld [vmem:[%s4865_s24 + $0xc0] sm:$0xff]  ;;  %v8709_v58 = vsel %vm5067_vm3, 4294967295, %v8708_v58  ;;  %v5079_v62 = vsel %vm5067_vm3, %v976_v59, 0.0  ;;  %v5082_v63 = vsel %vm8524_vm0, %v975_v53, %v977_v56  ;;  %v981_v25 = vrot.slane %v4911_v10, 1 }
  0x1b   : > { %1167 = vrot.lane.b32.xlu1 %v4888_v5, %s4809_s20  ;;  %1169 = vrot.lane.b32.xlu0 %v4891_v6, %s4809_s20  ;;  %v4991_v27 = vld [vmem:[%s4865_s24 + $0xc8] sm:$0xff]  ;;  %v5000_v29 = vld [vmem:[%s4865_s24 + $0xd0] sm:$0xff]  ;;  %8710 = vst [vmem:[#allocation4_spill] sm:$0xff] %v8709_v58  ;;  %v237_v31 = vadd.s32 88, %v4993_v28  ;;  %vm5086_vm4 = vcmp.le.s32.totalorder %v311_v60, 14  ;;  %v8711_v34 = vmov 0  ;;  %v980_v35 = vsel %vm8524_vm0, %v977_v56, %v979_v61 }
  0x1c   : > { %v5003_v30 = vld [vmem:[%s4865_s24 + $0xd8] sm:$0xff]  ;;  %v5011_v32 = vld [vmem:[%s4865_s24 + $0xe0] sm:$0xff]  ;;  %v5014_v33 = vld [vmem:[%s4865_s24 + $0xe8] sm:$0xff]  ;;  %v8712_v34 = vsel %vm5086_vm4, 4294967295, %v8711_v34  ;;  %v325_v36 = vand.u32 15, %v235_v57  ;;  %v983_v37 = vrot.slane %v4918_v11, 1  ;;  %v5101_v40 = vsel %vm8524_vm0, %v979_v61, %v981_v25 }
  0x1d   : > { %8713 = vst [vmem:[#allocation5_spill] sm:$0xff] %v8712_v34  ;;  %v5098_v38 = vsel %vm5086_vm4, %v980_v35, 0.0  ;;  %v985_v41 = vrot.slane %v4921_v12, 1  ;;  %v239_v43 = vadd.s32 104, %v4993_v28  ;;  %v8714_v44 = vmov 0 }
  0x1e   : > { %vm5105_vm5 = vcmp.le.s32.totalorder %v325_v36, 14  ;;  %v984_v45 = vsel %vm8524_vm0, %v981_v25, %v983_v37  ;;  %v339_v48 = vand.u32 15, %v237_v31  ;;  %v987_v49 = vrot.slane %v4928_v13, 1 }
  0x1f   : > { %1171 = vrot.lane.b32.xlu1 %v4898_v7, %s4809_s20  ;;  %1173 = vrot.lane.b32.xlu0 %v4901_v8, %s4809_s20  ;;  %v8715_v44 = vsel %vm5105_vm5, 4294967295, %v8714_v44  ;;  %v5117_v51 = vsel %vm5105_vm5, %v984_v45, 0.0  ;;  %v5120_v52 = vsel %vm8524_vm0, %v983_v37, %v985_v41  ;;  %v989_v53 = vrot.slane %v4931_v14, 1 }
  0x20   : > { %8716 = vst [vmem:[#allocation6_spill] sm:$0xff] %v8715_v44  ;;  %v241_v56 = vadd.s32 120, %v4993_v28  ;;  %vm5124_vm6 = vcmp.le.s32.totalorder %v339_v48, 14  ;;  %v8717_v57 = vmov 0  ;;  %v988_v59 = vsel %vm8524_vm0, %v985_v41, %v987_v49 }
  0x21   : > { %v8718_v57 = vsel %vm5124_vm6, 4294967295, %v8717_v57  ;;  %v353_v60 = vand.u32 15, %v239_v43  ;;  %v991_v61 = vrot.slane %v4938_v15, 1  ;;  %v5136_v25 = vsel %vm5124_vm6, %v988_v59, 0.0 }
  0x22   : > { %8719 = vst [vmem:[#allocation7_spill] sm:$0xff] %v8718_v57  ;;  %v5139_v31 = vsel %vm8524_vm0, %v987_v49, %v989_v53  ;;  %v993_v35 = vrot.slane %v4941_v16, 1  ;;  %v367_v36 = vand.u32 15, %v241_v56  ;;  %v8720_v37 = vmov 0 }
  0x23   : > { %1175 = vrot.lane.b32.xlu1 %v4908_v9, %s4809_s20  ;;  %1177 = vrot.lane.b32.xlu0 %v4911_v10, %s4809_s20  ;;  %vm5142_vm7 = vcmp.le.s32.totalorder %v353_v60, 14  ;;  %v992_v41 = vsel %vm8524_vm0, %v989_v53, %v991_v61  ;;  %v995_v43 = vrot.slane %v4948_v17, 1  ;;  %v243_v45 = vadd.s32 136, %v4993_v28 }
  0x24   : > { %v8721_v37 = vsel %vm5142_vm7, 4294967295, %v8720_v37  ;;  %v5155_v48 = vsel %vm5142_vm7, %v992_v41, 0.0  ;;  %v5158_v49 = vsel %vm8524_vm0, %v991_v61, %v993_v35  ;;  %vm5160_vm8 = vcmp.le.s32.totalorder %v367_v36, 14 }
  0x25   : > { %8722 = vst [vmem:[#allocation8_spill] sm:$0xff] %v8721_v37  ;;  %v8723_v56 = vmov 0  ;;  %v997_v53 = vrot.slane %v4951_v18, 1  ;;  %v996_v59 = vsel %vm8524_vm0, %v993_v35, %v995_v43  ;;  %v381_v60 = vand.u32 15, %v243_v45 }
  0x26   : > { %v8724_v56 = vsel %vm5160_vm8, 4294967295, %v8723_v56  ;;  %v245_v57 = vadd.s32 152, %v4993_v28  ;;  %v5174_v61 = vsel %vm5160_vm8, %v996_v59, 0.0  ;;  %v1001_v35 = vrot.slane %v4961_v20, 1 }
  0x27   : > { %1179 = vrot.lane.b32.xlu1 %v4918_v11, %s4809_s20  ;;  %1181 = vrot.lane.b32.xlu0 %v4921_v12, %s4809_s20  ;;  %8725 = vst [vmem:[#allocation9_spill] sm:$0xff] %v8724_v56  ;;  %8726 = vst [vmem:[#allocation10_spill] sm:$0xff] %v5174_v61  ;;  %v5177_v36 = vsel %vm8524_vm0, %v995_v43, %v997_v53  ;;  %v1003_v41 = vrot.slane %v4968_v21, 1  ;;  %vm5181_vm9 = vcmp.le.s32.totalorder %v381_v60, 14  ;;  %v8728_v45 = vmov 0 }
  0x28   : > { %8727 = vst [vmem:[#allocation11_spill] sm:$0xff] %v5177_v36  ;;  %v8729_v45 = vsel %vm5181_vm9, 4294967295, %v8728_v45  ;;  %v395_v44 = vand.u32 15, %v245_v57  ;;  %v247_v34 = vadd.s32 168, %v4993_v28  ;;  %v1005_v60 = vrot.slane %v4971_v22, 1 }
  0x29   : > { %8730 = vst [vmem:[#allocation12_spill] sm:$0xff] %v8729_v45  ;;  %v8733_v57 = vmov 0  ;;  %v1004_v56 = vsel %vm8524_vm0, %v1001_v35, %v1003_v41  ;;  %v249_v50 = vadd.s32 184, %v4993_v28 }
  0x2a   : > { %vm5200_vm10 = vcmp.le.s32.totalorder %v395_v44, 14  ;;  %v409_v58 = vand.u32 15, %v247_v34  ;;  %v5215_v44 = vsel %vm8524_vm0, %v1003_v41, %v1005_v60  ;;  %v8738_v34 = vmov 0 }
  0x2b   : > { %1183 = vrot.lane.b32.xlu1 %v4928_v13, %s4809_s20  ;;  %1185 = vrot.lane.b32.xlu0 %v4931_v14, %s4809_s20  ;;  %v8734_v57 = vsel %vm5200_vm10, 4294967295, %v8733_v57  ;;  %8737 = vst [vmem:[#allocation17_spill] sm:$0xff] %v5215_v44  ;;  %v423_v42 = vand.u32 15, %v249_v50  ;;  %v1013_v41 = vrot.slane %v4991_v27, 1  ;;  %v8743_v50 = vmov 0 }
  0x2c   : > { %8735 = vst [vmem:[#allocation15_spill] sm:$0xff] %v8734_v57  ;;  %vm5219_vm11 = vcmp.le.s32.totalorder %v409_v58, 14 }
  0x2d   : > { %v8739_v34 = vsel %vm5219_vm11, 4294967295, %v8738_v34  ;;  %vm5237_vm12 = vcmp.le.s32.totalorder %v423_v42, 14 }
  0x2e   : > { %8740 = vst [vmem:[#allocation18_spill] sm:$0xff] %v8739_v34  ;;  %v8744_v50 = vsel %vm5237_vm12, 4294967295, %v8743_v50 }
  0x2f   : > { %1187 = vrot.lane.b32.xlu1 %v4938_v15, %s4809_s20  ;;  %1189 = vrot.lane.b32.xlu0 %v4941_v16, %s4809_s20  ;;  %8745 = vst [vmem:[#allocation21_spill] sm:$0xff] %v8744_v50 }
  0x33   : > { %1191 = vrot.lane.b32.xlu1 %v4948_v17, %s4809_s20  ;;  %1193 = vrot.lane.b32.xlu0 %v4951_v18, %s4809_s20 }
  0x37   : > { %1195 = vrot.lane.b32.xlu1 %v4958_v19, %s4809_s20  ;;  %1197 = vrot.lane.b32.xlu0 %v4961_v20, %s4809_s20 }
  0x3b   : > { %1199 = vrot.lane.b32.xlu1 %v4968_v21, %s4809_s20  ;;  %1201 = vrot.lane.b32.xlu0 %v4971_v22, %s4809_s20 }
  0x3f   : > { %1203 = vrot.lane.b32.xlu1 %v4978_v23, %s4809_s20  ;;  %1205 = vrot.lane.b32.xlu0 %v4981_v24, %s4809_s20 }
  0x43   : > { %1207 = vrot.lane.b32.xlu1 %v4988_v26, %s4809_s20  ;;  %1209 = vrot.lane.b32.xlu0 %v4991_v27, %s4809_s20 }
  0x47   : > { %1211 = vrot.lane.b32.xlu1 %v5000_v29, %s4809_s20  ;;  %1213 = vrot.lane.b32.xlu0 %v5003_v30, %s4809_s20 }
  0x4b   : > { %1215 = vrot.lane.b32.xlu1 %v5011_v32, %s4809_s20  ;;  %1217 = vrot.lane.b32.xlu0 %v5014_v33, %s4809_s20 }
  0x4f   : > { %1280 = vrot.lane.b32.xlu1 %v8482_v0, %s4810_s25  ;;  %1282 = vrot.lane.b32.xlu0 %v5025_v39, %s4810_s25  ;;  %v999_v0 = vrot.slane %v4958_v19, 1 }
  0x51   : > { %v1000_v37 = vsel %vm8524_vm0, %v997_v53, %v999_v0  ;;  %v5196_v59 = vsel %vm8524_vm0, %v999_v0, %v1001_v35  ;;  %v1007_v53 = vrot.slane %v4978_v23, 1  ;;  %v5212_v0 = vsel %vm5200_vm10, %v1004_v56, 0.0 }
  0x52   : > { %v5193_v43 = vsel %vm5181_vm9, %v1000_v37, 0.0  ;;  %8732 = vst [vmem:[#allocation14_spill] sm:$0xff] %v5196_v59  ;;  %8736 = vst [vmem:[#allocation16_spill] sm:$0xff] %v5212_v0  ;;  %v1009_v37 = vrot.slane %v4981_v24, 1  ;;  %v251_v35 = vadd.s32 200, %v4993_v28  ;;  %vm9072_vm9 = vcmask 293888  }
  0x53   : > { %1284 = vrot.lane.b32.xlu1 %v5041_v46, %s4810_s25  ;;  %1286 = vrot.lane.b32.xlu0 %v5044_v47, %s4810_s25  ;;  %8731 = vst [vmem:[#allocation13_spill] sm:$0xff] %v5193_v43  ;;  %v1008_v45 = vsel %vm8524_vm0, %v1005_v60, %v1007_v53 }
  0x54   : > { %v5231_v56 = vsel %vm5219_vm11, %v1008_v45, 0.0  ;;  %v5234_v58 = vsel %vm8524_vm0, %v1007_v53, %v1009_v37  ;;  %v437_v60 = vand.u32 15, %v251_v35  ;;  %v8748_v53 = vmov 0 }
  0x55   : > { %8741 = vst [vmem:[#allocation19_spill] sm:$0xff] %v5231_v56  ;;  %8742 = vst [vmem:[#allocation20_spill] sm:$0xff] %v5234_v58 }
  0x56   : > { %vm5255_vm13 = vcmp.le.s32.totalorder %v437_v60, 14  ;;  %v8754_v60 = vmov 0 }
  0x57   : > { %1288 = vrot.lane.b32.xlu1 %v5060_v54, %s4810_s25  ;;  %1290 = vrot.lane.b32.xlu0 %v5063_v55, %s4810_s25  ;;  %v8749_v53 = vsel %vm5255_vm13, 4294967295, %v8748_v53 }
  0x58   : > { %8750 = vst [vmem:[#allocation24_spill] sm:$0xff] %v8749_v53 }
  0x5b   : > { %1292 = vrot.lane.b32.xlu1 %v5079_v62, %s4810_s25  ;;  %1294 = vrot.lane.b32.xlu0 %v5082_v63, %s4810_s25 }
  0x5f   : > { %1296 = vrot.lane.b32.xlu1 %v5098_v38, %s4810_s25  ;;  %1298 = vrot.lane.b32.xlu0 %v5101_v40, %s4810_s25 }
  0x63   : > { %1300 = vrot.lane.b32.xlu1 %v5117_v51, %s4810_s25  ;;  %1302 = vrot.lane.b32.xlu0 %v5120_v52, %s4810_s25 }
  0x67   : > { %1304 = vrot.lane.b32.xlu1 %v5136_v25, %s4810_s25  ;;  %1306 = vrot.lane.b32.xlu0 %v5139_v31, %s4810_s25 }
  0x6b   : > { %1308 = vrot.lane.b32.xlu1 %v5155_v48, %s4810_s25  ;;  %1310 = vrot.lane.b32.xlu0 %v5158_v49, %s4810_s25 }
  0x6f   : > { %1312 = vrot.lane.b32.xlu1 %v5174_v61, %s4810_s25  ;;  %1314 = vrot.lane.b32.xlu0 %v5177_v36, %s4810_s25 }
  0x73   : > { %1316 = vrot.lane.b32.xlu1 %v5193_v43, %s4810_s25  ;;  %1318 = vrot.lane.b32.xlu0 %v5196_v59, %s4810_s25  ;;  %v1011_v43 = vrot.slane %v4988_v26, 1  ;;  %v5264_v59 = vld [vmem:[%s4865_s24 + $0xf0] sm:$0xff] }
  0x75   : > { %v1012_v57 = vsel %vm8524_vm0, %v1009_v37, %v1011_v43  ;;  %v5253_v42 = vsel %vm8524_vm0, %v1011_v43, %v1013_v41  ;;  %v1017_v37 = vrot.slane %v5003_v30, 1 }
  0x76   : > { %v5250_v45 = vsel %vm5237_vm12, %v1012_v57, 0.0  ;;  %8747 = vst [vmem:[#allocation23_spill] sm:$0xff] %v5253_v42  ;;  %vm8626_vm12 = vcmask 162816  }
  0x77   : > { %1320 = vrot.lane.b32.xlu1 %v5212_v0, %s4810_s25  ;;  %1322 = vrot.lane.b32.xlu0 %v5215_v44, %s4810_s25  ;;  %v1015_v0 = vrot.slane %v5000_v29, 1  ;;  %v253_v44 = vadd.s32 216, %v4993_v28  ;;  %8746 = vst [vmem:[#allocation22_spill] sm:$0xff] %v5250_v45 }
  0x79   : > { %v1016_v35 = vsel %vm8524_vm0, %v1013_v41, %v1015_v0  ;;  %v451_v34 = vand.u32 15, %v253_v44  ;;  %v5277_v44 = vsel %vm8524_vm0, %v1015_v0, %v1017_v37  ;;  %v1021_v41 = vrot.slane %v5014_v33, 1 }
  0x7a   : > { %v5274_v57 = vsel %vm5255_vm13, %v1016_v35, 0.0  ;;  %8753 = vst [vmem:[#allocation27_spill] sm:$0xff] %v5277_v44  ;;  %v262_v0 = vand.u32 15, %v4993_v28  ;;  %v228_v35 = vadd.s32 16, %v4993_v28  ;;  %vm8610_vm13 = vcmask 1040384  }
  0x7b   : > { %1324 = vrot.lane.b32.xlu1 %v5231_v56, %s4810_s25  ;;  %1326 = vrot.lane.b32.xlu0 %v5234_v58, %s4810_s25  ;;  %v1019_v56 = vrot.slane %v5011_v32, 1  ;;  %v255_v58 = vadd.s32 232, %v4993_v28  ;;  %8752 = vst [vmem:[#allocation26_spill] sm:$0xff] %v5274_v57  ;;  %vm5280_vm14 = vcmp.le.s32.totalorder %v451_v34, 14 }
  0x7c   : > { %v8755_v60 = vsel %vm5280_vm14, 4294967295, %v8754_v60 }
  0x7d   : > { %8756 = vst [vmem:[#allocation28_spill] sm:$0xff] %v8755_v60  ;;  %v1020_v50 = vsel %vm8524_vm0, %v1017_v37, %v1019_v56  ;;  %v5297_v53 = vsel %vm8524_vm0, %v1019_v56, %v1021_v41  ;;  %v771_v37 = vrot.slane %v4871_v2, 7  ;;  %v8765_v56 = vmov 0 }
  0x7e   : > { %v5294_v34 = vsel %vm5280_vm14, %v1020_v50, 0.0  ;;  %8758 = vst [vmem:[#allocation30_spill] sm:$0xff] %v5297_v53  ;;  %v774_v50 = vrot.slane %v4878_v3, 7  ;;  %vm5312_vm14 = vcmp.ge.s32.totalorder %v262_v0, 1 }
  0x7f   : > { %1328 = vrot.lane.b32.xlu1 %v5250_v45, %s4810_s25  ;;  %1330 = vrot.lane.b32.xlu0 %v5253_v42, %s4810_s25  ;;  %v465_v45 = vand.u32 15, %v255_v58  ;;  %8757 = vst [vmem:[#allocation29_spill] sm:$0xff] %v5294_v34  ;;  %v8766_v56 = vsel %vm5312_vm14, 4294967295, %v8765_v56  ;;  %v866_v60 = vsel %vm8610_vm13, 0.0, %v771_v37 }
  0x80   : > { %v5270_v43 = vpop.permute.xlu0 %1157  ;;  %8767 = vst [vmem:[#allocation34_spill] sm:$0xff] %v8766_v56  ;;  %v5333_v61 = vsel %vm5312_vm14, %v866_v60, 0.0  ;;  %v778_v56 = vrot.slane %v4888_v5, 7  ;;  %v232_v60 = vadd.s32 48, %v4993_v28 }
  0x81   : > { %8751 = vst [vmem:[#allocation25_spill] sm:$0xff] %v5270_v43  ;;  %vm5304_vm15 = vcmp.le.s32.totalorder %v465_v45, 14  ;;  %v8761_v43 = vmov 0  ;;  %v276_v45 = vand.u32 15, %v228_v35  ;;  %8771 = vst [vmem:[#allocation38_spill] sm:$0xff] %v5333_v61  ;;  %v776_v35 = vrot.slane %v4881_v4, 7 }
  0x82   : > { %v8762_v43 = vsel %vm5304_vm15, 4294967295, %v8761_v43 }
  0x83   : > { %1332 = vrot.lane.b32.xlu1 %v5274_v57, %s4810_s25  ;;  %1334 = vrot.lane.b32.xlu0 %v5277_v44, %s4810_s25  ;;  %8763 = vst [vmem:[#allocation33_spill] sm:$0xff] %v8762_v43  ;;  %v8764_v57 = vrot.slane %v5264_v59, 1  ;;  %v779_v36 = vsel %vm8610_vm13, %v776_v35, %v778_v56 }
  0x85   : > { %v5299_v58 = vpop.permute.xlu1 %1161  ;;  %v5302_v42 = vpop.permute.xlu0 %1159  ;;  %v1024_v44 = vsel %vm8524_vm0, %v1021_v41, %v8764_v57  ;;  %v772_v57 = vrot.slane %v4868_v1, 7  ;;  %vm5337_vm0 = vcmp.ge.s32.totalorder %v276_v45, 1 }
  0x86   : > { %8759 = vst [vmem:[#allocation31_spill] sm:$0xff] %v5299_v58  ;;  %8760 = vst [vmem:[#allocation32_spill] sm:$0xff] %v5302_v42  ;;  %v230_v42 = vadd.s32 32, %v4993_v28  ;;  %v5325_v41 = vsel %vm5304_vm15, %v1024_v44, 0.0  ;;  %vm8627_vm15 = vcmask 130048  }
  0x87   : > { %1336 = vrot.lane.b32.xlu1 %v5294_v34, %s4810_s25  ;;  %1338 = vrot.lane.b32.xlu0 %v5297_v53, %s4810_s25  ;;  %8768 = vst [vmem:[#allocation35_spill] sm:$0xff] %v5325_v41  ;;  %v775_v34 = vsel %vm8610_vm13, %v772_v57, %v774_v50  ;;  %v8772_v53 = vmov 0  ;;  %v5352_v45 = vsel %vm8610_vm13, %v771_v37, %v772_v57  ;;  %v304_v37 = vand.u32 15, %v232_v60 }
  0x88   : > { %v8773_v53 = vsel %vm5337_vm0, 4294967295, %v8772_v53  ;;  %v290_v44 = vand.u32 15, %v230_v42  ;;  %8777 = vst [vmem:[#allocation42_spill] sm:$0xff] %v5352_v45  ;;  %v8779_v42 = vmov 0 }
  0x89   : > { %v5327_v0 = vpop.permute.xlu1 %1163  ;;  %v5329_v58 = vpop.permute.xlu0 %1165  ;;  %8774 = vst [vmem:[#allocation39_spill] sm:$0xff] %v8773_v53 }
  0x8a   : > { %8769 = vst [vmem:[#allocation36_spill] sm:$0xff] %v5327_v0  ;;  %8770 = vst [vmem:[#allocation37_spill] sm:$0xff] %v5329_v58  ;;  %v5356_v0 = vsel %vm5337_vm0, %v775_v34, 0.0  ;;  %vm5360_vm14 = vcmp.ge.s32.totalorder %v290_v44, 1  ;;  %v234_v34 = vadd.s32 64, %v4993_v28  ;;  %v5375_v44 = vsel %vm8610_vm13, %v774_v50, %v776_v35 }
  0x8b   : > { %1340 = vrot.lane.b32.xlu1 %v5325_v41, %s4810_s25  ;;  %1405 = vrot.lane.b32.xlu0 %v5333_v61, %s4811_s26  ;;  %8778 = vst [vmem:[#allocation43_spill] sm:$0xff] %v5356_v0  ;;  %v780_v41 = vrot.slane %v4891_v6, 7  ;;  %v782_v61 = vrot.slane %v4898_v7, 7  ;;  %v8780_v42 = vsel %vm5360_vm14, 4294967295, %v8779_v42  ;;  %8784 = vst [vmem:[#allocation47_spill] sm:$0xff] %v5375_v44  ;;  %vm5383_vm0 = vcmp.ge.s32.totalorder %v304_v37, 1 }
  0x8c   : > { %8781 = vst [vmem:[#allocation44_spill] sm:$0xff] %v8780_v42  ;;  %v318_v50 = vand.u32 15, %v234_v34  ;;  %v238_v34 = vadd.s32 96, %v4993_v28 }
  0x8d   : > { %v5347_v43 = vpop.permute.xlu1 %1167  ;;  %v5349_v58 = vpop.permute.xlu0 %1169  ;;  %v783_v60 = vsel %vm8610_vm13, %v780_v41, %v782_v61  ;;  %v5398_v37 = vsel %vm8610_vm13, %v778_v56, %v780_v41  ;;  %v790_v41 = vrot.slane %v4918_v11, 7 }
  0x8e   : > { %8775 = vst [vmem:[#allocation40_spill] sm:$0xff] %v5347_v43  ;;  %8776 = vst [vmem:[#allocation41_spill] sm:$0xff] %v5349_v58  ;;  %v5379_v58 = vsel %vm5360_vm14, %v779_v36, 0.0  ;;  %v784_v43 = vrot.slane %v4901_v8, 7  ;;  %v236_v36 = vadd.s32 80, %v4993_v28  ;;  %vm5406_vm14 = vcmp.ge.s32.totalorder %v318_v50, 1 }
  0x8f   : > { %1409 = vrot.lane.b32.xlu0 %v5356_v0, %s4811_s26  ;;  %1407 = vrot.lane.b32.xlu1 %v5352_v45, %s4811_s26  ;;  %8785 = vst [vmem:[#allocation48_spill] sm:$0xff] %v5379_v58  ;;  %v786_v0 = vrot.slane %v4908_v9, 7  ;;  %v8786_v45 = vmov 0  ;;  %8791 = vst [vmem:[#allocation52_spill] sm:$0xff] %v5398_v37 }
  0x90   : > { %v8787_v45 = vsel %vm5383_vm0, 4294967295, %v8786_v45  ;;  %v332_v56 = vand.u32 15, %v236_v36  ;;  %v5421_v50 = vsel %vm8610_vm13, %v782_v61, %v784_v43  ;;  %v8800_v36 = vmov 0 }
  0x91   : > { %v5370_v57 = vpop.permute.xlu1 %1171  ;;  %v5372_v53 = vpop.permute.xlu0 %1173  ;;  %8788 = vst [vmem:[#allocation49_spill] sm:$0xff] %v8787_v45  ;;  %8798 = vst [vmem:[#allocation57_spill] sm:$0xff] %v5421_v50  ;;  %v346_v61 = vand.u32 15, %v238_v34 }
  0x92   : > { %8782 = vst [vmem:[#allocation45_spill] sm:$0xff] %v5370_v57  ;;  %8783 = vst [vmem:[#allocation46_spill] sm:$0xff] %v5372_v53  ;;  %v5402_v53 = vsel %vm5383_vm0, %v783_v60, 0.0  ;;  %v787_v57 = vsel %vm8610_vm13, %v784_v43, %v786_v0  ;;  %vm5429_vm0 = vcmp.ge.s32.totalorder %v332_v56, 1  ;;  %v240_v43 = vadd.s32 112, %v4993_v28 }
  0x93   : > { %1413 = vrot.lane.b32.xlu0 %v5379_v58, %s4811_s26  ;;  %1411 = vrot.lane.b32.xlu1 %v5375_v44, %s4811_s26  ;;  %8792 = vst [vmem:[#allocation53_spill] sm:$0xff] %v5402_v53  ;;  %v788_v58 = vrot.slane %v4911_v10, 7  ;;  %v8793_v44 = vmov 0  ;;  %v8801_v36 = vsel %vm5429_vm0, 4294967295, %v8800_v36 }
  0x94   : > { %v8794_v44 = vsel %vm5406_vm14, 4294967295, %v8793_v44  ;;  %8802 = vst [vmem:[#allocation59_spill] sm:$0xff] %v8801_v36 }
  0x95   : > { %v5393_v35 = vpop.permute.xlu1 %1175  ;;  %v5395_v42 = vpop.permute.xlu0 %1177  ;;  %8795 = vst [vmem:[#allocation54_spill] sm:$0xff] %v8794_v44  ;;  %v5444_v56 = vsel %vm8610_vm13, %v786_v0, %v788_v58  ;;  %v798_v0 = vrot.slane %v4938_v15, 7 }
  0x96   : > { %8789 = vst [vmem:[#allocation50_spill] sm:$0xff] %v5393_v35  ;;  %8790 = vst [vmem:[#allocation51_spill] sm:$0xff] %v5395_v42  ;;  %v5425_v42 = vsel %vm5406_vm14, %v787_v57, 0.0  ;;  %v792_v35 = vrot.slane %v4921_v12, 7  ;;  %vm5452_vm14 = vcmp.ge.s32.totalorder %v346_v61, 1 }
  0x97   : > { %1417 = vrot.lane.b32.xlu0 %v5402_v53, %s4811_s26  ;;  %1415 = vrot.lane.b32.xlu1 %v5398_v37, %s4811_s26  ;;  %8799 = vst [vmem:[#allocation58_spill] sm:$0xff] %v5425_v42  ;;  %v794_v37 = vrot.slane %v4928_v13, 7  ;;  %v791_v53 = vsel %vm8610_vm13, %v788_v58, %v790_v41  ;;  %8805 = vst [vmem:[#allocation62_spill] sm:$0xff] %v5444_v56  ;;  %v360_v58 = vand.u32 15, %v240_v43  ;;  %v8814_v43 = vmov 0 }
  0x98   : > { %v5467_v61 = vsel %vm8610_vm13, %v790_v41, %v792_v35  ;;  %v244_v41 = vadd.s32 144, %v4993_v28 }
  0x99   : > { %v5416_v60 = vpop.permute.xlu1 %1179  ;;  %v5418_v45 = vpop.permute.xlu0 %1181  ;;  %8812 = vst [vmem:[#allocation67_spill] sm:$0xff] %v5467_v61 }
  0x9a   : > { %8796 = vst [vmem:[#allocation55_spill] sm:$0xff] %v5416_v60  ;;  %8797 = vst [vmem:[#allocation56_spill] sm:$0xff] %v5418_v45  ;;  %v5448_v45 = vsel %vm5429_vm0, %v791_v53, 0.0  ;;  %v795_v60 = vsel %vm8610_vm13, %v792_v35, %v794_v37  ;;  %v242_v53 = vadd.s32 128, %v4993_v28  ;;  %vm5475_vm0 = vcmp.ge.s32.totalorder %v360_v58, 1 }
  0x9b   : > { %1421 = vrot.lane.b32.xlu0 %v5425_v42, %s4811_s26  ;;  %1419 = vrot.lane.b32.xlu1 %v5421_v50, %s4811_s26  ;;  %8806 = vst [vmem:[#allocation63_spill] sm:$0xff] %v5448_v45  ;;  %v796_v42 = vrot.slane %v4931_v14, 7  ;;  %v8807_v50 = vmov 0  ;;  %v8815_v43 = vsel %vm5475_vm0, 4294967295, %v8814_v43 }
  0x9c   : > { %v8808_v50 = vsel %vm5452_vm14, 4294967295, %v8807_v50  ;;  %8816 = vst [vmem:[#allocation69_spill] sm:$0xff] %v8815_v43  ;;  %v374_v35 = vand.u32 15, %v242_v53 }
  0x9d   : > { %v5439_v57 = vpop.permute.xlu1 %1183  ;;  %v5441_v44 = vpop.permute.xlu0 %1185  ;;  %8809 = vst [vmem:[#allocation64_spill] sm:$0xff] %v8808_v50  ;;  %v5490_v58 = vsel %vm8610_vm13, %v794_v37, %v796_v42  ;;  %v806_v37 = vrot.slane %v4958_v19, 7 }
  0x9e   : > { %8803 = vst [vmem:[#allocation60_spill] sm:$0xff] %v5439_v57  ;;  %8804 = vst [vmem:[#allocation61_spill] sm:$0xff] %v5441_v44  ;;  %v5471_v44 = vsel %vm5452_vm14, %v795_v60, 0.0  ;;  %v800_v57 = vrot.slane %v4941_v16, 7  ;;  %vm5498_vm14 = vcmp.ge.s32.totalorder %v374_v35, 1 }
  0x9f   : > { %1425 = vrot.lane.b32.xlu0 %v5448_v45, %s4811_s26  ;;  %1423 = vrot.lane.b32.xlu1 %v5444_v56, %s4811_s26  ;;  %8813 = vst [vmem:[#allocation68_spill] sm:$0xff] %v5471_v44  ;;  %v802_v56 = vrot.slane %v4948_v17, 7  ;;  %v799_v45 = vsel %vm8610_vm13, %v796_v42, %v798_v0  ;;  %8819 = vst [vmem:[#allocation72_spill] sm:$0xff] %v5490_v58  ;;  %v388_v42 = vand.u32 15, %v244_v41  ;;  %v8828_v41 = vmov 0 }
  0xa0   : > { %v5513_v35 = vsel %vm8610_vm13, %v798_v0, %v800_v57  ;;  %v248_v0 = vadd.s32 176, %v4993_v28 }
  0xa1   : > { %v5462_v34 = vpop.permute.xlu1 %1187  ;;  %v5464_v36 = vpop.permute.xlu0 %1189  ;;  %8826 = vst [vmem:[#allocation77_spill] sm:$0xff] %v5513_v35 }
  0xa2   : > { %8810 = vst [vmem:[#allocation65_spill] sm:$0xff] %v5462_v34  ;;  %8811 = vst [vmem:[#allocation66_spill] sm:$0xff] %v5464_v36  ;;  %v5494_v36 = vsel %vm5475_vm0, %v799_v45, 0.0  ;;  %v803_v34 = vsel %vm8610_vm13, %v800_v57, %v802_v56  ;;  %v246_v45 = vadd.s32 160, %v4993_v28  ;;  %vm5521_vm0 = vcmp.ge.s32.totalorder %v388_v42, 1 }
  0xa3   : > { %1429 = vrot.lane.b32.xlu0 %v5471_v44, %s4811_s26  ;;  %1427 = vrot.lane.b32.xlu1 %v5467_v61, %s4811_s26  ;;  %8820 = vst [vmem:[#allocation73_spill] sm:$0xff] %v5494_v36  ;;  %v804_v44 = vrot.slane %v4951_v18, 7  ;;  %v8821_v61 = vmov 0  ;;  %v8829_v41 = vsel %vm5521_vm0, 4294967295, %v8828_v41 }
  0xa4   : > { %v8822_v61 = vsel %vm5498_vm14, 4294967295, %v8821_v61  ;;  %8830 = vst [vmem:[#allocation79_spill] sm:$0xff] %v8829_v41  ;;  %v402_v57 = vand.u32 15, %v246_v45 }
  0xa5   : > { %v5485_v60 = vpop.permute.xlu1 %1191  ;;  %v5487_v50 = vpop.permute.xlu0 %1193  ;;  %8823 = vst [vmem:[#allocation74_spill] sm:$0xff] %v8822_v61  ;;  %v5536_v42 = vsel %vm8610_vm13, %v802_v56, %v804_v44  ;;  %v814_v56 = vrot.slane %v4978_v23, 7 }
  0xa6   : > { %8817 = vst [vmem:[#allocation70_spill] sm:$0xff] %v5485_v60  ;;  %8818 = vst [vmem:[#allocation71_spill] sm:$0xff] %v5487_v50  ;;  %v5517_v50 = vsel %vm5498_vm14, %v803_v34, 0.0  ;;  %v808_v60 = vrot.slane %v4961_v20, 7  ;;  %vm5544_vm14 = vcmp.ge.s32.totalorder %v402_v57, 1 }
  0xa7   : > { %1433 = vrot.lane.b32.xlu0 %v5494_v36, %s4811_s26  ;;  %1431 = vrot.lane.b32.xlu1 %v5490_v58, %s4811_s26  ;;  %8827 = vst [vmem:[#allocation78_spill] sm:$0xff] %v5517_v50  ;;  %v810_v58 = vrot.slane %v4968_v21, 7  ;;  %v807_v36 = vsel %vm8610_vm13, %v804_v44, %v806_v37  ;;  %8833 = vst [vmem:[#allocation82_spill] sm:$0xff] %v5536_v42  ;;  %v416_v44 = vand.u32 15, %v248_v0  ;;  %v8842_v0 = vmov 0 }
  0xa8   : > { %v5559_v57 = vsel %vm8610_vm13, %v806_v37, %v808_v60  ;;  %v252_v37 = vadd.s32 208, %v4993_v28 }
  0xa9   : > { %v5508_v53 = vpop.permute.xlu1 %1195  ;;  %v5510_v43 = vpop.permute.xlu0 %1197  ;;  %8840 = vst [vmem:[#allocation87_spill] sm:$0xff] %v5559_v57 }
  0xaa   : > { %8824 = vst [vmem:[#allocation75_spill] sm:$0xff] %v5508_v53  ;;  %8825 = vst [vmem:[#allocation76_spill] sm:$0xff] %v5510_v43  ;;  %v5540_v43 = vsel %vm5521_vm0, %v807_v36, 0.0  ;;  %v811_v53 = vsel %vm8610_vm13, %v808_v60, %v810_v58  ;;  %v250_v36 = vadd.s32 192, %v4993_v28  ;;  %vm5567_vm0 = vcmp.ge.s32.totalorder %v416_v44, 1 }
  0xab   : > { %1437 = vrot.lane.b32.xlu0 %v5517_v50, %s4811_s26  ;;  %1435 = vrot.lane.b32.xlu1 %v5513_v35, %s4811_s26  ;;  %8834 = vst [vmem:[#allocation83_spill] sm:$0xff] %v5540_v43  ;;  %v812_v50 = vrot.slane %v4971_v22, 7  ;;  %v8835_v35 = vmov 0  ;;  %v8843_v0 = vsel %vm5567_vm0, 4294967295, %v8842_v0 }
  0xac   : > { %v8836_v35 = vsel %vm5544_vm14, 4294967295, %v8835_v35  ;;  %8844 = vst [vmem:[#allocation89_spill] sm:$0xff] %v8843_v0  ;;  %v430_v60 = vand.u32 15, %v250_v36 }
  0xad   : > { %v5531_v34 = vpop.permute.xlu1 %1199  ;;  %v5533_v61 = vpop.permute.xlu0 %1201  ;;  %8837 = vst [vmem:[#allocation84_spill] sm:$0xff] %v8836_v35  ;;  %v5582_v44 = vsel %vm8610_vm13, %v810_v58, %v812_v50  ;;  %v822_v58 = vrot.slane %v5000_v29, 7 }
  0xae   : > { %8831 = vst [vmem:[#allocation80_spill] sm:$0xff] %v5531_v34  ;;  %8832 = vst [vmem:[#allocation81_spill] sm:$0xff] %v5533_v61  ;;  %v5563_v61 = vsel %vm5544_vm14, %v811_v53, 0.0  ;;  %v816_v34 = vrot.slane %v4981_v24, 7  ;;  %vm5590_vm14 = vcmp.ge.s32.totalorder %v430_v60, 1  ;;  %v256_v60 = vadd.s32 240, %v4993_v28 }
  0xaf   : > { %1441 = vrot.lane.b32.xlu0 %v5540_v43, %s4811_s26  ;;  %1439 = vrot.lane.b32.xlu1 %v5536_v42, %s4811_s26  ;;  %8841 = vst [vmem:[#allocation88_spill] sm:$0xff] %v5563_v61  ;;  %v818_v42 = vrot.slane %v4988_v26, 7  ;;  %v815_v43 = vsel %vm8610_vm13, %v812_v50, %v814_v56  ;;  %8847 = vst [vmem:[#allocation92_spill] sm:$0xff] %v5582_v44  ;;  %v444_v50 = vand.u32 15, %v252_v37  ;;  %v8856_v37 = vmov 0 }
  0xb1   : > { %v5554_v45 = vpop.permute.xlu1 %1203  ;;  %v5556_v41 = vpop.permute.xlu0 %1205 }
  0xb2   : > { %8838 = vst [vmem:[#allocation85_spill] sm:$0xff] %v5554_v45  ;;  %8839 = vst [vmem:[#allocation86_spill] sm:$0xff] %v5556_v41  ;;  %v5586_v41 = vsel %vm5567_vm0, %v815_v43, 0.0  ;;  %v819_v45 = vsel %vm8610_vm13, %v816_v34, %v818_v42  ;;  %v254_v43 = vadd.s32 224, %v4993_v28  ;;  %vm5613_vm0 = vcmp.ge.s32.totalorder %v444_v50, 1 }
  0xb3   : > { %1445 = vrot.lane.b32.xlu0 %v5563_v61, %s4811_s26  ;;  %1443 = vrot.lane.b32.xlu1 %v5559_v57, %s4811_s26  ;;  %8848 = vst [vmem:[#allocation93_spill] sm:$0xff] %v5586_v41  ;;  %v820_v61 = vrot.slane %v4991_v27, 7  ;;  %v8849_v57 = vmov 0  ;;  %v8857_v37 = vsel %vm5613_vm0, 4294967295, %v8856_v37  ;;  %v472_v50 = vand.u32 15, %v256_v60 }
  0xb4   : > { %v8850_v57 = vsel %vm5590_vm14, 4294967295, %v8849_v57  ;;  %8858 = vst [vmem:[#allocation99_spill] sm:$0xff] %v8857_v37 }
  0xb5   : > { %v5577_v53 = vpop.permute.xlu1 %1207  ;;  %v5579_v35 = vpop.permute.xlu0 %1209  ;;  %8851 = vst [vmem:[#allocation94_spill] sm:$0xff] %v8850_v57 }
  0xb6   : > { %8845 = vst [vmem:[#allocation90_spill] sm:$0xff] %v5577_v53  ;;  %8846 = vst [vmem:[#allocation91_spill] sm:$0xff] %v5579_v35  ;;  %v5606_v35 = vsel %vm8610_vm13, %v814_v56, %v816_v34  ;;  %v5610_v53 = vsel %vm5590_vm14, %v819_v45, 0.0  ;;  %v458_v34 = vand.u32 15, %v254_v43  ;;  %v826_v56 = vrot.slane %v5011_v32, 7 }
  0xb7   : > { %1449 = vrot.lane.b32.xlu0 %v5586_v41, %s4811_s26  ;;  %1447 = vrot.lane.b32.xlu1 %v5582_v44, %s4811_s26  ;;  %8854 = vst [vmem:[#allocation97_spill] sm:$0xff] %v5606_v35  ;;  %8855 = vst [vmem:[#allocation98_spill] sm:$0xff] %v5610_v53  ;;  %v824_v44 = vrot.slane %v5003_v30, 7  ;;  %v823_v41 = vsel %vm8610_vm13, %v820_v61, %v822_v58 }
  0xb8   : > { %vm5635_vm14 = vcmp.ge.s32.totalorder %v458_v34, 1  ;;  %v5655_v34 = vld [vmem:[%s4865_s24 + $0xf8] sm:$0xff] }
  0xb9   : > { %v5600_v36 = vpop.permute.xlu1 %1211  ;;  %v5602_v0 = vpop.permute.xlu0 %1213  ;;  %v827_v43 = vsel %vm8610_vm13, %v824_v44, %v826_v56  ;;  %v5658_v37 = vsel %vm8610_vm13, %v822_v58, %v824_v44 }
  0xba   : > { %8852 = vst [vmem:[#allocation95_spill] sm:$0xff] %v5600_v36  ;;  %8853 = vst [vmem:[#allocation96_spill] sm:$0xff] %v5602_v0  ;;  %v830_v0 = vrot.slane %v5264_v59, 7  ;;  %v5629_v36 = vsel %vm8610_vm13, %v818_v42, %v820_v61 }
  0xbb   : > { %1453 = vrot.lane.b32.xlu0 %v5610_v53, %s4811_s26  ;;  %1451 = vrot.lane.b32.xlu1 %v5606_v35, %s4811_s26  ;;  %8861 = vst [vmem:[#allocation102_spill] sm:$0xff] %v5629_v36  ;;  %v5633_v53 = vsel %vm5613_vm0, %v823_v41, 0.0  ;;  %v8863_v35 = vmov 0  ;;  %vm5649_vm0 = vcmp.ge.s32.totalorder %v472_v50, 1  ;;  %v8868_v41 = vmov 0  ;;  %8871 = vst [vmem:[#allocation108_spill] sm:$0xff] %v5658_v37 }
  0xbc   : > { %8862 = vst [vmem:[#allocation103_spill] sm:$0xff] %v5633_v53  ;;  %v8864_v35 = vsel %vm5635_vm14, 4294967295, %v8863_v35  ;;  %v8869_v41 = vsel %vm5649_vm0, 4294967295, %v8868_v41 }
  0xbd   : > { %v5623_v45 = vpop.permute.xlu1 %1215  ;;  %v5625_v57 = vpop.permute.xlu0 %1217  ;;  %8865 = vst [vmem:[#allocation104_spill] sm:$0xff] %v8864_v35  ;;  %8870 = vst [vmem:[#allocation107_spill] sm:$0xff] %v8869_v41 }
  0xbe   : > { %8859 = vst [vmem:[#allocation100_spill] sm:$0xff] %v5623_v45  ;;  %8860 = vst [vmem:[#allocation101_spill] sm:$0xff] %v5625_v57  ;;  %v828_v45 = vrot.slane %v5014_v33, 7  ;;  %v5662_v57 = vsel %vm5635_vm14, %v827_v43, 0.0 }
  0xbf   : > { %1457 = vrot.lane.b32.xlu0 %v5633_v53, %s4811_s26  ;;  %1455 = vrot.lane.b32.xlu1 %v5629_v36, %s4811_s26  ;;  %8872 = vst [vmem:[#allocation109_spill] sm:$0xff] %v5662_v57 }
  0xc0   : > { %v831_v60 = vsel %vm8610_vm13, %v828_v45, %v830_v0  ;;  %v5678_v58 = vsel %vm8610_vm13, %v826_v56, %v828_v45 }
  0xc1   : > { %v5645_v61 = vpop.permute.xlu1 %1280  ;;  %v5647_v42 = vpop.permute.xlu0 %1282  ;;  %v5670_v50 = vsel %vm5649_vm0, %v831_v60, 0.0  ;;  %8873 = vst [vmem:[#allocation110_spill] sm:$0xff] %v5678_v58 }
  0xc2   : > { %8866 = vst [vmem:[#allocation105_spill] sm:$0xff] %v5645_v61  ;;  %8867 = vst [vmem:[#allocation106_spill] sm:$0xff] %v5647_v42  ;;  %v832_v42 = vrot.slane %v5655_v34, 7 }
  0xc3   : > { %1461 = vrot.lane.b32.xlu0 %v5662_v57, %s4811_s26  ;;  %1459 = vrot.lane.b32.xlu1 %v5658_v37, %s4811_s26 }
  0xc4   : > { %v5685_v43 = vsel %vm8610_vm13, %v830_v0, %v832_v42  ;;  %vm8941_vm13 = vcmask 1046528  }
  0xc5   : > { %v5673_v61 = vpop.permute.xlu1 %1284  ;;  %v5675_v44 = vpop.permute.xlu0 %1286  ;;  %vm8945_vm14 = vmmov %vm8941_vm13 }
  0xc7   : > { %1465 = vrot.lane.b32.xlu0 %v5670_v50, %s4811_s26  ;;  %1463 = vrot.lane.b32.xlu1 %v5678_v58, %s4811_s26 }
  0xc9   : > { %v5687_v60 = vpop.permute.xlu1 %1288  ;;  %v5689_v41 = vpop.permute.xlu0 %1290 }
  0xca   : > { %8874 = vst [vmem:[#allocation111_spill] sm:$0xff] %v5689_v41  ;;  %v8961_v41 = vld [vmem:[#allocation57_spill] sm:$0xff] }
  0xcb   : > { %1501 = vrot.lane.b32.xlu0 %v4871_v2, %s4812_s27  ;;  %1467 = vrot.lane.b32.xlu1 %v5685_v43, %s4811_s26 }
  0xcd   : > { %v5695_v56 = vpop.permute.xlu1 %1292  ;;  %v5697_v45 = vpop.permute.xlu0 %1294 }
  0xce   : > { %8875 = vst [vmem:[#allocation112_spill] sm:$0xff] %v5695_v56  ;;  %8876 = vst [vmem:[#allocation113_spill] sm:$0xff] %v5697_v45  ;;  %v8952_v45 = vld [vmem:[#allocation48_spill] sm:$0xff] }
  0xcf   : > { %1505 = vrot.lane.b32.xlu0 %v4878_v3, %s4812_s27  ;;  %1503 = vrot.lane.b32.xlu1 %v4868_v1, %s4812_s27 }
  0xd1   : > { %v5703_v0 = vpop.permute.xlu1 %1296  ;;  %v5705_v42 = vpop.permute.xlu0 %1298 }
  0xd2   : > { %8877 = vst [vmem:[#allocation114_spill] sm:$0xff] %v5703_v0  ;;  %8878 = vst [vmem:[#allocation115_spill] sm:$0xff] %v5705_v42  ;;  %v8942_v42 = vmov 0 }
  0xd3   : > { %1509 = vrot.lane.b32.xlu0 %v4888_v5, %s4812_s27  ;;  %1507 = vrot.lane.b32.xlu1 %v4881_v4, %s4812_s27 }
  0xd5   : > { %v5711_v2 = vpop.permute.xlu1 %1300  ;;  %v5713_v35 = vpop.permute.xlu0 %1302 }
  0xd6   : > { %8879 = vst [vmem:[#allocation116_spill] sm:$0xff] %v5711_v2  ;;  %8880 = vst [vmem:[#allocation117_spill] sm:$0xff] %v5713_v35  ;;  %v8938_v35 = vld [vmem:[#allocation30_spill] sm:$0xff] }
  0xd7   : > { %1513 = vrot.lane.b32.xlu0 %v4898_v7, %s4812_s27  ;;  %1511 = vrot.lane.b32.xlu1 %v4891_v6, %s4812_s27 }
  0xd9   : > { %v5719_v1 = vpop.permute.xlu1 %1304  ;;  %v5721_v3 = vpop.permute.xlu0 %1306 }
  0xda   : > { %8881 = vst [vmem:[#allocation118_spill] sm:$0xff] %v5719_v1  ;;  %8882 = vst [vmem:[#allocation119_spill] sm:$0xff] %v5721_v3  ;;  %v8936_v3 = vld [vmem:[#allocation27_spill] sm:$0xff] }
  0xdb   : > { %1517 = vrot.lane.b32.xlu0 %v4908_v9, %s4812_s27  ;;  %1515 = vrot.lane.b32.xlu1 %v4901_v8, %s4812_s27 }
  0xdd   : > { %v5727_v4 = vpop.permute.xlu1 %1308  ;;  %v5729_v5 = vpop.permute.xlu0 %1310 }
  0xde   : > { %8883 = vst [vmem:[#allocation120_spill] sm:$0xff] %v5727_v4  ;;  %8884 = vst [vmem:[#allocation121_spill] sm:$0xff] %v5729_v5  ;;  %v8930_v5 = vld [vmem:[#allocation19_spill] sm:$0xff] }
  0xdf   : > { %1521 = vrot.lane.b32.xlu0 %v4918_v11, %s4812_s27  ;;  %1519 = vrot.lane.b32.xlu1 %v4911_v10, %s4812_s27 }
  0xe1   : > { %v5735_v6 = vpop.permute.xlu1 %1312  ;;  %v5737_v7 = vpop.permute.xlu0 %1314 }
  0xe2   : > { %8885 = vst [vmem:[#allocation122_spill] sm:$0xff] %v5735_v6  ;;  %8886 = vst [vmem:[#allocation123_spill] sm:$0xff] %v5737_v7  ;;  %v8922_v7 = vld [vmem:[#allocation13_spill] sm:$0xff] }
  0xe3   : > { %1525 = vrot.lane.b32.xlu0 %v4928_v13, %s4812_s27  ;;  %1523 = vrot.lane.b32.xlu1 %v4921_v12, %s4812_s27 }
  0xe5   : > { %v5743_v8 = vpop.permute.xlu1 %1316  ;;  %v5745_v9 = vpop.permute.xlu0 %1318 }
  0xe6   : > { %8887 = vst [vmem:[#allocation124_spill] sm:$0xff] %v5743_v8  ;;  %8888 = vst [vmem:[#allocation125_spill] sm:$0xff] %v5745_v9  ;;  %v8917_v9 = vld [vmem:[#allocation11_spill] sm:$0xff] }
  0xe7   : > { %1529 = vrot.lane.b32.xlu0 %v4938_v15, %s4812_s27  ;;  %1527 = vrot.lane.b32.xlu1 %v4931_v14, %s4812_s27 }
  0xe9   : > { %v5751_v10 = vpop.permute.xlu1 %1320  ;;  %v5753_v11 = vpop.permute.xlu0 %1322 }
  0xea   : > { %8889 = vst [vmem:[#allocation126_spill] sm:$0xff] %v5751_v10  ;;  %8890 = vst [vmem:[#allocation127_spill] sm:$0xff] %v5753_v11 }
  0xeb   : > { %1533 = vrot.lane.b32.xlu0 %v4948_v17, %s4812_s27  ;;  %1531 = vrot.lane.b32.xlu1 %v4941_v16, %s4812_s27 }
  0xed   : > { %v5759_v12 = vpop.permute.xlu1 %1324  ;;  %v5761_v13 = vpop.permute.xlu0 %1326 }
  0xee   : > { %8891 = vst [vmem:[#allocation128_spill] sm:$0xff] %v5759_v12  ;;  %8892 = vst [vmem:[#allocation129_spill] sm:$0xff] %v5761_v13 }
  0xef   : > { %1537 = vrot.lane.b32.xlu0 %v4958_v19, %s4812_s27  ;;  %1535 = vrot.lane.b32.xlu1 %v4951_v18, %s4812_s27 }
  0xf1   : > { %v5767_v14 = vpop.permute.xlu1 %1328  ;;  %v5769_v15 = vpop.permute.xlu0 %1330 }
  0xf2   : > { %8893 = vst [vmem:[#allocation130_spill] sm:$0xff] %v5767_v14  ;;  %8894 = vst [vmem:[#allocation131_spill] sm:$0xff] %v5769_v15 }
  0xf3   : > { %1541 = vrot.lane.b32.xlu0 %v4968_v21, %s4812_s27  ;;  %1539 = vrot.lane.b32.xlu1 %v4961_v20, %s4812_s27 }
  0xf5   : > { %v5775_v16 = vpop.permute.xlu1 %1332  ;;  %v5777_v17 = vpop.permute.xlu0 %1334 }
  0xf6   : > { %8895 = vst [vmem:[#allocation132_spill] sm:$0xff] %v5775_v16  ;;  %8896 = vst [vmem:[#allocation133_spill] sm:$0xff] %v5777_v17 }
  0xf7   : > { %1545 = vrot.lane.b32.xlu0 %v4978_v23, %s4812_s27  ;;  %1543 = vrot.lane.b32.xlu1 %v4971_v22, %s4812_s27 }
  0xf9   : > { %v5783_v18 = vpop.permute.xlu1 %1336  ;;  %v5785_v19 = vpop.permute.xlu0 %1338 }
  0xfa   : > { %8897 = vst [vmem:[#allocation134_spill] sm:$0xff] %v5783_v18  ;;  %8898 = vst [vmem:[#allocation135_spill] sm:$0xff] %v5785_v19 }
  0xfb   : > { %1549 = vrot.lane.b32.xlu0 %v4988_v26, %s4812_s27  ;;  %1547 = vrot.lane.b32.xlu1 %v4981_v24, %s4812_s27 }
  0xfd   : > { %v5791_v20 = vpop.permute.xlu1 %1340  ;;  %v5793_v21 = vpop.permute.xlu0 %1405 }
  0xfe   : > { %8899 = vst [vmem:[#allocation136_spill] sm:$0xff] %v5791_v20 }
  0xff   : > { %1553 = vrot.lane.b32.xlu0 %v5000_v29, %s4812_s27  ;;  %1551 = vrot.lane.b32.xlu1 %v4991_v27, %s4812_s27 }
 0x101   : > { %v5799_v22 = vpop.permute.xlu0 %1409  ;;  %v5801_v23 = vpop.permute.xlu1 %1407 }
 0x103   : > { %1557 = vrot.lane.b32.xlu0 %v5011_v32, %s4812_s27  ;;  %1555 = vrot.lane.b32.xlu1 %v5003_v30, %s4812_s27 }
 0x105   : > { %v5807_v24 = vpop.permute.xlu0 %1413  ;;  %v5809_v26 = vpop.permute.xlu1 %1411 }
 0x107   : > { %1561 = vrot.lane.b32.xlu0 %v5264_v59, %s4812_s27  ;;  %1559 = vrot.lane.b32.xlu1 %v5014_v33, %s4812_s27 }
 0x109   : > { %v5815_v27 = vpop.permute.xlu0 %1417  ;;  %v5817_v29 = vpop.permute.xlu1 %1415 }
 0x10a   : > { %8900 = vst [vmem:[#allocation137_spill] sm:$0xff] %v5815_v27  ;;  %v8957_v27 = vld [vmem:[#allocation52_spill] sm:$0xff] }
 0x10b   : > { %1599 = vrot.lane.b32.xlu0 %v5025_v39, %s4813_s28  ;;  %1563 = vrot.lane.b32.xlu1 %v5655_v34, %s4812_s27 }
 0x10d   : > { %v5823_v30 = vpop.permute.xlu0 %1421  ;;  %v5825_v32 = vpop.permute.xlu1 %1419 }
 0x10e   : > { %8901 = vst [vmem:[#allocation138_spill] sm:$0xff] %v5823_v30  ;;  %8902 = vst [vmem:[#allocation139_spill] sm:$0xff] %v5825_v32  ;;  %v8956_v32 = vld [vmem:[#allocation53_spill] sm:$0xff] }
 0x10f   : > { %1603 = vrot.lane.b32.xlu0 %v5044_v47, %s4813_s28  ;;  %1601 = vrot.lane.b32.xlu1 %v5041_v46, %s4813_s28 }
 0x111   : > { %v5831_v33 = vpop.permute.xlu0 %1425  ;;  %v5833_v20 = vpop.permute.xlu1 %1423 }
 0x112   : > { %8903 = vst [vmem:[#allocation140_spill] sm:$0xff] %v5831_v33  ;;  %8904 = vst [vmem:[#allocation141_spill] sm:$0xff] %v5833_v20  ;;  %v8946_v20 = vld [vmem:[#allocation35_spill] sm:$0xff] }
 0x113   : > { %1607 = vrot.lane.b32.xlu0 %v5063_v55, %s4813_s28  ;;  %1605 = vrot.lane.b32.xlu1 %v5060_v54, %s4813_s28 }
 0x115   : > { %v5839_v39 = vpop.permute.xlu0 %1429  ;;  %v5841_v19 = vpop.permute.xlu1 %1427 }
 0x116   : > { %8905 = vst [vmem:[#allocation142_spill] sm:$0xff] %v5839_v39  ;;  %8906 = vst [vmem:[#allocation143_spill] sm:$0xff] %v5841_v19 }
 0x117   : > { %1611 = vrot.lane.b32.xlu0 %v5082_v63, %s4813_s28  ;;  %1609 = vrot.lane.b32.xlu1 %v5079_v62, %s4813_s28 }
 0x119   : > { %v5847_v46 = vpop.permute.xlu0 %1433  ;;  %v5849_v18 = vpop.permute.xlu1 %1431 }
 0x11a   : > { %8907 = vst [vmem:[#allocation144_spill] sm:$0xff] %v5847_v46  ;;  %8908 = vst [vmem:[#allocation145_spill] sm:$0xff] %v5849_v18  ;;  %v8934_v46 = vld [vmem:[#allocation22_spill] sm:$0xff] }
 0x11b   : > { %1615 = vrot.lane.b32.xlu0 %v5101_v40, %s4813_s28  ;;  %1613 = vrot.lane.b32.xlu1 %v5098_v38, %s4813_s28  ;;  %v8937_v18 = vld [vmem:[#allocation26_spill] sm:$0xff] }
 0x11d   : > { %v5855_v17 = vpop.permute.xlu0 %1437  ;;  %v5857_v16 = vpop.permute.xlu1 %1435 }
 0x11e   : > { %8909 = vst [vmem:[#allocation146_spill] sm:$0xff] %v5855_v17  ;;  %8910 = vst [vmem:[#allocation147_spill] sm:$0xff] %v5857_v16  ;;  %v8926_v17 = vld [vmem:[#allocation16_spill] sm:$0xff] }
 0x11f   : > { %1619 = vrot.lane.b32.xlu0 %v5120_v52, %s4813_s28  ;;  %1617 = vrot.lane.b32.xlu1 %v5117_v51, %s4813_s28 }
 0x121   : > { %v5863_v15 = vpop.permute.xlu0 %1441  ;;  %v5865_v14 = vpop.permute.xlu1 %1439 }
 0x122   : > { %8911 = vst [vmem:[#allocation148_spill] sm:$0xff] %v5863_v15  ;;  %8912 = vst [vmem:[#allocation149_spill] sm:$0xff] %v5865_v14  ;;  %v8918_v15 = vld [vmem:[#allocation10_spill] sm:$0xff] }
 0x123   : > { %1623 = vrot.lane.b32.xlu0 %v5139_v31, %s4813_s28  ;;  %1621 = vrot.lane.b32.xlu1 %v5136_v25, %s4813_s28 }
 0x125   : > { %v5871_v13 = vpop.permute.xlu0 %1445  ;;  %v5873_v12 = vpop.permute.xlu1 %1443 }
 0x126   : > { %8913 = vst [vmem:[#allocation150_spill] sm:$0xff] %v5871_v13  ;;  %8914 = vst [vmem:[#allocation151_spill] sm:$0xff] %v5873_v12  ;;  %v8921_v12 = vld [vmem:[#allocation14_spill] sm:$0xff] }
 0x127   : > { %1627 = vrot.lane.b32.xlu0 %v5158_v49, %s4813_s28  ;;  %1625 = vrot.lane.b32.xlu1 %v5155_v48, %s4813_s28 }
 0x129   : > { %v5879_v11 = vpop.permute.xlu0 %1449  ;;  %v5881_v10 = vpop.permute.xlu1 %1447 }
 0x12a   : > { %8915 = vst [vmem:[#allocation152_spill] sm:$0xff] %v5879_v11  ;;  %8916 = vst [vmem:[#allocation153_spill] sm:$0xff] %v5881_v10  ;;  %v8925_v10 = vld [vmem:[#allocation17_spill] sm:$0xff] }
 0x12b   : > { %1631 = vrot.lane.b32.xlu0 %v8917_v9, %s4813_s28  ;;  %1629 = vrot.lane.b32.xlu1 %v8918_v15, %s4813_s28 }
 0x12d   : > { %v5887_v8 = vpop.permute.xlu0 %1453  ;;  %v5889_v13 = vpop.permute.xlu1 %1451 }
 0x12e   : > { %8919 = vst [vmem:[#allocation11_spill] sm:$0xff] %v5887_v8  ;;  %8920 = vst [vmem:[#allocation10_spill] sm:$0xff] %v5889_v13  ;;  %v8929_v13 = vld [vmem:[#allocation20_spill] sm:$0xff] }
 0x12f   : > { %1635 = vrot.lane.b32.xlu0 %v8921_v12, %s4813_s28  ;;  %1633 = vrot.lane.b32.xlu1 %v8922_v7, %s4813_s28 }
 0x131   : > { %v5895_v14 = vpop.permute.xlu0 %1457  ;;  %v5897_v11 = vpop.permute.xlu1 %1455 }
 0x132   : > { %8923 = vst [vmem:[#allocation14_spill] sm:$0xff] %v5895_v14  ;;  %8924 = vst [vmem:[#allocation13_spill] sm:$0xff] %v5897_v11  ;;  %v8933_v11 = vld [vmem:[#allocation23_spill] sm:$0xff] }
 0x133   : > { %1639 = vrot.lane.b32.xlu0 %v8925_v10, %s4813_s28  ;;  %1637 = vrot.lane.b32.xlu1 %v8926_v17, %s4813_s28 }
 0x135   : > { %v5903_v6 = vpop.permute.xlu0 %1461  ;;  %v5905_v8 = vpop.permute.xlu1 %1459 }
 0x136   : > { %8927 = vst [vmem:[#allocation17_spill] sm:$0xff] %v5903_v6  ;;  %8928 = vst [vmem:[#allocation16_spill] sm:$0xff] %v5905_v8  ;;  %v257_v8 = vadd.s32 248, %v4993_v28  ;;  %v8940_v28 = vrot.slane %v5264_v59, 1 }
 0x137   : > { %1643 = vrot.lane.b32.xlu0 %v8929_v13, %s4813_s28  ;;  %1641 = vrot.lane.b32.xlu1 %v8930_v5, %s4813_s28 }
 0x138   : > { %v479_v1 = vand.u32 15, %v257_v8 }
 0x139   : > { %v5911_v16 = vpop.permute.xlu0 %1465  ;;  %v5913_v14 = vpop.permute.xlu1 %1463 }
 0x13a   : > { %8931 = vst [vmem:[#allocation20_spill] sm:$0xff] %v5911_v16  ;;  %8932 = vst [vmem:[#allocation19_spill] sm:$0xff] %v5913_v14  ;;  %v1025_v16 = vrot.slane %v5655_v34, 1  ;;  %vm5946_vm0 = vcmp.le.s32.totalorder %v479_v1, 14  ;;  %v8949_v1 = vld [vmem:[#allocation43_spill] sm:$0xff] }
 0x13b   : > { %1647 = vrot.lane.b32.xlu0 %v8933_v11, %s4813_s28  ;;  %1645 = vrot.lane.b32.xlu1 %v8934_v46, %s4813_s28  ;;  %v8943_v42 = vsel %vm5946_vm0, 4294967295, %v8942_v42 }
 0x13c   : > { %v5940_v19 = vsel %vm8941_vm13, %v8940_v28, %v1025_v16  ;;  %8944 = vst [vmem:[#allocation22_spill] sm:$0xff] %v8943_v42  ;;  %v1059_v8 = vsel %vm8945_vm14, %v1025_v16, 0.0  ;;  %vm8617_vm13 = vcmask 1043456   ;;  %vm8623_vm14 = vcmask 31744  }
 0x13d   : > { %v5919_v4 = vpop.permute.xlu0 %1501  ;;  %v5921_v6 = vpop.permute.xlu1 %1467  ;;  %v5957_v59 = vsel %vm5946_vm0, %v1059_v8, 0.0  ;;  %v8953_v8 = vld [vmem:[#allocation47_spill] sm:$0xff]  ;;  %vm8625_vm0 = vcmask 97280  }
 0x13e   : > { %8935 = vst [vmem:[#allocation23_spill] sm:$0xff] %v5921_v6  ;;  %v8939_v6 = vld [vmem:[#allocation29_spill] sm:$0xff] }
 0x13f   : > { %1651 = vrot.lane.b32.xlu0 %v8936_v3, %s4813_s28  ;;  %1649 = vrot.lane.b32.xlu1 %v8937_v18, %s4813_s28 }
 0x141   : > { %v5929_v14 = vpop.permute.xlu0 %1505  ;;  %v5931_v39 = vpop.permute.xlu1 %1503 }
 0x143   : > { %1655 = vrot.lane.b32.xlu0 %v8938_v35, %s4813_s28  ;;  %1653 = vrot.lane.b32.xlu1 %v8939_v6, %s4813_s28 }
 0x145   : > { %v5942_v33 = vpop.permute.xlu0 %1509  ;;  %v5944_v2 = vpop.permute.xlu1 %1507 }
 0x147   : > { %1659 = vrot.lane.b32.xlu0 %v5940_v19, %s4813_s28  ;;  %1657 = vrot.lane.b32.xlu1 %v8946_v20, %s4813_s28 }
 0x149   : > { %v5959_v28 = vpop.permute.xlu0 %1513  ;;  %v5961_v30 = vpop.permute.xlu1 %1511 }
 0x14a   : > { %8947 = vst [vmem:[#allocation27_spill] sm:$0xff] %v5959_v28  ;;  %8948 = vst [vmem:[#allocation26_spill] sm:$0xff] %v5961_v30 }
 0x14b   : > { %1695 = vrot.lane.b32.xlu0 %v8949_v1, %s4814_s29  ;;  %1661 = vrot.lane.b32.xlu1 %v5957_v59, %s4813_s28 }
 0x14d   : > { %v5967_v16 = vpop.permute.xlu0 %1517  ;;  %v5969_v0 = vpop.permute.xlu1 %1515 }
 0x14e   : > { %8950 = vst [vmem:[#allocation30_spill] sm:$0xff] %v5967_v16  ;;  %8951 = vst [vmem:[#allocation29_spill] sm:$0xff] %v5969_v0  ;;  %v8960_v0 = vld [vmem:[#allocation58_spill] sm:$0xff] }
 0x14f   : > { %1699 = vrot.lane.b32.xlu0 %v8952_v45, %s4814_s29  ;;  %1697 = vrot.lane.b32.xlu1 %v8953_v8, %s4814_s29 }
 0x151   : > { %v5975_v42 = vpop.permute.xlu0 %1521  ;;  %v5977_v28 = vpop.permute.xlu1 %1519 }
 0x152   : > { %8954 = vst [vmem:[#allocation35_spill] sm:$0xff] %v5975_v42  ;;  %8955 = vst [vmem:[#allocation43_spill] sm:$0xff] %v5977_v28  ;;  %v8964_v28 = vld [vmem:[#allocation63_spill] sm:$0xff] }
 0x153   : > { %1703 = vrot.lane.b32.xlu0 %v8956_v32, %s4814_s29  ;;  %1701 = vrot.lane.b32.xlu1 %v8957_v27, %s4814_s29  ;;  %v8965_v32 = vld [vmem:[#allocation62_spill] sm:$0xff] }
 0x155   : > { %v5983_v56 = vpop.permute.xlu0 %1525  ;;  %v5985_v16 = vpop.permute.xlu1 %1523 }
 0x156   : > { %8958 = vst [vmem:[#allocation47_spill] sm:$0xff] %v5983_v56  ;;  %8959 = vst [vmem:[#allocation154_spill] sm:$0xff] %v5985_v16  ;;  %v8968_v16 = vld [vmem:[#allocation68_spill] sm:$0xff] }
 0x157   : > { %1707 = vrot.lane.b32.xlu0 %v8960_v0, %s4814_s29  ;;  %1705 = vrot.lane.b32.xlu1 %v8961_v41, %s4814_s29  ;;  %v8969_v0 = vld [vmem:[#allocation67_spill] sm:$0xff] }
 0x159   : > { %v5991_v45 = vpop.permute.xlu0 %1529  ;;  %v5993_v42 = vpop.permute.xlu1 %1527 }
 0x15a   : > { %8962 = vst [vmem:[#allocation155_spill] sm:$0xff] %v5991_v45  ;;  %8963 = vst [vmem:[#allocation156_spill] sm:$0xff] %v5993_v42  ;;  %v8972_v42 = vld [vmem:[#allocation73_spill] sm:$0xff] }
 0x15b   : > { %1711 = vrot.lane.b32.xlu0 %v8964_v28, %s4814_s29  ;;  %1709 = vrot.lane.b32.xlu1 %v8965_v32, %s4814_s29  ;;  %v8973_v28 = vld [vmem:[#allocation72_spill] sm:$0xff] }
 0x15d   : > { %v5999_v27 = vpop.permute.xlu0 %1533  ;;  %v6001_v56 = vpop.permute.xlu1 %1531 }
 0x15e   : > { %8966 = vst [vmem:[#allocation157_spill] sm:$0xff] %v5999_v27  ;;  %8967 = vst [vmem:[#allocation158_spill] sm:$0xff] %v6001_v56  ;;  %v8976_v56 = vld [vmem:[#allocation78_spill] sm:$0xff] }
 0x15f   : > { %1715 = vrot.lane.b32.xlu0 %v8968_v16, %s4814_s29  ;;  %1713 = vrot.lane.b32.xlu1 %v8969_v0, %s4814_s29  ;;  %v8977_v16 = vld [vmem:[#allocation77_spill] sm:$0xff] }
 0x161   : > { %v6007_v41 = vpop.permute.xlu0 %1537  ;;  %v6009_v45 = vpop.permute.xlu1 %1535 }
 0x162   : > { %8970 = vst [vmem:[#allocation159_spill] sm:$0xff] %v6007_v41  ;;  %8971 = vst [vmem:[#allocation160_spill] sm:$0xff] %v6009_v45  ;;  %v8980_v45 = vld [vmem:[#allocation83_spill] sm:$0xff] }
 0x163   : > { %1719 = vrot.lane.b32.xlu0 %v8972_v42, %s4814_s29  ;;  %1717 = vrot.lane.b32.xlu1 %v8973_v28, %s4814_s29  ;;  %v8981_v42 = vld [vmem:[#allocation82_spill] sm:$0xff]  ;;  %v2239_v28 = vld [vmem:[%s8477_s1 + $0x18] sm:$0xff] }
 0x165   : > { %v6015_v32 = vpop.permute.xlu0 %1541  ;;  %v6017_v27 = vpop.permute.xlu1 %1539 }
 0x166   : > { %8974 = vst [vmem:[#allocation161_spill] sm:$0xff] %v6015_v32  ;;  %8975 = vst [vmem:[#allocation162_spill] sm:$0xff] %v6017_v27  ;;  %v2236_v32 = vld [vmem:[%s8477_s1] sm:$0xff]  ;;  %v2237_v27 = vld [vmem:[%s8477_s1 + $0x8] sm:$0xff] }
 0x167   : > { %1723 = vrot.lane.b32.xlu0 %v8976_v56, %s4814_s29  ;;  %1721 = vrot.lane.b32.xlu1 %v8977_v16, %s4814_s29  ;;  %v4706_v56 = vpack.c.bf16 %v2237_v27, %v2236_v32 }
 0x169   : > { %v6023_v0 = vpop.permute.xlu0 %1545  ;;  %v6025_v41 = vpop.permute.xlu1 %1543  ;;  %4707 = vmatprep.subr.bf16.mxu0 %v4706_v56 }
 0x16a   : > { %8978 = vst [vmem:[#allocation163_spill] sm:$0xff] %v6023_v0  ;;  %8979 = vst [vmem:[#allocation164_spill] sm:$0xff] %v6025_v41  ;;  %v8984_v41 = vld [vmem:[#allocation88_spill] sm:$0xff]  ;;  %4709 = vmatpush3.bf16.msra.mxu0 %v4706_v56  ;;  %v2240_v56 = vld [vmem:[%s8477_s1 + $0x20] sm:$0xf] }
 0x16b   : > { %1727 = vrot.lane.b32.xlu0 %v8980_v45, %s4814_s29  ;;  %1725 = vrot.lane.b32.xlu1 %v8981_v42, %s4814_s29  ;;  %v8985_v45 = vld [vmem:[#allocation87_spill] sm:$0xff]  ;;  %v2238_v42 = vld [vmem:[%s8477_s1 + $0x10] sm:$0xff] }
 0x16c   : > { %v4710_v27 = vpack.c.bf16 %v2239_v28, %v2238_v42  ;;  %v8992_v42 = vld [vmem:[#allocation98_spill] sm:$0xff]  ;;  %v8993_v28 = vld [vmem:[#allocation97_spill] sm:$0xff] }
 0x16d   : > { %v6037_v16 = vpop.permute.xlu0 %1549  ;;  %v6039_v0 = vpop.permute.xlu1 %1547 }
 0x16e   : > { %8982 = vst [vmem:[#allocation165_spill] sm:$0xff] %v6037_v16  ;;  %8983 = vst [vmem:[#allocation166_spill] sm:$0xff] %v6039_v0  ;;  %4711 = vmatprep.subr.bf16.mxu0 %v4710_v27  ;;  %v8988_v0 = vld [vmem:[#allocation93_spill] sm:$0xff] }
 0x16f   : > { %1731 = vrot.lane.b32.xlu0 %v8984_v41, %s4814_s29  ;;  %1729 = vrot.lane.b32.xlu1 %v8985_v45, %s4814_s29  ;;  %v8989_v41 = vld [vmem:[#allocation92_spill] sm:$0xff] }
 0x170   : > { %4713 = vmatpush3.bf16.msra.mxu0 %v4710_v27 }
 0x171   : > { %v6051_v32 = vpop.permute.xlu0 %1553  ;;  %v6053_v16 = vpop.permute.xlu1 %1551  ;;  %4598 = vmatprep.subr.msk.mxu0 %vm8617_vm13, %v2240_v56 }
 0x172   : > { %8986 = vst [vmem:[#allocation167_spill] sm:$0xff] %v6051_v32  ;;  %8987 = vst [vmem:[#allocation168_spill] sm:$0xff] %v6053_v16 }
 0x173   : > { %1735 = vrot.lane.b32.xlu0 %v8988_v0, %s4814_s29  ;;  %1733 = vrot.lane.b32.xlu1 %v8989_v41, %s4814_s29 }
 0x174   : > { %4599 = vmatpush3.msk.msra.mxu0 %vm8617_vm13, %v2240_v56  ;;  %v4740_v56 = vld [vmem:[%s4865_s24 + $0x10] sm:$0xff]  ;;  %vm8624_vm13 = vcmask 64512  }
 0x175   : > { %v6059_v45 = vpop.permute.xlu0 %1557  ;;  %v6061_v30 = vpop.permute.xlu1 %1555 }
 0x176   : > { %8990 = vst [vmem:[#allocation169_spill] sm:$0xff] %v6059_v45  ;;  %8991 = vst [vmem:[#allocation170_spill] sm:$0xff] %v6061_v30 }
 0x177   : > { %1739 = vrot.lane.b32.xlu0 %v8992_v42, %s4814_s29  ;;  %1737 = vrot.lane.b32.xlu1 %v8993_v28, %s4814_s29  ;;  %v4739_v42 = vld [vmem:[%s4865_s24 + $0x18] sm:$0xff] }
 0x179   : > { %v6072_v27 = vpop.permute.xlu0 %1561  ;;  %v6074_v45 = vpop.permute.xlu1 %1559 }
 0x17a   : > { %8994 = vst [vmem:[#allocation171_spill] sm:$0xff] %v6072_v27  ;;  %8995 = vst [vmem:[#allocation172_spill] sm:$0xff] %v6074_v45 }
 0x17b   : > { %1743 = vrot.lane.b32.xlu0 %v5633_v53, %s4814_s29  ;;  %1741 = vrot.lane.b32.xlu1 %v5629_v36, %s4814_s29 }
 0x17d   : > { %v6080_v30 = vpop.permute.xlu0 %1599  ;;  %v6082_v32 = vpop.permute.xlu1 %1563 }
 0x17e   : > { %8996 = vst [vmem:[#allocation173_spill] sm:$0xff] %v6082_v32 }
 0x17f   : > { %1790 = vrot.lane.b32.xlu0 %v4739_v42, %s4815_s15  ;;  %1788 = vrot.lane.b32.xlu1 %v4740_v56, %s4815_s15  ;;  %v4741_v42 = vld [vmem:[%s4865_s24 + $0x28] sm:$0xff]  ;;  %v4742_v56 = vld [vmem:[%s4865_s24 + $0x20] sm:$0xff] }
 0x181   : > { %v6088_v27 = vpop.permute.xlu0 %1603  ;;  %v6090_v45 = vpop.permute.xlu1 %1601 }
 0x183   : > { %1883 = vrot.lane.b32.xlu0 %v5060_v54, %s4816_s16  ;;  %1881 = vrot.lane.b32.xlu1 %v5044_v47, %s4816_s16 }
 0x185   : > { %v6096_v32 = vpop.permute.xlu0 %1607  ;;  %v6098_v53 = vpop.permute.xlu1 %1605 }
 0x187   : > { %1794 = vrot.lane.b32.xlu0 %v4741_v42, %s4815_s15  ;;  %1792 = vrot.lane.b32.xlu1 %v4742_v56, %s4815_s15  ;;  %v4743_v42 = vld [vmem:[%s4865_s24 + $0x38] sm:$0xff]  ;;  %v4744_v56 = vld [vmem:[%s4865_s24 + $0x30] sm:$0xff] }
 0x189   : > { %v6104_v36 = vpop.permute.xlu0 %1611  ;;  %v6106_v16 = vpop.permute.xlu1 %1609 }
 0x18b   : > { %1887 = vrot.lane.b32.xlu0 %v5079_v62, %s4816_s16  ;;  %1885 = vrot.lane.b32.xlu1 %v5063_v55, %s4816_s16 }
 0x18d   : > { %v6112_v47 = vpop.permute.xlu0 %1615  ;;  %v6114_v54 = vpop.permute.xlu1 %1613 }
 0x18f   : > { %1798 = vrot.lane.b32.xlu0 %v4743_v42, %s4815_s15  ;;  %1796 = vrot.lane.b32.xlu1 %v4744_v56, %s4815_s15  ;;  %v4745_v42 = vld [vmem:[%s4865_s24 + $0x48] sm:$0xff]  ;;  %v4746_v56 = vld [vmem:[%s4865_s24 + $0x40] sm:$0xff] }
 0x191   : > { %v6120_v28 = vpop.permute.xlu0 %1619  ;;  %v6122_v0 = vpop.permute.xlu1 %1617 }
 0x192   : > { %8997 = vst [vmem:[#allocation174_spill] sm:$0xff] %v6120_v28 }
 0x193   : > { %1891 = vrot.lane.b32.xlu0 %v5098_v38, %s4816_s16  ;;  %1889 = vrot.lane.b32.xlu1 %v5082_v63, %s4816_s16 }
 0x195   : > { %v6128_v55 = vpop.permute.xlu0 %1623  ;;  %v6130_v62 = vpop.permute.xlu1 %1621 }
 0x197   : > { %1802 = vrot.lane.b32.xlu0 %v4745_v42, %s4815_s15  ;;  %1800 = vrot.lane.b32.xlu1 %v4746_v56, %s4815_s15  ;;  %v4747_v42 = vld [vmem:[%s4865_s24 + $0x58] sm:$0xff]  ;;  %v4748_v56 = vld [vmem:[%s4865_s24 + $0x50] sm:$0xff] }
 0x199   : > { %v6136_v41 = vpop.permute.xlu0 %1627  ;;  %v6138_v28 = vpop.permute.xlu1 %1625 }
 0x19a   : > { %8998 = vst [vmem:[#allocation175_spill] sm:$0xff] %v6136_v41  ;;  %8999 = vst [vmem:[#allocation176_spill] sm:$0xff] %v6138_v28 }
 0x19b   : > { %1895 = vrot.lane.b32.xlu0 %v5117_v51, %s4816_s16  ;;  %1893 = vrot.lane.b32.xlu1 %v5101_v40, %s4816_s16 }
 0x19d   : > { %v6144_v63 = vpop.permute.xlu0 %1631  ;;  %v6146_v38 = vpop.permute.xlu1 %1629 }
 0x19f   : > { %1806 = vrot.lane.b32.xlu0 %v4747_v42, %s4815_s15  ;;  %1804 = vrot.lane.b32.xlu1 %v4748_v56, %s4815_s15  ;;  %v4749_v42 = vld [vmem:[%s4865_s24 + $0x68] sm:$0xff]  ;;  %v4750_v56 = vld [vmem:[%s4865_s24 + $0x60] sm:$0xff] }
 0x1a1   : > { %v6152_v41 = vpop.permute.xlu0 %1635  ;;  %v6154_v28 = vpop.permute.xlu1 %1633 }
 0x1a2   : > { %9000 = vst [vmem:[#allocation177_spill] sm:$0xff] %v6152_v41  ;;  %9001 = vst [vmem:[#allocation178_spill] sm:$0xff] %v6154_v28 }
 0x1a3   : > { %1899 = vrot.lane.b32.xlu0 %v5136_v25, %s4816_s16  ;;  %1897 = vrot.lane.b32.xlu1 %v5120_v52, %s4816_s16 }
 0x1a5   : > { %v6160_v40 = vpop.permute.xlu0 %1639  ;;  %v6162_v51 = vpop.permute.xlu1 %1637 }
 0x1a6   : > { %9002 = vst [vmem:[#allocation179_spill] sm:$0xff] %v6160_v40  ;;  %9003 = vst [vmem:[#allocation180_spill] sm:$0xff] %v6162_v51  ;;  %v4763_v51 = vld [vmem:[%s4865_s24 + $0xd0] sm:$0xff] }
 0x1a7   : > { %1810 = vrot.lane.b32.xlu0 %v4749_v42, %s4815_s15  ;;  %1808 = vrot.lane.b32.xlu1 %v4750_v56, %s4815_s15  ;;  %v4751_v42 = vld [vmem:[%s4865_s24 + $0x78] sm:$0xff]  ;;  %v4752_v56 = vld [vmem:[%s4865_s24 + $0x70] sm:$0xff] }
 0x1a9   : > { %v6168_v41 = vpop.permute.xlu0 %1643  ;;  %v6170_v28 = vpop.permute.xlu1 %1641 }
 0x1aa   : > { %9004 = vst [vmem:[#allocation181_spill] sm:$0xff] %v6168_v41  ;;  %9005 = vst [vmem:[#allocation182_spill] sm:$0xff] %v6170_v28 }
 0x1ab   : > { %1903 = vrot.lane.b32.xlu0 %v5155_v48, %s4816_s16  ;;  %1901 = vrot.lane.b32.xlu1 %v5139_v31, %s4816_s16 }
 0x1ad   : > { %v6176_v52 = vpop.permute.xlu0 %1647  ;;  %v6178_v25 = vpop.permute.xlu1 %1645 }
 0x1ae   : > { %9006 = vst [vmem:[#allocation183_spill] sm:$0xff] %v6176_v52  ;;  %9007 = vst [vmem:[#allocation184_spill] sm:$0xff] %v6178_v25  ;;  %v4761_v25 = vld [vmem:[%s4865_s24 + $0xc8] sm:$0xff] }
 0x1af   : > { %1814 = vrot.lane.b32.xlu0 %v4751_v42, %s4815_s15  ;;  %1812 = vrot.lane.b32.xlu1 %v4752_v56, %s4815_s15  ;;  %v4753_v42 = vld [vmem:[%s4865_s24 + $0x88] sm:$0xff]  ;;  %v4754_v56 = vld [vmem:[%s4865_s24 + $0x80] sm:$0xff] }
 0x1b1   : > { %v6184_v41 = vpop.permute.xlu0 %1651  ;;  %v6186_v28 = vpop.permute.xlu1 %1649 }
 0x1b2   : > { %9008 = vst [vmem:[#allocation185_spill] sm:$0xff] %v6184_v41  ;;  %9009 = vst [vmem:[#allocation186_spill] sm:$0xff] %v6186_v28 }
 0x1b3   : > { %1907 = vrot.lane.b32.xlu0 %v8918_v15, %s4816_s16  ;;  %1905 = vrot.lane.b32.xlu1 %v5158_v49, %s4816_s16 }
 0x1b5   : > { %v6192_v31 = vpop.permute.xlu0 %1655  ;;  %v6194_v48 = vpop.permute.xlu1 %1653 }
 0x1b6   : > { %9010 = vst [vmem:[#allocation187_spill] sm:$0xff] %v6192_v31  ;;  %9011 = vst [vmem:[#allocation188_spill] sm:$0xff] %v6194_v48 }
 0x1b7   : > { %1818 = vrot.lane.b32.xlu0 %v4753_v42, %s4815_s15  ;;  %1816 = vrot.lane.b32.xlu1 %v4754_v56, %s4815_s15  ;;  %v4755_v42 = vld [vmem:[%s4865_s24 + $0x98] sm:$0xff]  ;;  %v4756_v56 = vld [vmem:[%s4865_s24 + $0x90] sm:$0xff] }
 0x1b9   : > { %v6200_v41 = vpop.permute.xlu0 %1659  ;;  %v6202_v28 = vpop.permute.xlu1 %1657 }
 0x1ba   : > { %9012 = vst [vmem:[#allocation189_spill] sm:$0xff] %v6200_v41  ;;  %9013 = vst [vmem:[#allocation190_spill] sm:$0xff] %v6202_v28 }
 0x1bb   : > { %1911 = vrot.lane.b32.xlu0 %v8922_v7, %s4816_s16  ;;  %1909 = vrot.lane.b32.xlu1 %v8917_v9, %s4816_s16 }
 0x1bd   : > { %v6208_v49 = vpop.permute.xlu0 %1695  ;;  %v6210_v15 = vpop.permute.xlu1 %1661 }
 0x1be   : > { %9014 = vst [vmem:[#allocation191_spill] sm:$0xff] %v6210_v15 }
 0x1bf   : > { %1822 = vrot.lane.b32.xlu0 %v4755_v42, %s4815_s15  ;;  %1820 = vrot.lane.b32.xlu1 %v4756_v56, %s4815_s15  ;;  %v4757_v42 = vld [vmem:[%s4865_s24 + $0xa8] sm:$0xff]  ;;  %v4758_v56 = vld [vmem:[%s4865_s24 + $0xa0] sm:$0xff] }
 0x1c1   : > { %v6216_v41 = vpop.permute.xlu0 %1699  ;;  %v6218_v28 = vpop.permute.xlu1 %1697 }
 0x1c3   : > { %1915 = vrot.lane.b32.xlu0 %v8926_v17, %s4816_s16  ;;  %1913 = vrot.lane.b32.xlu1 %v8921_v12, %s4816_s16 }
 0x1c5   : > { %v6224_v7 = vpop.permute.xlu0 %1703  ;;  %v6226_v9 = vpop.permute.xlu1 %1701 }
 0x1c7   : > { %1826 = vrot.lane.b32.xlu0 %v4757_v42, %s4815_s15  ;;  %1824 = vrot.lane.b32.xlu1 %v4758_v56, %s4815_s15  ;;  %v4759_v42 = vld [vmem:[%s4865_s24 + $0xb8] sm:$0xff]  ;;  %v4760_v56 = vld [vmem:[%s4865_s24 + $0xb0] sm:$0xff] }
 0x1c9   : > { %v6232_v15 = vpop.permute.xlu0 %1707  ;;  %v6234_v31 = vpop.permute.xlu1 %1705 }
 0x1cb   : > { %1919 = vrot.lane.b32.xlu0 %v8930_v5, %s4816_s16  ;;  %1917 = vrot.lane.b32.xlu1 %v8925_v10, %s4816_s16 }
 0x1cd   : > { %v6240_v12 = vpop.permute.xlu0 %1711  ;;  %v6242_v17 = vpop.permute.xlu1 %1709 }
 0x1cf   : > { %1830 = vrot.lane.b32.xlu0 %v4759_v42, %s4815_s15  ;;  %1828 = vrot.lane.b32.xlu1 %v4760_v56, %s4815_s15  ;;  %v4762_v42 = vld [vmem:[%s4865_s24 + $0xc0] sm:$0xff] }
 0x1d1   : > { %v6248_v48 = vpop.permute.xlu0 %1715  ;;  %v6250_v52 = vpop.permute.xlu1 %1713 }
 0x1d3   : > { %1923 = vrot.lane.b32.xlu0 %v8934_v46, %s4816_s16  ;;  %1921 = vrot.lane.b32.xlu1 %v8929_v13, %s4816_s16 }
 0x1d5   : > { %v6256_v5 = vpop.permute.xlu0 %1719  ;;  %v6258_v10 = vpop.permute.xlu1 %1717 }
 0x1d7   : > { %1834 = vrot.lane.b32.xlu0 %v4761_v25, %s4815_s15  ;;  %1832 = vrot.lane.b32.xlu1 %v4762_v42, %s4815_s15 }
 0x1d9   : > { %v6264_v56 = vpop.permute.xlu0 %1723  ;;  %v6266_v40 = vpop.permute.xlu1 %1721 }
 0x1db   : > { %1927 = vrot.lane.b32.xlu0 %v8937_v18, %s4816_s16  ;;  %1925 = vrot.lane.b32.xlu1 %v8933_v11, %s4816_s16  ;;  %v4764_v18 = vld [vmem:[%s4865_s24 + $0xd8] sm:$0xff] }
 0x1dd   : > { %v6272_v13 = vpop.permute.xlu0 %1727  ;;  %v6274_v46 = vpop.permute.xlu1 %1725 }
 0x1de   : > { %9015 = vst [vmem:[#allocation192_spill] sm:$0xff] %v6272_v13 }
 0x1df   : > { %1836 = vrot.lane.b32.xlu0 %v4763_v51, %s4815_s15  ;;  %1745 = vrot.lane.b32.xlu1 %v5658_v37, %s4814_s29 }
 0x1e1   : > { %v6280_v25 = vpop.permute.xlu0 %1731  ;;  %v6282_v42 = vpop.permute.xlu1 %1729 }
 0x1e2   : > { %9016 = vst [vmem:[#allocation193_spill] sm:$0xff] %v6280_v25  ;;  %v4765_v25 = vld [vmem:[%s4865_s24 + $0xe0] sm:$0xff] }
 0x1e3   : > { %1929 = vrot.lane.b32.xlu0 %v8936_v3, %s4816_s16  ;;  %1838 = vrot.lane.b32.xlu1 %v4764_v18, %s4815_s15 }
 0x1e5   : > { %v6288_v11 = vpop.permute.xlu0 %1735  ;;  %v6290_v13 = vpop.permute.xlu1 %1733 }
 0x1e7   : > { %1747 = vrot.lane.b32.xlu0 %v5662_v57, %s4814_s29  ;;  %1931 = vrot.lane.b32.xlu1 %v8939_v6, %s4816_s16  ;;  %v9021_v57 = vld [vmem:[#allocation25_spill] sm:$0xff] }
 0x1e8   : > { %v1975_v6 = vsel %vm8623_vm14, 0.0, %v9021_v57  ;;  %vm8630_vm14 = vcmask 195584  }
 0x1e9   : > { %v6296_v51 = vpop.permute.xlu0 %1739  ;;  %v6298_v37 = vpop.permute.xlu1 %1737 }
 0x1ea   : > { %9017 = vst [vmem:[#allocation194_spill] sm:$0xff] %v6296_v51  ;;  %9018 = vst [vmem:[#allocation195_spill] sm:$0xff] %v6298_v37  ;;  %v4766_v51 = vld [vmem:[%s4865_s24 + $0xe8] sm:$0xff] }
 0x1eb   : > { %1840 = vrot.lane.b32.xlu0 %v4765_v25, %s4815_s15  ;;  %1749 = vrot.lane.b32.xlu1 %v5678_v58, %s4814_s29  ;;  %v9022_v25 = vld [vmem:[#allocation105_spill] sm:$0xff] }
 0x1ec   : > { %v6316_v58 = vsel %vm8624_vm13, %v1975_v6, %v9022_v25  ;;  %vm8629_vm13 = vcmask 228352  }
 0x1ed   : > { %v6304_v3 = vpop.permute.xlu0 %1743  ;;  %v6306_v18 = vpop.permute.xlu1 %1741  ;;  %v2040_v57 = vsel %vm8625_vm0, %v6316_v58, %v5801_v23 }
 0x1ee   : > { %9019 = vst [vmem:[#allocation196_spill] sm:$0xff] %v6304_v3  ;;  %9020 = vst [vmem:[#allocation197_spill] sm:$0xff] %v6306_v18  ;;  %v2039_v3 = vsel %vm8625_vm0, %v6316_v58, %v5793_v21  ;;  %vm8631_vm0 = vcmask 261120  }
 0x1ef   : > { %1933 = vrot.lane.b32.xlu0 %v8938_v35, %s4816_s16  ;;  %1842 = vrot.lane.b32.xlu1 %v4766_v51, %s4815_s15  ;;  %v2072_v35 = vsel %vm8627_vm15, %v2039_v3, %v5919_v4  ;;  %v2073_v51 = vsel %vm8627_vm15, %v2040_v57, %v5931_v39  ;;  %v9023_v57 = vld [vmem:[#allocation31_spill] sm:$0xff]  ;;  %vm9025_vm15 = vcmask 31744  }
 0x1f0   : > { %v2105_v6 = vsel %vm8626_vm12, %v2072_v35, %v6080_v30  ;;  %v2106_v21 = vsel %vm8626_vm12, %v2073_v51, %v6090_v45  ;;  %vm8633_vm12 = vcmask 293888   ;;  %v9026_v51 = vld [vmem:[#allocation32_spill] sm:$0xff]  ;;  %vm9028_vm11 = vmmov %vm9025_vm15 }
 0x1f1   : > { %v1791_v18 = vpop.permute.xlu0 %1790  ;;  %v1789_v37 = vpop.permute.xlu1 %1788  ;;  %v2138_v4 = vsel %vm8630_vm14, %v2105_v6, %v6208_v49  ;;  %v2139_v23 = vsel %vm8630_vm14, %v2106_v21, %v6218_v28  ;;  %v9027_v49 = vld [vmem:[#allocation38_spill] sm:$0xff]  ;;  %v4767_v28 = vld [vmem:[%s4865_s24 + $0xf0] sm:$0xff] }
 0x1f2   : > { %v2172_v39 = vsel %vm8629_vm13, %v2139_v23, %v1791_v18  ;;  %v2171_v30 = vsel %vm8629_vm13, %v2138_v4, %v1789_v37  ;;  %v1976_v6 = vsel %vm9028_vm11, %v9027_v49, %v9026_v51  ;;  %v9029_v37 = vld [vmem:[#allocation106_spill] sm:$0xff]  ;;  %vm9030_vm13 = vcmask 64512  }
 0x1f3   : > { %1751 = vrot.lane.b32.xlu0 %v5670_v50, %s4814_s29  ;;  %1935 = vrot.lane.b32.xlu1 %v8946_v20, %s4816_s16  ;;  %v9024_v20 = vld [vmem:[#allocation42_spill] sm:$0xff]  ;;  %v2008_v18 = vsel %vm9030_vm13, %v1976_v6, %v9029_v37  ;;  %vm9031_vm14 = vmmov %vm9030_vm13  ;;  %vm9034_vm11 = vcmask 130048  }
 0x1f4   : > { %v1977_v35 = vsel %vm9025_vm15, %v9024_v20, %v9023_v57  ;;  %vm9032_vm15 = vcmask 97280   ;;  %vm9035_vm13 = vmmov %vm9034_vm11  ;;  %v9046_v57 = vld [vmem:[#allocation37_spill] sm:$0xff]  ;;  %v9056_v6 = vld [vmem:[#allocation26_spill] sm:$0xff] }
 0x1f5   : > { %v1884_v3 = vpop.permute.xlu0 %1883  ;;  %v1882_v25 = vpop.permute.xlu1 %1881  ;;  %v2009_v21 = vsel %vm9031_vm14, %v1977_v35, %v5673_v61  ;;  %v2041_v4 = vsel %vm9032_vm15, %v2008_v18, %v5799_v22  ;;  %vm9036_vm14 = vcmask 162816  }
 0x1f6   : > { %v2205_v45 = vsel %vm8631_vm0, %v2172_v39, %v1884_v3  ;;  %v2204_v50 = vsel %vm8631_vm0, %v2171_v30, %v1882_v25  ;;  %vm9033_vm0 = vmmov %vm9032_vm15 }
 0x1f7   : > { %1844 = vrot.lane.b32.xlu0 %v4767_v28, %s4815_s15  ;;  %1753 = vrot.lane.b32.xlu1 %v5685_v43, %s4814_s29  ;;  %v2042_v23 = vsel %vm9033_vm0, %v2009_v21, %v5809_v26  ;;  %v2074_v43 = vsel %vm9034_vm11, %v2041_v4, %v5929_v14  ;;  %vm9037_vm10 = vmmov %vm9036_vm14  ;;  %vm9038_vm0 = vcmask 195584   ;;  %vm9040_vm11 = vcmask 228352   ;;  %v9066_v4 = vld [vmem:[#allocation40_spill] sm:$0xff] }
 0x1f8   : > { %4600 = vmatprep.mubr.msk.f32.mxu0 %vm8633_vm12, %v2204_v50  ;;  %v2075_v3 = vsel %vm9035_vm13, %v2042_v23, %v5944_v2  ;;  %v2107_v61 = vsel %vm9036_vm14, %v2074_v43, %v6088_v27  ;;  %vm9039_vm15 = vmmov %vm9038_vm0  ;;  %vm9042_vm14 = vcmask 261120   ;;  %v9067_v23 = vld [vmem:[#allocation48_spill] sm:$0xff] }
 0x1f9   : > { %4601 = vmatmul.mubr.msk.f32.vlgmr.msra.gmra.mrb[0].mxu0 %vm8633_vm12, %v2205_v45  ;;  %v1795_v39 = vpop.permute.xlu0 %1794  ;;  %v1793_v30 = vpop.permute.xlu1 %1792  ;;  %v2108_v25 = vsel %vm9037_vm10, %v2075_v3, %v6098_v53  ;;  %v2140_v22 = vsel %vm9038_vm0, %v2107_v61, %v6216_v41  ;;  %vm9041_vm13 = vmmov %vm9040_vm11  ;;  %vm9045_vm12 = vcmask 31744   ;;  %v9070_v43 = vld [vmem:[#allocation52_spill] sm:$0xff] }
 0x1fa   : > { %v2141_v14 = vsel %vm9039_vm15, %v2108_v25, %v6226_v9  ;;  %v2173_v26 = vsel %vm9041_vm13, %v2140_v22, %v1793_v30  ;;  %vm9043_vm10 = vmmov %vm9042_vm14  ;;  %v9048_v9 = vmov 0.0   ;;  %vm9049_vm15 = vcmask 64512   ;;  %v9069_v30 = vld [vmem:[#allocation41_spill] sm:$0xff]  ;;  %v9075_v61 = vld [vmem:[#allocation112_spill] sm:$0xff] }
 0x1fb   : > { %1937 = vrot.lane.b32.xlu0 %v5940_v19, %s4816_s16  ;;  %1846 = vrot.lane.b32.xlu1 %v5655_v34, %s4815_s15  ;;  %v2174_v2 = vsel %vm9040_vm11, %v2141_v14, %v1795_v39  ;;  %v9044_v19 = vld [vmem:[#allocation36_spill] sm:$0xff]  ;;  %vm9047_vm0 = vmmov %vm9045_vm12  ;;  %vm9051_vm13 = vcmask 293888   ;;  %v9078_v22 = vld [vmem:[#allocation137_spill] sm:$0xff] }
 0x1fc   : > { %v1978_v34 = vsel %vm9045_vm12, %v8949_v1, %v9044_v19  ;;  %v1979_v41 = vsel %vm9047_vm0, %v8953_v8, %v9046_v57  ;;  %vm9050_vm11 = vmmov %vm9049_vm15  ;;  %vm9052_vm12 = vcmask 97280   ;;  %vm9055_vm0 = vcmask 130048   ;;  %v9084_v19 = vld [vmem:[#allocation29_spill] sm:$0xff] }
 0x1fd   : > { %v1888_v27 = vpop.permute.xlu0 %1887  ;;  %v1886_v45 = vpop.permute.xlu1 %1885  ;;  %v2010_v20 = vsel %vm9049_vm15, %v1978_v34, %v5675_v44  ;;  %v2011_v35 = vsel %vm9050_vm11, %v1979_v41, %v5687_v60  ;;  %vm9057_vm15 = vmmov %vm9055_vm0  ;;  %vm9058_vm11 = vcmask 162816  }
 0x1fe   : > { %v2207_v53 = vsel %vm9042_vm14, %v2174_v2, %v1888_v27  ;;  %v2206_v50 = vsel %vm9043_vm10, %v2173_v26, %v1886_v45  ;;  %v2043_v1 = vsel %vm9052_vm12, %v2010_v20, %v5807_v24  ;;  %vm9053_vm14 = vmmov %vm9052_vm12  ;;  %vm9060_vm12 = vcmask 195584   ;;  %v9080_v2 = vld [vmem:[#allocation139_spill] sm:$0xff] }
 0x1ff   : > { %1755 = vrot.lane.b32.xlu0 %v9048_v9, %s4814_s29  ;;  %1939 = vrot.lane.b32.xlu1 %v5957_v59, %s4816_s16  ;;  %v2044_v8 = vsel %vm9053_vm14, %v2011_v35, %v5817_v29  ;;  %vm9054_vm10 = vmmov %vm9051_vm13  ;;  %v2076_v59 = vsel %vm9055_vm0, %v2043_v1, %v5942_v33 }
 0x200   : > { %4603 = vmatprep.mubr.msk.f32.mxu0 %vm9051_vm13, %v2206_v50  ;;  %v2077_v44 = vsel %vm9057_vm15, %v2044_v8, %v9056_v6  ;;  %v2109_v60 = vsel %vm9058_vm11, %v2076_v59, %v6096_v32  ;;  %vm9059_vm13 = vmmov %vm9058_vm11  ;;  %vm9064_vm15 = vcmask 261120   ;;  %v9095_v6 = vld [vmem:[#allocation53_spill] sm:$0xff] }
 0x201   : > { %4604 = vmatmul.mubr.msk.f32.gmra.mrb[2].mxu0 %vm9054_vm10, %v2207_v53  ;;  %v1799_v51 = vpop.permute.xlu0 %1798  ;;  %v1797_v49 = vpop.permute.xlu1 %1796  ;;  %v2110_v28 = vsel %vm9059_vm13, %v2077_v44, %v6106_v16  ;;  %v2142_v24 = vsel %vm9060_vm12, %v2109_v60, %v6224_v7  ;;  %vm9061_vm14 = vmmov %vm9060_vm12  ;;  %vm9062_vm10 = vcmask 228352   ;;  %vm9068_vm13 = vcmask 31744   ;;  %v9082_v53 = vld [vmem:[#allocation27_spill] sm:$0xff]  ;;  %v9097_v44 = vld [vmem:[#allocation46_spill] sm:$0xff] }
 0x202   : > { %v2143_v29 = vsel %vm9061_vm14, %v2110_v28, %v6234_v31  ;;  %vm9063_vm0 = vmmov %vm9062_vm10  ;;  %v1980_v39 = vsel %vm9068_vm13, %v9067_v23, %v9066_v4  ;;  %v9073_v31 = vld [vmem:[#allocation111_spill] sm:$0xff]  ;;  %vm9074_vm14 = vcmask 64512   ;;  %v9098_v60 = vld [vmem:[#allocation57_spill] sm:$0xff] }
 0x203   : > { %1848 = vrot.lane.b32.xlu1 %v9048_v9, %s4815_s15  ;;  %1941 = vrot.lane.b32.xlu0 %v9048_v9, %s4816_s16  ;;  %v2176_v33 = vsel %vm9062_vm10, %v2143_v29, %v1799_v51  ;;  %v2175_v37 = vsel %vm9063_vm0, %v2142_v24, %v1797_v49  ;;  %vm9065_vm11 = vmmov %vm9064_vm15  ;;  %v2012_v3 = vsel %vm9074_vm14, %v1980_v39, %v9073_v31  ;;  %v9103_v24 = vld [vmem:[#allocation114_spill] sm:$0xff]  ;;  %v9112_v39 = vld [vmem:[#allocation43_spill] sm:$0xff] }
 0x204   : > { %vm9071_vm12 = vmmov %vm9068_vm13  ;;  %vm9083_vm13 = vcmask 130048   ;;  %v9110_v4 = vld [vmem:[#allocation30_spill] sm:$0xff] }
 0x205   : > { %v1892_v32 = vpop.permute.xlu0 %1891  ;;  %v1890_v18 = vpop.permute.xlu1 %1889  ;;  %v1981_v7 = vsel %vm9071_vm12, %v9070_v43, %v9069_v30  ;;  %vm9076_vm10 = vmmov %vm9074_vm14  ;;  %vm9086_vm12 = vcmask 162816  }
 0x206   : > { %v2209_v16 = vsel %vm9064_vm15, %v2176_v33, %v1892_v32  ;;  %v2208_v21 = vsel %vm9065_vm11, %v2175_v37, %v1890_v18  ;;  %v2013_v25 = vsel %vm9076_vm10, %v1981_v7, %v9075_v61  ;;  %vm9077_vm0 = vmmov %vm9072_vm9  ;;  %vm9079_vm15 = vcmask 97280   ;;  %v9106_v33 = vld [vmem:[#allocation138_spill] sm:$0xff]  ;;  %v9108_v32 = vld [vmem:[#allocation141_spill] sm:$0xff] }
 0x207   : > { %4606 = vmatprep.mubr.msk.f32.mxu0 %vm9072_vm9, %v2208_v21  ;;  %v2045_v14 = vsel %vm9079_vm15, %v2012_v3, %v9078_v22  ;;  %vm9081_vm11 = vmmov %vm9079_vm15  ;;  %vm9088_vm10 = vcmask 195584   ;;  %vm9090_vm15 = vcmask 228352  }
 0x208   : > { %4607 = vmatmul.mubr.msk.f32.gmra.mrb[4].mxu0 %vm9077_vm0, %v2209_v16  ;;  %v2046_v26 = vsel %vm9081_vm11, %v2013_v25, %v9080_v2  ;;  %v2078_v50 = vsel %vm9083_vm13, %v2045_v14, %v9082_v53  ;;  %vm9085_vm9 = vmmov %vm9083_vm13  ;;  %vm9092_vm13 = vcmask 261120   ;;  %v9126_v53 = vld [vmem:[#allocation62_spill] sm:$0xff] }
 0x209   : > { %v1803_v27 = vpop.permute.xlu0 %1802  ;;  %v1801_v45 = vpop.permute.xlu1 %1800  ;;  %v2079_v34 = vsel %vm9085_vm9, %v2046_v26, %v9084_v19  ;;  %v2111_v57 = vsel %vm9086_vm12, %v2078_v50, %v6104_v36  ;;  %vm9087_vm14 = vmmov %vm9086_vm12  ;;  %v9094_v36 = vld [vmem:[#allocation45_spill] sm:$0xff]  ;;  %vm9096_vm12 = vcmask 31744   ;;  %v9131_v19 = vld [vmem:[#allocation116_spill] sm:$0xff] }
 0x20a   : > { %v2112_v41 = vsel %vm9087_vm14, %v2079_v34, %v6114_v54  ;;  %v2144_v9 = vsel %vm9088_vm10, %v2111_v57, %v6232_v15  ;;  %vm9089_vm0 = vmmov %vm9088_vm10  ;;  %v1982_v54 = vsel %vm9096_vm12, %v9095_v6, %v9094_v36  ;;  %vm9100_vm10 = vcmask 293888   ;;  %v9134_v57 = vld [vmem:[#allocation140_spill] sm:$0xff]  ;;  %v9142_v36 = vld [vmem:[#allocation174_spill] sm:$0xff] }
 0x20b   : > { %v2145_v20 = vsel %vm9089_vm0, %v2112_v41, %v6242_v17  ;;  %vm9091_vm11 = vmmov %vm9090_vm15  ;;  %v9101_v17 = vld [vmem:[#allocation113_spill] sm:$0xff]  ;;  %vm9102_vm0 = vcmask 64512  }
 0x20c   : > { %v2178_v35 = vsel %vm9090_vm15, %v2145_v20, %v1803_v27  ;;  %v2177_v1 = vsel %vm9091_vm11, %v2144_v9, %v1801_v45  ;;  %vm9093_vm9 = vmmov %vm9092_vm13  ;;  %v2014_v28 = vsel %vm9102_vm0, %v1982_v54, %v9101_v17  ;;  %v9123_v27 = vld [vmem:[#allocation58_spill] sm:$0xff]  ;;  %v9125_v45 = vld [vmem:[#allocation51_spill] sm:$0xff] }
 0x20d   : > { %v1896_v8 = vpop.permute.xlu0 %1895  ;;  %v1894_v51 = vpop.permute.xlu1 %1893  ;;  %vm9099_vm14 = vmmov %vm9096_vm12  ;;  %vm9111_vm12 = vcmask 130048   ;;  %v9136_v9 = vld [vmem:[#allocation143_spill] sm:$0xff] }
 0x20e   : > { %v2211_v49 = vsel %vm9092_vm13, %v2178_v35, %v1896_v8  ;;  %v2210_v59 = vsel %vm9093_vm9, %v2177_v1, %v1894_v51  ;;  %v1983_v15 = vsel %vm9099_vm14, %v9098_v60, %v9097_v44  ;;  %vm9104_vm15 = vmmov %vm9102_vm0  ;;  %vm9107_vm13 = vcmask 97280   ;;  %v9138_v8 = vld [vmem:[#allocation35_spill] sm:$0xff] }
 0x20f   : > { %4609 = vmatprep.mubr.msk.f32.mxu0 %vm9100_vm10, %v2210_v59  ;;  %v2015_v29 = vsel %vm9104_vm15, %v1983_v15, %v9103_v24  ;;  %vm9105_vm11 = vmmov %vm9100_vm10  ;;  %v2047_v37 = vsel %vm9107_vm13, %v2014_v28, %v9106_v33  ;;  %vm9114_vm10 = vcmask 162816   ;;  %vm9116_vm15 = vcmask 195584  }
 0x210   : > { %4610 = vmatmul.mubr.msk.f32.gmra.mrb[6].mxu0 %vm9105_vm11, %v2211_v49  ;;  %vm9109_vm9 = vmmov %vm9107_vm13  ;;  %v2080_v23 = vsel %vm9111_vm12, %v2047_v37, %v9110_v4  ;;  %vm9118_vm13 = vcmask 228352   ;;  %v9140_v49 = vld [vmem:[#allocation154_spill] sm:$0xff]  ;;  %v9151_v37 = vld [vmem:[#allocation55_spill] sm:$0xff] }
 0x211   : > { %v2048_v18 = vsel %vm9109_vm9, %v2015_v29, %v9108_v32  ;;  %v1807_v16 = vpop.permute.xlu0 %1806  ;;  %v1805_v21 = vpop.permute.xlu1 %1804  ;;  %vm9113_vm14 = vmmov %vm9111_vm12  ;;  %v2113_v43 = vsel %vm9114_vm10, %v2080_v23, %v6112_v47  ;;  %vm9120_vm12 = vcmask 261120   ;;  %v9122_v47 = vld [vmem:[#allocation50_spill] sm:$0xff]  ;;  %v9152_v32 = vld [vmem:[#allocation63_spill] sm:$0xff] }
 0x212   : > { %v2081_v30 = vsel %vm9113_vm14, %v2048_v18, %v9112_v39  ;;  %vm9115_vm0 = vmmov %vm9114_vm10  ;;  %v2146_v31 = vsel %vm9116_vm15, %v2113_v43, %v6240_v12  ;;  %vm9124_vm10 = vcmask 31744   ;;  %v9154_v18 = vld [vmem:[#allocation56_spill] sm:$0xff]  ;;  %v9160_v4 = vld [vmem:[#allocation118_spill] sm:$0xff] }
 0x213   : > { %v2114_v7 = vsel %vm9115_vm0, %v2081_v30, %v6122_v0  ;;  %vm9117_vm11 = vmmov %vm9116_vm15  ;;  %v1984_v0 = vsel %vm9124_vm10, %v9123_v27, %v9122_v47  ;;  %vm9128_vm15 = vcmask 293888   ;;  %v9163_v39 = vld [vmem:[#allocation142_spill] sm:$0xff]  ;;  %v9165_v43 = vld [vmem:[#allocation145_spill] sm:$0xff] }
 0x214   : > { %v2147_v3 = vsel %vm9117_vm11, %v2114_v7, %v6250_v52  ;;  %vm9119_vm9 = vmmov %vm9118_vm13  ;;  %v9129_v52 = vld [vmem:[#allocation115_spill] sm:$0xff]  ;;  %vm9130_vm11 = vcmask 64512  }
 0x215   : > { %v2180_v61 = vsel %vm9118_vm13, %v2147_v3, %v1807_v16  ;;  %v2179_v25 = vsel %vm9119_vm9, %v2146_v31, %v1805_v21  ;;  %v1900_v22 = vpop.permute.xlu0 %1899  ;;  %v1898_v14 = vpop.permute.xlu1 %1897  ;;  %vm9121_vm14 = vmmov %vm9120_vm12  ;;  %v2016_v50 = vsel %vm9130_vm11, %v1984_v0, %v9129_v52  ;;  %v9155_v16 = vld [vmem:[#allocation67_spill] sm:$0xff] }
 0x216   : > { %v2213_v2 = vsel %vm9120_vm12, %v2180_v61, %v1900_v22  ;;  %v2212_v26 = vsel %vm9121_vm14, %v2179_v25, %v1898_v14  ;;  %vm9127_vm0 = vmmov %vm9124_vm10  ;;  %vm9135_vm12 = vcmask 97280   ;;  %vm9139_vm10 = vcmask 130048   ;;  %v9167_v61 = vld [vmem:[#allocation47_spill] sm:$0xff]  ;;  %v9169_v22 = vld [vmem:[#allocation156_spill] sm:$0xff] }
 0x217   : > { %v1985_v12 = vsel %vm9127_vm0, %v9126_v53, %v9125_v45  ;;  %4612 = vmatprep.mubr.msk.f32.mxu0 %vm9128_vm15, %v2212_v26  ;;  %vm9132_vm13 = vmmov %vm9130_vm11  ;;  %v2049_v41 = vsel %vm9135_vm12, %v2016_v50, %v9134_v57  ;;  %v9172_v26 = vld [vmem:[#allocation176_spill] sm:$0xff] }
 0x218   : > { %v2017_v34 = vsel %vm9132_vm13, %v1985_v12, %v9131_v19  ;;  %vm9133_vm9 = vmmov %vm9128_vm15  ;;  %v2082_v51 = vsel %vm9139_vm10, %v2049_v41, %v9138_v8  ;;  %vm9143_vm15 = vcmask 162816   ;;  %vm9145_vm13 = vcmask 195584   ;;  %v9183_v41 = vld [vmem:[#allocation61_spill] sm:$0xff]  ;;  %v9192_v8 = vld [vmem:[#allocation144_spill] sm:$0xff] }
 0x219   : > { %4613 = vmatmul.mubr.msk.f32.gmra.mrb[8].mxu0 %vm9133_vm9, %v2213_v2  ;;  %vm9137_vm14 = vmmov %vm9135_vm12  ;;  %v1811_v35 = vpop.permute.xlu0 %1810  ;;  %v1809_v1 = vpop.permute.xlu1 %1808  ;;  %v2115_v6 = vsel %vm9143_vm15, %v2082_v51, %v9142_v36  ;;  %vm9147_vm12 = vcmask 228352  }
 0x21a   : > { %v2050_v20 = vsel %vm9137_vm14, %v2017_v34, %v9136_v9  ;;  %vm9141_vm0 = vmmov %vm9139_vm10  ;;  %v2148_v44 = vsel %vm9145_vm13, %v2115_v6, %v6248_v48  ;;  %vm9149_vm10 = vcmask 261120   ;;  %v9181_v34 = vld [vmem:[#allocation68_spill] sm:$0xff] }
 0x21b   : > { %v2083_v59 = vsel %vm9141_vm0, %v2050_v20, %v9140_v49  ;;  %vm9144_vm11 = vmmov %vm9143_vm15  ;;  %vm9153_vm15 = vcmask 31744   ;;  %v9184_v9 = vld [vmem:[#allocation72_spill] sm:$0xff]  ;;  %v9194_v49 = vld [vmem:[#allocation147_spill] sm:$0xff] }
 0x21c   : > { %v2116_v54 = vsel %vm9144_vm11, %v2083_v59, %v6130_v62  ;;  %vm9146_vm9 = vmmov %vm9145_vm13  ;;  %v1986_v62 = vsel %vm9153_vm15, %v9152_v32, %v9151_v37  ;;  %vm9157_vm13 = vcmask 293888  }
 0x21d   : > { %v2149_v60 = vsel %vm9146_vm9, %v2116_v54, %v6258_v10  ;;  %vm9148_vm14 = vmmov %vm9147_vm12  ;;  %v1904_v28 = vpop.permute.xlu0 %1903  ;;  %v1902_v24 = vpop.permute.xlu1 %1901  ;;  %v9158_v10 = vld [vmem:[#allocation117_spill] sm:$0xff]  ;;  %vm9159_vm9 = vcmask 64512   ;;  %v9196_v54 = vld [vmem:[#allocation155_spill] sm:$0xff] }
 0x21e   : > { %v2182_v15 = vsel %vm9147_vm12, %v2149_v60, %v1811_v35  ;;  %v2181_v17 = vsel %vm9148_vm14, %v2148_v44, %v1809_v1  ;;  %vm9150_vm0 = vmmov %vm9149_vm10  ;;  %v2018_v21 = vsel %vm9159_vm9, %v1986_v62, %v9158_v10  ;;  %v9189_v35 = vld [vmem:[#allocation120_spill] sm:$0xff]  ;;  %v9198_v60 = vld [vmem:[#allocation158_spill] sm:$0xff] }
 0x21f   : > { %v2215_v29 = vsel %vm9149_vm10, %v2182_v15, %v1904_v28  ;;  %v2214_v33 = vsel %vm9150_vm0, %v2181_v17, %v1902_v24  ;;  %vm9156_vm11 = vmmov %vm9153_vm15  ;;  %vm9164_vm10 = vcmask 97280   ;;  %vm9168_vm15 = vcmask 130048   ;;  %v9200_v17 = vld [vmem:[#allocation175_spill] sm:$0xff]  ;;  %v9209_v10 = vld [vmem:[#allocation65_spill] sm:$0xff] }
 0x220   : > { %v1987_v48 = vsel %vm9156_vm11, %v9155_v16, %v9154_v18  ;;  %4615 = vmatprep.mubr.msk.f32.mxu0 %vm9157_vm13, %v2214_v33  ;;  %vm9161_vm12 = vmmov %vm9159_vm9  ;;  %v2051_v30 = vsel %vm9164_vm10, %v2018_v21, %v9163_v39  ;;  %v9210_v21 = vld [vmem:[#allocation73_spill] sm:$0xff] }
 0x221   : > { %v2019_v23 = vsel %vm9161_vm12, %v1987_v48, %v9160_v4  ;;  %vm9162_vm14 = vmmov %vm9157_vm13  ;;  %v1815_v31 = vpop.permute.xlu0 %1814  ;;  %v1813_v3 = vpop.permute.xlu1 %1812  ;;  %v2084_v25 = vsel %vm9168_vm15, %v2051_v30, %v9167_v61  ;;  %vm9171_vm13 = vcmask 162816   ;;  %vm9174_vm12 = vcmask 195584   ;;  %v9212_v4 = vld [vmem:[#allocation66_spill] sm:$0xff] }
 0x222   : > { %4616 = vmatmul.mubr.msk.f32.gmra.mrb[10].mxu0 %vm9162_vm14, %v2215_v29  ;;  %vm9166_vm0 = vmmov %vm9164_vm10  ;;  %v2117_v2 = vsel %vm9171_vm13, %v2084_v25, %v6128_v55  ;;  %vm9176_vm10 = vcmask 228352   ;;  %v9180_v55 = vld [vmem:[#allocation60_spill] sm:$0xff]  ;;  %v9218_v30 = vld [vmem:[#allocation122_spill] sm:$0xff] }
 0x223   : > { %v2052_v7 = vsel %vm9166_vm0, %v2019_v23, %v9165_v43  ;;  %vm9170_vm11 = vmmov %vm9168_vm15  ;;  %v2150_v27 = vsel %vm9174_vm12, %v2117_v2, %v6256_v5  ;;  %vm9178_vm15 = vcmask 261120   ;;  %v9213_v23 = vld [vmem:[#allocation77_spill] sm:$0xff] }
 0x224   : > { %v2085_v14 = vsel %vm9170_vm11, %v2052_v7, %v9169_v22  ;;  %vm9173_vm9 = vmmov %vm9171_vm13  ;;  %vm9182_vm13 = vcmask 31744   ;;  %v9221_v7 = vld [vmem:[#allocation146_spill] sm:$0xff] }
 0x225   : > { %v2118_v47 = vsel %vm9173_vm9, %v2085_v14, %v9172_v26  ;;  %vm9175_vm14 = vmmov %vm9174_vm12  ;;  %v1908_v12 = vpop.permute.xlu0 %1907  ;;  %v1906_v52 = vpop.permute.xlu1 %1905  ;;  %v1988_v57 = vsel %vm9182_vm13, %v9181_v34, %v9180_v55  ;;  %vm9186_vm12 = vcmask 293888   ;;  %v9225_v14 = vld [vmem:[#allocation157_spill] sm:$0xff]  ;;  %v9227_v26 = vld [vmem:[#allocation160_spill] sm:$0xff] }
 0x226   : > { %v2151_v0 = vsel %vm9175_vm14, %v2118_v47, %v6266_v40  ;;  %vm9177_vm0 = vmmov %vm9176_vm10  ;;  %v9187_v40 = vld [vmem:[#allocation119_spill] sm:$0xff]  ;;  %vm9188_vm14 = vcmask 64512  }
 0x227   : > { %v2184_v45 = vsel %vm9176_vm10, %v2151_v0, %v1815_v31  ;;  %v2183_v53 = vsel %vm9177_vm0, %v2150_v27, %v1813_v3  ;;  %vm9179_vm11 = vmmov %vm9178_vm15  ;;  %v2020_v20 = vsel %vm9188_vm14, %v1988_v57, %v9187_v40  ;;  %v9223_v3 = vld [vmem:[#allocation149_spill] sm:$0xff]  ;;  %v9230_v0 = vld [vmem:[#allocation178_spill] sm:$0xff] }
 0x228   : > { %v2217_v50 = vsel %vm9178_vm15, %v2184_v45, %v1908_v12  ;;  %v2216_v19 = vsel %vm9179_vm11, %v2183_v53, %v1906_v52  ;;  %vm9185_vm9 = vmmov %vm9182_vm13  ;;  %vm9193_vm15 = vcmask 97280   ;;  %vm9197_vm13 = vcmask 130048   ;;  %v9232_v53 = vld [vmem:[#allocation192_spill] sm:$0xff]  ;;  %v9242_v40 = vld [vmem:[#allocation71_spill] sm:$0xff] }
 0x229   : > { %v1989_v5 = vsel %vm9185_vm9, %v9184_v9, %v9183_v41  ;;  %4618 = vmatprep.mubr.msk.f32.mxu0 %vm9186_vm12, %v2216_v19  ;;  %vm9190_vm10 = vmmov %vm9188_vm14  ;;  %v2053_v51 = vsel %vm9193_vm15, %v2020_v20, %v9192_v8  ;;  %v1819_v36 = vpop.permute.xlu0 %1818  ;;  %v1817_v6 = vpop.permute.xlu1 %1816  ;;  %v9240_v9 = vld [vmem:[#allocation78_spill] sm:$0xff]  ;;  %v9248_v8 = vld [vmem:[#allocation124_spill] sm:$0xff] }
 0x22a   : > { %v2021_v1 = vsel %vm9190_vm10, %v1989_v5, %v9189_v35  ;;  %vm9191_vm0 = vmmov %vm9186_vm12  ;;  %v2086_v44 = vsel %vm9197_vm13, %v2053_v51, %v9196_v54  ;;  %vm9201_vm12 = vcmask 162816   ;;  %vm9203_vm10 = vcmask 195584   ;;  %v9243_v20 = vld [vmem:[#allocation82_spill] sm:$0xff] }
 0x22b   : > { %4619 = vmatmul.mubr.msk.f32.gmra.mrb[12].mxu0 %vm9191_vm0, %v2217_v50  ;;  %vm9195_vm11 = vmmov %vm9193_vm15  ;;  %v2119_v28 = vsel %vm9201_vm12, %v2086_v44, %v9200_v17  ;;  %vm9205_vm15 = vcmask 228352   ;;  %v9257_v17 = vld [vmem:[#allocation162_spill] sm:$0xff] }
 0x22c   : > { %v2054_v59 = vsel %vm9195_vm11, %v2021_v1, %v9194_v49  ;;  %vm9199_vm9 = vmmov %vm9197_vm13  ;;  %v2152_v29 = vsel %vm9203_vm10, %v2119_v28, %v6264_v56  ;;  %vm9207_vm13 = vcmask 261120   ;;  %v9251_v49 = vld [vmem:[#allocation148_spill] sm:$0xff] }
 0x22d   : > { %v2087_v15 = vsel %vm9199_vm9, %v2054_v59, %v9198_v60  ;;  %vm9202_vm14 = vmmov %vm9201_vm12  ;;  %v1912_v62 = vpop.permute.xlu0 %1911  ;;  %v1910_v18 = vpop.permute.xlu1 %1909  ;;  %vm9211_vm12 = vcmask 31744   ;;  %v9255_v60 = vld [vmem:[#allocation159_spill] sm:$0xff] }
 0x22e   : > { %v2120_v24 = vsel %vm9202_vm14, %v2087_v15, %v6146_v38  ;;  %vm9204_vm0 = vmmov %vm9203_vm10  ;;  %v1990_v38 = vsel %vm9211_vm12, %v9210_v21, %v9209_v10  ;;  %vm9215_vm10 = vcmask 293888  }
 0x22f   : > { %v2153_v33 = vsel %vm9204_vm0, %v2120_v24, %v6274_v46  ;;  %vm9206_vm11 = vmmov %vm9205_vm15  ;;  %v9216_v46 = vld [vmem:[#allocation121_spill] sm:$0xff]  ;;  %vm9217_vm0 = vcmask 64512  }
 0x230   : > { %v2186_v37 = vsel %vm9205_vm15, %v2153_v33, %v1819_v36  ;;  %v2185_v32 = vsel %vm9206_vm11, %v2152_v29, %v1817_v6  ;;  %vm9208_vm9 = vmmov %vm9207_vm13  ;;  %v2022_v39 = vsel %vm9217_vm0, %v1990_v38, %v9216_v46  ;;  %v9253_v36 = vld [vmem:[#allocation151_spill] sm:$0xff]  ;;  %v9259_v24 = vld [vmem:[#allocation177_spill] sm:$0xff] }
 0x231   : > { %v2219_v16 = vsel %vm9207_vm13, %v2186_v37, %v1912_v62  ;;  %v2218_v48 = vsel %vm9208_vm9, %v2185_v32, %v1910_v18  ;;  %vm9214_vm14 = vmmov %vm9211_vm12  ;;  %vm9222_vm13 = vcmask 97280   ;;  %v1823_v25 = vpop.permute.xlu0 %1822  ;;  %v1821_v22 = vpop.permute.xlu1 %1820  ;;  %vm9226_vm12 = vcmask 130048   ;;  %v9261_v33 = vld [vmem:[#allocation180_spill] sm:$0xff]  ;;  %v9263_v32 = vld [vmem:[#allocation193_spill] sm:$0xff] }
 0x232   : > { %v1991_v56 = vsel %vm9214_vm14, %v9213_v23, %v9212_v4  ;;  %4621 = vmatprep.mubr.msk.f32.mxu0 %vm9215_vm10, %v2218_v48  ;;  %vm9219_vm15 = vmmov %vm9217_vm0  ;;  %v2055_v31 = vsel %vm9222_vm13, %v2022_v39, %v9221_v7  ;;  %v9270_v23 = vld [vmem:[#allocation75_spill] sm:$0xff]  ;;  %v9273_v39 = vld [vmem:[#allocation76_spill] sm:$0xff] }
 0x233   : > { %v2023_v43 = vsel %vm9219_vm15, %v1991_v56, %v9218_v30  ;;  %vm9220_vm11 = vmmov %vm9215_vm10  ;;  %v2088_v2 = vsel %vm9226_vm12, %v2055_v31, %v9225_v14  ;;  %vm9229_vm10 = vcmask 162816   ;;  %vm9233_vm15 = vcmask 195584   ;;  %v9271_v56 = vld [vmem:[#allocation83_spill] sm:$0xff]  ;;  %v9279_v31 = vld [vmem:[#allocation126_spill] sm:$0xff] }
 0x234   : > { %4622 = vmatmul.mubr.msk.f32.gmra.mrb[14].mxu0 %vm9220_vm11, %v2219_v16  ;;  %vm9224_vm9 = vmmov %vm9222_vm13  ;;  %v2121_v27 = vsel %vm9229_vm10, %v2088_v2, %v6144_v63  ;;  %vm9235_vm13 = vcmask 228352   ;;  %v9239_v63 = vld [vmem:[#allocation70_spill] sm:$0xff]  ;;  %v9274_v30 = vld [vmem:[#allocation87_spill] sm:$0xff] }
 0x235   : > { %v2056_v61 = vsel %vm9224_vm9, %v2023_v43, %v9223_v3  ;;  %vm9228_vm14 = vmmov %vm9226_vm12  ;;  %v2154_v12 = vsel %vm9233_vm15, %v2121_v27, %v9232_v53  ;;  %v1916_v55 = vpop.permute.xlu0 %1915  ;;  %v1914_v34 = vpop.permute.xlu1 %1913  ;;  %vm9237_vm12 = vcmask 261120   ;;  %v9290_v53 = vld [vmem:[#allocation179_spill] sm:$0xff] }
 0x236   : > { %v2089_v47 = vsel %vm9228_vm14, %v2056_v61, %v9227_v26  ;;  %vm9231_vm0 = vmmov %vm9229_vm10  ;;  %vm9241_vm10 = vcmask 31744   ;;  %v9282_v61 = vld [vmem:[#allocation150_spill] sm:$0xff] }
 0x237   : > { %v2122_v45 = vsel %vm9231_vm0, %v2089_v47, %v9230_v0  ;;  %vm9234_vm11 = vmmov %vm9233_vm15  ;;  %v1992_v5 = vsel %vm9241_vm10, %v9240_v9, %v9239_v63  ;;  %vm9245_vm15 = vcmask 293888   ;;  %v9286_v47 = vld [vmem:[#allocation161_spill] sm:$0xff]  ;;  %v9288_v0 = vld [vmem:[#allocation164_spill] sm:$0xff] }
 0x238   : > { %v2155_v52 = vsel %vm9234_vm11, %v2122_v45, %v6282_v42  ;;  %vm9236_vm9 = vmmov %vm9235_vm13  ;;  %v9246_v42 = vld [vmem:[#allocation123_spill] sm:$0xff]  ;;  %vm9247_vm11 = vcmask 64512  }
 0x239   : > { %v2188_v50 = vsel %vm9235_vm13, %v2155_v52, %v1823_v25  ;;  %v2187_v19 = vsel %vm9236_vm9, %v2154_v12, %v1821_v22  ;;  %vm9238_vm14 = vmmov %vm9237_vm12  ;;  %v2024_v1 = vsel %vm9247_vm11, %v1992_v5, %v9246_v42  ;;  %v1827_v54 = vpop.permute.xlu0 %1826  ;;  %v1825_v44 = vpop.permute.xlu1 %1824  ;;  %v9284_v22 = vld [vmem:[#allocation153_spill] sm:$0xff]  ;;  %v9292_v52 = vld [vmem:[#allocation182_spill] sm:$0xff] }
 0x23a   : > { %v2221_v57 = vsel %vm9237_vm12, %v2188_v50, %v1916_v55  ;;  %v2220_v41 = vsel %vm9238_vm14, %v2187_v19, %v1914_v34  ;;  %vm9244_vm0 = vmmov %vm9241_vm10  ;;  %vm9252_vm12 = vcmask 97280   ;;  %vm9256_vm10 = vcmask 130048   ;;  %v9295_v55 = vld [vmem:[#allocation195_spill] sm:$0xff] }
 0x23b   : > { %v1993_v35 = vsel %vm9244_vm0, %v9243_v20, %v9242_v40  ;;  %4624 = vmatprep.mubr.msk.f32.mxu0 %vm9245_vm15, %v2220_v41  ;;  %vm9249_vm13 = vmmov %vm9247_vm11  ;;  %v2057_v59 = vsel %vm9252_vm12, %v2024_v1, %v9251_v49  ;;  %v9301_v20 = vld [vmem:[#allocation80_spill] sm:$0xff]  ;;  %v9304_v1 = vld [vmem:[#allocation81_spill] sm:$0xff] }
 0x23c   : > { %v2025_v51 = vsel %vm9249_vm13, %v1993_v35, %v9248_v8  ;;  %vm9250_vm9 = vmmov %vm9245_vm15  ;;  %v2090_v15 = vsel %vm9256_vm10, %v2057_v59, %v9255_v60  ;;  %vm9260_vm15 = vcmask 162816   ;;  %vm9264_vm13 = vcmask 195584   ;;  %v9302_v35 = vld [vmem:[#allocation88_spill] sm:$0xff] }
 0x23d   : > { %4625 = vmatmul.mubr.msk.f32.gmra.mrb[16].mxu0 %vm9250_vm9, %v2221_v57  ;;  %vm9254_vm14 = vmmov %vm9252_vm12  ;;  %v2123_v29 = vsel %vm9260_vm15, %v2090_v15, %v9259_v24  ;;  %vm9266_vm12 = vcmask 228352   ;;  %v1920_v10 = vpop.permute.xlu0 %1919  ;;  %v1918_v21 = vpop.permute.xlu1 %1917  ;;  %v9305_v8 = vld [vmem:[#allocation92_spill] sm:$0xff] }
 0x23e   : > { %v2058_v6 = vsel %vm9254_vm14, %v2025_v51, %v9253_v36  ;;  %vm9258_vm0 = vmmov %vm9256_vm10  ;;  %v2156_v62 = vsel %vm9264_vm13, %v2123_v29, %v9263_v32  ;;  %vm9268_vm10 = vcmask 261120   ;;  %v9308_v51 = vld [vmem:[#allocation127_spill] sm:$0xff]  ;;  %v9310_v59 = vld [vmem:[#allocation128_spill] sm:$0xff] }
 0x23f   : > { %v2091_v28 = vsel %vm9258_vm0, %v2058_v6, %v9257_v17  ;;  %vm9262_vm11 = vmmov %vm9260_vm15  ;;  %vm9272_vm15 = vcmask 31744   ;;  %v9313_v6 = vld [vmem:[#allocation152_spill] sm:$0xff]  ;;  %v9319_v29 = vld [vmem:[#allocation166_spill] sm:$0xff] }
 0x240   : > { %v2124_v37 = vsel %vm9262_vm11, %v2091_v28, %v9261_v33  ;;  %vm9265_vm9 = vmmov %vm9264_vm13  ;;  %v1994_v46 = vsel %vm9272_vm15, %v9271_v56, %v9270_v23  ;;  %vm9276_vm13 = vcmask 293888   ;;  %v9317_v28 = vld [vmem:[#allocation163_spill] sm:$0xff] }
 0x241   : > { %v2157_v18 = vsel %vm9265_vm9, %v2124_v37, %v6290_v13  ;;  %vm9267_vm14 = vmmov %vm9266_vm12  ;;  %v9277_v13 = vld [vmem:[#allocation125_spill] sm:$0xff]  ;;  %vm9278_vm9 = vcmask 64512   ;;  %v1831_v2 = vpop.permute.xlu0 %1830  ;;  %v1829_v26 = vpop.permute.xlu1 %1828 }
 0x242   : > { %v2190_v16 = vsel %vm9266_vm12, %v2157_v18, %v1827_v54  ;;  %v2189_v48 = vsel %vm9267_vm14, %v2156_v62, %v1825_v44  ;;  %vm9269_vm0 = vmmov %vm9268_vm10  ;;  %v2026_v7 = vsel %vm9278_vm9, %v1994_v46, %v9277_v13  ;;  %v9315_v44 = vld [vmem:[#allocation10_spill] sm:$0xff]  ;;  %v9321_v37 = vld [vmem:[#allocation181_spill] sm:$0xff] }
 0x243   : > { %v2223_v38 = vsel %vm9268_vm10, %v2190_v16, %v1920_v10  ;;  %v2222_v4 = vsel %vm9269_vm0, %v2189_v48, %v1918_v21  ;;  %vm9275_vm11 = vmmov %vm9272_vm15  ;;  %vm9283_vm10 = vcmask 97280   ;;  %vm9287_vm15 = vcmask 130048   ;;  %v9323_v62 = vld [vmem:[#allocation184_spill] sm:$0xff]  ;;  %v9325_v16 = vld [vmem:[#allocation194_spill] sm:$0xff] }
 0x244   : > { %v1995_v43 = vsel %vm9275_vm11, %v9274_v30, %v9273_v39  ;;  %4627 = vmatprep.mubr.msk.f32.mxu0 %vm9276_vm13, %v2222_v4  ;;  %vm9280_vm12 = vmmov %vm9278_vm9  ;;  %v2059_v25 = vsel %vm9283_vm10, %v2026_v7, %v9282_v61  ;;  %v9327_v10 = vld [vmem:[#allocation197_spill] sm:$0xff] }
 0x245   : > { %v2027_v3 = vsel %vm9280_vm12, %v1995_v43, %v9279_v31  ;;  %vm9281_vm14 = vmmov %vm9276_vm13  ;;  %v2092_v27 = vsel %vm9287_vm15, %v2059_v25, %v9286_v47  ;;  %vm9291_vm13 = vcmask 162816   ;;  %vm9294_vm12 = vcmask 195584   ;;  %v1924_v63 = vpop.permute.xlu0 %1923  ;;  %v1922_v9 = vpop.permute.xlu1 %1921  ;;  %v9333_v30 = vld [vmem:[#allocation85_spill] sm:$0xff] }
 0x246   : > { %4628 = vmatmul.mubr.msk.f32.gmra.mrb[18].mxu0 %vm9281_vm14, %v2223_v38  ;;  %vm9285_vm0 = vmmov %vm9283_vm10  ;;  %v2125_v12 = vsel %vm9291_vm13, %v2092_v27, %v9290_v53  ;;  %vm9297_vm10 = vcmask 228352   ;;  %v9334_v43 = vld [vmem:[#allocation93_spill] sm:$0xff]  ;;  %v9349_v53 = vld [vmem:[#allocation130_spill] sm:$0xff] }
 0x247   : > { %v2060_v14 = vsel %vm9285_vm0, %v2027_v3, %v9284_v22  ;;  %vm9289_vm11 = vmmov %vm9287_vm15  ;;  %v2158_v19 = vsel %vm9294_vm12, %v2125_v12, %v6288_v11  ;;  %vm9299_vm15 = vcmask 261120   ;;  %v9337_v7 = vld [vmem:[#allocation129_spill] sm:$0xff]  ;;  %v9340_v3 = vld [vmem:[#allocation11_spill] sm:$0xff] }
 0x248   : > { %v2093_v45 = vsel %vm9289_vm11, %v2060_v14, %v9288_v0  ;;  %vm9293_vm9 = vmmov %vm9291_vm13  ;;  %vm9303_vm13 = vcmask 31744   ;;  %v9342_v14 = vld [vmem:[#allocation165_spill] sm:$0xff]  ;;  %v9347_v0 = vld [vmem:[#allocation183_spill] sm:$0xff] }
 0x249   : > { %v2126_v50 = vsel %vm9293_vm9, %v2093_v45, %v9292_v52  ;;  %vm9296_vm14 = vmmov %vm9294_vm12  ;;  %v1996_v42 = vsel %vm9303_vm13, %v9302_v35, %v9301_v20  ;;  %vm9307_vm12 = vcmask 293888   ;;  %v1835_v15 = vpop.permute.xlu0 %1834  ;;  %v1833_v17 = vpop.permute.xlu1 %1832  ;;  %v9345_v47 = vld [vmem:[#allocation97_spill] sm:$0xff]  ;;  %v9351_v52 = vld [vmem:[#allocation196_spill] sm:$0xff] }
 0x24a   : > { %v2159_v34 = vsel %vm9296_vm14, %v2126_v50, %v9295_v55  ;;  %vm9298_vm0 = vmmov %vm9297_vm10  ;;  %vm9309_vm14 = vcmask 64512  }
 0x24b   : > { %v2192_v57 = vsel %vm9297_vm10, %v2159_v34, %v1831_v2  ;;  %v2191_v41 = vsel %vm9298_vm0, %v2158_v19, %v1829_v26  ;;  %vm9300_vm11 = vmmov %vm9299_vm15  ;;  %v2028_v49 = vsel %vm9309_vm14, %v1996_v42, %v9308_v51  ;;  %v9344_v26 = vld [vmem:[#allocation86_spill] sm:$0xff]  ;;  %v9353_v19 = vld [vmem:[#allocation13_spill] sm:$0xff] }
 0x24c   : > { %v2225_v5 = vsel %vm9299_vm15, %v2192_v57, %v1924_v63  ;;  %v2224_v40 = vsel %vm9300_vm11, %v2191_v41, %v1922_v9  ;;  %vm9306_vm9 = vmmov %vm9303_vm13  ;;  %vm9314_vm15 = vcmask 97280   ;;  %vm9318_vm13 = vcmask 130048   ;;  %v9356_v63 = vld [vmem:[#allocation168_spill] sm:$0xff]  ;;  %v9365_v51 = vld [vmem:[#allocation90_spill] sm:$0xff] }
 0x24d   : > { %v1997_v11 = vsel %vm9306_vm9, %v9305_v8, %v9304_v1  ;;  %4630 = vmatprep.mubr.msk.f32.mxu0 %vm9307_vm12, %v2224_v40  ;;  %vm9311_vm10 = vmmov %vm9309_vm14  ;;  %v2061_v54 = vsel %vm9314_vm15, %v2028_v49, %v9313_v6  ;;  %v1928_v23 = vpop.permute.xlu0 %1927  ;;  %v1926_v56 = vpop.permute.xlu1 %1925  ;;  %v9359_v40 = vld [vmem:[#allocation186_spill] sm:$0xff] }
 0x24e   : > { %v2029_v36 = vsel %vm9311_vm10, %v1997_v11, %v9310_v59  ;;  %vm9312_vm0 = vmmov %vm9307_vm12  ;;  %v2094_v24 = vsel %vm9318_vm13, %v2061_v54, %v9317_v28  ;;  %vm9322_vm12 = vcmask 162816   ;;  %vm9326_vm10 = vcmask 195584   ;;  %v9366_v49 = vld [vmem:[#allocation98_spill] sm:$0xff] }
 0x24f   : > { %4631 = vmatmul.mubr.msk.f32.gmra.mrb[20].mxu0 %vm9312_vm0, %v2225_v5  ;;  %vm9316_vm11 = vmmov %vm9314_vm15  ;;  %v2127_v32 = vsel %vm9322_vm12, %v2094_v24, %v9321_v37  ;;  %vm9329_vm15 = vcmask 228352   ;;  %v9371_v54 = vld [vmem:[#allocation14_spill] sm:$0xff]  ;;  %v9375_v24 = vld [vmem:[#allocation91_spill] sm:$0xff] }
 0x250   : > { %v2062_v60 = vsel %vm9316_vm11, %v2029_v36, %v9315_v44  ;;  %vm9320_vm9 = vmmov %vm9318_vm13  ;;  %v2160_v48 = vsel %vm9326_vm10, %v2127_v32, %v9325_v16  ;;  %vm9331_vm13 = vcmask 261120   ;;  %v9369_v36 = vld [vmem:[#allocation131_spill] sm:$0xff]  ;;  %v9378_v37 = vld [vmem:[#allocation185_spill] sm:$0xff] }
 0x251   : > { %v2095_v33 = vsel %vm9320_vm9, %v2062_v60, %v9319_v29  ;;  %vm9324_vm14 = vmmov %vm9322_vm12  ;;  %vm9335_vm12 = vcmask 31744   ;;  %v1837_v25 = vpop.permute.xlu0 %1836  ;;  %v1746_v22 = vpop.permute.xlu1 %1745  ;;  %v9376_v29 = vld [vmem:[#allocation102_spill] sm:$0xff] }
 0x252   : > { %v2128_v18 = vsel %vm9324_vm14, %v2095_v33, %v9323_v62  ;;  %vm9328_vm0 = vmmov %vm9326_vm10  ;;  %v1998_v13 = vsel %vm9335_vm12, %v9334_v43, %v9333_v30  ;;  %vm9336_vm14 = vcmask 293888   ;;  %vm9338_vm10 = vcmask 64512   ;;  %v9380_v62 = vld [vmem:[#allocation132_spill] sm:$0xff] }
 0x253   : > { %v2161_v21 = vsel %vm9328_vm0, %v2128_v18, %v9327_v10  ;;  %vm9330_vm11 = vmmov %vm9329_vm15  ;;  %v2030_v31 = vsel %vm9338_vm10, %v1998_v13, %v9337_v7 }
 0x254   : > { %v2194_v38 = vsel %vm9329_vm15, %v2161_v21, %v1835_v15  ;;  %v2193_v4 = vsel %vm9330_vm11, %v2160_v48, %v1833_v17  ;;  %vm9332_vm9 = vmmov %vm9331_vm13  ;;  %vm9341_vm15 = vcmask 97280   ;;  %vm9343_vm11 = vcmask 130048   ;;  %v9373_v17 = vld [vmem:[#allocation167_spill] sm:$0xff]  ;;  %v9383_v48 = vld [vmem:[#allocation16_spill] sm:$0xff] }
 0x255   : > { %v2227_v46 = vsel %vm9331_vm13, %v2194_v38, %v1928_v23  ;;  %v2226_v39 = vsel %vm9332_vm9, %v2193_v4, %v1926_v56  ;;  %vm9339_vm0 = vmmov %vm9336_vm14  ;;  %v2063_v61 = vsel %vm9341_vm15, %v2030_v31, %v9340_v3  ;;  %vm9348_vm9 = vcmask 162816   ;;  %v1930_v57 = vpop.permute.xlu0 %1929  ;;  %v1839_v41 = vpop.permute.xlu1 %1838  ;;  %v9386_v23 = vld [vmem:[#allocation170_spill] sm:$0xff] }
 0x256   : > { %4633 = vmatprep.mubr.msk.f32.mxu0 %vm9336_vm14, %v2226_v39  ;;  %v2096_v2 = vsel %vm9343_vm11, %v2063_v61, %v9342_v14  ;;  %vm9346_vm13 = vmmov %vm9335_vm12  ;;  %vm9352_vm14 = vcmask 195584   ;;  %v9389_v39 = vld [vmem:[#allocation188_spill] sm:$0xff]  ;;  %v9395_v61 = vld [vmem:[#allocation95_spill] sm:$0xff] }
 0x257   : > { %4634 = vmatmul.mubr.msk.f32.gmra.mrb[22].mxu0 %vm9339_vm0, %v2227_v46  ;;  %v1999_v27 = vsel %vm9346_vm13, %v9345_v47, %v9344_v26  ;;  %v2129_v45 = vsel %vm9348_vm9, %v2096_v2, %v9347_v0  ;;  %vm9350_vm12 = vmmov %vm9338_vm10  ;;  %vm9355_vm0 = vcmask 228352   ;;  %v9399_v14 = vld [vmem:[#allocation133_spill] sm:$0xff] }
 0x258   : > { %v2031_v12 = vsel %vm9350_vm12, %v1999_v27, %v9349_v53  ;;  %v2162_v50 = vsel %vm9352_vm14, %v2129_v45, %v9351_v52  ;;  %vm9354_vm10 = vmmov %vm9341_vm15  ;;  %v9401_v26 = vld [vmem:[#allocation17_spill] sm:$0xff]  ;;  %v9406_v52 = vld [vmem:[#allocation108_spill] sm:$0xff] }
 0x259   : > { %v2064_v55 = vsel %vm9354_vm10, %v2031_v12, %v9353_v19  ;;  %v2195_v34 = vsel %vm9355_vm0, %v2162_v50, %v1837_v25  ;;  %vm9357_vm15 = vmmov %vm9343_vm11  ;;  %vm9358_vm11 = vcmask 261120   ;;  %v1748_v1 = vpop.permute.xlu0 %1747  ;;  %v1932_v8 = vpop.permute.xlu1 %1931  ;;  %v9396_v25 = vld [vmem:[#allocation103_spill] sm:$0xff]  ;;  %v9403_v45 = vld [vmem:[#allocation169_spill] sm:$0xff] }
 0x25a   : > { %v2097_v9 = vsel %vm9357_vm15, %v2064_v55, %v9356_v63  ;;  %v2228_v5 = vsel %vm9358_vm11, %v2195_v34, %v1930_v57  ;;  %vm9360_vm13 = vmmov %vm9348_vm9  ;;  %vm9361_vm9 = vcmask 293888   ;;  %v9405_v12 = vld [vmem:[#allocation96_spill] sm:$0xff]  ;;  %v9408_v19 = vld [vmem:[#allocation187_spill] sm:$0xff] }
 0x25b   : > { %v2130_v20 = vsel %vm9360_vm13, %v2097_v9, %v9359_v40  ;;  %4636 = vmatprep.mubr.msk.f32.mxu0 %vm9361_vm9, %v2228_v5  ;;  %vm9362_vm12 = vmmov %vm9352_vm14  ;;  %vm9372_vm13 = vcmask 97280   ;;  %v9410_v34 = vld [vmem:[#allocation134_spill] sm:$0xff]  ;;  %v9413_v63 = vld [vmem:[#allocation19_spill] sm:$0xff] }
 0x25c   : > { %v2163_v35 = vsel %vm9362_vm12, %v2130_v20, %v1746_v22  ;;  %vm9363_vm14 = vmmov %vm9355_vm0  ;;  %vm9367_vm0 = vcmask 31744  }
 0x25d   : > { %v2196_v42 = vsel %vm9363_vm14, %v2163_v35, %v1839_v41  ;;  %vm9364_vm10 = vmmov %vm9358_vm11  ;;  %v2000_v59 = vsel %vm9367_vm0, %v9366_v49, %v9365_v51  ;;  %vm9370_vm11 = vcmask 64512   ;;  %v1841_v60 = vpop.permute.xlu0 %1840  ;;  %v1750_v15 = vpop.permute.xlu1 %1749  ;;  %vm9379_vm14 = vcmask 162816   ;;  %v9416_v35 = vld [vmem:[#allocation172_spill] sm:$0xff]  ;;  %v9423_v49 = vld [vmem:[#allocation109_spill] sm:$0xff] }
 0x25e   : > { %v2229_v11 = vsel %vm9364_vm10, %v2196_v42, %v1932_v8  ;;  %vm9368_vm15 = vmmov %vm9361_vm9  ;;  %v2032_v6 = vsel %vm9370_vm11, %v2000_v59, %v9369_v36  ;;  %vm9374_vm9 = vcmask 130048   ;;  %v9419_v8 = vld [vmem:[#allocation190_spill] sm:$0xff]  ;;  %v9422_v51 = vld [vmem:[#allocation100_spill] sm:$0xff] }
 0x25f   : > { %4637 = vmatmul.mubr.msk.f32.gmra.mrb[24].mxu0 %vm9368_vm15, %v2229_v11  ;;  %v2065_v44 = vsel %vm9372_vm13, %v2032_v6, %v9371_v54  ;;  %vm9377_vm12 = vmmov %vm9367_vm0  ;;  %vm9382_vm0 = vcmask 195584   ;;  %v9425_v36 = vld [vmem:[#allocation101_spill] sm:$0xff]  ;;  %v9426_v6 = vld [vmem:[#allocation110_spill] sm:$0xff] }
 0x260   : > { %v2098_v28 = vsel %vm9374_vm9, %v2065_v44, %v9373_v17  ;;  %v2001_v33 = vsel %vm9377_vm12, %v9376_v29, %v9375_v24  ;;  %vm9381_vm10 = vmmov %vm9370_vm11  ;;  %vm9385_vm11 = vcmask 228352   ;;  %v9431_v17 = vld [vmem:[#allocation136_spill] sm:$0xff] }
 0x261   : > { %v2131_v32 = vsel %vm9379_vm14, %v2098_v28, %v9378_v37  ;;  %v2033_v18 = vsel %vm9381_vm10, %v2001_v33, %v9380_v62  ;;  %vm9384_vm15 = vmmov %vm9372_vm13  ;;  %v1934_v38 = vpop.permute.xlu0 %1933  ;;  %v1843_v4 = vpop.permute.xlu1 %1842  ;;  %v9435_v37 = vld [vmem:[#allocation20_spill] sm:$0xff]  ;;  %v9437_v62 = vld [vmem:[#allocation23_spill] sm:$0xff] }
 0x262   : > { %v2164_v16 = vsel %vm9382_vm0, %v2131_v32, %v1748_v1  ;;  %v2066_v10 = vsel %vm9384_vm15, %v2033_v18, %v9383_v48  ;;  %vm9387_vm13 = vmmov %vm9374_vm9  ;;  %vm9388_vm9 = vcmask 261120   ;;  %v9440_v48 = vld [vmem:[#allocation171_spill] sm:$0xff] }
 0x263   : > { %v2197_v21 = vsel %vm9385_vm11, %v2164_v16, %v1841_v60  ;;  %v2099_v56 = vsel %vm9387_vm13, %v2066_v10, %v9386_v23  ;;  %vm9390_vm12 = vmmov %vm9379_vm14  ;;  %vm9391_vm14 = vcmask 293888   ;;  %v9429_v60 = vld [vmem:[#allocation135_spill] sm:$0xff] }
 0x264   : > { %v2230_v46 = vsel %vm9388_vm9, %v2197_v21, %v1934_v38  ;;  %v2132_v30 = vsel %vm9390_vm12, %v2099_v56, %v9389_v39  ;;  %vm9392_vm10 = vmmov %vm9382_vm0  ;;  %vm9402_vm12 = vcmask 97280   ;;  %v9442_v21 = vld [vmem:[#allocation173_spill] sm:$0xff]  ;;  %v9447_v56 = vld [vmem:[#allocation191_spill] sm:$0xff] }
 0x265   : > { %4639 = vmatprep.mubr.msk.f32.mxu0 %vm9391_vm14, %v2230_v46  ;;  %v2165_v43 = vsel %vm9392_vm10, %v2132_v30, %v1750_v15  ;;  %vm9393_vm0 = vmmov %vm9385_vm11  ;;  %v1752_v7 = vpop.permute.xlu0 %1751  ;;  %v1936_v31 = vpop.permute.xlu1 %1935  ;;  %vm9397_vm11 = vcmask 31744  }
 0x266   : > { %v2198_v13 = vsel %vm9393_vm0, %v2165_v43, %v1843_v4  ;;  %vm9394_vm15 = vmmov %vm9388_vm9  ;;  %v2002_v22 = vsel %vm9397_vm11, %v9396_v25, %v9395_v61  ;;  %vm9400_vm9 = vcmask 64512   ;;  %vm9409_vm0 = vcmask 162816   ;;  %v9445_v4 = vld [vmem:[#allocation189_spill] sm:$0xff]  ;;  %v6850_v25 = vld [vmem:[%s8478_s2] ss:$0 sm:$0xff] }
 0x267   : > { %v2231_v3 = vsel %vm9394_vm15, %v2198_v13, %v1936_v31  ;;  %vm9398_vm13 = vmmov %vm9391_vm14  ;;  %v2034_v2 = vsel %vm9400_vm9, %v2002_v22, %v9399_v14  ;;  %vm9404_vm14 = vcmask 130048  }
 0x268   : > { %4640 = vmatmul.mubr.msk.f32.gmra.mrb[26].mxu0 %vm9398_vm13, %v2231_v3  ;;  %v2067_v47 = vsel %vm9402_vm12, %v2034_v2, %v9401_v26  ;;  %vm9407_vm10 = vmmov %vm9397_vm11  ;;  %vm9412_vm11 = vcmask 195584  }
 0x269   : > { %v1845_v27 = vpop.permute.xlu0 %1844  ;;  %v1754_v0 = vpop.permute.xlu1 %1753  ;;  %v2100_v53 = vsel %vm9404_vm14, %v2067_v47, %v9403_v45  ;;  %v2003_v50 = vsel %vm9407_vm10, %v9406_v52, %v9405_v12  ;;  %vm9411_vm15 = vmmov %vm9400_vm9  ;;  %vm9415_vm9 = vcmask 228352  }
 0x26a   : > { %v2133_v55 = vsel %vm9409_vm0, %v2100_v53, %v9408_v19  ;;  %v2035_v57 = vsel %vm9411_vm15, %v2003_v50, %v9410_v34  ;;  %vm9414_vm13 = vmmov %vm9402_vm12  ;;  %vm9424_vm15 = vcmask 31744  }
 0x26b   : > { %v2166_v41 = vsel %vm9412_vm11, %v2133_v55, %v1752_v7  ;;  %v2068_v9 = vsel %vm9414_vm13, %v2035_v57, %v9413_v63  ;;  %vm9417_vm12 = vmmov %vm9404_vm14  ;;  %vm9418_vm14 = vcmask 261120   ;;  %v2004_v59 = vsel %vm9424_vm15, %v9423_v49, %v9422_v51 }
 0x26c   : > { %v2199_v5 = vsel %vm9415_vm9, %v2166_v41, %v1845_v27  ;;  %v2101_v42 = vsel %vm9417_vm12, %v2068_v9, %v9416_v35  ;;  %vm9420_vm10 = vmmov %vm9409_vm0  ;;  %vm9421_vm0 = vcmask 293888   ;;  %vm9428_vm13 = vcmask 195584  }
 0x26d   : > { %v1938_v40 = vpop.permute.xlu0 %1937  ;;  %v1847_v20 = vpop.permute.xlu1 %1846  ;;  %v2134_v11 = vsel %vm9420_vm10, %v2101_v42, %v9419_v8  ;;  %vm9427_vm11 = vmmov %vm9424_vm15  ;;  %vm9430_vm9 = vcmask 64512   ;;  %vm9436_vm10 = vcmask 97280   ;;  %vm9439_vm15 = vcmask 261120  }
 0x26e   : > { %v2232_v1 = vsel %vm9418_vm14, %v2199_v5, %v1938_v40  ;;  %v2005_v54 = vsel %vm9427_vm11, %v9426_v6, %v9425_v36  ;;  %v2167_v44 = vsel %vm9428_vm13, %v2134_v11, %v1754_v0  ;;  %v2036_v15 = vsel %vm9430_vm9, %v2004_v59, %v9429_v60  ;;  %vm9432_vm12 = vmmov %vm9430_vm9 }
 0x26f   : > { %4642 = vmatprep.mubr.msk.f32.mxu0 %vm9421_vm0, %v2232_v1  ;;  %v2037_v28 = vsel %vm9432_vm12, %v2005_v54, %v9431_v17  ;;  %vm9433_vm14 = vcmask 228352   ;;  %v2069_v32 = vsel %vm9436_vm10, %v2036_v15, %v9435_v37  ;;  %vm9438_vm0 = vmmov %vm9436_vm10  ;;  %vm9441_vm11 = vcmask 130048  }
 0x270   : > { %v2200_v24 = vsel %vm9433_vm14, %v2167_v44, %v1847_v20  ;;  %v2070_v18 = vsel %vm9438_vm0, %v2037_v28, %v9437_v62  ;;  %v2102_v10 = vsel %vm9441_vm11, %v2069_v32, %v9440_v48  ;;  %vm9443_vm13 = vmmov %vm9441_vm11  ;;  %vm9444_vm9 = vcmask 293888  }
 0x271   : > { %v6813_v29 = vpop.permute.xlu0 %1755  ;;  %v1940_v33 = vpop.permute.xlu1 %1939  ;;  %v2103_v38 = vsel %vm9443_vm13, %v2070_v18, %v9442_v21  ;;  %vm9446_vm12 = vcmask 162816   ;;  %vm9451_vm10 = vcmask 195584   ;;  %vm9455_vm13 = vcmask 261120  }
 0x272   : > { %9434 = vst [vmem:[#allocation25_spill] sm:$0xff] %v6813_v29  ;;  %v2233_v16 = vsel %vm9439_vm15, %v2200_v24, %v1940_v33  ;;  %v2135_v23 = vsel %vm9446_vm12, %v2102_v10, %v9445_v4  ;;  %vm9448_vm14 = vmmov %vm9446_vm12  ;;  %vm9453_vm15 = vcmask 228352   ;;  %vm9457_vm12 = vcmask 293888  }
 0x273   : > { %4643 = vmatmul.mubr.msk.f32.gmra.mrb[28].mxu0 %vm9444_vm9, %v2233_v16  ;;  %v2136_v46 = vsel %vm9448_vm14, %v2103_v38, %v9447_v56  ;;  %v2168_v43 = vsel %vm9451_vm10, %v2135_v23, %v6813_v29  ;;  %vm9452_vm0 = vmmov %vm9451_vm10  ;;  %vm9470_vm10 = vcmask 1046528  }
 0x274   : > { %v2169_v13 = vsel %vm9452_vm0, %v2136_v46, %v6813_v29  ;;  %vm9454_vm11 = vmmov %vm9453_vm15 }
 0x275   : > { %v6829_v39 = vpop.permute.xlu1 %1848  ;;  %v6831_v30 = vpop.permute.xlu0 %1941  ;;  %vm9456_vm9 = vmmov %vm9455_vm13 }
 0x276   : > { %9449 = vst [vmem:[#allocation105_spill] sm:$0xff] %v6829_v39  ;;  %9450 = vst [vmem:[#allocation31_spill] sm:$0xff] %v6831_v30  ;;  %v2201_v7 = vsel %vm9453_vm15, %v2168_v43, %v6829_v39  ;;  %v2202_v31 = vsel %vm9454_vm11, %v2169_v13, %v6829_v39  ;;  %v9503_v39 = vld [vmem:[#allocation15_spill] sm:$0xff] }
 0x277   : > { %v2234_v3 = vsel %vm9455_vm13, %v2201_v7, %v6831_v30  ;;  %v2235_v61 = vsel %vm9456_vm9, %v2202_v31, %v6831_v30  ;;  %vm9458_vm14 = vmmov %vm9457_vm12 }
 0x278   : > { %4645 = vmatprep.mubr.msk.f32.mxu0 %vm9457_vm12, %v2234_v3  ;;  %vm9473_vm0 = vmmov %vm9470_vm10 }
 0x279   : > { %4646 = vmatmul.mubr.msk.f32.gmra.mrb[30].mxu0 %vm9458_vm14, %v2235_v61  ;;  %vm9474_vm15 = vmmov %vm9473_vm0 }
 0x27a   : > { %vm9478_vm11 = vmmov %vm9473_vm0 }
 0x27b   : > { %vm9482_vm13 = vmmov %vm9473_vm0 }
 0x27c   : > { %vm9483_vm9 = vmmov %vm9473_vm0 }
 0x27d   : > { %vm9486_vm12 = vmmov %vm9473_vm0 }
 0x27e   : > { %vm9489_vm14 = vmmov %vm9473_vm0 }
 0x2cc   : > { %v4602_v22 = vpop.f32.mrb[0].mxu0 }
 0x2cd   : > { %v2421_v14 = vadd.f32 %v4602_v22, %v6850_v25  ;;  %v2415_v2 = vpop.f32.mrb[1].mxu0 }
 0x2ce   : > { %v2416_v26 = vadd.f32 %v6850_v25, %v2415_v2 }
 0x2cf   : > { %v6854_v47 = vmax.f32 %v2421_v14, 0.0 }
 0x2d0   : > { %v6856_v27 = vmax.f32 %v2416_v26, 0.0 }
 0x2d1   : > { %2896 = vrot.lane.b32.xlu0 %v6854_v47, %s4809_s20 }
 0x2d2   : > { %2894 = vrot.lane.b32.xlu1 %v6856_v27, %s4809_s20 }
 0x2d4   : > { %v4605_v0 = vpop.f32.mrb[2].mxu0 }
 0x2d5   : > { %v2431_v45 = vadd.f32 %v4605_v0, %v6850_v25  ;;  %v2425_v53 = vpop.f32.mrb[3].mxu0 }
 0x2d6   : > { %v2426_v12 = vadd.f32 %v6850_v25, %v2425_v53 }
 0x2d7   : > { %v6864_v52 = vmax.f32 %v2431_v45, 0.0 }
 0x2d8   : > { %v6866_v50 = vmax.f32 %v2426_v12, 0.0 }
 0x2d9   : > { %2900 = vrot.lane.b32.xlu0 %v6864_v52, %s4809_s20 }
 0x2da   : > { %2898 = vrot.lane.b32.xlu1 %v6866_v50, %s4809_s20 }
 0x2db   : > { %v4608_v19 = vpop.f32.mrb[4].mxu0 }
 0x2dc   : > { %v2441_v55 = vadd.f32 %v4608_v19, %v6850_v25  ;;  %v2435_v34 = vpop.f32.mrb[5].mxu0 }
 0x2dd   : > { %v2436_v57 = vadd.f32 %v6850_v25, %v2435_v34 }
 0x2de   : > { %v6874_v41 = vmax.f32 %v2441_v55, 0.0 }
 0x2df   : > { %v6876_v63 = vmax.f32 %v2436_v57, 0.0 }
 0x2e0   : > { %2904 = vrot.lane.b32.xlu0 %v6874_v41, %s4809_s20 }
 0x2e1   : > { %2902 = vrot.lane.b32.xlu1 %v6876_v63, %s4809_s20 }
 0x2e3   : > { %v4611_v9 = vpop.f32.mrb[6].mxu0 }
 0x2e4   : > { %v2451_v5 = vadd.f32 %v4611_v9, %v6850_v25  ;;  %v2445_v40 = vpop.f32.mrb[7].mxu0 }
 0x2e5   : > { %v2446_v20 = vadd.f32 %v6850_v25, %v2445_v40 }
 0x2e6   : > { %v6884_v35 = vmax.f32 %v2451_v5, 0.0 }
 0x2e7   : > { %v6886_v42 = vmax.f32 %v2446_v20, 0.0 }
 0x2e8   : > { %2908 = vrot.lane.b32.xlu0 %v6884_v35, %s4809_s20 }
 0x2e9   : > { %2906 = vrot.lane.b32.xlu1 %v6886_v42, %s4809_s20 }
 0x2ec   : > { %v4614_v1 = vpop.f32.mrb[8].mxu0 }
 0x2ed   : > { %v2461_v8 = vadd.f32 %v4614_v1, %v6850_v25  ;;  %v2455_v11 = vpop.f32.mrb[9].mxu0 }
 0x2ee   : > { %v2456_v51 = vadd.f32 %v6850_v25, %v2455_v11 }
 0x2ef   : > { %v6894_v49 = vmax.f32 %v2461_v8, 0.0 }
 0x2f0   : > { %v6896_v59 = vmax.f32 %v2456_v51, 0.0 }
 0x2f1   : > { %2912 = vrot.lane.b32.xlu0 %v6894_v49, %s4809_s20 }
 0x2f2   : > { %2910 = vrot.lane.b32.xlu1 %v6896_v59, %s4809_s20 }
 0x2f5   : > { %v4617_v36 = vpop.f32.mrb[10].mxu0 }
 0x2f6   : > { %v2471_v6 = vadd.f32 %v4617_v36, %v6850_v25  ;;  %v2465_v54 = vpop.f32.mrb[11].mxu0 }
 0x2f7   : > { %v2466_v44 = vadd.f32 %v6850_v25, %v2465_v54 }
 0x2f8   : > { %v6904_v60 = vmax.f32 %v2471_v6, 0.0 }
 0x2f9   : > { %v6906_v15 = vmax.f32 %v2466_v44, 0.0 }
 0x2fa   : > { %2916 = vrot.lane.b32.xlu0 %v6904_v60, %s4809_s20 }
 0x2fb   : > { %2914 = vrot.lane.b32.xlu1 %v6906_v15, %s4809_s20 }
 0x2fe   : > { %v4620_v17 = vpop.f32.mrb[12].mxu0 }
 0x2ff   : > { %v2481_v28 = vadd.f32 %v4620_v17, %v6850_v25  ;;  %v2475_v24 = vpop.f32.mrb[13].mxu0 }
 0x300   : > { %v2476_v33 = vadd.f32 %v6850_v25, %v2475_v24 }
 0x301   : > { %v6914_v37 = vmax.f32 %v2481_v28, 0.0 }
 0x302   : > { %v6916_v32 = vmax.f32 %v2476_v33, 0.0 }
 0x303   : > { %2920 = vrot.lane.b32.xlu0 %v6914_v37, %s4809_s20 }
 0x304   : > { %2918 = vrot.lane.b32.xlu1 %v6916_v32, %s4809_s20 }
 0x307   : > { %v4623_v62 = vpop.f32.mrb[14].mxu0 }
 0x308   : > { %v2491_v18 = vadd.f32 %v4623_v62, %v6850_v25  ;;  %v2485_v16 = vpop.f32.mrb[15].mxu0  ;;  %v2769_v62 = vrot.slane %v6866_v50, 1 }
 0x309   : > { %v2486_v48 = vadd.f32 %v6850_v25, %v2485_v16 }
 0x30a   : > { %v6924_v10 = vmax.f32 %v2491_v18, 0.0 }
 0x30b   : > { %v6926_v21 = vmax.f32 %v2486_v48, 0.0  ;;  %v2767_v48 = vrot.slane %v6854_v47, 1 }
 0x30c   : > { %2924 = vrot.lane.b32.xlu0 %v6924_v10, %s4809_s20 }
 0x30d   : > { %2922 = vrot.lane.b32.xlu1 %v6926_v21, %s4809_s20 }
 0x310   : > { %v4626_v38 = vpop.f32.mrb[16].mxu0 }
 0x311   : > { %v2501_v4 = vadd.f32 %v4626_v38, %v6850_v25  ;;  %v2495_v23 = vpop.f32.mrb[17].mxu0 }
 0x312   : > { %v2496_v56 = vadd.f32 %v6850_v25, %v2495_v23  ;;  %v2766_v23 = vrot.slane %v6856_v27, 1 }
 0x313   : > { %v6934_v46 = vmax.f32 %v2501_v4, 0.0  ;;  %v2770_v4 = vsel %vm9470_vm10, %v2767_v48, %v2769_v62  ;;  %vm9492_vm10 = vmmov %vm9473_vm0 }
 0x314   : > { %v6936_v43 = vmax.f32 %v2496_v56, 0.0  ;;  %v2773_v56 = vrot.slane %v6876_v63, 1 }
 0x315   : > { %2928 = vrot.lane.b32.xlu0 %v6934_v46, %s4809_s20 }
 0x316   : > { %2926 = vrot.lane.b32.xlu1 %v6936_v43, %s4809_s20 }
 0x319   : > { %v4629_v13 = vpop.f32.mrb[18].mxu0 }
 0x31a   : > { %v2511_v7 = vadd.f32 %v4629_v13, %v6850_v25  ;;  %v2505_v31 = vpop.f32.mrb[19].mxu0 }
 0x31b   : > { %v2506_v3 = vadd.f32 %v6850_v25, %v2505_v31 }
 0x31c   : > { %v6944_v61 = vmax.f32 %v2511_v7, 0.0 }
 0x31d   : > { %v6946_v22 = vmax.f32 %v2506_v3, 0.0  ;;  %v2771_v3 = vrot.slane %v6864_v52, 1 }
 0x31e   : > { %9459 = vst [vmem:[#allocation42_spill] sm:$0xff] %v6944_v61  ;;  %2932 = vrot.lane.b32.xlu0 %v6944_v61, %s4809_s20 }
 0x31f   : > { %2930 = vrot.lane.b32.xlu1 %v6946_v22, %s4809_s20 }
 0x322   : > { %v4632_v14 = vpop.f32.mrb[20].mxu0 }
 0x323   : > { %v2521_v2 = vadd.f32 %v4632_v14, %v6850_v25  ;;  %v2515_v26 = vpop.f32.mrb[21].mxu0 }
 0x324   : > { %v2516_v0 = vadd.f32 %v6850_v25, %v2515_v26  ;;  %v7012_v26 = vsel %vm5029_vm1, %v2770_v4, 0.0  ;;  %vm9477_vm1 = vmmov %vm9473_vm0  ;;  %v2783_v4 = vrot.slane %v6894_v49, 1 }
 0x325   : > { %v6954_v45 = vmax.f32 %v2521_v2, 0.0 }
 0x326   : > { %v6956_v53 = vmax.f32 %v2516_v0, 0.0 }
 0x327   : > { %9460 = vst [vmem:[#allocation32_spill] sm:$0xff] %v6954_v45  ;;  %2936 = vrot.lane.b32.xlu0 %v6954_v45, %s4809_s20  ;;  %v2807_v30 = vrot.slane %v6954_v45, 1  ;;  %v2653_v45 = vrot.slane %v6896_v59, 7 }
 0x328   : > { %9461 = vst [vmem:[#allocation38_spill] sm:$0xff] %v6956_v53  ;;  %2934 = vrot.lane.b32.xlu1 %v6956_v53, %s4809_s20 }
 0x32a   : > { %v4635_v12 = vpop.f32.mrb[22].mxu0 }
 0x32b   : > { %v2531_v19 = vadd.f32 %v4635_v12, %v6850_v25  ;;  %v2525_v55 = vpop.f32.mrb[23].mxu0  ;;  %v7019_v12 = vsel %vm9473_vm0, %v2766_v23, %v2767_v48  ;;  %v2785_v48 = vrot.slane %v6906_v15, 1 }
 0x32c   : > { %v2526_v34 = vadd.f32 %v6850_v25, %v2525_v55  ;;  %v2777_v55 = vrot.slane %v6886_v42, 1 }
 0x32d   : > { %v6964_v57 = vmax.f32 %v2531_v19, 0.0  ;;  %v2774_v19 = vsel %vm9474_vm15, %v2771_v3, %v2773_v56  ;;  %vm9497_vm15 = vmmov %vm9473_vm0 }
 0x32e   : > { %v6966_v9 = vmax.f32 %v2526_v34, 0.0 }
 0x32f   : > { %9462 = vst [vmem:[#allocation106_spill] sm:$0xff] %v6964_v57  ;;  %2940 = vrot.lane.b32.xlu0 %v6964_v57, %s4809_s20  ;;  %v2811_v29 = vrot.slane %v6964_v57, 1  ;;  %v2649_v57 = vrot.slane %v6886_v42, 7 }
 0x330   : > { %9463 = vst [vmem:[#allocation36_spill] sm:$0xff] %v6966_v9  ;;  %2938 = vrot.lane.b32.xlu1 %v6966_v9, %s4809_s20 }
 0x332   : > { %v4638_v5 = vpop.f32.mrb[24].mxu0 }
 0x333   : > { %v2541_v40 = vadd.f32 %v4638_v5, %v6850_v25  ;;  %v2535_v20 = vpop.f32.mrb[25].mxu0 }
 0x334   : > { %v2536_v1 = vadd.f32 %v6850_v25, %v2535_v20  ;;  %v7031_v20 = vsel %vm5048_vm2, %v2774_v19, 0.0  ;;  %vm9479_vm2 = vmmov %vm9473_vm0 }
 0x335   : > { %v6974_v8 = vmax.f32 %v2541_v40, 0.0  ;;  %v2791_v40 = vrot.slane %v6914_v37, 1 }
 0x336   : > { %v6976_v11 = vmax.f32 %v2536_v1, 0.0 }
 0x337   : > { %9464 = vst [vmem:[#allocation37_spill] sm:$0xff] %v6974_v8  ;;  %2944 = vrot.lane.b32.xlu0 %v6974_v8, %s4809_s20 }
 0x338   : > { %9465 = vst [vmem:[#allocation26_spill] sm:$0xff] %v6976_v11  ;;  %2942 = vrot.lane.b32.xlu1 %v6976_v11, %s4809_s20 }
 0x33b   : > { %v4641_v51 = vpop.f32.mrb[26].mxu0 }
 0x33c   : > { %v2551_v36 = vadd.f32 %v4641_v51, %v6850_v25  ;;  %v2545_v6 = vpop.f32.mrb[27].mxu0  ;;  %v7037_v51 = vsel %vm9477_vm1, %v2769_v62, %v2771_v3  ;;  %v2787_v3 = vrot.slane %v6904_v60, 1 }
 0x33d   : > { %v2546_v54 = vadd.f32 %v6850_v25, %v2545_v6  ;;  %v2781_v6 = vrot.slane %v6896_v59, 1 }
 0x33e   : > { %v6984_v44 = vmax.f32 %v2551_v36, 0.0 }
 0x33f   : > { %v6986_v17 = vmax.f32 %v2546_v54, 0.0  ;;  %v2779_v54 = vrot.slane %v6884_v35, 1 }
 0x340   : > { %9466 = vst [vmem:[#allocation40_spill] sm:$0xff] %v6984_v44  ;;  %2948 = vrot.lane.b32.xlu0 %v6984_v44, %s4809_s20 }
 0x341   : > { %9467 = vst [vmem:[#allocation48_spill] sm:$0xff] %v6986_v17  ;;  %2946 = vrot.lane.b32.xlu1 %v6986_v17, %s4809_s20 }
 0x346   : > { %v4644_v28 = vpop.f32.mrb[28].mxu0 }
 0x347   : > { %v2561_v24 = vadd.f32 %v4644_v28, %v6850_v25  ;;  %v2555_v33 = vpop.f32.mrb[29].mxu0 }
 0x348   : > { %v2556_v18 = vadd.f32 %v6850_v25, %v2555_v33 }
 0x349   : > { %v6995_v16 = vmax.f32 %v2561_v24, 0.0 }
 0x34a   : > { %v6998_v38 = vmax.f32 %v2556_v18, 0.0  ;;  %v2782_v18 = vsel %vm9483_vm9, %v2779_v54, %v2781_v6  ;;  %vm9508_vm9 = vmmov %vm9473_vm0 }
 0x34b   : > { %9468 = vst [vmem:[#allocation41_spill] sm:$0xff] %v6995_v16  ;;  %2952 = vrot.lane.b32.xlu0 %v6995_v16, %s4809_s20 }
 0x34c   : > { %9469 = vst [vmem:[#allocation52_spill] sm:$0xff] %v6998_v38  ;;  %v4647_v13 = vpop.f32.mrb[30].mxu0  ;;  %2950 = vrot.lane.b32.xlu1 %v6998_v38, %s4809_s20 }
 0x34d   : > { %v2571_v7 = vadd.f32 %v4647_v13, %v6850_v25  ;;  %v2565_v31 = vpop.f32.mrb[31].mxu0  ;;  %v7067_v13 = vsel %vm5086_vm4, %v2782_v18, 0.0  ;;  %vm9488_vm4 = vmmov %vm9473_vm0  ;;  %v2797_v18 = vrot.slane %v6936_v43, 1 }
 0x34e   : > { %v2566_v14 = vadd.f32 %v6850_v25, %v2565_v31  ;;  %v2775_v25 = vrot.slane %v6874_v41, 1  ;;  %v2789_v31 = vrot.slane %v6916_v32, 1  ;;  %v7086_v19 = vsel %vm9488_vm4, %v2781_v6, %v2783_v4  ;;  %vm9514_vm4 = vmmov %vm9473_vm0 }
 0x34f   : > { %v7014_v0 = vmax.f32 %v2571_v7, 0.0  ;;  %3016 = vrot.lane.b32.xlu0 %v7012_v26, %s4810_s25 }
 0x350   : > { %v7023_v34 = vmax.f32 %v2566_v14, 0.0  ;;  %3014 = vrot.lane.b32.xlu1 %v7019_v12, %s4810_s25  ;;  %v2778_v36 = vsel %vm9478_vm11, %v2775_v25, %v2777_v55  ;;  %v7058_v62 = vsel %vm9482_vm13, %v2773_v56, %v2775_v25  ;;  %v2786_v56 = vsel %vm9486_vm12, %v2783_v4, %v2785_v48  ;;  %vm9502_vm11 = vmmov %vm9473_vm0 }
 0x351   : > { %9472 = vst [vmem:[#allocation111_spill] sm:$0xff] %v7014_v0  ;;  %v8635_v5 = vrot.slane %v7014_v0, 1  ;;  %v7053_v33 = vsel %vm5067_vm3, %v2778_v36, 0.0  ;;  %vm9485_vm3 = vmmov %vm9473_vm0  ;;  %v7081_v2 = vsel %vm5105_vm5, %v2786_v56, 0.0  ;;  %v2793_v25 = vrot.slane %v6926_v21, 1 }
 0x352   : > { %9475 = vst [vmem:[#allocation112_spill] sm:$0xff] %v7023_v34  ;;  %v8636_v1 = vrot.slane %v7023_v34, 1  ;;  %v7072_v7 = vsel %vm9485_vm3, %v2777_v55, %v2779_v54  ;;  %v2790_v55 = vsel %vm9489_vm14, %v2787_v3, %v2789_v31  ;;  %vm9491_vm5 = vmmov %vm9473_vm0  ;;  %v2795_v4 = vrot.slane %v6924_v10, 1 }
 0x353   : > { %3020 = vrot.lane.b32.xlu0 %v7031_v20, %s4810_s25  ;;  %v7095_v54 = vsel %vm5124_vm6, %v2790_v55, 0.0  ;;  %v7100_v24 = vsel %vm9491_vm5, %v2785_v48, %v2787_v3  ;;  %v2794_v6 = vsel %vm9492_vm10, %v2791_v40, %v2793_v25  ;;  %vm9494_vm6 = vmmov %vm9473_vm0  ;;  %v2801_v3 = vrot.slane %v6946_v22, 1 }
 0x354   : > { %3018 = vrot.lane.b32.xlu1 %v7037_v51, %s4810_s25  ;;  %v7049_v28 = vsel %vm9479_vm2, %v8636_v1, %v8635_v5  ;;  %v7109_v56 = vsel %vm5142_vm7, %v2794_v6, 0.0  ;;  %v7114_v14 = vsel %vm9494_vm6, %v2789_v31, %v2791_v40  ;;  %v2798_v48 = vsel %vm9473_vm0, %v2795_v4, %v2797_v18  ;;  %vm9496_vm7 = vmmov %vm9473_vm0  ;;  %v9498_v1 = vld [vmem:[#allocation12_spill] sm:$0xff] }
 0x355   : > { %9480 = vst [vmem:[#allocation137_spill] sm:$0xff] %v7049_v28  ;;  %v2799_v55 = vrot.slane %v6934_v46, 1  ;;  %v7123_v23 = vsel %vm5160_vm8, %v2798_v48, 0.0  ;;  %v7128_v6 = vsel %vm9496_vm7, %v2793_v25, %v2795_v4  ;;  %v2805_v40 = vrot.slane %v6956_v53, 1  ;;  %vm9501_vm8 = vmmov %vm9473_vm0  ;;  %v9509_v28 = vld [vmem:[#allocation18_spill] sm:$0xff] }
 0x356   : > { %v2803_v5 = vrot.slane %v6944_v61, 1  ;;  %vm9499_vm1 = vnez %v9498_v1  ;;  %v2809_v4 = vrot.slane %v6966_v9, 1  ;;  %vm9504_vm2 = vnez %v9503_v39  ;;  %vm9506_vm13 = vmmov %vm9473_vm0 }
 0x357   : > { %3024 = vrot.lane.b32.xlu0 %v7053_v33, %s4810_s25  ;;  %v2802_v31 = vsel %vm9497_vm15, %v2799_v55, %v2801_v3  ;;  %v7142_v48 = vsel %vm9501_vm8, %v2797_v18, %v2799_v55  ;;  %v2813_v55 = vrot.slane %v6976_v11, 1  ;;  %vm9510_vm3 = vnez %v9509_v28  ;;  %vm9512_vm12 = vmmov %vm9473_vm0  ;;  %v9515_v11 = vld [vmem:[#allocation21_spill] sm:$0xff] }
 0x358   : > { %3022 = vrot.lane.b32.xlu1 %v7058_v62, %s4810_s25  ;;  %v7137_v36 = vsel %vm9499_vm1, %v2802_v31, 0.0  ;;  %v2806_v25 = vsel %vm9502_vm11, %v2803_v5, %v2805_v40  ;;  %v7156_v31 = vsel %vm9506_vm13, %v2801_v3, %v2803_v5  ;;  %v2810_v18 = vsel %vm9508_vm9, %v2807_v30, %v2809_v4  ;;  %vm9518_vm5 = vmmov %vm9473_vm0 }
 0x359   : > { %9500 = vst [vmem:[#allocation139_spill] sm:$0xff] %v7137_v36  ;;  %v7151_v1 = vsel %vm9504_vm2, %v2806_v25, 0.0  ;;  %9507 = vst [vmem:[#allocation29_spill] sm:$0xff] %v7156_v31  ;;  %v7165_v39 = vsel %vm9510_vm3, %v2810_v18, 0.0  ;;  %v7170_v25 = vsel %vm9512_vm12, %v2805_v40, %v2807_v30  ;;  %v2814_v5 = vsel %vm9514_vm4, %v2811_v29, %v2813_v55 }
 0x35a   : > { %9505 = vst [vmem:[#allocation27_spill] sm:$0xff] %v7151_v1  ;;  %9511 = vst [vmem:[#allocation45_spill] sm:$0xff] %v7165_v39  ;;  %v2817_v3 = vrot.slane %v6986_v17, 1  ;;  %v2815_v0 = vrot.slane %v6974_v8, 1  ;;  %vm9516_vm14 = vnez %v9515_v11  ;;  %v7184_v18 = vsel %vm9518_vm5, %v2809_v4, %v2811_v29  ;;  %v9521_v8 = vld [vmem:[#allocation24_spill] sm:$0xff] }
 0x35b   : > { %3028 = vrot.lane.b32.xlu0 %v7067_v13, %s4810_s25  ;;  %9513 = vst [vmem:[#allocation53_spill] sm:$0xff] %v7170_v25  ;;  %v7179_v28 = vsel %vm9516_vm14, %v2814_v5, 0.0  ;;  %9519 = vst [vmem:[#allocation57_spill] sm:$0xff] %v7184_v18  ;;  %v2821_v40 = vrot.slane %v6998_v38, 1  ;;  %v2819_v17 = vrot.slane %v6984_v44, 1  ;;  %vm9522_vm6 = vnez %v9521_v8  ;;  %v9526_v38 = vld [vmem:[#allocation28_spill] sm:$0xff] }
 0x35c   : > { %3026 = vrot.lane.b32.xlu1 %v7072_v7, %s4810_s25  ;;  %9517 = vst [vmem:[#allocation46_spill] sm:$0xff] %v7179_v28  ;;  %vm9520_vm10 = vmmov %vm9473_vm0  ;;  %v7198_v5 = vsel %vm9473_vm0, %v2813_v55, %v2815_v0  ;;  %v2823_v4 = vrot.slane %v6995_v16, 1  ;;  %vm9527_vm15 = vnez %v9526_v38  ;;  %v7219_v16 = vpop.permute.xlu0 %2896  ;;  %v2639_v38 = vrot.slane %v6854_v47, 7 }
 0x35d   : > { %v2818_v30 = vsel %vm9520_vm10, %v2815_v0, %v2817_v3  ;;  %9524 = vst [vmem:[#allocation114_spill] sm:$0xff] %v7198_v5  ;;  %vm9525_vm7 = vmmov %vm9473_vm0  ;;  %v9531_v0 = vrot.slane %v7023_v34, 1  ;;  %vm9538_vm13 = vcmask 1040384   ;;  %v2651_v9 = vrot.slane %v6884_v35, 7 }
 0x35e   : > { %v7193_v11 = vsel %vm9522_vm6, %v2818_v30, 0.0  ;;  %v2822_v29 = vsel %vm9525_vm7, %v2819_v17, %v2821_v40  ;;  %vm9529_vm1 = vmmov %vm9473_vm0  ;;  %v2638_v30 = vrot.slane %v6856_v27, 7  ;;  %v2657_v53 = vrot.slane %v6906_v15, 7 }
 0x35f   : > { %3032 = vrot.lane.b32.xlu0 %v7081_v2, %s4810_s25  ;;  %9523 = vst [vmem:[#allocation113_spill] sm:$0xff] %v7193_v11  ;;  %v7206_v44 = vsel %vm9527_vm15, %v2822_v29, 0.0  ;;  %v7211_v8 = vsel %vm9529_vm1, %v2817_v3, %v2819_v17  ;;  %vm9532_vm8 = vmmov %vm9473_vm0  ;;  %v7222_v29 = vpop.permute.xlu1 %2894  ;;  %v8696_v61 = vrot.slane %v6926_v21, 7 }
 0x360   : > { %3030 = vrot.lane.b32.xlu1 %v7086_v19, %s4810_s25  ;;  %9528 = vst [vmem:[#allocation138_spill] sm:$0xff] %v7206_v44  ;;  %9530 = vst [vmem:[#allocation141_spill] sm:$0xff] %v7211_v8  ;;  %v2826_v55 = vsel %vm9532_vm8, %v2823_v4, %v9531_v0  ;;  %v2733_v3 = vsel %vm9538_vm13, 0.0, %v2638_v30  ;;  %v2641_v0 = vrot.slane %v6866_v50, 7  ;;  %v7237_v34 = vpop.permute.xlu0 %2900 }
 0x361   : > { %vm9536_vm2 = vmmov %vm9473_vm0 }
 0x362   : > { %v7231_v17 = vsel %vm9536_vm2, %v2821_v40, %v2823_v4  ;;  %vm9539_vm9 = vmmov %vm9538_vm13 }
 0x363   : > { %3036 = vrot.lane.b32.xlu0 %v7095_v54, %s4810_s25  ;;  %9537 = vst [vmem:[#allocation43_spill] sm:$0xff] %v7231_v17  ;;  %vm9542_vm12 = vmmov %vm9539_vm9 }
 0x364   : > { %3034 = vrot.lane.b32.xlu1 %v7100_v24, %s4810_s25  ;;  %v2642_v4 = vsel %vm9542_vm12, %v2639_v38, %v2641_v0  ;;  %vm9544_vm4 = vmmov %vm9539_vm9 }
 0x365   : > { %vm9548_vm5 = vmmov %vm9544_vm4 }
 0x366   : > { %vm9550_vm10 = vmmov %vm9544_vm4 }
 0x367   : > { %3040 = vrot.lane.b32.xlu0 %v7109_v56, %s4810_s25  ;;  %vm9554_vm0 = vmmov %vm9544_vm4 }
 0x368   : > { %3038 = vrot.lane.b32.xlu1 %v7114_v14, %s4810_s25  ;;  %vm9556_vm7 = vmmov %vm9554_vm0 }
 0x369   : > { %vm9560_vm1 = vmmov %vm9554_vm0 }
 0x36a   : > { %vm9562_vm8 = vmmov %vm9554_vm0 }
 0x36b   : > { %3044 = vrot.lane.b32.xlu0 %v7123_v23, %s4810_s25  ;;  %vm9566_vm2 = vmmov %vm9554_vm0 }
 0x36c   : > { %3042 = vrot.lane.b32.xlu1 %v7128_v6, %s4810_s25  ;;  %vm9568_vm13 = vmmov %vm9554_vm0 }
 0x36d   : > { %vm9576_vm12 = vmmov %vm9554_vm0 }
 0x36f   : > { %3048 = vrot.lane.b32.xlu0 %v7137_v36, %s4810_s25  ;;  %v9585_v36 = vld [vmem:[#allocation69_spill] sm:$0xff] }
 0x370   : > { %3046 = vrot.lane.b32.xlu1 %v7142_v48, %s4810_s25 }
 0x373   : > { %3052 = vrot.lane.b32.xlu0 %v7151_v1, %s4810_s25 }
 0x374   : > { %3050 = vrot.lane.b32.xlu1 %v7156_v31, %s4810_s25 }
 0x377   : > { %3056 = vrot.lane.b32.xlu0 %v7165_v39, %s4810_s25 }
 0x378   : > { %3054 = vrot.lane.b32.xlu1 %v7170_v25, %s4810_s25 }
 0x37b   : > { %3060 = vrot.lane.b32.xlu0 %v7179_v28, %s4810_s25  ;;  %v2647_v28 = vrot.slane %v6874_v41, 7 }
 0x37c   : > { %3058 = vrot.lane.b32.xlu1 %v7184_v18, %s4810_s25 }
 0x37f   : > { %3064 = vrot.lane.b32.xlu0 %v7193_v11, %s4810_s25  ;;  %v9533_v11 = vld [vmem:[#allocation33_spill] sm:$0xff] }
 0x380   : > { %3062 = vrot.lane.b32.xlu1 %v7198_v5, %s4810_s25  ;;  %vm9534_vm11 = vnez %v9533_v11  ;;  %v2643_v11 = vrot.slane %v6864_v52, 7 }
 0x382   : > { %v7258_v5 = vsel %vm9544_vm4, %v2641_v0, %v2643_v11 }
 0x383   : > { %3068 = vrot.lane.b32.xlu0 %v7206_v44, %s4810_s25  ;;  %v7226_v44 = vsel %vm9534_vm11, %v2826_v55, 0.0  ;;  %v7243_v55 = vpop.permute.xlu1 %2898 }
 0x384   : > { %3066 = vrot.lane.b32.xlu1 %v7211_v8, %s4810_s25  ;;  %9535 = vst [vmem:[#allocation30_spill] sm:$0xff] %v7226_v44  ;;  %v7240_v8 = vsel %vm9539_vm9, %v2638_v30, %v2639_v38  ;;  %v7255_v30 = vpop.permute.xlu0 %2904 }
 0x385   : > { %9543 = vst [vmem:[#allocation50_spill] sm:$0xff] %v7255_v30 }
 0x387   : > { %3072 = vrot.lane.b32.xlu0 %v7226_v44, %s4810_s25  ;;  %v9540_v44 = vld [vmem:[#allocation34_spill] sm:$0xff] }
 0x388   : > { %3070 = vrot.lane.b32.xlu1 %v7231_v17, %s4810_s25  ;;  %vm9541_vm3 = vnez %v9540_v44  ;;  %v2645_v17 = vrot.slane %v6876_v63, 7  ;;  %v7261_v44 = vpop.permute.xlu1 %2902  ;;  %v7273_v0 = vpop.permute.xlu0 %2908 }
 0x389   : > { %v7247_v40 = vsel %vm9541_vm3, %v2733_v3, 0.0  ;;  %9545 = vst [vmem:[#allocation58_spill] sm:$0xff] %v7261_v44  ;;  %v9546_v3 = vld [vmem:[#allocation39_spill] sm:$0xff]  ;;  %9549 = vst [vmem:[#allocation51_spill] sm:$0xff] %v7273_v0  ;;  %v7294_v0 = vsel %vm9556_vm7, %v2649_v57, %v2651_v9  ;;  %v2661_v44 = vrot.slane %v6916_v32, 7 }
 0x38a   : > { %vm9547_vm14 = vnez %v9546_v3  ;;  %v2646_v38 = vsel %vm9548_vm5, %v2643_v11, %v2645_v17  ;;  %v7276_v39 = vsel %vm9550_vm10, %v2645_v17, %v2647_v28  ;;  %v2650_v11 = vsel %vm9554_vm0, %v2647_v28, %v2649_v57  ;;  %vm9574_vm3 = vmmov %vm9554_vm0 }
 0x38b   : > { %3138 = vrot.lane.b32.xlu0 %v7240_v8, %s4811_s26  ;;  %v7265_v18 = vsel %vm9547_vm14, %v2642_v4, 0.0  ;;  %v9552_v4 = vld [vmem:[#allocation44_spill] sm:$0xff]  ;;  %v2654_v28 = vsel %vm9560_vm1, %v2651_v9, %v2653_v45  ;;  %vm9582_vm14 = vmmov %vm9554_vm0  ;;  %vm9586_vm5 = vnez %v9585_v36  ;;  %vm9593_vm10 = vcmask 1043456  }
 0x38c   : > { %3136 = vrot.lane.b32.xlu1 %v7247_v40, %s4811_s26  ;;  %v7279_v3 = vpop.permute.xlu1 %2906  ;;  %vm9553_vm6 = vnez %v9552_v4  ;;  %v7291_v17 = vpop.permute.xlu0 %2912  ;;  %vm9625_vm0 = vcmask 97280   ;;  %vm9627_vm7 = vmmov %vm9560_vm1  ;;  %vm9629_vm1 = vcmask 162816  }
 0x38d   : > { %9551 = vst [vmem:[#allocation62_spill] sm:$0xff] %v7279_v3  ;;  %v7283_v25 = vsel %vm9553_vm6, %v2646_v38, 0.0  ;;  %9555 = vst [vmem:[#allocation115_spill] sm:$0xff] %v7291_v17  ;;  %v2655_v3 = vrot.slane %v6894_v49, 7  ;;  %v9558_v38 = vld [vmem:[#allocation49_spill] sm:$0xff] }
 0x38e   : > { %vm9559_vm15 = vnez %v9558_v38  ;;  %vm9595_vm6 = vmmov %vm9593_vm10 }
 0x38f   : > { %3142 = vrot.lane.b32.xlu0 %v7258_v5, %s4811_s26  ;;  %v7301_v1 = vsel %vm9559_vm15, %v2650_v11, 0.0  ;;  %v7312_v17 = vsel %vm9562_vm8, %v2653_v45, %v2655_v3  ;;  %v9564_v11 = vld [vmem:[#allocation54_spill] sm:$0xff]  ;;  %v2658_v9 = vsel %vm9566_vm2, %v2655_v3, %v2657_v53  ;;  %vm9628_vm15 = vcmask 130048   ;;  %vm9630_vm8 = vmmov %vm9625_vm0 }
 0x390   : > { %3140 = vrot.lane.b32.xlu1 %v7265_v18, %s4811_s26  ;;  %v7297_v4 = vpop.permute.xlu1 %2910  ;;  %v7309_v57 = vpop.permute.xlu0 %2916  ;;  %vm9565_vm11 = vnez %v9564_v11  ;;  %vm9632_vm2 = vmmov %vm9628_vm15 }
 0x391   : > { %9557 = vst [vmem:[#allocation116_spill] sm:$0xff] %v7297_v4  ;;  %9561 = vst [vmem:[#allocation140_spill] sm:$0xff] %v7309_v57  ;;  %v2659_v4 = vrot.slane %v6904_v60, 7  ;;  %v7319_v30 = vsel %vm9565_vm11, %v2654_v28, 0.0  ;;  %v9571_v28 = vld [vmem:[#allocation59_spill] sm:$0xff]  ;;  %vm9631_vm11 = vcmask 195584  }
 0x392   : > { %vm9572_vm9 = vnez %v9571_v28  ;;  %v9579_v28 = vld [vmem:[#allocation64_spill] sm:$0xff] }
 0x393   : > { %3146 = vrot.lane.b32.xlu0 %v7276_v39, %s4811_s26  ;;  %v7330_v57 = vsel %vm9568_vm13, %v2657_v53, %v2659_v4  ;;  %v7337_v31 = vsel %vm9572_vm9, %v2658_v9, 0.0  ;;  %v2662_v3 = vsel %vm9574_vm3, %v2659_v4, %v2661_v44  ;;  %vm9580_vm4 = vnez %v9579_v28  ;;  %vm9634_vm9 = vmmov %vm9629_vm1 }
 0x394   : > { %3144 = vrot.lane.b32.xlu1 %v7283_v25, %s4811_s26  ;;  %v7315_v38 = vpop.permute.xlu1 %2914  ;;  %v7327_v45 = vpop.permute.xlu0 %2920  ;;  %9569 = vst [vmem:[#allocation154_spill] sm:$0xff] %v7330_v57  ;;  %9573 = vst [vmem:[#allocation55_spill] sm:$0xff] %v7337_v31  ;;  %v7354_v9 = vsel %vm9580_vm4, %v2662_v3, 0.0  ;;  %v3949_v3 = vld [vmem:[%s8479_s3 + $0x8] sm:$0xff]  ;;  %vm9633_vm13 = vcmask 228352   ;;  %vm9635_vm3 = vcmask 261120  }
 0x395   : > { %9563 = vst [vmem:[#allocation143_spill] sm:$0xff] %v7315_v38  ;;  %9567 = vst [vmem:[#allocation35_spill] sm:$0xff] %v7327_v45  ;;  %v2663_v38 = vrot.slane %v6914_v37, 7  ;;  %vm9637_vm4 = vcmask 293888  }
 0x396   : > { %9581 = vst [vmem:[#allocation117_spill] sm:$0xff] %v7354_v9 }
 0x397   : > { %3150 = vrot.lane.b32.xlu0 %v7294_v0, %s4811_s26  ;;  %v7348_v45 = vsel %vm9576_vm12, %v2661_v44, %v2663_v38  ;;  %v2666_v4 = vsel %vm9582_vm14, %v2663_v38, %v8696_v61  ;;  %v3948_v38 = vld [vmem:[%s8479_s3] sm:$0xff]  ;;  %vm9636_vm12 = vmmov %vm9631_vm11 }
 0x398   : > { %3148 = vrot.lane.b32.xlu1 %v7301_v1, %s4811_s26  ;;  %v7333_v11 = vpop.permute.xlu1 %2918  ;;  %v7345_v53 = vpop.permute.xlu0 %2924  ;;  %9577 = vst [vmem:[#allocation56_spill] sm:$0xff] %v7348_v45  ;;  %v4714_v61 = vpack.c.bf16 %v3949_v3, %v3948_v38  ;;  %vm9638_vm14 = vmmov %vm9633_vm13 }
 0x399   : > { %9570 = vst [vmem:[#allocation174_spill] sm:$0xff] %v7333_v11  ;;  %9575 = vst [vmem:[#allocation63_spill] sm:$0xff] %v7345_v53 }
 0x39a   : > { %4715 = vmatprep.subr.bf16.mxu1 %v4714_v61 }
 0x39b   : > { %3154 = vrot.lane.b32.xlu0 %v7312_v17, %s4811_s26  ;;  %4717 = vmatpush3.bf16.msra.mxu1 %v4714_v61 }
 0x39c   : > { %3152 = vrot.lane.b32.xlu1 %v7319_v30, %s4811_s26  ;;  %v7350_v11 = vpop.permute.xlu1 %2922  ;;  %v7363_v53 = vpop.permute.xlu0 %2928 }
 0x39d   : > { %9578 = vst [vmem:[#allocation67_spill] sm:$0xff] %v7350_v11  ;;  %9583 = vst [vmem:[#allocation118_spill] sm:$0xff] %v7363_v53  ;;  %v7369_v11 = vsel %vm9586_vm5, %v2666_v4, 0.0  ;;  %v3951_v4 = vld [vmem:[%s8479_s3 + $0x18] sm:$0xff] }
 0x39e   : > { %9587 = vst [vmem:[#allocation145_spill] sm:$0xff] %v7369_v11  ;;  %vm9639_vm5 = vmmov %vm9635_vm3 }
 0x39f   : > { %3158 = vrot.lane.b32.xlu0 %v7330_v57, %s4811_s26 }
 0x3a0   : > { %3156 = vrot.lane.b32.xlu1 %v7337_v31, %s4811_s26  ;;  %v7365_v44 = vpop.permute.xlu1 %2926  ;;  %v7381_v28 = vpop.permute.xlu0 %2932 }
 0x3a1   : > { %9584 = vst [vmem:[#allocation142_spill] sm:$0xff] %v7365_v44  ;;  %9588 = vst [vmem:[#allocation47_spill] sm:$0xff] %v7381_v28 }
 0x3a3   : > { %3162 = vrot.lane.b32.xlu0 %v7348_v45, %s4811_s26 }
 0x3a4   : > { %3160 = vrot.lane.b32.xlu1 %v7354_v9, %s4811_s26  ;;  %v7383_v36 = vpop.permute.xlu1 %2930  ;;  %v7395_v28 = vpop.permute.xlu0 %2936 }
 0x3a5   : > { %9589 = vst [vmem:[#allocation156_spill] sm:$0xff] %v7383_v36  ;;  %9590 = vst [vmem:[#allocation176_spill] sm:$0xff] %v7395_v28 }
 0x3a7   : > { %3232 = vrot.lane.b32.xlu0 %v6856_v27, %s4812_s27  ;;  %v3950_v27 = vld [vmem:[%s8479_s3 + $0x10] sm:$0xff] }
 0x3a8   : > { %3164 = vrot.lane.b32.xlu1 %v7369_v11, %s4811_s26  ;;  %v4718_v38 = vpack.c.bf16 %v3951_v4, %v3950_v27  ;;  %v7397_v3 = vpop.permute.xlu1 %2934  ;;  %v7406_v61 = vpop.permute.xlu0 %2940 }
 0x3a9   : > { %9591 = vst [vmem:[#allocation60_spill] sm:$0xff] %v7397_v3  ;;  %9592 = vst [vmem:[#allocation68_spill] sm:$0xff] %v7406_v61 }
 0x3aa   : > { %4719 = vmatprep.subr.bf16.mxu1 %v4718_v38 }
 0x3ab   : > { %3330 = vrot.lane.b32.xlu0 %v7019_v12, %s4813_s28  ;;  %4721 = vmatpush3.bf16.msra.mxu1 %v4718_v38 }
 0x3ac   : > { %3234 = vrot.lane.b32.xlu1 %v6854_v47, %s4812_s27  ;;  %v3952_v47 = vld [vmem:[%s8479_s3 + $0x20] sm:$0xf]  ;;  %v7409_v12 = vpop.permute.xlu1 %2938 }
 0x3ad   : > { %4656 = vmatprep.subr.msk.mxu1 %vm9593_vm10, %v3952_v47  ;;  %9594 = vst [vmem:[#allocation61_spill] sm:$0xff] %v7409_v12  ;;  %vm9640_vm10 = vmmov %vm9637_vm4 }
 0x3af   : > { %3426 = vrot.lane.b32.xlu0 %v7265_v18, %s4814_s29  ;;  %4657 = vmatpush3.msk.msra.mxu1 %vm9595_vm6, %v3952_v47  ;;  %vm9641_vm6 = vmmov %vm9627_vm7 }
 0x3b0   : > { %3332 = vrot.lane.b32.xlu1 %v7012_v26, %s4813_s28  ;;  %v7416_v26 = vpop.permute.xlu0 %2944  ;;  %v7418_v27 = vpop.permute.xlu1 %2942 }
 0x3b1   : > { %9596 = vst [vmem:[#allocation72_spill] sm:$0xff] %v7416_v26  ;;  %9597 = vst [vmem:[#allocation119_spill] sm:$0xff] %v7418_v27 }
 0x3b3   : > { %3516 = vrot.lane.b32.xlu0 %v6866_v50, %s4815_s15 }
 0x3b4   : > { %3428 = vrot.lane.b32.xlu1 %v7258_v5, %s4814_s29  ;;  %v7424_v4 = vpop.permute.xlu0 %2948  ;;  %v7426_v38 = vpop.permute.xlu1 %2946 }
 0x3b5   : > { %9598 = vst [vmem:[#allocation120_spill] sm:$0xff] %v7424_v4  ;;  %9599 = vst [vmem:[#allocation144_spill] sm:$0xff] %v7426_v38 }
 0x3b7   : > { %3518 = vrot.lane.b32.xlu0 %v6864_v52, %s4815_s15 }
 0x3b8   : > { %3236 = vrot.lane.b32.xlu1 %v6866_v50, %s4812_s27 }
 0x3bb   : > { %3238 = vrot.lane.b32.xlu0 %v6864_v52, %s4812_s27 }
 0x3bc   : > { %3606 = vrot.lane.b32.xlu1 %v7037_v51, %s4816_s16 }
 0x3bd   : > { %v7432_v47 = vpop.permute.xlu0 %2952 }
 0x3be   : > { %9600 = vst [vmem:[#allocation147_spill] sm:$0xff] %v7432_v47  ;;  %v7434_v26 = vpop.permute.xlu1 %2950 }
 0x3bf   : > { %9601 = vst [vmem:[#allocation155_spill] sm:$0xff] %v7434_v26  ;;  %3608 = vrot.lane.b32.xlu0 %v7031_v20, %s4816_s16 }
 0x3c0   : > { %3334 = vrot.lane.b32.xlu1 %v7037_v51, %s4813_s28 }
 0x3c1   : > { %v7440_v50 = vpop.permute.xlu0 %3016 }
 0x3c2   : > { %v7442_v4 = vpop.permute.xlu1 %3014 }
 0x3c3   : > { %3430 = vrot.lane.b32.xlu0 %v7283_v25, %s4814_s29 }
 0x3c4   : > { %3336 = vrot.lane.b32.xlu1 %v7031_v20, %s4813_s28 }
 0x3c5   : > { %v7448_v52 = vpop.permute.xlu0 %3020 }
 0x3c6   : > { %v7450_v47 = vpop.permute.xlu1 %3018 }
 0x3c7   : > { %3520 = vrot.lane.b32.xlu0 %v6876_v63, %s4815_s15 }
 0x3c8   : > { %3432 = vrot.lane.b32.xlu1 %v7276_v39, %s4814_s29 }
 0x3c9   : > { %v7456_v51 = vpop.permute.xlu0 %3024 }
 0x3ca   : > { %v7458_v26 = vpop.permute.xlu1 %3022 }
 0x3cb   : > { %3522 = vrot.lane.b32.xlu0 %v6874_v41, %s4815_s15 }
 0x3cc   : > { %3240 = vrot.lane.b32.xlu1 %v6876_v63, %s4812_s27 }
 0x3cd   : > { %v7464_v20 = vpop.permute.xlu0 %3028 }
 0x3ce   : > { %v7466_v38 = vpop.permute.xlu1 %3026 }
 0x3cf   : > { %3242 = vrot.lane.b32.xlu0 %v6874_v41, %s4812_s27 }
 0x3d0   : > { %3610 = vrot.lane.b32.xlu1 %v7058_v62, %s4816_s16 }
 0x3d1   : > { %v7472_v27 = vpop.permute.xlu0 %3032 }
 0x3d2   : > { %v7474_v61 = vpop.permute.xlu1 %3030 }
 0x3d3   : > { %3612 = vrot.lane.b32.xlu0 %v7053_v33, %s4816_s16 }
 0x3d4   : > { %3338 = vrot.lane.b32.xlu1 %v7058_v62, %s4813_s28 }
 0x3d5   : > { %v7480_v63 = vpop.permute.xlu0 %3036 }
 0x3d6   : > { %9602 = vst [vmem:[#allocation158_spill] sm:$0xff] %v7480_v63  ;;  %v7482_v12 = vpop.permute.xlu1 %3034  ;;  %v9626_v63 = vrot.slane %v6926_v21, 7 }
 0x3d7   : > { %9603 = vst [vmem:[#allocation175_spill] sm:$0xff] %v7482_v12  ;;  %3434 = vrot.lane.b32.xlu0 %v7301_v1, %s4814_s29 }
 0x3d8   : > { %3340 = vrot.lane.b32.xlu1 %v7053_v33, %s4813_s28 }
 0x3d9   : > { %v7488_v41 = vpop.permute.xlu0 %3040 }
 0x3da   : > { %9604 = vst [vmem:[#allocation65_spill] sm:$0xff] %v7488_v41  ;;  %v7490_v28 = vpop.permute.xlu1 %3038 }
 0x3db   : > { %9605 = vst [vmem:[#allocation73_spill] sm:$0xff] %v7490_v28  ;;  %3524 = vrot.lane.b32.xlu0 %v6886_v42, %s4815_s15 }
 0x3dc   : > { %3436 = vrot.lane.b32.xlu1 %v7294_v0, %s4814_s29 }
 0x3dd   : > { %v7496_v62 = vpop.permute.xlu0 %3044 }
 0x3de   : > { %9606 = vst [vmem:[#allocation66_spill] sm:$0xff] %v7496_v62  ;;  %v7498_v3 = vpop.permute.xlu1 %3042 }
 0x3df   : > { %9607 = vst [vmem:[#allocation77_spill] sm:$0xff] %v7498_v3  ;;  %3526 = vrot.lane.b32.xlu0 %v6884_v35, %s4815_s15 }
 0x3e0   : > { %3244 = vrot.lane.b32.xlu1 %v6886_v42, %s4812_s27 }
 0x3e1   : > { %v7504_v33 = vpop.permute.xlu0 %3048 }
 0x3e2   : > { %9608 = vst [vmem:[#allocation121_spill] sm:$0xff] %v7504_v33  ;;  %v7506_v36 = vpop.permute.xlu1 %3046 }
 0x3e3   : > { %9609 = vst [vmem:[#allocation122_spill] sm:$0xff] %v7506_v36  ;;  %3246 = vrot.lane.b32.xlu0 %v6884_v35, %s4812_s27 }
 0x3e4   : > { %3614 = vrot.lane.b32.xlu1 %v7072_v7, %s4816_s16 }
 0x3e5   : > { %v7512_v53 = vpop.permute.xlu0 %3052 }
 0x3e6   : > { %9610 = vst [vmem:[#allocation146_spill] sm:$0xff] %v7512_v53  ;;  %v7514_v44 = vpop.permute.xlu1 %3050 }
 0x3e7   : > { %9611 = vst [vmem:[#allocation149_spill] sm:$0xff] %v7514_v44  ;;  %3616 = vrot.lane.b32.xlu0 %v7067_v13, %s4816_s16 }
 0x3e8   : > { %3342 = vrot.lane.b32.xlu1 %v7072_v7, %s4813_s28 }
 0x3e9   : > { %v7520_v42 = vpop.permute.xlu0 %3056 }
 0x3ea   : > { %9612 = vst [vmem:[#allocation157_spill] sm:$0xff] %v7520_v42  ;;  %v7522_v33 = vpop.permute.xlu1 %3054 }
 0x3eb   : > { %9613 = vst [vmem:[#allocation160_spill] sm:$0xff] %v7522_v33  ;;  %3438 = vrot.lane.b32.xlu0 %v7319_v30, %s4814_s29 }
 0x3ec   : > { %3344 = vrot.lane.b32.xlu1 %v7067_v13, %s4813_s28 }
 0x3ed   : > { %v7528_v35 = vpop.permute.xlu0 %3060 }
 0x3ee   : > { %9614 = vst [vmem:[#allocation178_spill] sm:$0xff] %v7528_v35  ;;  %v7530_v53 = vpop.permute.xlu1 %3058 }
 0x3ef   : > { %9615 = vst [vmem:[#allocation192_spill] sm:$0xff] %v7530_v53  ;;  %3528 = vrot.lane.b32.xlu0 %v6896_v59, %s4815_s15 }
 0x3f0   : > { %3440 = vrot.lane.b32.xlu1 %v7312_v17, %s4814_s29 }
 0x3f1   : > { %v7536_v7 = vpop.permute.xlu0 %3064 }
 0x3f2   : > { %9616 = vst [vmem:[#allocation70_spill] sm:$0xff] %v7536_v7  ;;  %v7538_v42 = vpop.permute.xlu1 %3062 }
 0x3f3   : > { %9617 = vst [vmem:[#allocation78_spill] sm:$0xff] %v7538_v42  ;;  %3530 = vrot.lane.b32.xlu0 %v6894_v49, %s4815_s15 }
 0x3f4   : > { %3248 = vrot.lane.b32.xlu1 %v6896_v59, %s4812_s27 }
 0x3f5   : > { %v7544_v13 = vpop.permute.xlu0 %3068 }
 0x3f6   : > { %9618 = vst [vmem:[#allocation71_spill] sm:$0xff] %v7544_v13  ;;  %v7546_v35 = vpop.permute.xlu1 %3066 }
 0x3f7   : > { %9619 = vst [vmem:[#allocation82_spill] sm:$0xff] %v7546_v35  ;;  %3250 = vrot.lane.b32.xlu0 %v6894_v49, %s4812_s27 }
 0x3f8   : > { %3618 = vrot.lane.b32.xlu1 %v7086_v19, %s4816_s16 }
 0x3f9   : > { %v7552_v53 = vpop.permute.xlu0 %3072 }
 0x3fa   : > { %9620 = vst [vmem:[#allocation123_spill] sm:$0xff] %v7552_v53  ;;  %v7554_v7 = vpop.permute.xlu1 %3070 }
 0x3fb   : > { %9621 = vst [vmem:[#allocation124_spill] sm:$0xff] %v7554_v7  ;;  %3620 = vrot.lane.b32.xlu0 %v7081_v2, %s4816_s16 }
 0x3fc   : > { %3346 = vrot.lane.b32.xlu1 %v7086_v19, %s4813_s28 }
 0x3fd   : > { %v3139_v59 = vpop.permute.xlu0 %3138 }
 0x3fe   : > { %v3137_v13 = vpop.permute.xlu1 %3136 }
 0x3ff   : > { %3442 = vrot.lane.b32.xlu0 %v7337_v31, %s4814_s29 }
 0x400   : > { %3348 = vrot.lane.b32.xlu1 %v7081_v2, %s4813_s28 }
 0x401   : > { %v7564_v49 = vpop.permute.xlu0 %3142 }
 0x402   : > { %v7566_v35 = vpop.permute.xlu1 %3140 }
 0x403   : > { %3532 = vrot.lane.b32.xlu0 %v6906_v15, %s4815_s15 }
 0x404   : > { %3444 = vrot.lane.b32.xlu1 %v7330_v57, %s4814_s29 }
 0x405   : > { %v7572_v53 = vpop.permute.xlu0 %3146 }
 0x406   : > { %v7574_v19 = vpop.permute.xlu1 %3144 }
 0x407   : > { %3534 = vrot.lane.b32.xlu0 %v6904_v60, %s4815_s15 }
 0x408   : > { %3252 = vrot.lane.b32.xlu1 %v6906_v15, %s4812_s27 }
 0x409   : > { %v7580_v2 = vpop.permute.xlu0 %3150 }
 0x40a   : > { %v7582_v7 = vpop.permute.xlu1 %3148 }
 0x40b   : > { %3254 = vrot.lane.b32.xlu0 %v6904_v60, %s4812_s27 }
 0x40c   : > { %3622 = vrot.lane.b32.xlu1 %v7100_v24, %s4816_s16 }
 0x40d   : > { %v7588_v42 = vpop.permute.xlu0 %3154 }
 0x40e   : > { %v7590_v33 = vpop.permute.xlu1 %3152 }
 0x40f   : > { %3624 = vrot.lane.b32.xlu0 %v7095_v54, %s4816_s16 }
 0x410   : > { %3350 = vrot.lane.b32.xlu1 %v7100_v24, %s4813_s28 }
 0x411   : > { %v7596_v15 = vpop.permute.xlu0 %3158 }
 0x412   : > { %v7598_v44 = vpop.permute.xlu1 %3156 }
 0x413   : > { %3446 = vrot.lane.b32.xlu0 %v7354_v9, %s4814_s29  ;;  %v3756_v9 = vsel %vm9625_vm0, %v6316_v58, %v3137_v13  ;;  %vm9642_vm0 = vcmask 31744  }
 0x414   : > { %3352 = vrot.lane.b32.xlu1 %v7095_v54, %s4813_s28 }
 0x415   : > { %v7604_v60 = vpop.permute.xlu0 %3162 }
 0x416   : > { %9622 = vst [vmem:[#allocation148_spill] sm:$0xff] %v7604_v60  ;;  %v7606_v36 = vpop.permute.xlu1 %3160 }
 0x417   : > { %9623 = vst [vmem:[#allocation151_spill] sm:$0xff] %v7606_v36  ;;  %3536 = vrot.lane.b32.xlu0 %v6916_v32, %s4815_s15 }
 0x418   : > { %3448 = vrot.lane.b32.xlu1 %v7348_v45, %s4814_s29 }
 0x419   : > { %v3233_v24 = vpop.permute.xlu0 %3232 }
 0x41a   : > { %v7612_v62 = vpop.permute.xlu1 %3164 }
 0x41b   : > { %9624 = vst [vmem:[#allocation159_spill] sm:$0xff] %v7612_v62  ;;  %3538 = vrot.lane.b32.xlu0 %v6914_v37, %s4815_s15 }
 0x41c   : > { %3256 = vrot.lane.b32.xlu1 %v6916_v32, %s4812_s27  ;;  %v2667_v32 = vrot.slane %v6924_v10, 7 }
 0x41d   : > { %v3331_v54 = vpop.permute.xlu0 %3330 }
 0x41e   : > { %v3235_v3 = vpop.permute.xlu1 %3234  ;;  %v7636_v57 = vsel %vm9627_vm7, %v9626_v63, %v2667_v32  ;;  %vm9643_vm7 = vcmask 64512  }
 0x41f   : > { %3258 = vrot.lane.b32.xlu0 %v6914_v37, %s4812_s27 }
 0x420   : > { %3626 = vrot.lane.b32.xlu1 %v7114_v14, %s4816_s16 }
 0x421   : > { %v3427_v41 = vpop.permute.xlu0 %3426 }
 0x422   : > { %v3333_v28 = vpop.permute.xlu1 %3332 }
 0x423   : > { %3628 = vrot.lane.b32.xlu0 %v7109_v56, %s4816_s16 }
 0x424   : > { %3354 = vrot.lane.b32.xlu1 %v7114_v14, %s4813_s28  ;;  %v3788_v14 = vsel %vm9628_vm15, %v3756_v9, %v3233_v24 }
 0x425   : > { %v3517_v45 = vpop.permute.xlu0 %3516 }
 0x426   : > { %v3429_v62 = vpop.permute.xlu1 %3428 }
 0x427   : > { %3450 = vrot.lane.b32.xlu0 %v7369_v11, %s4814_s29  ;;  %v3820_v11 = vsel %vm9629_vm1, %v3788_v14, %v3331_v54  ;;  %v9644_v14 = vld [vmem:[#allocation74_spill] sm:$0xff]  ;;  %vm9646_vm1 = vmmov %vm9630_vm8 }
 0x428   : > { %3356 = vrot.lane.b32.xlu1 %v7109_v56, %s4813_s28  ;;  %v3757_v56 = vsel %vm9630_vm8, %v6316_v58, %v3139_v59  ;;  %v3852_v13 = vsel %vm9631_vm11, %v3820_v11, %v3427_v41  ;;  %v3696_v59 = vsel %vm9642_vm0, %v7247_v40, %v7222_v29  ;;  %vm9645_vm15 = vnez %v9644_v14  ;;  %vm9647_vm8 = vmmov %vm9642_vm0 }
 0x429   : > { %v3519_v37 = vpop.permute.xlu0 %3518  ;;  %v3789_v12 = vsel %vm9632_vm2, %v3757_v56, %v3235_v3  ;;  %v3884_v63 = vsel %vm9633_vm13, %v3852_v13, %v3517_v45  ;;  %v3697_v13 = vsel %vm9647_vm8, %v7240_v8, %v7219_v16  ;;  %v2671_v29 = vrot.slane %v6934_v46, 7  ;;  %vm9648_vm11 = vmmov %vm9632_vm2 }
 0x42a   : > { %v3237_v60 = vpop.permute.xlu1 %3236  ;;  %v3821_v9 = vsel %vm9634_vm9, %v3789_v12, %v3333_v28  ;;  %v2669_v28 = vrot.slane %v6936_v43, 7  ;;  %vm9649_vm2 = vmmov %vm9643_vm7  ;;  %vm9659_vm0 = vcmask 293888  }
 0x42b   : > { %3540 = vrot.lane.b32.xlu0 %v6926_v21, %s4815_s15  ;;  %v3853_v54 = vsel %vm9636_vm12, %v3821_v9, %v3429_v62  ;;  %v3727_v40 = vsel %vm9649_vm2, %v3697_v13, %v7440_v50  ;;  %vm9650_vm13 = vmmov %vm9634_vm9 }
 0x42c   : > { %3452 = vrot.lane.b32.xlu1 %v7636_v57, %s4814_s29  ;;  %v3885_v58 = vsel %vm9638_vm14, %v3853_v54, %v3519_v37  ;;  %v2670_v62 = vsel %vm9641_vm6, %v2667_v32, %v2669_v28  ;;  %vm9651_vm9 = vmmov %vm9646_vm1 }
 0x42d   : > { %v3239_v36 = vpop.permute.xlu0 %3238 }
 0x42e   : > { %v3607_v31 = vpop.permute.xlu1 %3606 }
 0x42f   : > { %3260 = vrot.lane.b32.xlu0 %v6926_v21, %s4812_s27  ;;  %v3916_v24 = vsel %vm9635_vm3, %v3884_v63, %v3607_v31  ;;  %vm9652_vm3 = vmmov %vm9636_vm12 }
 0x430   : > { %3166 = vrot.lane.b32.xlu1 %v7636_v57, %s4811_s26  ;;  %4658 = vmatprep.mubr.msk.f32.mxu1 %vm9637_vm4, %v3916_v24  ;;  %vm9653_vm12 = vmmov %vm9648_vm11 }
 0x431   : > { %v3609_v11 = vpop.permute.xlu0 %3608  ;;  %vm9654_vm4 = vmmov %vm9638_vm14 }
 0x432   : > { %v3917_v45 = vsel %vm9639_vm5, %v3885_v58, %v3609_v11  ;;  %v3335_v3 = vpop.permute.xlu1 %3334  ;;  %vm9655_vm14 = vmmov %vm9641_vm6 }
 0x433   : > { %3630 = vrot.lane.b32.xlu0 %v7128_v6, %s4816_s16  ;;  %4659 = vmatmul.mubr.msk.f32.vlgmr.msra.gmra.mrb[0].mxu1 %vm9640_vm10, %v3917_v45  ;;  %v7703_v24 = vsel %vm9655_vm14, %v2669_v28, %v2671_v29  ;;  %vm9656_vm5 = vmmov %vm9650_vm13  ;;  %vm9657_vm10 = vcmask 261120  }
 0x434   : > { %3542 = vrot.lane.b32.xlu1 %v6924_v10, %s4815_s15  ;;  %vm9658_vm6 = vmmov %vm9652_vm3 }
 0x435   : > { %v3431_v21 = vpop.permute.xlu0 %3430 }
 0x436   : > { %v3337_v31 = vpop.permute.xlu1 %3336 }
 0x437   : > { %3358 = vrot.lane.b32.xlu0 %v7128_v6, %s4813_s28  ;;  %v3726_v6 = vsel %vm9643_vm7, %v3696_v59, %v7442_v4  ;;  %vm9660_vm7 = vmmov %vm9654_vm4 }
 0x438   : > { %3262 = vrot.lane.b32.xlu1 %v6924_v10, %s4812_s27  ;;  %v7681_v10 = vsel %vm9645_vm15, %v2670_v62, 0.0  ;;  %v3758_v32 = vsel %vm9646_vm1, %v3726_v6, %v7566_v35  ;;  %v3759_v35 = vsel %vm9651_vm9, %v3727_v40, %v7564_v49  ;;  %vm9661_vm15 = vmmov %vm9657_vm10 }
 0x439   : > { %v3521_v12 = vpop.permute.xlu0 %3520  ;;  %v3791_v63 = vsel %vm9653_vm12, %v3759_v35, %v3239_v36  ;;  %vm9662_vm1 = vmmov %vm9659_vm0 }
 0x43a   : > { %v3433_v41 = vpop.permute.xlu1 %3432  ;;  %v3823_v50 = vsel %vm9656_vm5, %v3791_v63, %v3337_v31 }
 0x43b   : > { %3360 = vrot.lane.b32.xlu0 %v7123_v23, %s4813_s28  ;;  %v3855_v49 = vsel %vm9658_vm6, %v3823_v50, %v3433_v41 }
 0x43c   : > { %3632 = vrot.lane.b32.xlu1 %v7123_v23, %s4816_s16  ;;  %v3790_v23 = vsel %vm9648_vm11, %v3758_v32, %v3237_v60  ;;  %vm9663_vm11 = vmmov %vm9649_vm2 }
 0x43d   : > { %v3523_v37 = vpop.permute.xlu0 %3522  ;;  %v3822_v4 = vsel %vm9650_vm13, %v3790_v23, %v3335_v3  ;;  %vm9664_vm2 = vmmov %vm9651_vm9 }
 0x43e   : > { %v3241_v56 = vpop.permute.xlu1 %3240  ;;  %v3854_v16 = vsel %vm9652_vm3, %v3822_v4, %v3431_v21  ;;  %v3887_v36 = vsel %vm9660_vm7, %v3855_v49, %v3523_v37  ;;  %vm9665_vm13 = vmmov %vm9647_vm8 }
 0x43f   : > { %3168 = vrot.lane.b32.xlu0 %v7681_v10, %s4811_s26  ;;  %v3886_v60 = vsel %vm9654_vm4, %v3854_v16, %v3521_v12  ;;  %v2673_v12 = vrot.slane %v6946_v22, 7  ;;  %v3699_v37 = vsel %vm9665_vm13, %v7258_v5, %v7237_v34  ;;  %vm9666_vm9 = vmmov %vm9655_vm14 }
 0x440   : > { %3454 = vrot.lane.b32.xlu1 %v7681_v10, %s4814_s29  ;;  %vm9667_vm3 = vmmov %vm9653_vm12 }
 0x441   : > { %v3243_v8 = vpop.permute.xlu0 %3242  ;;  %vm9669_vm12 = vmmov %vm9663_vm11 }
 0x442   : > { %v3611_v9 = vpop.permute.xlu1 %3610  ;;  %vm9670_vm4 = vmmov %vm9656_vm5 }
 0x443   : > { %v3918_v54 = vsel %vm9657_vm10, %v3886_v60, %v3611_v9  ;;  %3544 = vrot.lane.b32.xlu0 %v6936_v43, %s4815_s15  ;;  %vm9671_vm14 = vmmov %vm9664_vm2 }
 0x444   : > { %3456 = vrot.lane.b32.xlu1 %v7703_v24, %s4814_s29  ;;  %4661 = vmatprep.mubr.msk.f32.mxu1 %vm9659_vm0, %v3918_v54  ;;  %vm9672_vm5 = vmmov %vm9658_vm6 }
 0x445   : > { %v3613_v58 = vpop.permute.xlu0 %3612  ;;  %vm9675_vm6 = vmmov %vm9667_vm3 }
 0x446   : > { %v3919_v11 = vsel %vm9661_vm15, %v3887_v36, %v3613_v58  ;;  %v3339_v45 = vpop.permute.xlu1 %3338  ;;  %vm9676_vm0 = vmmov %vm9660_vm7  ;;  %v9685_v36 = vld [vmem:[#allocation29_spill] sm:$0xff]  ;;  %v9686_v58 = vld [vmem:[#allocation58_spill] sm:$0xff] }
 0x447   : > { %3264 = vrot.lane.b32.xlu0 %v6936_v43, %s4812_s27  ;;  %4662 = vmatmul.mubr.msk.f32.gmra.mrb[2].mxu1 %vm9662_vm1, %v3919_v11  ;;  %v3698_v43 = vsel %vm9647_vm8, %v7265_v18, %v7243_v55  ;;  %v9668_v18 = vld [vmem:[#allocation139_spill] sm:$0xff]  ;;  %vm9678_vm7 = vmmov %vm9670_vm4  ;;  %vm9680_vm8 = vcmask 293888  }
 0x448   : > { %3170 = vrot.lane.b32.xlu1 %v7703_v24, %s4811_s26  ;;  %v3728_v41 = vsel %vm9663_vm11, %v3698_v43, %v7450_v47  ;;  %vm9679_vm1 = vmmov %vm9672_vm5 }
 0x449   : > { %v3435_v3 = vpop.permute.xlu0 %3434  ;;  %v3760_v59 = vsel %vm9664_vm2, %v3728_v41, %v7574_v19  ;;  %v9673_v19 = vld [vmem:[#allocation79_spill] sm:$0xff]  ;;  %vm9681_vm11 = vmmov %vm9676_vm0 }
 0x44a   : > { %v3341_v21 = vpop.permute.xlu1 %3340  ;;  %v3792_v14 = vsel %vm9667_vm3, %v3760_v59, %v3241_v56  ;;  %vm9674_vm10 = vnez %v9673_v19  ;;  %vm9682_vm2 = vmmov %vm9661_vm15  ;;  %vm9687_vm3 = vcmask 31744  }
 0x44b   : > { %3634 = vrot.lane.b32.xlu0 %v7142_v48, %s4816_s16  ;;  %v3824_v55 = vsel %vm9670_vm4, %v3792_v14, %v3339_v45  ;;  %vm9683_vm13 = vmmov %vm9666_vm9  ;;  %v3700_v11 = vsel %vm9687_vm3, %v7283_v25, %v9686_v58 }
 0x44c   : > { %3546 = vrot.lane.b32.xlu1 %v6934_v46, %s4815_s15  ;;  %v3856_v34 = vsel %vm9672_vm5, %v3824_v55, %v3435_v3  ;;  %v3730_v45 = vsel %vm9669_vm12, %v3700_v11, %v7458_v26  ;;  %vm9688_vm4 = vmmov %vm9671_vm14 }
 0x44d   : > { %v3525_v31 = vpop.permute.xlu0 %3524  ;;  %vm9692_vm5 = vmmov %vm9675_vm6 }
 0x44e   : > { %v3437_v28 = vpop.permute.xlu1 %3436  ;;  %v3888_v13 = vsel %vm9676_vm0, %v3856_v34, %v3525_v31  ;;  %v9689_v31 = vld [vmem:[#allocation50_spill] sm:$0xff]  ;;  %vm9695_vm0 = vmmov %vm9688_vm4 }
 0x44f   : > { %3362 = vrot.lane.b32.xlu0 %v7142_v48, %s4813_s28  ;;  %v2674_v48 = vsel %vm9666_vm9, %v2671_v29, %v2673_v12  ;;  %v9677_v29 = vld [vmem:[#allocation42_spill] sm:$0xff]  ;;  %vm9684_vm9 = vmmov %vm9680_vm8 }
 0x450   : > { %3266 = vrot.lane.b32.xlu1 %v6934_v46, %s4812_s27  ;;  %v3729_v46 = vsel %vm9669_vm12, %v3699_v37, %v7448_v52  ;;  %v7753_v32 = vsel %vm9674_vm10, %v2674_v48, 0.0  ;;  %v2675_v23 = vrot.slane %v9677_v29, 7  ;;  %vm9693_vm10 = vmmov %vm9669_vm12 }
 0x451   : > { %v3527_v62 = vpop.permute.xlu0 %3526  ;;  %v3761_v47 = vsel %vm9671_vm14, %v3729_v46, %v7572_v53  ;;  %vm9690_vm14 = vmmov %vm9687_vm3 }
 0x452   : > { %v3245_v6 = vpop.permute.xlu1 %3244  ;;  %v3793_v56 = vsel %vm9675_vm6, %v3761_v47, %v3243_v8  ;;  %v7769_v60 = vsel %vm9683_vm13, %v2673_v12, %v2675_v23  ;;  %v9691_v12 = vld [vmem:[#allocation38_spill] sm:$0xff]  ;;  %vm9694_vm6 = vmmov %vm9678_vm7  ;;  %v9704_v47 = vld [vmem:[#allocation84_spill] sm:$0xff] }
 0x453   : > { %3364 = vrot.lane.b32.xlu0 %v9668_v18, %s4813_s28  ;;  %v3825_v40 = vsel %vm9678_vm7, %v3793_v56, %v3341_v21  ;;  %v2677_v43 = vrot.slane %v9691_v12, 7  ;;  %vm9696_vm7 = vmmov %vm9679_vm1  ;;  %vm9705_vm12 = vnez %v9704_v47  ;;  %v9707_v56 = vld [vmem:[#allocation32_spill] sm:$0xff] }
 0x454   : > { %3636 = vrot.lane.b32.xlu1 %v9668_v18, %s4816_s16  ;;  %v3857_v53 = vsel %vm9679_vm1, %v3825_v40, %v3437_v28  ;;  %v3701_v28 = vsel %vm9690_vm14, %v7276_v39, %v9689_v31  ;;  %vm9698_vm1 = vmmov %vm9681_vm11  ;;  %v9701_v18 = vld [vmem:[#allocation27_spill] sm:$0xff] }
 0x455   : > { %v3247_v5 = vpop.permute.xlu0 %3246  ;;  %v3889_v35 = vsel %vm9681_vm11, %v3857_v53, %v3527_v62  ;;  %v3731_v25 = vsel %vm9693_vm10, %v3701_v28, %v7456_v51  ;;  %vm9700_vm11 = vmmov %vm9694_vm6  ;;  %v9710_v53 = vld [vmem:[#allocation62_spill] sm:$0xff]  ;;  %vm9711_vm10 = vcmask 31744  }
 0x456   : > { %v3615_v52 = vpop.permute.xlu1 %3614  ;;  %vm9703_vm3 = vmmov %vm9698_vm1 }
 0x457   : > { %v3920_v4 = vsel %vm9661_vm15, %v3888_v13, %v3615_v52  ;;  %3172 = vrot.lane.b32.xlu0 %v7753_v32, %s4811_s26  ;;  %vm9697_vm15 = vmmov %vm9692_vm5  ;;  %v2679_v13 = vrot.slane %v9707_v56, 7 }
 0x458   : > { %3458 = vrot.lane.b32.xlu1 %v7753_v32, %s4814_s29  ;;  %4664 = vmatprep.mubr.msk.f32.mxu1 %vm9680_vm8, %v3920_v4  ;;  %vm9699_vm8 = vmmov %vm9683_vm13 }
 0x459   : > { %v3617_v16 = vpop.permute.xlu0 %3616  ;;  %v2678_v48 = vsel %vm9699_vm8, %v2675_v23, %v2677_v43  ;;  %vm9702_vm13 = vmmov %vm9696_vm7 }
 0x45a   : > { %v3921_v8 = vsel %vm9682_vm2, %v3889_v35, %v3617_v16  ;;  %v3343_v63 = vpop.permute.xlu1 %3342  ;;  %v7820_v34 = vsel %vm9705_vm12, %v2678_v48, 0.0  ;;  %vm9708_vm14 = vmmov %vm9684_vm9  ;;  %v3702_v35 = vsel %vm9711_vm10, %v7301_v1, %v9710_v53 }
 0x45b   : > { %3548 = vrot.lane.b32.xlu0 %v6946_v22, %s4815_s15  ;;  %4665 = vmatmul.mubr.msk.f32.gmra.mrb[4].mxu1 %vm9684_vm9, %v3921_v8 }
 0x45c   : > { %3460 = vrot.lane.b32.xlu1 %v7769_v60, %s4814_s29 }
 0x45d   : > { %v3439_v9 = vpop.permute.xlu0 %3438 }
 0x45e   : > { %v3345_v50 = vpop.permute.xlu1 %3344 }
 0x45f   : > { %3268 = vrot.lane.b32.xlu0 %v6946_v22, %s4812_s27  ;;  %v3762_v22 = vsel %vm9688_vm4, %v3730_v45, %v7582_v7  ;;  %v3763_v7 = vsel %vm9695_vm0, %v3731_v25, %v7580_v2  ;;  %vm9706_vm4 = vmmov %vm9682_vm2 }
 0x460   : > { %3174 = vrot.lane.b32.xlu1 %v7769_v60, %s4811_s26  ;;  %v3794_v41 = vsel %vm9692_vm5, %v3762_v22, %v3245_v6  ;;  %v3795_v59 = vsel %vm9697_vm15, %v3763_v7, %v3247_v5  ;;  %vm9709_vm5 = vmmov %vm9699_vm8  ;;  %v9722_v22 = vld [vmem:[#allocation36_spill] sm:$0xff] }
 0x461   : > { %v3529_v54 = vpop.permute.xlu0 %3528  ;;  %v3826_v26 = vsel %vm9694_vm6, %v3794_v41, %v3343_v63  ;;  %v3827_v51 = vsel %vm9700_vm11, %v3795_v59, %v3345_v50  ;;  %v7830_v23 = vsel %vm9709_vm5, %v2677_v43, %v2679_v13  ;;  %vm9712_vm6 = vcmask 64512   ;;  %v9713_v50 = vld [vmem:[#allocation51_spill] sm:$0xff]  ;;  %vm9717_vm8 = vmmov %vm9700_vm11 }
 0x462   : > { %v3441_v49 = vpop.permute.xlu1 %3440  ;;  %v3858_v39 = vsel %vm9696_vm7, %v3826_v26, %v3439_v9  ;;  %v3732_v16 = vsel %vm9712_vm6, %v3702_v35, %v7466_v38  ;;  %vm9714_vm7 = vmmov %vm9711_vm10  ;;  %v9729_v26 = vld [vmem:[#allocation45_spill] sm:$0xff] }
 0x463   : > { %3638 = vrot.lane.b32.xlu0 %v9685_v36, %s4816_s16  ;;  %v3890_v6 = vsel %vm9698_vm1, %v3858_v39, %v3529_v54  ;;  %v3859_v46 = vsel %vm9702_vm13, %v3827_v51, %v3441_v49  ;;  %v3764_v63 = vsel %vm9695_vm0, %v3732_v16, %v7590_v33  ;;  %v3703_v54 = vsel %vm9714_vm7, %v7294_v0, %v9713_v50  ;;  %vm9716_vm1 = vmmov %vm9712_vm6  ;;  %v9731_v39 = vld [vmem:[#allocation89_spill] sm:$0xff]  ;;  %v9750_v50 = vld [vmem:[#allocation26_spill] sm:$0xff] }
 0x464   : > { %3550 = vrot.lane.b32.xlu1 %v9677_v29, %s4815_s15  ;;  %v3733_v1 = vsel %vm9716_vm1, %v3703_v54, %v7464_v20  ;;  %vm9718_vm11 = vmmov %vm9695_vm0  ;;  %vm9728_vm6 = vcmask 1040384   ;;  %vm9732_vm7 = vnez %v9731_v39  ;;  %vm9736_vm1 = vcmask 31744   ;;  %v9745_v35 = vld [vmem:[#allocation57_spill] sm:$0xff] }
 0x465   : > { %v3531_v3 = vpop.permute.xlu0 %3530  ;;  %v3765_v38 = vsel %vm9718_vm11, %v3733_v1, %v7588_v42  ;;  %vm9724_vm12 = vmmov %vm9706_vm4  ;;  %v2685_v54 = vrot.slane %v9750_v50, 7 }
 0x466   : > { %v3249_v21 = vpop.permute.xlu1 %3248  ;;  %v3891_v2 = vsel %vm9703_vm3, %v3859_v46, %v3531_v3  ;;  %vm9727_vm10 = vmmov %vm9724_vm12 }
 0x467   : > { %3366 = vrot.lane.b32.xlu0 %v9685_v36, %s4813_s28  ;;  %v3796_v49 = vsel %vm9697_vm15, %v3764_v63, %v3249_v21  ;;  %v9715_v36 = vld [vmem:[#allocation53_spill] sm:$0xff]  ;;  %v2681_v21 = vrot.slane %v9722_v22, 7  ;;  %vm9730_vm0 = vmmov %vm9708_vm14 }
 0x468   : > { %3270 = vrot.lane.b32.xlu1 %v9677_v29, %s4812_s27 }
 0x469   : > { %v3251_v62 = vpop.permute.xlu0 %3250  ;;  %v2682_v25 = vsel %vm9728_vm6, %v2679_v13, %v2681_v21 }
 0x46a   : > { %v3619_v37 = vpop.permute.xlu1 %3618 }
 0x46b   : > { %v3922_v14 = vsel %vm9682_vm2, %v3890_v6, %v3619_v37  ;;  %3368 = vrot.lane.b32.xlu0 %v9701_v18, %s4813_s28  ;;  %vm9719_vm2 = vmmov %vm9702_vm13  ;;  %v9733_v6 = vld [vmem:[#allocation106_spill] sm:$0xff] }
 0x46c   : > { %3640 = vrot.lane.b32.xlu1 %v9701_v18, %s4816_s16  ;;  %4667 = vmatprep.mubr.msk.f32.mxu1 %vm9684_vm9, %v3922_v14  ;;  %vm9720_vm13 = vmmov %vm9697_vm15  ;;  %v2683_v37 = vrot.slane %v9733_v6, 7  ;;  %v9735_v18 = vld [vmem:[#allocation116_spill] sm:$0xff] }
 0x46d   : > { %v3621_v55 = vpop.permute.xlu0 %3620  ;;  %v3797_v0 = vsel %vm9720_vm13, %v3765_v38, %v3251_v62  ;;  %vm9721_vm9 = vmmov %vm9703_vm3  ;;  %v7882_v62 = vsel %vm9732_vm7, %v2682_v25, 0.0  ;;  %v3704_v46 = vsel %vm9736_vm1, %v7319_v30, %v9735_v18  ;;  %vm9747_vm7 = vcmask 293888   ;;  %v9771_v18 = vld [vmem:[#allocation154_spill] sm:$0xff] }
 0x46e   : > { %v3923_v5 = vsel %vm9706_vm4, %v3891_v2, %v3621_v55  ;;  %v3347_v19 = vpop.permute.xlu1 %3346  ;;  %vm9723_vm3 = vmmov %vm9717_vm8 }
 0x46f   : > { %3176 = vrot.lane.b32.xlu0 %v7820_v34, %s4811_s26  ;;  %4668 = vmatmul.mubr.msk.f32.gmra.mrb[6].mxu1 %vm9708_vm14, %v3923_v5  ;;  %v3828_v58 = vsel %vm9717_vm8, %v3796_v49, %v3347_v19  ;;  %vm9725_vm4 = vmmov %vm9719_vm2  ;;  %vm9737_vm8 = vcmask 64512   ;;  %v9738_v19 = vld [vmem:[#allocation115_spill] sm:$0xff] }
 0x470   : > { %3462 = vrot.lane.b32.xlu1 %v7820_v34, %s4814_s29  ;;  %vm9726_vm5 = vmmov %vm9721_vm9  ;;  %v3734_v2 = vsel %vm9737_vm8, %v3704_v46, %v7474_v61 }
 0x471   : > { %v3443_v52 = vpop.permute.xlu0 %3442  ;;  %vm9734_vm15 = vmmov %vm9728_vm6  ;;  %v3766_v47 = vsel %vm9718_vm11, %v3734_v2, %v7598_v44  ;;  %vm9744_vm6 = vcmask 261120   ;;  %v9773_v2 = vld [vmem:[#allocation158_spill] sm:$0xff] }
 0x472   : > { %v3349_v29 = vpop.permute.xlu1 %3348  ;;  %v3860_v33 = vsel %vm9719_vm2, %v3828_v58, %v3443_v52  ;;  %v7890_v14 = vsel %vm9734_vm15, %v2681_v21, %v2683_v37  ;;  %vm9739_vm2 = vmmov %vm9736_vm1  ;;  %v9753_v58 = vld [vmem:[#allocation46_spill] sm:$0xff]  ;;  %v9759_v21 = vld [vmem:[#allocation37_spill] sm:$0xff] }
 0x473   : > { %3552 = vrot.lane.b32.xlu0 %v9691_v12, %s4815_s15  ;;  %v3829_v20 = vsel %vm9723_vm3, %v3797_v0, %v3349_v29  ;;  %vm9748_vm15 = vmmov %vm9726_vm5 }
 0x474   : > { %3464 = vrot.lane.b32.xlu1 %v7830_v23, %s4814_s29  ;;  %vm9749_vm1 = vmmov %vm9744_vm6 }
 0x475   : > { %v3533_v40 = vpop.permute.xlu0 %3532 }
 0x476   : > { %v3445_v4 = vpop.permute.xlu1 %3444  ;;  %v3892_v45 = vsel %vm9721_vm9, %v3860_v33, %v3533_v40  ;;  %vm9740_vm9 = vmmov %vm9737_vm8  ;;  %v9754_v33 = vld [vmem:[#allocation94_spill] sm:$0xff] }
 0x477   : > { %3272 = vrot.lane.b32.xlu0 %v9691_v12, %s4812_s27  ;;  %v3861_v28 = vsel %vm9725_vm4, %v3829_v20, %v3445_v4  ;;  %vm9751_vm8 = vmmov %vm9747_vm7  ;;  %v2687_v20 = vrot.slane %v9759_v21, 7 }
 0x478   : > { %3178 = vrot.lane.b32.xlu1 %v7830_v23, %s4811_s26 }
 0x479   : > { %v3535_v8 = vpop.permute.xlu0 %3534 }
 0x47a   : > { %v3253_v9 = vpop.permute.xlu1 %3252  ;;  %v3893_v42 = vsel %vm9726_vm5, %v3861_v28, %v3535_v8 }
 0x47b   : > { %3642 = vrot.lane.b32.xlu0 %v9715_v36, %s4816_s16  ;;  %v3798_v13 = vsel %vm9720_vm13, %v3766_v47, %v3253_v9 }
 0x47c   : > { %3554 = vrot.lane.b32.xlu1 %v9707_v56, %s4815_s15 }
 0x47d   : > { %v3255_v11 = vpop.permute.xlu0 %3254 }
 0x47e   : > { %v3623_v3 = vpop.permute.xlu1 %3622 }
 0x47f   : > { %v3924_v31 = vsel %vm9724_vm12, %v3892_v45, %v3623_v3  ;;  %3370 = vrot.lane.b32.xlu0 %v9715_v36, %s4813_s28  ;;  %vm9741_vm12 = vmmov %vm9718_vm11  ;;  %vm9752_vm11 = vcmask 1040384   ;;  %v9756_v45 = vld [vmem:[#allocation143_spill] sm:$0xff] }
 0x480   : > { %3274 = vrot.lane.b32.xlu1 %v9707_v56, %s4812_s27  ;;  %4670 = vmatprep.mubr.msk.f32.mxu1 %vm9708_vm14, %v3924_v31  ;;  %v3705_v56 = vsel %vm9739_vm2, %v7312_v17, %v9738_v19  ;;  %vm9742_vm14 = vmmov %vm9720_vm13  ;;  %v2686_v1 = vsel %vm9752_vm11, %v2683_v37, %v2685_v54  ;;  %vm9755_vm2 = vnez %v9754_v33  ;;  %v9757_v3 = vld [vmem:[#allocation55_spill] sm:$0xff]  ;;  %vm9758_vm13 = vcmask 31744  }
 0x481   : > { %v3625_v12 = vpop.permute.xlu0 %3624  ;;  %v3735_v30 = vsel %vm9740_vm9, %v3705_v56, %v7472_v27  ;;  %v9760_v31 = vld [vmem:[#allocation175_spill] sm:$0xff] }
 0x482   : > { %v3925_v43 = vsel %vm9727_vm10, %v3893_v42, %v3625_v12  ;;  %v3351_v41 = vpop.permute.xlu1 %3350  ;;  %v3767_v44 = vsel %vm9741_vm12, %v3735_v30, %v7596_v15  ;;  %vm9743_vm10 = vmmov %vm9723_vm3  ;;  %v9761_v42 = vld [vmem:[#allocation151_spill] sm:$0xff]  ;;  %v9778_v30 = vld [vmem:[#allocation114_spill] sm:$0xff] }
 0x483   : > { %3372 = vrot.lane.b32.xlu0 %v9729_v26, %s4813_s28  ;;  %4671 = vmatmul.mubr.msk.f32.gmra.mrb[8].mxu1 %vm9730_vm0, %v3925_v43  ;;  %v3830_v52 = vsel %vm9723_vm3, %v3798_v13, %v3351_v41  ;;  %v3799_v17 = vsel %vm9742_vm14, %v3767_v44, %v3255_v11  ;;  %vm9746_vm0 = vmmov %vm9725_vm4  ;;  %v7942_v11 = vsel %vm9755_vm2, %v2686_v1, 0.0  ;;  %v9792_v1 = vld [vmem:[#allocation40_spill] sm:$0xff] }
 0x484   : > { %3644 = vrot.lane.b32.xlu1 %v9729_v26, %s4816_s16  ;;  %vm9762_vm3 = vmmov %vm9741_vm12 }
 0x485   : > { %v3447_v7 = vpop.permute.xlu0 %3446  ;;  %vm9763_vm12 = vmmov %vm9742_vm14 }
 0x486   : > { %v3353_v59 = vpop.permute.xlu1 %3352  ;;  %v3862_v61 = vsel %vm9725_vm4, %v3830_v52, %v3447_v7  ;;  %vm9764_vm4 = vmmov %vm9752_vm11 }
 0x487   : > { %3180 = vrot.lane.b32.xlu0 %v7882_v62, %s4811_s26  ;;  %v3831_v53 = vsel %vm9743_vm10, %v3799_v17, %v3353_v59  ;;  %v7960_v26 = vsel %vm9764_vm4, %v2685_v54, %v2687_v20  ;;  %vm9765_vm14 = vmmov %vm9743_vm10  ;;  %v9789_v54 = vld [vmem:[#allocation174_spill] sm:$0xff] }
 0x488   : > { %3466 = vrot.lane.b32.xlu1 %v7882_v62, %s4814_s29  ;;  %vm9767_vm10 = vmmov %vm9748_vm15 }
 0x489   : > { %v3537_v48 = vpop.permute.xlu0 %3536  ;;  %vm9779_vm11 = vmmov %vm9765_vm14 }
 0x48a   : > { %v3449_v51 = vpop.permute.xlu1 %3448  ;;  %v3894_v40 = vsel %vm9726_vm5, %v3862_v61, %v3537_v48  ;;  %vm9766_vm5 = vmmov %vm9746_vm0 }
 0x48b   : > { %3556 = vrot.lane.b32.xlu0 %v9722_v22, %s4815_s15  ;;  %v3863_v16 = vsel %vm9746_vm0, %v3831_v53, %v3449_v51  ;;  %vm9769_vm0 = vmmov %vm9747_vm7  ;;  %v9770_v51 = vld [vmem:[#allocation140_spill] sm:$0xff] }
 0x48c   : > { %3468 = vrot.lane.b32.xlu1 %v7890_v14, %s4814_s29  ;;  %vm9780_vm2 = vmmov %vm9766_vm5 }
 0x48d   : > { %v3539_v55 = vpop.permute.xlu0 %3538 }
 0x48e   : > { %v3257_v5 = vpop.permute.xlu1 %3256  ;;  %v3895_v15 = vsel %vm9748_vm15, %v3863_v16, %v3539_v55  ;;  %vm9774_vm15 = vmmov %vm9740_vm9 }
 0x48f   : > { %3276 = vrot.lane.b32.xlu0 %v9722_v22, %s4812_s27  ;;  %v3706_v22 = vsel %vm9758_vm13, %v9757_v3, %v9756_v45 }
 0x490   : > { %3182 = vrot.lane.b32.xlu1 %v7890_v14, %s4811_s26  ;;  %v3736_v28 = vsel %vm9740_vm9, %v3706_v22, %v9760_v31 }
 0x491   : > { %v3259_v29 = vpop.permute.xlu0 %3258  ;;  %v3768_v12 = vsel %vm9762_vm3, %v3736_v28, %v9761_v42 }
 0x492   : > { %v3627_v4 = vpop.permute.xlu1 %3626  ;;  %v3800_v41 = vsel %vm9763_vm12, %v3768_v12, %v3257_v5  ;;  %v9775_v5 = vld [vmem:[#allocation148_spill] sm:$0xff] }
 0x493   : > { %v3926_v27 = vsel %vm9744_vm6, %v3894_v40, %v3627_v4  ;;  %3646 = vrot.lane.b32.xlu0 %v9745_v35, %s4816_s16  ;;  %vm9768_vm6 = vmmov %vm9749_vm1  ;;  %v9782_v4 = vld [vmem:[#allocation48_spill] sm:$0xff] }
 0x494   : > { %3558 = vrot.lane.b32.xlu1 %v9733_v6, %s4815_s15  ;;  %4673 = vmatprep.mubr.msk.f32.mxu1 %vm9747_vm7, %v3926_v27  ;;  %vm9772_vm7 = vmmov %vm9758_vm13  ;;  %v2689_v53 = vrot.slane %v9782_v4, 7 }
 0x495   : > { %v3629_v8 = vpop.permute.xlu0 %3628  ;;  %v3707_v46 = vsel %vm9772_vm7, %v9771_v18, %v9770_v51  ;;  %vm9781_vm13 = vmmov %vm9767_vm10 }
 0x496   : > { %v3927_v63 = vsel %vm9749_vm1, %v3895_v15, %v3629_v8  ;;  %v3355_v9 = vpop.permute.xlu1 %3354  ;;  %v3737_v55 = vsel %vm9774_vm15, %v3707_v46, %v9773_v2  ;;  %vm9776_vm1 = vmmov %vm9762_vm3  ;;  %v9786_v15 = vld [vmem:[#allocation113_spill] sm:$0xff] }
 0x497   : > { %3374 = vrot.lane.b32.xlu0 %v9745_v35, %s4813_s28  ;;  %4674 = vmatmul.mubr.msk.f32.gmra.mrb[10].mxu1 %vm9751_vm8, %v3927_v63  ;;  %v3832_v7 = vsel %vm9765_vm14, %v3800_v41, %v3355_v9  ;;  %v3769_v19 = vsel %vm9776_vm1, %v3737_v55, %v9775_v5  ;;  %vm9777_vm8 = vmmov %vm9763_vm12  ;;  %v9787_v63 = vld [vmem:[#allocation99_spill] sm:$0xff]  ;;  %v9811_v2 = vld [vmem:[#allocation141_spill] sm:$0xff] }
 0x498   : > { %3278 = vrot.lane.b32.xlu1 %v9733_v6, %s4812_s27  ;;  %v3801_v13 = vsel %vm9777_vm8, %v3769_v19, %v3259_v29  ;;  %vm9783_vm9 = vmmov %vm9768_vm6 }
 0x499   : > { %v3451_v49 = vpop.permute.xlu0 %3450  ;;  %vm9784_vm3 = vmmov %vm9769_vm0 }
 0x49a   : > { %v3357_v36 = vpop.permute.xlu1 %3356  ;;  %v3864_v39 = vsel %vm9766_vm5, %v3832_v7, %v3451_v49  ;;  %vm9785_vm12 = vmmov %vm9764_vm4  ;;  %vm9788_vm4 = vnez %v9787_v63  ;;  %v9790_v49 = vld [vmem:[#allocation117_spill] sm:$0xff]  ;;  %v9804_v7 = vld [vmem:[#allocation35_spill] sm:$0xff] }
 0x49b   : > { %3376 = vrot.lane.b32.xlu0 %v9753_v58, %s4813_s28  ;;  %v3833_v52 = vsel %vm9779_vm11, %v3801_v13, %v3357_v36  ;;  %v2690_v16 = vsel %vm9785_vm12, %v2687_v20, %v2689_v53  ;;  %vm9791_vm14 = vmmov %vm9772_vm7 }
 0x49c   : > { %3648 = vrot.lane.b32.xlu1 %v9753_v58, %s4816_s16  ;;  %v8004_v9 = vsel %vm9788_vm4, %v2690_v16, 0.0  ;;  %v3708_v36 = vsel %vm9791_vm14, %v9790_v49, %v9789_v54  ;;  %v2691_v58 = vrot.slane %v9792_v1, 7  ;;  %vm9794_vm5 = vmmov %vm9774_vm15  ;;  %v9823_v16 = vld [vmem:[#allocation145_spill] sm:$0xff] }
 0x49d   : > { %v3541_v38 = vpop.permute.xlu0 %3540  ;;  %vm9799_vm7 = vmmov %vm9779_vm11 }
 0x49e   : > { %v3453_v0 = vpop.permute.xlu1 %3452  ;;  %v3896_v59 = vsel %vm9767_vm10, %v3864_v39, %v3541_v38  ;;  %v9793_v38 = vld [vmem:[#allocation73_spill] sm:$0xff]  ;;  %vm9796_vm10 = vmmov %vm9776_vm1  ;;  %v9805_v39 = vld [vmem:[#allocation56_spill] sm:$0xff] }
 0x49f   : > { %3184 = vrot.lane.b32.xlu0 %v7942_v11, %s4811_s26  ;;  %v3865_v44 = vsel %vm9780_vm2, %v3833_v52, %v3453_v0  ;;  %v3738_v33 = vsel %vm9794_vm5, %v3708_v36, %v9793_v38  ;;  %v9795_v0 = vld [vmem:[#allocation159_spill] sm:$0xff]  ;;  %vm9800_vm15 = vmmov %vm9780_vm2 }
 0x4a0   : > { %3470 = vrot.lane.b32.xlu1 %v7942_v11, %s4814_s29  ;;  %v3770_v45 = vsel %vm9796_vm10, %v3738_v33, %v9795_v0  ;;  %vm9801_vm1 = vmmov %vm9781_vm13 }
 0x4a1   : > { %v3261_v43 = vpop.permute.xlu0 %3260  ;;  %vm9803_vm11 = vmmov %vm9784_vm3 }
 0x4a2   : > { %v7957_v25 = vpop.permute.xlu1 %3166  ;;  %vm9806_vm2 = vmmov %vm9791_vm14 }
 0x4a3   : > { %3560 = vrot.lane.b32.xlu0 %v9750_v50, %s4815_s15  ;;  %vm9813_vm4 = vmmov %vm9800_vm15 }
 0x4a4   : > { %3472 = vrot.lane.b32.xlu1 %v7960_v26, %s4814_s29  ;;  %vm9814_vm14 = vmmov %vm9801_vm1 }
 0x4a5   : > { %v3631_v6 = vpop.permute.xlu0 %3630 }
 0x4a6   : > { %v3928_v37 = vsel %vm9768_vm6, %v3896_v59, %v3631_v6  ;;  %v3543_v48 = vpop.permute.xlu1 %3542  ;;  %vm9797_vm6 = vmmov %vm9777_vm8  ;;  %v3709_v59 = vsel %vm9806_vm2, %v9805_v39, %v9804_v7  ;;  %v9807_v6 = vld [vmem:[#allocation65_spill] sm:$0xff] }
 0x4a7   : > { %3280 = vrot.lane.b32.xlu0 %v9750_v50, %s4812_s27  ;;  %4676 = vmatprep.mubr.msk.f32.mxu1 %vm9769_vm0, %v3928_v37  ;;  %v3897_v17 = vsel %vm9781_vm13, %v3865_v44, %v3543_v48  ;;  %v3802_v22 = vsel %vm9797_vm6, %v3770_v45, %v3261_v43  ;;  %vm9798_vm0 = vmmov %vm9785_vm12 }
 0x4a8   : > { %3186 = vrot.lane.b32.xlu1 %v7960_v26, %s4811_s26  ;;  %v8022_v20 = vsel %vm9798_vm0, %v2689_v53, %v2691_v58  ;;  %vm9802_vm8 = vmmov %vm9783_vm9 }
 0x4a9   : > { %v3359_v47 = vpop.permute.xlu0 %3358  ;;  %vm9808_vm13 = vmmov %vm9794_vm5 }
 0x4aa   : > { %v3263_v56 = vpop.permute.xlu1 %3262  ;;  %v3834_v31 = vsel %vm9799_vm7, %v3802_v22, %v3359_v47  ;;  %v3739_v37 = vsel %vm9808_vm13, %v3709_v59, %v9807_v6  ;;  %vm9812_vm12 = vmmov %vm9799_vm7  ;;  %v9842_v59 = vld [vmem:[#allocation43_spill] sm:$0xff] }
 0x4ab   : > { %3650 = vrot.lane.b32.xlu0 %v9778_v30, %s4816_s16  ;;  %vm9816_vm5 = vmmov %vm9802_vm8 }
 0x4ac   : > { %3562 = vrot.lane.b32.xlu1 %v9759_v21, %s4815_s15  ;;  %vm9824_vm7 = vmmov %vm9806_vm2 }
 0x4ad   : > { %v3361_v61 = vpop.permute.xlu0 %3360  ;;  %vm9831_vm2 = vmmov %vm9812_vm12 }
 0x4ae   : > { %v3633_v40 = vpop.permute.xlu1 %3632 }
 0x4af   : > { %v3929_v27 = vsel %vm9783_vm9, %v3897_v17, %v3633_v40  ;;  %3378 = vrot.lane.b32.xlu0 %v9778_v30, %s4813_s28  ;;  %vm9809_vm9 = vmmov %vm9796_vm10  ;;  %v9815_v30 = vld [vmem:[#allocation52_spill] sm:$0xff]  ;;  %v9819_v17 = vld [vmem:[#allocation138_spill] sm:$0xff] }
 0x4b0   : > { %3282 = vrot.lane.b32.xlu1 %v9759_v21, %s4812_s27  ;;  %4677 = vmatmul.mubr.msk.f32.gmra.mrb[12].mxu1 %vm9784_vm3, %v3929_v27  ;;  %v3771_v51 = vsel %vm9809_vm9, %v3739_v37, %v7957_v25  ;;  %vm9810_vm3 = vmmov %vm9797_vm6  ;;  %v2693_v52 = vrot.slane %v9815_v30, 7 }
 0x4b1   : > { %v3169_v29 = vpop.permute.xlu0 %3168  ;;  %v3803_v46 = vsel %vm9810_vm3, %v3771_v51, %v3263_v56  ;;  %vm9817_vm10 = vmmov %vm9803_vm11 }
 0x4b2   : > { %v3455_v35 = vpop.permute.xlu1 %3454  ;;  %v3835_v55 = vsel %vm9812_vm12, %v3803_v46, %v3361_v61  ;;  %vm9818_vm6 = vmmov %vm9798_vm0 }
 0x4b3   : > { %3380 = vrot.lane.b32.xlu0 %v9786_v15, %s4813_s28  ;;  %v3866_v28 = vsel %vm9800_vm15, %v3834_v31, %v3455_v35  ;;  %v2694_v61 = vsel %vm9818_vm6, %v2691_v58, %v2693_v52  ;;  %v9822_v35 = vld [vmem:[#allocation67_spill] sm:$0xff]  ;;  %vm9827_vm15 = vmmov %vm9808_vm13 }
 0x4b4   : > { %3652 = vrot.lane.b32.xlu1 %v9786_v15, %s4816_s16  ;;  %v3710_v15 = vsel %vm9824_vm7, %v9823_v16, %v9822_v35  ;;  %vm9832_vm13 = vmmov %vm9813_vm4  ;;  %v9836_v31 = vld [vmem:[#allocation63_spill] sm:$0xff] }
 0x4b5   : > { %v3545_v8 = vpop.permute.xlu0 %3544  ;;  %vm9835_vm12 = vmmov %vm9817_vm10 }
 0x4b6   : > { %v3457_v50 = vpop.permute.xlu1 %3456  ;;  %v3898_v42 = vsel %vm9801_vm1, %v3866_v28, %v3545_v8  ;;  %v9825_v8 = vld [vmem:[#allocation41_spill] sm:$0xff]  ;;  %vm9828_vm1 = vmmov %vm9809_vm9 }
 0x4b7   : > { %3188 = vrot.lane.b32.xlu0 %v8004_v9, %s4811_s26  ;;  %v3867_v47 = vsel %vm9813_vm4, %v3835_v55, %v3457_v50  ;;  %v2695_v63 = vrot.slane %v9825_v8, 7  ;;  %v9826_v50 = vld [vmem:[#allocation77_spill] sm:$0xff]  ;;  %vm9833_vm9 = vmmov %vm9814_vm14 }
 0x4b8   : > { %3474 = vrot.lane.b32.xlu1 %v8004_v9, %s4814_s29  ;;  %v3740_v54 = vsel %vm9827_vm15, %v3710_v15, %v9826_v50  ;;  %vm9837_vm4 = vmmov %vm9824_vm7 }
 0x4b9   : > { %v3265_v3 = vpop.permute.xlu0 %3264  ;;  %v3772_v49 = vsel %vm9828_vm1, %v3740_v54, %v3169_v29  ;;  %v3711_v28 = vsel %vm9837_vm4, %v7636_v57, %v9836_v31  ;;  %vm9845_vm7 = vmmov %vm9833_vm9  ;;  %v9872_v31 = vld [vmem:[#allocation137_spill] sm:$0xff] }
 0x4ba   : > { %v8019_v21 = vpop.permute.xlu1 %3170 }
 0x4bb   : > { %3564 = vrot.lane.b32.xlu0 %v9782_v4, %s4815_s15 }
 0x4bc   : > { %3476 = vrot.lane.b32.xlu1 %v8022_v20, %s4814_s29 }
 0x4bd   : > { %v3635_v12 = vpop.permute.xlu0 %3634 }
 0x4be   : > { %v3930_v43 = vsel %vm9802_vm8, %v3898_v42, %v3635_v12  ;;  %v3547_v41 = vpop.permute.xlu1 %3546  ;;  %vm9829_vm8 = vmmov %vm9810_vm3  ;;  %v9838_v42 = vld [vmem:[#allocation66_spill] sm:$0xff] }
 0x4bf   : > { %3284 = vrot.lane.b32.xlu0 %v9782_v4, %s4812_s27  ;;  %4679 = vmatprep.mubr.msk.f32.mxu1 %vm9803_vm11, %v3930_v43  ;;  %v3899_v19 = vsel %vm9814_vm14, %v3867_v47, %v3547_v41  ;;  %v9820_v4 = vld [vmem:[#allocation104_spill] sm:$0xff]  ;;  %vm9830_vm11 = vmmov %vm9818_vm6  ;;  %v9849_v47 = vld [vmem:[#allocation30_spill] sm:$0xff] }
 0x4c0   : > { %3190 = vrot.lane.b32.xlu1 %v8022_v20, %s4811_s26  ;;  %vm9821_vm0 = vnez %v9820_v4  ;;  %v8083_v38 = vsel %vm9830_vm11, %v2693_v52, %v2695_v63  ;;  %vm9834_vm3 = vmmov %vm9816_vm5 }
 0x4c1   : > { %v3363_v48 = vpop.permute.xlu0 %3362  ;;  %v8066_v53 = vsel %vm9821_vm0, %v2694_v61, 0.0  ;;  %vm9839_vm14 = vmmov %vm9827_vm15  ;;  %v9855_v61 = vld [vmem:[#allocation111_spill] sm:$0xff] }
 0x4c2   : > { %v3267_v18 = vpop.permute.xlu1 %3266  ;;  %v3741_v12 = vsel %vm9839_vm14, %v3711_v28, %v9838_v42  ;;  %vm9843_vm6 = vmmov %vm9831_vm2 }
 0x4c3   : > { %3654 = vrot.lane.b32.xlu0 %v9811_v2, %s4816_s16  ;;  %vm9844_vm0 = vmmov %vm9832_vm13 }
 0x4c4   : > { %3566 = vrot.lane.b32.xlu1 %v9792_v1, %s4815_s15  ;;  %vm9846_vm15 = vmmov %vm9834_vm3 }
 0x4c5   : > { %v3365_v5 = vpop.permute.xlu0 %3364 }
 0x4c6   : > { %v3637_v13 = vpop.permute.xlu1 %3636 }
 0x4c7   : > { %v3931_v25 = vsel %vm9816_vm5, %v3899_v19, %v3637_v13  ;;  %3382 = vrot.lane.b32.xlu0 %v9811_v2, %s4813_s28  ;;  %vm9840_vm5 = vmmov %vm9828_vm1 }
 0x4c8   : > { %3286 = vrot.lane.b32.xlu1 %v9792_v1, %s4812_s27  ;;  %4680 = vmatmul.mubr.msk.f32.gmra.mrb[14].mxu1 %vm9817_vm10, %v3931_v25  ;;  %v3804_v1 = vsel %vm9829_vm8, %v3772_v49, %v3265_v3  ;;  %v3773_v41 = vsel %vm9840_vm5, %v3741_v12, %v8019_v21  ;;  %vm9841_vm10 = vmmov %vm9829_vm8  ;;  %v9847_v21 = vld [vmem:[#allocation112_spill] sm:$0xff]  ;;  %v9853_v25 = vld [vmem:[#allocation142_spill] sm:$0xff] }
 0x4c9   : > { %v3173_v56 = vpop.permute.xlu0 %3172  ;;  %v3836_v33 = vsel %vm9831_vm2, %v3804_v1, %v3363_v48  ;;  %v3805_v39 = vsel %vm9841_vm10, %v3773_v41, %v3267_v18  ;;  %v2697_v18 = vrot.slane %v9847_v21, 7  ;;  %vm9848_vm1 = vmmov %vm9835_vm12 }
 0x4ca   : > { %v3459_v44 = vpop.permute.xlu1 %3458  ;;  %v3837_v6 = vsel %vm9843_vm6, %v3805_v39, %v3365_v5  ;;  %vm9850_vm8 = vmmov %vm9830_vm11 }
 0x4cb   : > { %3384 = vrot.lane.b32.xlu0 %v9819_v17, %s4813_s28  ;;  %v3868_v0 = vsel %vm9832_vm13, %v3836_v33, %v3459_v44  ;;  %v2698_v5 = vsel %vm9850_vm8, %v2695_v63, %v2697_v18  ;;  %vm9854_vm2 = vmmov %vm9837_vm4  ;;  %v9868_v33 = vld [vmem:[#allocation121_spill] sm:$0xff] }
 0x4cc   : > { %3656 = vrot.lane.b32.xlu1 %v9819_v17, %s4816_s16  ;;  %v3712_v44 = vsel %vm9854_vm2, %v7681_v10, %v9853_v25  ;;  %v2699_v17 = vrot.slane %v9855_v61, 7  ;;  %vm9857_vm13 = vmmov %vm9839_vm14 }
 0x4cd   : > { %v3549_v40 = vpop.permute.xlu0 %3548  ;;  %vm9861_vm4 = vmmov %vm9850_vm8 }
 0x4ce   : > { %v3461_v27 = vpop.permute.xlu1 %3460  ;;  %v3900_v29 = vsel %vm9833_vm9, %v3868_v0, %v3549_v40  ;;  %v9856_v40 = vld [vmem:[#allocation122_spill] sm:$0xff]  ;;  %vm9858_vm9 = vmmov %vm9840_vm5  ;;  %v2700_v10 = vsel %vm9861_vm4, %v2697_v18, %v2699_v17 }
 0x4cf   : > { %3192 = vrot.lane.b32.xlu0 %v8066_v53, %s4811_s26  ;;  %v3869_v57 = vsel %vm9844_vm0, %v3837_v6, %v3461_v27  ;;  %v3742_v4 = vsel %vm9857_vm13, %v3712_v44, %v9856_v40  ;;  %vm9862_vm14 = vmmov %vm9844_vm0  ;;  %v9880_v6 = vld [vmem:[#allocation22_spill] sm:$0xff] }
 0x4d0   : > { %3478 = vrot.lane.b32.xlu1 %v8066_v53, %s4814_s29  ;;  %v3774_v27 = vsel %vm9858_vm9, %v3742_v4, %v3173_v56  ;;  %vm9863_vm5 = vmmov %vm9845_vm7  ;;  %v9893_v4 = vld [vmem:[#allocation47_spill] sm:$0xff] }
 0x4d1   : > { %v3269_v36 = vpop.permute.xlu0 %3268  ;;  %vm9867_vm0 = vmmov %vm9854_vm2 }
 0x4d2   : > { %v8080_v58 = vpop.permute.xlu1 %3174  ;;  %vm9875_vm2 = vmmov %vm9863_vm5 }
 0x4d3   : > { %3568 = vrot.lane.b32.xlu0 %v9815_v30, %s4815_s15  ;;  %vm9883_vm4 = vmmov %vm9867_vm0 }
 0x4d4   : > { %3480 = vrot.lane.b32.xlu1 %v8083_v38, %s4814_s29 }
 0x4d5   : > { %v3639_v45 = vpop.permute.xlu0 %3638 }
 0x4d6   : > { %v3932_v3 = vsel %vm9834_vm3, %v3900_v29, %v3639_v45  ;;  %v3551_v22 = vpop.permute.xlu1 %3550  ;;  %vm9859_vm3 = vmmov %vm9841_vm10 }
 0x4d7   : > { %3288 = vrot.lane.b32.xlu0 %v9815_v30, %s4812_s27  ;;  %4682 = vmatprep.mubr.msk.f32.mxu1 %vm9835_vm12, %v3932_v3  ;;  %v3901_v48 = vsel %vm9845_vm7, %v3869_v57, %v3551_v22  ;;  %v9851_v30 = vld [vmem:[#allocation107_spill] sm:$0xff]  ;;  %v3806_v16 = vsel %vm9859_vm3, %v3774_v27, %v3269_v36  ;;  %vm9860_vm12 = vmmov %vm9843_vm6  ;;  %v9866_v36 = vld [vmem:[#allocation118_spill] sm:$0xff] }
 0x4d8   : > { %3194 = vrot.lane.b32.xlu1 %v8083_v38, %s4811_s26  ;;  %vm9852_vm11 = vnez %v9851_v30  ;;  %vm9864_vm10 = vmmov %vm9846_vm15  ;;  %v3713_v1 = vsel %vm9867_vm0, %v7703_v24, %v9866_v36 }
 0x4d9   : > { %v3367_v43 = vpop.permute.xlu0 %3366  ;;  %v2764_v52 = vsel %vm9852_vm11, %v2698_v5, 0.0  ;;  %vm9865_vm6 = vmmov %vm9848_vm1 }
 0x4da   : > { %v3271_v7 = vpop.permute.xlu1 %3270  ;;  %vm9869_vm7 = vmmov %vm9857_vm13 }
 0x4db   : > { %3658 = vrot.lane.b32.xlu0 %v9842_v59, %s4816_s16  ;;  %v3743_v0 = vsel %vm9869_vm7, %v3713_v1, %v9868_v33  ;;  %vm9873_vm8 = vmmov %vm9860_vm12 }
 0x4dc   : > { %3570 = vrot.lane.b32.xlu1 %v9825_v8, %s4815_s15  ;;  %vm9874_vm11 = vmmov %vm9862_vm14 }
 0x4dd   : > { %v3369_v37 = vpop.permute.xlu0 %3368  ;;  %vm9876_vm13 = vmmov %vm9864_vm10 }
 0x4de   : > { %v3641_v51 = vpop.permute.xlu1 %3640  ;;  %vm9889_vm0 = vmmov %vm9874_vm11 }
 0x4df   : > { %v3933_v46 = vsel %vm9846_vm15, %v3901_v48, %v3641_v51  ;;  %3386 = vrot.lane.b32.xlu0 %v9842_v59, %s4813_s28  ;;  %vm9870_vm15 = vmmov %vm9858_vm9  ;;  %vm9878_vm9 = vcmask 1046528   ;;  %v9882_v51 = vld [vmem:[#allocation156_spill] sm:$0xff] }
 0x4e0   : > { %3290 = vrot.lane.b32.xlu1 %v9825_v8, %s4812_s27  ;;  %4683 = vmatmul.mubr.msk.f32.gmra.mrb[16].mxu1 %vm9848_vm1, %v3933_v46  ;;  %v3838_v8 = vsel %vm9860_vm12, %v3806_v16, %v3367_v43  ;;  %v3775_v45 = vsel %vm9870_vm15, %v3743_v0, %v8080_v58  ;;  %vm9871_vm1 = vmmov %vm9859_vm3  ;;  %v9877_v58 = vrot.slane %v9855_v61, 1  ;;  %vm9881_vm12 = vnez %v9880_v6  ;;  %v9895_v16 = vld [vmem:[#allocation146_spill] sm:$0xff] }
 0x4e1   : > { %v3177_v2 = vpop.permute.xlu0 %3176  ;;  %v3807_v22 = vsel %vm9871_vm1, %v3775_v45, %v3271_v7  ;;  %vm9879_vm3 = vmmov %vm9865_vm6  ;;  %v3714_v46 = vsel %vm9883_vm4, %v7753_v32, %v9882_v51 }
 0x4e2   : > { %v3463_v55 = vpop.permute.xlu1 %3462  ;;  %v3839_v28 = vsel %vm9873_vm8, %v3807_v22, %v3369_v37  ;;  %v2861_v7 = vsel %vm9878_vm9, %v9877_v58, 0.0 }
 0x4e3   : > { %3388 = vrot.lane.b32.xlu0 %v9849_v47, %s4813_s28  ;;  %v3870_v63 = vsel %vm9862_vm14, %v3838_v8, %v3463_v55  ;;  %v2893_v57 = vsel %vm9881_vm12, %v2861_v7, 0.0  ;;  %vm9885_vm14 = vmmov %vm9869_vm7 }
 0x4e4   : > { %3660 = vrot.lane.b32.xlu1 %v9849_v47, %s4816_s16  ;;  %vm9890_vm7 = vmmov %vm9875_vm2 }
 0x4e5   : > { %v3553_v19 = vpop.permute.xlu0 %3552  ;;  %vm9901_vm12 = vmmov %vm9883_vm4 }
 0x4e6   : > { %v3465_v13 = vpop.permute.xlu1 %3464  ;;  %v3902_v50 = vsel %vm9863_vm5, %v3870_v63, %v3553_v19  ;;  %vm9886_vm5 = vmmov %vm9870_vm15 }
 0x4e7   : > { %3196 = vrot.lane.b32.xlu0 %v2764_v52, %s4811_s26  ;;  %v3871_v24 = vsel %vm9874_vm11, %v3839_v28, %v3465_v13  ;;  %vm9891_vm15 = vmmov %vm9876_vm13 }
 0x4e8   : > { %3482 = vrot.lane.b32.xlu1 %v2764_v52, %s4814_s29  ;;  %v8191_v52 = vld [vmem:[%s8480_s4] ss:$0 sm:$0xff]  ;;  %vm9896_vm11 = vmmov %vm9885_vm14 }
 0x4e9   : > { %v3273_v35 = vpop.permute.xlu0 %3272 }
 0x4ea   : > { %v3179_v15 = vpop.permute.xlu1 %3178 }
 0x4eb   : > { %3572 = vrot.lane.b32.xlu0 %v9847_v21, %s4815_s15 }
 0x4ec   : > { %3484 = vrot.lane.b32.xlu1 %v2700_v10, %s4814_s29 }
 0x4ed   : > { %v3643_v54 = vpop.permute.xlu0 %3642 }
 0x4ee   : > { %v3934_v56 = vsel %vm9864_vm10, %v3902_v50, %v3643_v54  ;;  %v3555_v49 = vpop.permute.xlu1 %3554  ;;  %vm9887_vm10 = vmmov %vm9871_vm1 }
 0x4ef   : > { %3292 = vrot.lane.b32.xlu0 %v9847_v21, %s4812_s27  ;;  %4685 = vmatprep.mubr.msk.f32.mxu1 %vm9865_vm6, %v3934_v56  ;;  %v3903_v12 = vsel %vm9875_vm2, %v3871_v24, %v3555_v49  ;;  %v9884_v21 = vld [vmem:[#allocation149_spill] sm:$0xff]  ;;  %vm9888_vm6 = vmmov %vm9873_vm8  ;;  %v4769_v56 = vld [vmem:[%s4865_s24] sm:$0xff] }
 0x4f0   : > { %3198 = vrot.lane.b32.xlu1 %v2700_v10, %s4811_s26  ;;  %v3744_v18 = vsel %vm9885_vm14, %v3714_v46, %v9884_v21  ;;  %vm9892_vm1 = vmmov %vm9879_vm3  ;;  %v4768_v10 = vld [vmem:[%s4865_s24 + $0x8] sm:$0xff] }
 0x4f1   : > { %v3371_v29 = vpop.permute.xlu0 %3370  ;;  %v3776_v55 = vsel %vm9886_vm5, %v3744_v18, %v3177_v2  ;;  %vm9894_vm8 = vmmov %vm9883_vm4 }
 0x4f2   : > { %v3275_v3 = vpop.permute.xlu1 %3274  ;;  %v3808_v5 = vsel %vm9887_vm10, %v3776_v55, %v3273_v35  ;;  %v3715_v27 = vsel %vm9894_vm8, %v7769_v60, %v9893_v4  ;;  %vm9897_vm2 = vmmov %vm9886_vm5 }
 0x4f3   : > { %3662 = vrot.lane.b32.xlu0 %v9872_v31, %s4816_s16  ;;  %v3840_v13 = vsel %vm9888_vm6, %v3808_v5, %v3371_v29  ;;  %v3745_v8 = vsel %vm9896_vm11, %v3715_v27, %v9895_v16  ;;  %vm9899_vm9 = vmmov %vm9888_vm6 }
 0x4f4   : > { %3574 = vrot.lane.b32.xlu1 %v9855_v61, %s4815_s15  ;;  %v3777_v54 = vsel %vm9897_vm2, %v3745_v8, %v3179_v15  ;;  %vm9902_vm4 = vmmov %vm9890_vm7 }
 0x4f5   : > { %v3373_v42 = vpop.permute.xlu0 %3372  ;;  %vm9903_vm14 = vmmov %vm9894_vm8 }
 0x4f6   : > { %v3645_v43 = vpop.permute.xlu1 %3644  ;;  %vm9904_vm5 = vmmov %vm9891_vm15 }
 0x4f7   : > { %v3935_v41 = vsel %vm9876_vm13, %v3903_v12, %v3645_v43  ;;  %3390 = vrot.lane.b32.xlu0 %v9872_v31, %s4813_s28  ;;  %vm9898_vm13 = vmmov %vm9887_vm10  ;;  %v9906_v12 = vld [vmem:[#allocation60_spill] sm:$0xff] }
 0x4f8   : > { %3294 = vrot.lane.b32.xlu1 %v9855_v61, %s4812_s27  ;;  %4686 = vmatmul.mubr.msk.f32.gmra.mrb[18].mxu1 %vm9879_vm3, %v3935_v41  ;;  %v3809_v36 = vsel %vm9898_vm13, %v3777_v54, %v3275_v3  ;;  %vm9900_vm3 = vmmov %vm9889_vm0  ;;  %v9908_v41 = vld [vmem:[#allocation160_spill] sm:$0xff] }
 0x4f9   : > { %v3181_v39 = vpop.permute.xlu0 %3180  ;;  %v3841_v33 = vsel %vm9899_vm9, %v3809_v36, %v3373_v42  ;;  %vm9905_vm10 = vmmov %vm9892_vm1 }
 0x4fa   : > { %v3467_v59 = vpop.permute.xlu1 %3466  ;;  %vm9907_vm6 = vmmov %vm9894_vm8 }
 0x4fb   : > { %3392 = vrot.lane.b32.xlu0 %v2893_v57, %s4813_s28  ;;  %v3872_v30 = vsel %vm9889_vm0, %v3840_v13, %v3467_v59  ;;  %v3716_v43 = vsel %vm9907_vm6, %v7820_v34, %v9906_v12  ;;  %vm9909_vm0 = vmmov %vm9896_vm11 }
 0x4fc   : > { %3664 = vrot.lane.b32.xlu1 %v2893_v57, %s4816_s16  ;;  %v3746_v58 = vsel %vm9909_vm0, %v3716_v43, %v9908_v41  ;;  %vm9913_vm8 = vmmov %vm9900_vm3  ;;  %v4773_v43 = vld [vmem:[%s4865_s24 + $0x20] sm:$0xff] }
 0x4fd   : > { %v3557_v37 = vpop.permute.xlu0 %3556  ;;  %vm9914_vm11 = vmmov %vm9902_vm4 }
 0x4fe   : > { %v3469_v48 = vpop.permute.xlu1 %3468  ;;  %v3904_v32 = vsel %vm9890_vm7, %v3872_v30, %v3557_v37  ;;  %vm9910_vm7 = vmmov %vm9897_vm2 }
 0x4ff   : > { %v3873_v29 = vsel %vm9900_vm3, %v3841_v33, %v3469_v48  ;;  %v3778_v7 = vsel %vm9910_vm7, %v3746_v58, %v3181_v39  ;;  %v4770_v39 = vld [vmem:[%s4865_s24 + $0x18] sm:$0xff]  ;;  %vm9915_vm2 = vmmov %vm9904_vm5 }
 0x500   : > { %vm9920_vm3 = vmmov %vm9909_vm0 }
 0x501   : > { %v3277_v47 = vpop.permute.xlu0 %3276  ;;  %vm9927_vm0 = vmmov %vm9914_vm11 }
 0x502   : > { %v8184_v19 = vpop.permute.xlu1 %3182 }
 0x505   : > { %v3647_v2 = vpop.permute.xlu0 %3646 }
 0x506   : > { %v3936_v25 = vsel %vm9891_vm15, %v3904_v32, %v3647_v2  ;;  %v4660_v44 = vpop.f32.mrb[0].mxu1  ;;  %v3559_v61 = vpop.permute.xlu1 %3558  ;;  %vm9911_vm15 = vmmov %vm9898_vm13 }
 0x507   : > { %v4131_v17 = vadd.f32 %v4660_v44, %v8191_v52  ;;  %v4125_v40 = vpop.f32.mrb[1].mxu1  ;;  %4688 = vmatprep.mubr.msk.f32.mxu1 %vm9892_vm1, %v3936_v25  ;;  %v3905_v45 = vsel %vm9902_vm4, %v3873_v29, %v3559_v61  ;;  %v3810_v6 = vsel %vm9911_vm15, %v3778_v7, %v3277_v47  ;;  %vm9912_vm1 = vmmov %vm9899_vm9  ;;  %v4771_v47 = vld [vmem:[%s4865_s24 + $0x10] sm:$0xff] }
 0x508   : > { %v4126_v35 = vadd.f32 %v8191_v52, %v4125_v40  ;;  %vm9916_vm13 = vmmov %vm9905_vm10  ;;  %v9917_v25 = vld [vmem:[#allocation176_spill] sm:$0xff] }
 0x509   : > { %v4285_v63 = vadd.f32 %v4768_v10, %v4131_v17  ;;  %v3375_v50 = vpop.permute.xlu0 %3374  ;;  %vm9918_vm9 = vmmov %vm9907_vm6  ;;  %v9919_v17 = vld [vmem:[#allocation157_spill] sm:$0xff] }
 0x50a   : > { %v4284_v60 = vadd.f32 %v4769_v56, %v4126_v35  ;;  %v3279_v49 = vpop.permute.xlu1 %3278  ;;  %v3842_v48 = vsel %vm9912_vm1, %v3810_v6, %v3375_v50  ;;  %v3717_v44 = vsel %vm9918_vm9, %v7830_v23, %v9917_v25  ;;  %vm9922_vm4 = vmmov %vm9910_vm7 }
 0x50b   : > { %v4317_v1 = vmax.f32 %v4285_v63, 0.0  ;;  %v3747_v40 = vsel %vm9920_vm3, %v3717_v44, %v9919_v17  ;;  %vm9928_vm7 = vmmov %vm9915_vm2 }
 0x50c   : > { %v4316_v0 = vmax.f32 %v4284_v60, 0.0  ;;  %v3779_v27 = vsel %vm9922_vm4, %v3747_v40, %v8184_v19 }
 0x50d   : > { %4349 = vst.msk [vmem:[%s8210_s12 + $0x8] sm:$0xff] %vm9901_vm12, %v4317_v1  ;;  %v3377_v15 = vpop.permute.xlu0 %3376  ;;  %vm9921_vm12 = vmmov %vm9907_vm6 }
 0x50e   : > { %4348 = vst.msk [vmem:[%s8210_s12] sm:$0xff] %vm9903_vm14, %v4316_v0  ;;  %v3649_v22 = vpop.permute.xlu1 %3648  ;;  %vm9923_vm14 = vmmov %vm9907_vm6 }
 0x50f   : > { %v3937_v31 = vsel %vm9904_vm5, %v3905_v45, %v3649_v22  ;;  %vm9924_vm5 = vmmov %vm9911_vm15 }
 0x510   : > { %4689 = vmatmul.mubr.msk.f32.gmra.mrb[20].mxu1 %vm9905_vm10, %v3937_v31  ;;  %v3811_v16 = vsel %vm9924_vm5, %v3779_v27, %v3279_v49  ;;  %vm9925_vm10 = vmmov %vm9912_vm1  ;;  %v9930_v49 = vld [vmem:[#allocation61_spill] sm:$0xff] }
 0x511   : > { %v3185_v28 = vpop.permute.xlu0 %3184  ;;  %v3843_v8 = vsel %vm9925_vm10, %v3811_v16, %v3377_v15  ;;  %vm9926_vm6 = vmmov %vm9913_vm8  ;;  %v9932_v15 = vld [vmem:[#allocation192_spill] sm:$0xff]  ;;  %v4774_v27 = vld [vmem:[%s4865_s24 + $0x38] sm:$0xff] }
 0x512   : > { %v3471_v3 = vpop.permute.xlu1 %3470  ;;  %vm9929_vm15 = vmmov %vm9916_vm13 }
 0x513   : > { %v3874_v34 = vsel %vm9913_vm8, %v3842_v48, %v3471_v3  ;;  %vm9931_vm1 = vmmov %vm9918_vm9  ;;  %v4772_v3 = vld [vmem:[%s4865_s24 + $0x28] sm:$0xff] }
 0x514   : > { %v3718_v33 = vsel %vm9931_vm1, %v7882_v62, %v9930_v49  ;;  %vm9933_vm8 = vmmov %vm9920_vm3 }
 0x515   : > { %v3561_v24 = vpop.permute.xlu0 %3560  ;;  %v3748_v45 = vsel %vm9933_vm8, %v3718_v33, %v9932_v15  ;;  %vm9937_vm9 = vmmov %vm9926_vm6 }
 0x516   : > { %v3473_v42 = vpop.permute.xlu1 %3472  ;;  %v3906_v18 = vsel %vm9914_vm11, %v3874_v34, %v3561_v24  ;;  %vm9934_vm11 = vmmov %vm9922_vm4 }
 0x517   : > { %v3875_v10 = vsel %vm9926_vm6, %v3843_v8, %v3473_v42  ;;  %v3780_v31 = vsel %vm9934_vm11, %v3748_v45, %v3185_v28  ;;  %vm9938_vm3 = vmmov %vm9927_vm0  ;;  %v4775_v8 = vld [vmem:[%s4865_s24 + $0x30] sm:$0xff] }
 0x518   : > { %vm9940_vm4 = vmmov %vm9931_vm1 }
 0x519   : > { %v3281_v59 = vpop.permute.xlu0 %3280  ;;  %vm9946_vm6 = vmmov %vm9933_vm8 }
 0x51a   : > { %v4663_v57 = vpop.f32.mrb[2].mxu1  ;;  %v8230_v37 = vpop.permute.xlu1 %3186  ;;  %vm9951_vm8 = vmmov %vm9938_vm3 }
 0x51b   : > { %v4141_v51 = vadd.f32 %v4663_v57, %v8191_v52  ;;  %v4135_v46 = vpop.f32.mrb[3].mxu1 }
 0x51c   : > { %v4136_v21 = vadd.f32 %v8191_v52, %v4135_v46 }
 0x51d   : > { %v4287_v55 = vadd.f32 %v4770_v39, %v4141_v51  ;;  %v3651_v5 = vpop.permute.xlu0 %3650 }
 0x51e   : > { %v4286_v13 = vadd.f32 %v4771_v47, %v4136_v21  ;;  %v3938_v30 = vsel %vm9915_vm2, %v3906_v18, %v3651_v5  ;;  %v3563_v32 = vpop.permute.xlu1 %3562  ;;  %vm9935_vm2 = vmmov %vm9924_vm5  ;;  %v9945_v21 = vld [vmem:[#allocation178_spill] sm:$0xff] }
 0x51f   : > { %v4319_v2 = vmax.f32 %v4287_v55, 0.0  ;;  %4691 = vmatprep.mubr.msk.f32.mxu1 %vm9916_vm13, %v3938_v30  ;;  %v3907_v63 = vsel %vm9927_vm0, %v3875_v10, %v3563_v32  ;;  %v3812_v12 = vsel %vm9935_vm2, %v3780_v31, %v3281_v59  ;;  %vm9936_vm13 = vmmov %vm9925_vm10  ;;  %v9943_v59 = vld [vmem:[#allocation68_spill] sm:$0xff] }
 0x520   : > { %v4318_v61 = vmax.f32 %v4286_v13, 0.0  ;;  %vm9942_vm5 = vmmov %vm9929_vm15 }
 0x521   : > { %4351 = vst.msk [vmem:[%s8210_s12 + $0x18] sm:$0xff] %vm9921_vm12, %v4319_v2  ;;  %v3379_v4 = vpop.permute.xlu0 %3378  ;;  %vm9939_vm12 = vmmov %vm9931_vm1 }
 0x522   : > { %4350 = vst.msk [vmem:[%s8210_s12 + $0x10] sm:$0xff] %vm9923_vm14, %v4318_v61  ;;  %v3283_v35 = vpop.permute.xlu1 %3282  ;;  %v3844_v58 = vsel %vm9936_vm13, %v3812_v12, %v3379_v4  ;;  %vm9941_vm14 = vmmov %vm9928_vm7 }
 0x523   : > { %vm9944_vm10 = vmmov %vm9931_vm1 }
 0x524   : > { %v3719_v34 = vsel %vm9944_vm10, %v7890_v14, %v9943_v59  ;;  %vm9947_vm0 = vmmov %vm9934_vm11 }
 0x525   : > { %v3381_v23 = vpop.permute.xlu0 %3380  ;;  %v3749_v18 = vsel %vm9946_vm6, %v3719_v34, %v9945_v21  ;;  %vm9950_vm1 = vmmov %vm9937_vm9  ;;  %v4776_v34 = vld [vmem:[%s4865_s24 + $0x48] sm:$0xff] }
 0x526   : > { %v3653_v50 = vpop.permute.xlu1 %3652  ;;  %v3781_v55 = vsel %vm9947_vm0, %v3749_v18, %v8230_v37  ;;  %vm9952_vm11 = vmmov %vm9941_vm14 }
 0x527   : > { %v3939_v54 = vsel %vm9928_vm7, %v3907_v63, %v3653_v50  ;;  %vm9948_vm7 = vmmov %vm9935_vm2  ;;  %v9954_v63 = vld [vmem:[#allocation119_spill] sm:$0xff] }
 0x528   : > { %4692 = vmatmul.mubr.msk.f32.gmra.mrb[22].mxu1 %vm9929_vm15, %v3939_v54  ;;  %v3813_v47 = vsel %vm9948_vm7, %v3781_v55, %v3283_v35  ;;  %vm9949_vm15 = vmmov %vm9936_vm13 }
 0x529   : > { %v3189_v19 = vpop.permute.xlu0 %3188  ;;  %v3845_v13 = vsel %vm9949_vm15, %v3813_v47, %v3381_v23  ;;  %vm9953_vm2 = vmmov %vm9942_vm5 }
 0x52a   : > { %v3475_v56 = vpop.permute.xlu1 %3474  ;;  %vm9955_vm13 = vmmov %vm9940_vm4 }
 0x52b   : > { %v3876_v6 = vsel %vm9937_vm9, %v3844_v58, %v3475_v56  ;;  %v3720_v50 = vsel %vm9955_vm13, %v7942_v11, %v9954_v63  ;;  %v9956_v56 = vld [vmem:[#allocation78_spill] sm:$0xff]  ;;  %vm9957_vm9 = vmmov %vm9946_vm6 }
 0x52c   : > { %vm9964_vm6 = vmmov %vm9951_vm8 }
 0x52d   : > { %v3565_v60 = vpop.permute.xlu0 %3564 }
 0x52e   : > { %v3477_v36 = vpop.permute.xlu1 %3476  ;;  %v4666_v1 = vpop.f32.mrb[4].mxu1  ;;  %v3908_v48 = vsel %vm9938_vm3, %v3876_v6, %v3565_v60  ;;  %v3750_v60 = vsel %vm9957_vm9, %v3720_v50, %v9956_v56  ;;  %vm9958_vm3 = vmmov %vm9947_vm0  ;;  %v9992_v50 = vld [vmem:[#allocation124_spill] sm:$0xff] }
 0x52f   : > { %v4151_v0 = vadd.f32 %v4666_v1, %v8191_v52  ;;  %v4145_v29 = vpop.f32.mrb[5].mxu1  ;;  %v3877_v30 = vsel %vm9950_vm1, %v3845_v13, %v3477_v36  ;;  %v3782_v1 = vsel %vm9958_vm3, %v3750_v60, %v3189_v19  ;;  %vm9965_vm0 = vmmov %vm9952_vm11  ;;  %v9967_v19 = vld [vmem:[#allocation72_spill] sm:$0xff] }
 0x530   : > { %v4146_v22 = vadd.f32 %v8191_v52, %v4145_v29 }
 0x531   : > { %v4289_v24 = vadd.f32 %v4772_v3, %v4151_v0  ;;  %v3285_v42 = vpop.permute.xlu0 %3284 }
 0x532   : > { %v4288_v41 = vadd.f32 %v4773_v43, %v4146_v22  ;;  %v3191_v62 = vpop.permute.xlu1 %3190 }
 0x533   : > { %v4321_v7 = vmax.f32 %v4289_v24, 0.0  ;;  %v9969_v24 = vld [vmem:[#allocation70_spill] sm:$0xff] }
 0x534   : > { %v4320_v57 = vmax.f32 %v4288_v41, 0.0 }
 0x535   : > { %4353 = vst.msk [vmem:[%s8210_s12 + $0x28] sm:$0xff] %vm9939_vm12, %v4321_v7  ;;  %v3655_v51 = vpop.permute.xlu0 %3654  ;;  %vm9959_vm12 = vmmov %vm9940_vm4 }
 0x536   : > { %4352 = vst.msk [vmem:[%s8210_s12 + $0x20] sm:$0xff] %vm9940_vm4, %v4320_v57  ;;  %v3940_v28 = vsel %vm9941_vm14, %v3908_v48, %v3655_v51  ;;  %v3567_v46 = vpop.permute.xlu1 %3566  ;;  %vm9960_vm4 = vmmov %vm9948_vm7 }
 0x537   : > { %4694 = vmatprep.mubr.msk.f32.mxu1 %vm9942_vm5, %v3940_v28  ;;  %v3909_v2 = vsel %vm9951_vm8, %v3877_v30, %v3567_v46  ;;  %v3814_v33 = vsel %vm9960_vm4, %v3782_v1, %v3285_v42  ;;  %vm9961_vm14 = vmmov %vm9944_vm10 }
 0x538   : > { %vm9962_vm5 = vmmov %vm9949_vm15 }
 0x539   : > { %v3383_v39 = vpop.permute.xlu0 %3382  ;;  %vm9963_vm10 = vmmov %vm9950_vm1 }
 0x53a   : > { %v3287_v5 = vpop.permute.xlu1 %3286  ;;  %v3846_v29 = vsel %vm9962_vm5, %v3814_v33, %v3383_v39  ;;  %vm9966_vm7 = vmmov %vm9953_vm2  ;;  %v4777_v39 = vld [vmem:[%s4865_s24 + $0x40] sm:$0xff]  ;;  %v10001_v33 = vld [vmem:[#allocation147_spill] sm:$0xff] }
 0x53b   : > { %vm9968_vm15 = vmmov %vm9959_vm12 }
 0x53c   : > { %v3721_v3 = vsel %vm9968_vm15, %v7960_v26, %v9967_v19  ;;  %vm9970_vm1 = vmmov %vm9957_vm9 }
 0x53d   : > { %v3385_v32 = vpop.permute.xlu0 %3384  ;;  %v3751_v42 = vsel %vm9970_vm1, %v3721_v3, %v9969_v24  ;;  %vm9971_vm8 = vmmov %vm9958_vm3  ;;  %v10007_v3 = vld [vmem:[#allocation25_spill] sm:$0xff] }
 0x53e   : > { %v3657_v14 = vpop.permute.xlu1 %3656  ;;  %v3783_v43 = vsel %vm9971_vm8, %v3751_v42, %v3191_v62  ;;  %vm9974_vm13 = vmmov %vm9963_vm10 }
 0x53f   : > { %v3941_v25 = vsel %vm9952_vm11, %v3909_v2, %v3657_v14  ;;  %vm9972_vm11 = vmmov %vm9960_vm4  ;;  %v9980_v2 = vld [vmem:[#allocation144_spill] sm:$0xff] }
 0x540   : > { %4695 = vmatmul.mubr.msk.f32.gmra.mrb[24].mxu1 %vm9953_vm2, %v3941_v25  ;;  %v3815_v58 = vsel %vm9972_vm11, %v3783_v43, %v3287_v5  ;;  %vm9973_vm2 = vmmov %vm9962_vm5  ;;  %v9982_v25 = vld [vmem:[#allocation82_spill] sm:$0xff] }
 0x541   : > { %v3193_v44 = vpop.permute.xlu0 %3192  ;;  %v3847_v7 = vsel %vm9973_vm2, %v3815_v58, %v3385_v32  ;;  %vm9975_vm9 = vmmov %vm9964_vm6 }
 0x542   : > { %v3479_v61 = vpop.permute.xlu1 %3478  ;;  %v4669_v37 = vpop.f32.mrb[6].mxu1  ;;  %vm9976_vm3 = vmmov %vm9965_vm0 }
 0x543   : > { %v4161_v17 = vadd.f32 %v4669_v37, %v8191_v52  ;;  %v4155_v40 = vpop.f32.mrb[7].mxu1  ;;  %v3878_v15 = vsel %vm9963_vm10, %v3846_v29, %v3479_v61  ;;  %vm9978_vm4 = vmmov %vm9961_vm14 }
 0x544   : > { %v4156_v4 = vadd.f32 %v8191_v52, %v4155_v40  ;;  %vm9981_vm5 = vmmov %vm9978_vm4 }
 0x545   : > { %v4291_v35 = vadd.f32 %v4774_v27, %v4161_v17  ;;  %v3569_v16 = vpop.permute.xlu0 %3568  ;;  %v3722_v14 = vsel %vm9981_vm5, %v8004_v9, %v9980_v2  ;;  %vm9983_vm10 = vmmov %vm9970_vm1 }
 0x546   : > { %v4290_v10 = vadd.f32 %v4775_v8, %v4156_v4  ;;  %v3481_v23 = vpop.permute.xlu1 %3480  ;;  %v3910_v11 = vsel %vm9964_vm6, %v3878_v15, %v3569_v16  ;;  %v3752_v61 = vsel %vm9983_vm10, %v3722_v14, %v9982_v25  ;;  %vm9984_vm6 = vmmov %vm9971_vm8  ;;  %v4780_v25 = vld [vmem:[%s4865_s24 + $0x68] sm:$0xff] }
 0x547   : > { %v4323_v54 = vmax.f32 %v4291_v35, 0.0  ;;  %v3879_v6 = vsel %vm9974_vm13, %v3847_v7, %v3481_v23  ;;  %v3784_v37 = vsel %vm9984_vm6, %v3752_v61, %v3193_v44  ;;  %vm9987_vm15 = vmmov %vm9974_vm13 }
 0x548   : > { %v4322_v36 = vmax.f32 %v4290_v10, 0.0  ;;  %vm9988_vm1 = vmmov %vm9975_vm9  ;;  %v9989_v10 = vld [vmem:[#allocation155_spill] sm:$0xff] }
 0x549   : > { %4355 = vst.msk [vmem:[%s8210_s12 + $0x38] sm:$0xff] %vm9959_vm12, %v4323_v54  ;;  %v3289_v49 = vpop.permute.xlu0 %3288  ;;  %vm9977_vm12 = vmmov %vm9966_vm7  ;;  %v9995_v54 = vld [vmem:[#allocation120_spill] sm:$0xff] }
 0x54a   : > { %4354 = vst.msk [vmem:[%s8210_s12 + $0x30] sm:$0xff] %vm9961_vm14, %v4322_v36  ;;  %v3195_v0 = vpop.permute.xlu1 %3194  ;;  %vm9979_vm14 = vmmov %vm9978_vm4  ;;  %v9998_v36 = vld [vmem:[#allocation71_spill] sm:$0xff] }
 0x54b   : > { %vm9990_vm8 = vmmov %vm9978_vm4 }
 0x54c   : > { %v3724_v9 = vsel %vm9990_vm8, %v8066_v53, %v9989_v10  ;;  %vm9994_vm13 = vmmov %vm9977_vm12  ;;  %v4782_v10 = vld [vmem:[%s4865_s24 + $0x78] sm:$0xff] }
 0x54d   : > { %v3659_v45 = vpop.permute.xlu0 %3658 }
 0x54e   : > { %v3942_v22 = vsel %vm9965_vm0, %v3910_v11, %v3659_v45  ;;  %v3571_v31 = vpop.permute.xlu1 %3570  ;;  %vm9985_vm0 = vmmov %vm9972_vm11 }
 0x54f   : > { %4697 = vmatprep.mubr.msk.f32.mxu1 %vm9966_vm7, %v3942_v22  ;;  %v3911_v48 = vsel %vm9975_vm9, %v3879_v6, %v3571_v31  ;;  %v3816_v40 = vsel %vm9985_vm0, %v3784_v37, %v3289_v49  ;;  %vm9986_vm7 = vmmov %vm9973_vm2  ;;  %v4778_v6 = vld [vmem:[%s4865_s24 + $0x58] sm:$0xff]  ;;  %v4781_v37 = vld [vmem:[%s4865_s24 + $0x60] sm:$0xff] }
 0x550   : > { %vm9991_vm11 = vmmov %vm9976_vm3 }
 0x551   : > { %v3387_v12 = vpop.permute.xlu0 %3386  ;;  %vm9993_vm2 = vmmov %vm9983_vm10 }
 0x552   : > { %v3291_v41 = vpop.permute.xlu1 %3290  ;;  %v3848_v27 = vsel %vm9986_vm7, %v3816_v40, %v3387_v12  ;;  %v3754_v44 = vsel %vm9993_vm2, %v3724_v9, %v9992_v50  ;;  %vm9996_vm9 = vmmov %vm9978_vm4 }
 0x553   : > { %v3723_v56 = vsel %vm9996_vm9, %v8022_v20, %v9995_v54  ;;  %vm10004_vm10 = vmmov %vm9986_vm7  ;;  %v10005_v20 = vld [vmem:[#allocation123_spill] sm:$0xff] }
 0x554   : > { %vm10008_vm7 = vmmov %vm9987_vm15 }
 0x555   : > { %v3389_v57 = vpop.permute.xlu0 %3388  ;;  %vm10011_vm8 = vmmov %vm10008_vm7 }
 0x556   : > { %v3661_v26 = vpop.permute.xlu1 %3660  ;;  %v4672_v51 = vpop.f32.mrb[8].mxu1  ;;  %vm10016_vm9 = vmmov %vm10004_vm10 }
 0x557   : > { %v3943_v28 = vsel %vm9976_vm3, %v3911_v48, %v3661_v26  ;;  %v4171_v46 = vadd.f32 %v4672_v51, %v8191_v52  ;;  %v4165_v62 = vpop.f32.mrb[9].mxu1  ;;  %vm9997_vm3 = vmmov %vm9984_vm6  ;;  %v10013_v26 = vld [vmem:[#allocation105_spill] sm:$0xff] }
 0x558   : > { %v4166_v59 = vadd.f32 %v8191_v52, %v4165_v62  ;;  %4698 = vmatmul.mubr.msk.f32.gmra.mrb[26].mxu1 %vm9977_vm12, %v3943_v28  ;;  %vm9999_vm12 = vmmov %vm9993_vm2 }
 0x559   : > { %v4293_v21 = vadd.f32 %v4776_v34, %v4171_v46  ;;  %v3197_v18 = vpop.permute.xlu0 %3196  ;;  %v3753_v1 = vsel %vm9999_vm12, %v3723_v56, %v9998_v36  ;;  %vm10006_vm6 = vmmov %vm9993_vm2  ;;  %vm10014_vm2 = vcmask 228352   ;;  %v4779_v46 = vld [vmem:[%s4865_s24 + $0x50] sm:$0xff]  ;;  %vm10018_vm12 = vcmask 261120  }
 0x55a   : > { %v4292_v55 = vadd.f32 %v4777_v39, %v4166_v59  ;;  %v3483_v5 = vpop.permute.xlu1 %3482  ;;  %v3786_v60 = vsel %vm9997_vm3, %v3754_v44, %v3197_v18 }
 0x55b   : > { %v4325_v47 = vmax.f32 %v4293_v21, 0.0  ;;  %v3880_v35 = vsel %vm9987_vm15, %v3848_v27, %v3483_v5  ;;  %vm10009_vm15 = vmmov %vm10004_vm10 }
 0x55c   : > { %v4324_v13 = vmax.f32 %v4292_v55, 0.0  ;;  %v10020_v55 = vld [vmem:[#allocation31_spill] sm:$0xff] }
 0x55d   : > { %4357 = vst.msk [vmem:[%s8210_s12 + $0x48] sm:$0xff] %vm9978_vm4, %v4325_v47  ;;  %v3573_v30 = vpop.permute.xlu0 %3572  ;;  %vm10000_vm4 = vmmov %vm9985_vm0 }
 0x55e   : > { %4356 = vst.msk [vmem:[%s8210_s12 + $0x40] sm:$0xff] %vm9979_vm14, %v4324_v13  ;;  %v3485_v32 = vpop.permute.xlu1 %3484  ;;  %v3912_v16 = vsel %vm9988_vm1, %v3880_v35, %v3573_v30  ;;  %vm10002_vm14 = vmmov %vm9981_vm5 }
 0x55f   : > { %v3725_v29 = vsel %vm10002_vm14, %v8083_v38, %v10001_v33  ;;  %vm10003_vm5 = vmmov %vm9997_vm3 }
 0x560   : > { %v3785_v15 = vsel %vm10003_vm5, %v3753_v1, %v3195_v0  ;;  %v3755_v31 = vsel %vm10006_vm6, %v3725_v29, %v10005_v20  ;;  %vm10010_vm1 = vmmov %vm9997_vm3  ;;  %v4784_v1 = vld [vmem:[%s4865_s24 + $0x88] sm:$0xff] }
 0x561   : > { %v3293_v17 = vpop.permute.xlu0 %3292  ;;  %v3817_v19 = vsel %vm9985_vm0, %v3785_v15, %v3291_v41  ;;  %vm10017_vm3 = vmmov %vm10008_vm7 }
 0x562   : > { %v3199_v4 = vpop.permute.xlu1 %3198  ;;  %v3818_v49 = vsel %vm10000_vm4, %v3786_v60, %v3293_v17  ;;  %v3849_v38 = vsel %vm10009_vm15, %v3817_v19, %v3389_v57  ;;  %vm10019_vm4 = vcmask 293888   ;;  %vm10021_vm14 = vmmov %vm10018_vm12 }
 0x563   : > { %v3787_v0 = vsel %vm10010_vm1, %v3755_v31, %v3199_v4  ;;  %v3881_v58 = vsel %vm10011_vm8, %v3849_v38, %v3485_v32  ;;  %vm10022_vm5 = vmmov %vm10014_vm2  ;;  %v4786_v31 = vld [vmem:[%s4865_s24 + $0x98] sm:$0xff] }
 0x564   : > { %vm10024_vm6 = vmmov %vm10019_vm4 }
 0x565   : > { %v3663_v8 = vpop.permute.xlu0 %3662  ;;  %vm10027_vm15 = vmmov %vm10019_vm4 }
 0x566   : > { %v3944_v23 = vsel %vm9991_vm11, %v3912_v16, %v3663_v8  ;;  %v3575_v63 = vpop.permute.xlu1 %3574  ;;  %vm10012_vm11 = vmmov %vm9985_vm0 }
 0x567   : > { %4700 = vmatprep.mubr.msk.f32.mxu1 %vm9994_vm13, %v3944_v23  ;;  %vm10015_vm13 = vmmov %vm10014_vm2  ;;  %v4783_v23 = vld [vmem:[%s4865_s24 + $0x70] sm:$0xff] }
 0x568   : > { %v3913_v28 = vsel %vm10015_vm13, %v3881_v58, %v3575_v63 }
 0x569   : > { %v3391_v53 = vpop.permute.xlu0 %3390 }
 0x56a   : > { %v3850_v11 = vsel %vm10004_vm10, %v3818_v49, %v3391_v53  ;;  %v3295_v45 = vpop.permute.xlu1 %3294  ;;  %v4675_v22 = vpop.f32.mrb[10].mxu1  ;;  %vm10023_vm10 = vcmask 31744   ;;  %v4785_v53 = vld [vmem:[%s4865_s24 + $0x80] sm:$0xff] }
 0x56b   : > { %v3882_v24 = vsel %vm10008_vm7, %v3850_v11, %v10007_v3  ;;  %v4181_v42 = vadd.f32 %v4675_v22, %v8191_v52  ;;  %v4175_v12 = vpop.f32.mrb[11].mxu1  ;;  %v3819_v7 = vsel %vm10012_vm11, %v3787_v0, %v3295_v45  ;;  %vm10025_vm0 = vmmov %vm10023_vm10 }
 0x56c   : > { %v4176_v43 = vadd.f32 %v8191_v52, %v4175_v12  ;;  %v3914_v51 = vsel %vm10014_vm2, %v3882_v24, %v10013_v26  ;;  %vm10026_vm7 = vmmov %vm10018_vm12 }
 0x56d   : > { %v4295_v48 = vadd.f32 %v4778_v6, %v4181_v42  ;;  %v3393_v41 = vpop.permute.xlu0 %3392  ;;  %v3946_v5 = vsel %vm10021_vm14, %v3914_v51, %v10020_v55  ;;  %vm10028_vm1 = vmmov %vm10025_vm0 }
 0x56e   : > { %v4294_v57 = vadd.f32 %v4779_v46, %v4176_v43  ;;  %v3851_v62 = vsel %vm10016_vm9, %v3819_v7, %v3393_v41  ;;  %v3665_v59 = vpop.permute.xlu1 %3664  ;;  %vm10029_vm8 = vmmov %vm10025_vm0  ;;  %v4788_v7 = vld [vmem:[%s4865_s24 + $0xa8] sm:$0xff] }
 0x56f   : > { %v4327_v34 = vmax.f32 %v4295_v48, 0.0  ;;  %v3883_v21 = vsel %vm10017_vm3, %v3851_v62, %v10007_v3  ;;  %v3945_v18 = vsel %vm10018_vm12, %v3913_v28, %v3665_v59  ;;  %vm10030_vm11 = vmmov %vm10025_vm0  ;;  %v4787_v3 = vld [vmem:[%s4865_s24 + $0x90] sm:$0xff]  ;;  %v4789_v48 = vld [vmem:[%s4865_s24 + $0xa0] sm:$0xff] }
 0x570   : > { %v4326_v39 = vmax.f32 %v4294_v57, 0.0  ;;  %4701 = vmatmul.mubr.msk.f32.gmra.mrb[28].mxu1 %vm10019_vm4, %v3945_v18  ;;  %v3915_v47 = vsel %vm10022_vm5, %v3883_v21, %v10013_v26  ;;  %vm10031_vm2 = vmmov %vm10025_vm0  ;;  %v4790_v59 = vld [vmem:[%s4865_s24 + $0xb8] sm:$0xff]  ;;  %v4791_v21 = vld [vmem:[%s4865_s24 + $0xb0] sm:$0xff] }
 0x571   : > { %4359 = vst.msk [vmem:[%s8210_s12 + $0x58] sm:$0xff] %vm10023_vm10, %v4327_v34  ;;  %4703 = vmatprep.mubr.msk.f32.mxu1 %vm10024_vm6, %v3946_v5  ;;  %v3947_v13 = vsel %vm10026_vm7, %v3915_v47, %v10020_v55  ;;  %vm10032_vm13 = vmmov %vm10025_vm0 }
 0x572   : > { %4358 = vst.msk [vmem:[%s8210_s12 + $0x50] sm:$0xff] %vm10025_vm0, %v4326_v39  ;;  %vm10033_vm9 = vmmov %vm10025_vm0 }
 0x573   : > { %vm10034_vm3 = vmmov %vm10025_vm0 }
 0x574   : > { %4704 = vmatmul.mubr.msk.f32.gmra.mrb[30].mxu1 %vm10027_vm15, %v3947_v13  ;;  %vm10035_vm12 = vmmov %vm10025_vm0 }
 0x575   : > { %vm10036_vm4 = vmmov %vm10025_vm0 }
 0x576   : > { %vm10037_vm14 = vmmov %vm10025_vm0 }
 0x577   : > { %vm10038_vm5 = vmmov %vm10025_vm0 }
 0x578   : > { %vm10039_vm10 = vmmov %vm10025_vm0 }
 0x579   : > { %vm10040_vm6 = vmmov %vm10025_vm0 }
 0x57a   : > { %vm10041_vm7 = vmmov %vm10025_vm0 }
 0x57b   : > { %vm10042_vm15 = vmmov %vm10025_vm0 }
 0x583   : > { %v4678_v30 = vpop.f32.mrb[12].mxu1 }
 0x584   : > { %v4191_v32 = vadd.f32 %v4678_v30, %v8191_v52  ;;  %v4185_v2 = vpop.f32.mrb[13].mxu1 }
 0x585   : > { %v4186_v14 = vadd.f32 %v8191_v52, %v4185_v2 }
 0x586   : > { %v4297_v61 = vadd.f32 %v4780_v25, %v4191_v32  ;;  %v4792_v32 = vld [vmem:[%s4865_s24 + $0xc8] sm:$0xff] }
 0x587   : > { %v4296_v17 = vadd.f32 %v4781_v37, %v4186_v14  ;;  %v4793_v14 = vld [vmem:[%s4865_s24 + $0xc0] sm:$0xff] }
 0x588   : > { %v4329_v40 = vmax.f32 %v4297_v61, 0.0 }
 0x589   : > { %v4328_v4 = vmax.f32 %v4296_v17, 0.0 }
 0x58a   : > { %4361 = vst.msk [vmem:[%s8210_s12 + $0x68] sm:$0xff] %vm10028_vm1, %v4329_v40  ;;  %vm10043_vm1 = vmmov %vm10025_vm0 }
 0x58b   : > { %4360 = vst.msk [vmem:[%s8210_s12 + $0x60] sm:$0xff] %vm10029_vm8, %v4328_v4  ;;  %vm10044_vm8 = vmmov %vm10025_vm0 }
 0x59b   : > { %v4681_v27 = vpop.f32.mrb[14].mxu1 }
 0x59c   : > { %v4201_v35 = vadd.f32 %v4681_v27, %v8191_v52  ;;  %v4195_v16 = vpop.f32.mrb[15].mxu1 }
 0x59d   : > { %v4196_v8 = vadd.f32 %v8191_v52, %v4195_v16 }
 0x59e   : > { %v4299_v9 = vadd.f32 %v4782_v10, %v4201_v35  ;;  %v4794_v35 = vld [vmem:[%s4865_s24 + $0xd8] sm:$0xff] }
 0x59f   : > { %v4298_v63 = vadd.f32 %v4783_v23, %v4196_v8  ;;  %v4795_v8 = vld [vmem:[%s4865_s24 + $0xd0] sm:$0xff] }
 0x5a0   : > { %v4331_v50 = vmax.f32 %v4299_v9, 0.0 }
 0x5a1   : > { %v4330_v44 = vmax.f32 %v4298_v63, 0.0 }
 0x5a2   : > { %4363 = vst.msk [vmem:[%s8210_s12 + $0x78] sm:$0xff] %vm10030_vm11, %v4331_v50  ;;  %vm10045_vm11 = vmmov %vm10025_vm0 }
 0x5a3   : > { %4362 = vst.msk [vmem:[%s8210_s12 + $0x70] sm:$0xff] %vm10031_vm2, %v4330_v44  ;;  %vm10046_vm2 = vmmov %vm10025_vm0 }
 0x5b3   : > { %v4684_v54 = vpop.f32.mrb[16].mxu1 }
 0x5b4   : > { %v4211_v56 = vadd.f32 %v4684_v54, %v8191_v52  ;;  %v4205_v60 = vpop.f32.mrb[17].mxu1 }
 0x5b5   : > { %v4206_v36 = vadd.f32 %v8191_v52, %v4205_v60 }
 0x5b6   : > { %v4301_v49 = vadd.f32 %v4784_v1, %v4211_v56  ;;  %v4796_v56 = vld [vmem:[%s4865_s24 + $0xe8] sm:$0xff] }
 0x5b7   : > { %v4300_v33 = vadd.f32 %v4785_v53, %v4206_v36  ;;  %v4797_v36 = vld [vmem:[%s4865_s24 + $0xe0] sm:$0xff] }
 0x5b8   : > { %v4333_v29 = vmax.f32 %v4301_v49, 0.0 }
 0x5b9   : > { %v4332_v15 = vmax.f32 %v4300_v33, 0.0 }
 0x5ba   : > { %4365 = vst.msk [vmem:[%s8210_s12 + $0x88] sm:$0xff] %vm10032_vm13, %v4333_v29 }
 0x5bb   : > { %4364 = vst.msk [vmem:[%s8210_s12 + $0x80] sm:$0xff] %vm10033_vm9, %v4332_v15 }
 0x5cb   : > { %v4687_v11 = vpop.f32.mrb[18].mxu1 }
 0x5cc   : > { %v4221_v45 = vadd.f32 %v4687_v11, %v8191_v52  ;;  %v4215_v22 = vpop.f32.mrb[19].mxu1 }
 0x5cd   : > { %v4216_v20 = vadd.f32 %v8191_v52, %v4215_v22 }
 0x5ce   : > { %v4303_v19 = vadd.f32 %v4786_v31, %v4221_v45  ;;  %v4798_v45 = vld [vmem:[%s4865_s24 + $0xf8] sm:$0xff] }
 0x5cf   : > { %v4302_v24 = vadd.f32 %v4787_v3, %v4216_v20  ;;  %v4799_v20 = vld [vmem:[%s4865_s24 + $0xf0] sm:$0xff] }
 0x5d0   : > { %v4335_v42 = vmax.f32 %v4303_v19, 0.0 }
 0x5d1   : > { %v4334_v12 = vmax.f32 %v4302_v24, 0.0 }
 0x5d2   : > { %4367 = vst.msk [vmem:[%s8210_s12 + $0x98] sm:$0xff] %vm10034_vm3, %v4335_v42 }
 0x5d3   : > { %4366 = vst.msk [vmem:[%s8210_s12 + $0x90] sm:$0xff] %vm10035_vm12, %v4334_v12 }
 0x5e3   : > { %v4690_v38 = vpop.f32.mrb[20].mxu1 }
 0x5e4   : > { %v4231_v0 = vadd.f32 %v4690_v38, %v8191_v52  ;;  %v4225_v43 = vpop.f32.mrb[21].mxu1 }
 0x5e5   : > { %v4226_v58 = vadd.f32 %v8191_v52, %v4225_v43 }
 0x5e6   : > { %v4305_v6 = vadd.f32 %v4788_v7, %v4231_v0 }
 0x5e7   : > { %v4304_v41 = vadd.f32 %v4789_v48, %v4226_v58 }
 0x5e8   : > { %v4337_v26 = vmax.f32 %v4305_v6, 0.0 }
 0x5e9   : > { %v4336_v51 = vmax.f32 %v4304_v41, 0.0 }
 0x5ea   : > { %4369 = vst.msk [vmem:[%s8210_s12 + $0xa8] sm:$0xff] %vm10036_vm4, %v4337_v26 }
 0x5eb   : > { %4368 = vst.msk [vmem:[%s8210_s12 + $0xa0] sm:$0xff] %vm10037_vm14, %v4336_v51 }
 0x5fb   : > { %v4693_v28 = vpop.f32.mrb[22].mxu1 }
 0x5fc   : > { %v4241_v46 = vadd.f32 %v4693_v28, %v8191_v52  ;;  %v4235_v57 = vpop.f32.mrb[23].mxu1 }
 0x5fd   : > { %v4236_v62 = vadd.f32 %v8191_v52, %v4235_v57 }
 0x5fe   : > { %v4307_v34 = vadd.f32 %v4790_v59, %v4241_v46 }
 0x5ff   : > { %v4306_v18 = vadd.f32 %v4791_v21, %v4236_v62 }
 0x600   : > { %v4339_v39 = vmax.f32 %v4307_v34, 0.0 }
 0x601   : > { %v4338_v55 = vmax.f32 %v4306_v18, 0.0 }
 0x602   : > { %4371 = vst.msk [vmem:[%s8210_s12 + $0xb8] sm:$0xff] %vm10038_vm5, %v4339_v39 }
 0x603   : > { %4370 = vst.msk [vmem:[%s8210_s12 + $0xb0] sm:$0xff] %vm10039_vm10, %v4338_v55 }
 0x613   : > { %v4696_v5 = vpop.f32.mrb[24].mxu1 }
 0x614   : > { %v4251_v47 = vadd.f32 %v4696_v5, %v8191_v52  ;;  %v4245_v13 = vpop.f32.mrb[25].mxu1 }
 0x615   : > { %v4246_v30 = vadd.f32 %v8191_v52, %v4245_v13 }
 0x616   : > { %v4309_v2 = vadd.f32 %v4792_v32, %v4251_v47 }
 0x617   : > { %v4308_v25 = vadd.f32 %v4793_v14, %v4246_v30 }
 0x618   : > { %v4341_v61 = vmax.f32 %v4309_v2, 0.0 }
 0x619   : > { %v4340_v37 = vmax.f32 %v4308_v25, 0.0 }
 0x61a   : > { %4373 = vst.msk [vmem:[%s8210_s12 + $0xc8] sm:$0xff] %vm10040_vm6, %v4341_v61 }
 0x61b   : > { %4372 = vst.msk [vmem:[%s8210_s12 + $0xc0] sm:$0xff] %vm10025_vm0, %v4340_v37 }
 0x62b   : > { %v4699_v17 = vpop.f32.mrb[26].mxu1 }
 0x62c   : > { %v4261_v40 = vadd.f32 %v4699_v17, %v8191_v52  ;;  %v4255_v4 = vpop.f32.mrb[27].mxu1 }
 0x62d   : > { %v4256_v27 = vadd.f32 %v8191_v52, %v4255_v4 }
 0x62e   : > { %v4311_v16 = vadd.f32 %v4794_v35, %v4261_v40 }
 0x62f   : > { %v4310_v10 = vadd.f32 %v4795_v8, %v4256_v27 }
 0x630   : > { %v4343_v9 = vmax.f32 %v4311_v16, 0.0 }
 0x631   : > { %v4342_v23 = vmax.f32 %v4310_v10, 0.0 }
 0x632   : > { %4375 = vst.msk [vmem:[%s8210_s12 + $0xd8] sm:$0xff] %vm10041_vm7, %v4343_v9 }
 0x633   : > { %4374 = vst.msk [vmem:[%s8210_s12 + $0xd0] sm:$0xff] %vm10042_vm15, %v4342_v23 }
 0x643   : > { %v4702_v63 = vpop.f32.mrb[28].mxu1 }
 0x644   : > { %v4271_v50 = vadd.f32 %v4702_v63, %v8191_v52  ;;  %v4265_v44 = vpop.f32.mrb[29].mxu1 }
 0x645   : > { %v4266_v54 = vadd.f32 %v8191_v52, %v4265_v44 }
 0x646   : > { %v4313_v60 = vadd.f32 %v4796_v56, %v4271_v50 }
 0x647   : > { %v4312_v1 = vadd.f32 %v4797_v36, %v4266_v54  ;;  %v4705_v49 = vpop.f32.mrb[30].mxu1 }
 0x648   : > { %v4345_v53 = vmax.f32 %v4313_v60, 0.0  ;;  %v4281_v33 = vadd.f32 %v4705_v49, %v8191_v52  ;;  %v4275_v29 = vpop.f32.mrb[31].mxu1 }
 0x649   : > { %v4344_v15 = vmax.f32 %v4312_v1, 0.0  ;;  %v4276_v11 = vadd.f32 %v8191_v52, %v4275_v29 }
 0x64a   : > { %4377 = vst.msk [vmem:[%s8210_s12 + $0xe8] sm:$0xff] %vm10043_vm1, %v4345_v53  ;;  %v4315_v22 = vadd.f32 %v4798_v45, %v4281_v33 }
 0x64b   : > { %4376 = vst.msk [vmem:[%s8210_s12 + $0xe0] sm:$0xff] %vm10044_vm8, %v4344_v15  ;;  %v4314_v31 = vadd.f32 %v4799_v20, %v4276_v11 }
 0x64c   : > { %v4347_v19 = vmax.f32 %v4315_v22, 0.0 }
 0x64d   : > { %v4346_v3 = vmax.f32 %v4314_v31, 0.0 }
 0x64e   : > { %4379 = vst.msk [vmem:[%s8210_s12 + $0xf8] sm:$0xff] %vm10045_vm11, %v4347_v19 }
 0x64f   : > { %4378 = vst.msk [vmem:[%s8210_s12 + $0xf0] sm:$0xff] %vm10046_vm2, %v4346_v3 }
 0x650 PF: > { %s15_s18 = sadd.s32 1, %s4806_s18  }
 0x651   : > { %p12_p4 = scmp.ge.s32.totalorder %s15_s18, 4  }
 0x653   :  { %14 = sbr.rel (!%p12_p4) target bundleno = 1 (0x1), region = 70 }

// kernel: tpu_custom_call.1
= control target key start
LH: loop header
LB: loop body
LE: loop exit
PB: predicated region body
PF: predicated region fallthrough
CT: control target
= control target key end

     0   :  { %s4847_s18 = smov 0   ;;  %s8476_s0 = inlined_call_operand.vmem [shape: f32[2,256,4], index: 0, kind: input, shape index: {}]   ;;  %s8477_s1 = inlined_call_operand.vmem [shape: f32[36,4], index: 1, kind: input, shape index: {}]   ;;  %s8478_s2 = inlined_call_operand.vmem [shape: f32[1,4], index: 2, kind: input, shape index: {}]   ;;  %s8479_s3 = inlined_call_operand.vmem [shape: f32[36,4], index: 3, kind: input, shape index: {}]   ;;  %s8480_s4 = inlined_call_operand.vmem [shape: f32[1,4], index: 4, kind: input, shape index: {}]   ;;  %s8481_s5 = inlined_call_operand.vmem [shape: f32[2,256,4], index: 5, kind: output, shape index: {}]  }
   0x1 LB: > { %s4435_s19 = sadd.s32 4294967295, %s4806_s18   ;;  %p4439_p0 = scmp.ge.s32.totalorder %s4806_s18, 1  ;;  %s4806_s18 = sphi %s4847_s18, %s15_s18  }
   0x2   : > { %p187_p1 = scmp.lt.s32.totalorder %s4806_s18, 3 }
   0x4   : > { %p188_p2 = pnand %p4439_p0, %p187_p1 }
   0x6   : > { %191 = sbr.rel (%p188_p2) target bundleno = 1616 (0x650), region = 40 }
   0xd   : > { %p215_p3 = scmp.lt.s32.totalorder %s4435_s19, 1  ;;  %v8482_v0 = vmov 0.0   ;;  %s4809_s20 = smov 4   ;;  %v225_v25 = vlaneseq  ;;  %vm8524_vm0 = vcmask 1046528   ;;  %v8702_v42 = vmov 0 }
   0xe   : > { %1157 = vrot.lane.b32.xlu0 %v8482_v0, %s4809_s20  ;;  %s4810_s25 = smov 8   ;;  %v8705_v50 = vmov 0  ;;  %v8708_v58 = vmov 0  ;;  %s4811_s26 = smov 12  }
   0xf   : > { %s10048_s19 = smov (!%p215_p3, %s4435_s19), 1  ;;  %v4993_v28 = vshrl.u32 %v225_v25, 7  ;;  %s4812_s27 = smov 16  }
  0x10   : > { %s4514_s21 = sshll.u32 %s10048_s19, 8  ;;  %s4813_s28 = smov 20  }
  0x11   : > { %s4865_s24 = scalar_lea.vmem %s8476_s0, %s4514_s21  ;;  %v227_v31 = vadd.s32 8, %v4993_v28  ;;  %v229_v38 = vadd.s32 24, %v4993_v28  ;;  %v231_v41 = vadd.s32 40, %v4993_v28  ;;  %v233_v49 = vadd.s32 56, %v4993_v28  ;;  %s4814_s29 = smov 24  }
  0x12   : > { %v4868_v1 = vld [vmem:[%s4865_s24 + $0x8] sm:$0xff]  ;;  %v4871_v2 = vld [vmem:[%s4865_s24] sm:$0xff]  ;;  %v4878_v3 = vld [vmem:[%s4865_s24 + $0x10] sm:$0xff]  ;;  %v235_v57 = vadd.s32 72, %v4993_v28  ;;  %s4815_s15 = smov 28   ;;  %s4816_s16 = smov 32  }
  0x13   : > { %1161 = vrot.lane.b32.xlu1 %v4868_v1, %s4809_s20  ;;  %1159 = vrot.lane.b32.xlu0 %v4871_v2, %s4809_s20  ;;  %v4881_v4 = vld [vmem:[%s4865_s24 + $0x18] sm:$0xff]  ;;  %v4888_v5 = vld [vmem:[%s4865_s24 + $0x20] sm:$0xff]  ;;  %v964_v34 = vrot.slane %v4871_v2, 1  ;;  %v965_v35 = vrot.slane %v4868_v1, 1  ;;  %v269_v36 = vand.u32 15, %v227_v31  ;;  %v967_v37 = vrot.slane %v4878_v3, 1  ;;  %s8210_s12 = scalar_lea.vmem %s8481_s5, %s4514_s21 }
  0x14   : > { %v4891_v6 = vld [vmem:[%s4865_s24 + $0x28] sm:$0xff]  ;;  %v4898_v7 = vld [vmem:[%s4865_s24 + $0x30] sm:$0xff]  ;;  %v4901_v8 = vld [vmem:[%s4865_s24 + $0x38] sm:$0xff]  ;;  %v969_v40 = vrot.slane %v4881_v4, 1  ;;  %v283_v44 = vand.u32 15, %v229_v38  ;;  %v971_v45 = vrot.slane %v4888_v5, 1 }
  0x15   : > { %v4908_v9 = vld [vmem:[%s4865_s24 + $0x40] sm:$0xff]  ;;  %v4911_v10 = vld [vmem:[%s4865_s24 + $0x48] sm:$0xff]  ;;  %v4918_v11 = vld [vmem:[%s4865_s24 + $0x50] sm:$0xff]  ;;  %v5025_v39 = vsel %vm8524_vm0, %v964_v34, %v965_v35  ;;  %vm5029_vm1 = vcmp.le.s32.totalorder %v269_v36, 14  ;;  %v968_v43 = vsel %vm8524_vm0, %v965_v35, %v967_v37  ;;  %v973_v48 = vrot.slane %v4891_v6, 1 }
  0x16   : > { %v4921_v12 = vld [vmem:[%s4865_s24 + $0x58] sm:$0xff]  ;;  %v4928_v13 = vld [vmem:[%s4865_s24 + $0x60] sm:$0xff]  ;;  %v4931_v14 = vld [vmem:[%s4865_s24 + $0x68] sm:$0xff]  ;;  %v8703_v42 = vsel %vm5029_vm1, 4294967295, %v8702_v42  ;;  %v5041_v46 = vsel %vm5029_vm1, %v968_v43, 0.0  ;;  %v5044_v47 = vsel %vm8524_vm0, %v967_v37, %v969_v40  ;;  %vm5048_vm2 = vcmp.le.s32.totalorder %v283_v44, 14 }
  0x17   : > { %1163 = vrot.lane.b32.xlu1 %v4878_v3, %s4809_s20  ;;  %1165 = vrot.lane.b32.xlu0 %v4881_v4, %s4809_s20  ;;  %v4938_v15 = vld [vmem:[%s4865_s24 + $0x70] sm:$0xff]  ;;  %v4941_v16 = vld [vmem:[%s4865_s24 + $0x78] sm:$0xff]  ;;  %8704 = vst [vmem:[#allocation2_spill] sm:$0xff] %v8703_v42  ;;  %v8706_v50 = vsel %vm5048_vm2, 4294967295, %v8705_v50  ;;  %v972_v51 = vsel %vm8524_vm0, %v969_v40, %v971_v45  ;;  %v297_v52 = vand.u32 15, %v231_v41  ;;  %v975_v53 = vrot.slane %v4898_v7, 1 }
  0x18   : > { %v4948_v17 = vld [vmem:[%s4865_s24 + $0x80] sm:$0xff]  ;;  %v4951_v18 = vld [vmem:[%s4865_s24 + $0x88] sm:$0xff]  ;;  %v4958_v19 = vld [vmem:[%s4865_s24 + $0x90] sm:$0xff]  ;;  %8707 = vst [vmem:[#allocation3_spill] sm:$0xff] %v8706_v50  ;;  %v5060_v54 = vsel %vm5048_vm2, %v972_v51, 0.0  ;;  %v5063_v55 = vsel %vm8524_vm0, %v971_v45, %v973_v48  ;;  %v977_v56 = vrot.slane %v4901_v8, 1 }
  0x19   : > { %v4961_v20 = vld [vmem:[%s4865_s24 + $0x98] sm:$0xff]  ;;  %v4968_v21 = vld [vmem:[%s4865_s24 + $0xa0] sm:$0xff]  ;;  %v4971_v22 = vld [vmem:[%s4865_s24 + $0xa8] sm:$0xff]  ;;  %vm5067_vm3 = vcmp.le.s32.totalorder %v297_v52, 14  ;;  %v976_v59 = vsel %vm8524_vm0, %v973_v48, %v975_v53  ;;  %v311_v60 = vand.u32 15, %v233_v49  ;;  %v979_v61 = vrot.slane %v4908_v9, 1 }
  0x1a   : > { %v4978_v23 = vld [vmem:[%s4865_s24 + $0xb0] sm:$0xff]  ;;  %v4981_v24 = vld [vmem:[%s4865_s24 + $0xb8] sm:$0xff]  ;;  %v4988_v26 = vld [vmem:[%s4865_s24 + $0xc0] sm:$0xff]  ;;  %v8709_v58 = vsel %vm5067_vm3, 4294967295, %v8708_v58  ;;  %v5079_v62 = vsel %vm5067_vm3, %v976_v59, 0.0  ;;  %v5082_v63 = vsel %vm8524_vm0, %v975_v53, %v977_v56  ;;  %v981_v25 = vrot.slane %v4911_v10, 1 }
  0x1b   : > { %1167 = vrot.lane.b32.xlu1 %v4888_v5, %s4809_s20  ;;  %1169 = vrot.lane.b32.xlu0 %v4891_v6, %s4809_s20  ;;  %v4991_v27 = vld [vmem:[%s4865_s24 + $0xc8] sm:$0xff]  ;;  %v5000_v29 = vld [vmem:[%s4865_s24 + $0xd0] sm:$0xff]  ;;  %8710 = vst [vmem:[#allocation4_spill] sm:$0xff] %v8709_v58  ;;  %v237_v31 = vadd.s32 88, %v4993_v28  ;;  %vm5086_vm4 = vcmp.le.s32.totalorder %v311_v60, 14  ;;  %v8711_v34 = vmov 0  ;;  %v980_v35 = vsel %vm8524_vm0, %v977_v56, %v979_v61 }
  0x1c   : > { %v5003_v30 = vld [vmem:[%s4865_s24 + $0xd8] sm:$0xff]  ;;  %v5011_v32 = vld [vmem:[%s4865_s24 + $0xe0] sm:$0xff]  ;;  %v5014_v33 = vld [vmem:[%s4865_s24 + $0xe8] sm:$0xff]  ;;  %v8712_v34 = vsel %vm5086_vm4, 4294967295, %v8711_v34  ;;  %v325_v36 = vand.u32 15, %v235_v57  ;;  %v983_v37 = vrot.slane %v4918_v11, 1  ;;  %v5101_v40 = vsel %vm8524_vm0, %v979_v61, %v981_v25 }
  0x1d   : > { %8713 = vst [vmem:[#allocation5_spill] sm:$0xff] %v8712_v34  ;;  %v5098_v38 = vsel %vm5086_vm4, %v980_v35, 0.0  ;;  %v985_v41 = vrot.slane %v4921_v12, 1  ;;  %v239_v43 = vadd.s32 104, %v4993_v28  ;;  %v8714_v44 = vmov 0 }
  0x1e   : > { %vm5105_vm5 = vcmp.le.s32.totalorder %v325_v36, 14  ;;  %v984_v45 = vsel %vm8524_vm0, %v981_v25, %v983_v37  ;;  %v339_v48 = vand.u32 15, %v237_v31  ;;  %v987_v49 = vrot.slane %v4928_v13, 1 }
  0x1f   : > { %1171 = vrot.lane.b32.xlu1 %v4898_v7, %s4809_s20  ;;  %1173 = vrot.lane.b32.xlu0 %v4901_v8, %s4809_s20  ;;  %v8715_v44 = vsel %vm5105_vm5, 4294967295, %v8714_v44  ;;  %v5117_v51 = vsel %vm5105_vm5, %v984_v45, 0.0  ;;  %v5120_v52 = vsel %vm8524_vm0, %v983_v37, %v985_v41  ;;  %v989_v53 = vrot.slane %v4931_v14, 1 }
  0x20   : > { %8716 = vst [vmem:[#allocation6_spill] sm:$0xff] %v8715_v44  ;;  %v241_v56 = vadd.s32 120, %v4993_v28  ;;  %vm5124_vm6 = vcmp.le.s32.totalorder %v339_v48, 14  ;;  %v8717_v57 = vmov 0  ;;  %v988_v59 = vsel %vm8524_vm0, %v985_v41, %v987_v49 }
  0x21   : > { %v8718_v57 = vsel %vm5124_vm6, 4294967295, %v8717_v57  ;;  %v353_v60 = vand.u32 15, %v239_v43  ;;  %v991_v61 = vrot.slane %v4938_v15, 1  ;;  %v5136_v25 = vsel %vm5124_vm6, %v988_v59, 0.0 }
  0x22   : > { %8719 = vst [vmem:[#allocation7_spill] sm:$0xff] %v8718_v57  ;;  %v5139_v31 = vsel %vm8524_vm0, %v987_v49, %v989_v53  ;;  %v993_v35 = vrot.slane %v4941_v16, 1  ;;  %v367_v36 = vand.u32 15, %v241_v56  ;;  %v8720_v37 = vmov 0 }
  0x23   : > { %1175 = vrot.lane.b32.xlu1 %v4908_v9, %s4809_s20  ;;  %1177 = vrot.lane.b32.xlu0 %v4911_v10, %s4809_s20  ;;  %vm5142_vm7 = vcmp.le.s32.totalorder %v353_v60, 14  ;;  %v992_v41 = vsel %vm8524_vm0, %v989_v53, %v991_v61  ;;  %v995_v43 = vrot.slane %v4948_v17, 1  ;;  %v243_v45 = vadd.s32 136, %v4993_v28 }
  0x24   : > { %v8721_v37 = vsel %vm5142_vm7, 4294967295, %v8720_v37  ;;  %v5155_v48 = vsel %vm5142_vm7, %v992_v41, 0.0  ;;  %v5158_v49 = vsel %vm8524_vm0, %v991_v61, %v993_v35  ;;  %vm5160_vm8 = vcmp.le.s32.totalorder %v367_v36, 14 }
  0x25   : > { %8722 = vst [vmem:[#allocation8_spill] sm:$0xff] %v8721_v37  ;;  %v8723_v56 = vmov 0  ;;  %v997_v53 = vrot.slane %v4951_v18, 1  ;;  %v996_v59 = vsel %vm8524_vm0, %v993_v35, %v995_v43  ;;  %v381_v60 = vand.u32 15, %v243_v45 }
  0x26   : > { %v8724_v56 = vsel %vm5160_vm8, 4294967295, %v8723_v56  ;;  %v245_v57 = vadd.s32 152, %v4993_v28  ;;  %v5174_v61 = vsel %vm5160_vm8, %v996_v59, 0.0  ;;  %v1001_v35 = vrot.slane %v4961_v20, 1 }
  0x27   : > { %1179 = vrot.lane.b32.xlu1 %v4918_v11, %s4809_s20  ;;  %1181 = vrot.lane.b32.xlu0 %v4921_v12, %s4809_s20  ;;  %8725 = vst [vmem:[#allocation9_spill] sm:$0xff] %v8724_v56  ;;  %8726 = vst [vmem:[#allocation10_spill] sm:$0xff] %v5174_v61  ;;  %v5177_v36 = vsel %vm8524_vm0, %v995_v43, %v997_v53  ;;  %v1003_v41 = vrot.slane %v4968_v21, 1  ;;  %vm5181_vm9 = vcmp.le.s32.totalorder %v381_v60, 14  ;;  %v8728_v45 = vmov 0 }
  0x28   : > { %8727 = vst [vmem:[#allocation11_spill] sm:$0xff] %v5177_v36  ;;  %v8729_v45 = vsel %vm5181_vm9, 4294967295, %v8728_v45  ;;  %v395_v44 = vand.u32 15, %v245_v57  ;;  %v247_v34 = vadd.s32 168, %v4993_v28  ;;  %v1005_v60 = vrot.slane %v4971_v22, 1 }
  0x29   : > { %8730 = vst [vmem:[#allocation12_spill] sm:$0xff] %v8729_v45  ;;  %v8733_v57 = vmov 0  ;;  %v1004_v56 = vsel %vm8524_vm0, %v1001_v35, %v1003_v41  ;;  %v249_v50 = vadd.s32 184, %v4993_v28 }
  0x2a   : > { %vm5200_vm10 = vcmp.le.s32.totalorder %v395_v44, 14  ;;  %v409_v58 = vand.u32 15, %v247_v34  ;;  %v5215_v44 = vsel %vm8524_vm0, %v1003_v41, %v1005_v60  ;;  %v8738_v34 = vmov 0 }
  0x2b   : > { %1183 = vrot.lane.b32.xlu1 %v4928_v13, %s4809_s20  ;;  %1185 = vrot.lane.b32.xlu0 %v4931_v14, %s4809_s20  ;;  %v8734_v57 = vsel %vm5200_vm10, 4294967295, %v8733_v57  ;;  %8737 = vst [vmem:[#allocation17_spill] sm:$0xff] %v5215_v44  ;;  %v423_v42 = vand.u32 15, %v249_v50  ;;  %v1013_v41 = vrot.slane %v4991_v27, 1  ;;  %v8743_v50 = vmov 0 }
  0x2c   : > { %8735 = vst [vmem:[#allocation15_spill] sm:$0xff] %v8734_v57  ;;  %vm5219_vm11 = vcmp.le.s32.totalorder %v409_v58, 14 }
  0x2d   : > { %v8739_v34 = vsel %vm5219_vm11, 4294967295, %v8738_v34  ;;  %vm5237_vm12 = vcmp.le.s32.totalorder %v423_v42, 14 }
  0x2e   : > { %8740 = vst [vmem:[#allocation18_spill] sm:$0xff] %v8739_v34  ;;  %v8744_v50 = vsel %vm5237_vm12, 4294967295, %v8743_v50 }
  0x2f   : > { %1187 = vrot.lane.b32.xlu1 %v4938_v15, %s4809_s20  ;;  %1189 = vrot.lane.b32.xlu0 %v4941_v16, %s4809_s20  ;;  %8745 = vst [vmem:[#allocation21_spill] sm:$0xff] %v8744_v50 }
  0x33   : > { %1191 = vrot.lane.b32.xlu1 %v4948_v17, %s4809_s20  ;;  %1193 = vrot.lane.b32.xlu0 %v4951_v18, %s4809_s20 }
  0x37   : > { %1195 = vrot.lane.b32.xlu1 %v4958_v19, %s4809_s20  ;;  %1197 = vrot.lane.b32.xlu0 %v4961_v20, %s4809_s20 }
  0x3b   : > { %1199 = vrot.lane.b32.xlu1 %v4968_v21, %s4809_s20  ;;  %1201 = vrot.lane.b32.xlu0 %v4971_v22, %s4809_s20 }
  0x3f   : > { %1203 = vrot.lane.b32.xlu1 %v4978_v23, %s4809_s20  ;;  %1205 = vrot.lane.b32.xlu0 %v4981_v24, %s4809_s20 }
  0x43   : > { %1207 = vrot.lane.b32.xlu1 %v4988_v26, %s4809_s20  ;;  %1209 = vrot.lane.b32.xlu0 %v4991_v27, %s4809_s20 }
  0x47   : > { %1211 = vrot.lane.b32.xlu1 %v5000_v29, %s4809_s20  ;;  %1213 = vrot.lane.b32.xlu0 %v5003_v30, %s4809_s20 }
  0x4b   : > { %1215 = vrot.lane.b32.xlu1 %v5011_v32, %s4809_s20  ;;  %1217 = vrot.lane.b32.xlu0 %v5014_v33, %s4809_s20 }
  0x4f   : > { %1280 = vrot.lane.b32.xlu1 %v8482_v0, %s4810_s25  ;;  %1282 = vrot.lane.b32.xlu0 %v5025_v39, %s4810_s25  ;;  %v999_v0 = vrot.slane %v4958_v19, 1 }
  0x51   : > { %v1000_v37 = vsel %vm8524_vm0, %v997_v53, %v999_v0  ;;  %v5196_v59 = vsel %vm8524_vm0, %v999_v0, %v1001_v35  ;;  %v1007_v53 = vrot.slane %v4978_v23, 1  ;;  %v5212_v0 = vsel %vm5200_vm10, %v1004_v56, 0.0 }
  0x52   : > { %v5193_v43 = vsel %vm5181_vm9, %v1000_v37, 0.0  ;;  %8732 = vst [vmem:[#allocation14_spill] sm:$0xff] %v5196_v59  ;;  %8736 = vst [vmem:[#allocation16_spill] sm:$0xff] %v5212_v0  ;;  %v1009_v37 = vrot.slane %v4981_v24, 1  ;;  %v251_v35 = vadd.s32 200, %v4993_v28  ;;  %vm9072_vm9 = vcmask 293888  }
  0x53   : > { %1284 = vrot.lane.b32.xlu1 %v5041_v46, %s4810_s25  ;;  %1286 = vrot.lane.b32.xlu0 %v5044_v47, %s4810_s25  ;;  %8731 = vst [vmem:[#allocation13_spill] sm:$0xff] %v5193_v43  ;;  %v1008_v45 = vsel %vm8524_vm0, %v1005_v60, %v1007_v53 }
  0x54   : > { %v5231_v56 = vsel %vm5219_vm11, %v1008_v45, 0.0  ;;  %v5234_v58 = vsel %vm8524_vm0, %v1007_v53, %v1009_v37  ;;  %v437_v60 = vand.u32 15, %v251_v35  ;;  %v8748_v53 = vmov 0 }
  0x55   : > { %8741 = vst [vmem:[#allocation19_spill] sm:$0xff] %v5231_v56  ;;  %8742 = vst [vmem:[#allocation20_spill] sm:$0xff] %v5234_v58 }
  0x56   : > { %vm5255_vm13 = vcmp.le.s32.totalorder %v437_v60, 14  ;;  %v8754_v60 = vmov 0 }
  0x57   : > { %1288 = vrot.lane.b32.xlu1 %v5060_v54, %s4810_s25  ;;  %1290 = vrot.lane.b32.xlu0 %v5063_v55, %s4810_s25  ;;  %v8749_v53 = vsel %vm5255_vm13, 4294967295, %v8748_v53 }
  0x58   : > { %8750 = vst [vmem:[#allocation24_spill] sm:$0xff] %v8749_v53 }
  0x5b   : > { %1292 = vrot.lane.b32.xlu1 %v5079_v62, %s4810_s25  ;;  %1294 = vrot.lane.b32.xlu0 %v5082_v63, %s4810_s25 }
  0x5f   : > { %1296 = vrot.lane.b32.xlu1 %v5098_v38, %s4810_s25  ;;  %1298 = vrot.lane.b32.xlu0 %v5101_v40, %s4810_s25 }
  0x63   : > { %1300 = vrot.lane.b32.xlu1 %v5117_v51, %s4810_s25  ;;  %1302 = vrot.lane.b32.xlu0 %v5120_v52, %s4810_s25 }
  0x67   : > { %1304 = vrot.lane.b32.xlu1 %v5136_v25, %s4810_s25  ;;  %1306 = vrot.lane.b32.xlu0 %v5139_v31, %s4810_s25 }
  0x6b   : > { %1308 = vrot.lane.b32.xlu1 %v5155_v48, %s4810_s25  ;;  %1310 = vrot.lane.b32.xlu0 %v5158_v49, %s4810_s25 }
  0x6f   : > { %1312 = vrot.lane.b32.xlu1 %v5174_v61, %s4810_s25  ;;  %1314 = vrot.lane.b32.xlu0 %v5177_v36, %s4810_s25 }
  0x73   : > { %1316 = vrot.lane.b32.xlu1 %v5193_v43, %s4810_s25  ;;  %1318 = vrot.lane.b32.xlu0 %v5196_v59, %s4810_s25  ;;  %v1011_v43 = vrot.slane %v4988_v26, 1  ;;  %v5264_v59 = vld [vmem:[%s4865_s24 + $0xf0] sm:$0xff] }
  0x75   : > { %v1012_v57 = vsel %vm8524_vm0, %v1009_v37, %v1011_v43  ;;  %v5253_v42 = vsel %vm8524_vm0, %v1011_v43, %v1013_v41  ;;  %v1017_v37 = vrot.slane %v5003_v30, 1 }
  0x76   : > { %v5250_v45 = vsel %vm5237_vm12, %v1012_v57, 0.0  ;;  %8747 = vst [vmem:[#allocation23_spill] sm:$0xff] %v5253_v42  ;;  %vm8626_vm12 = vcmask 162816  }
  0x77   : > { %1320 = vrot.lane.b32.xlu1 %v5212_v0, %s4810_s25  ;;  %1322 = vrot.lane.b32.xlu0 %v5215_v44, %s4810_s25  ;;  %v1015_v0 = vrot.slane %v5000_v29, 1  ;;  %v253_v44 = vadd.s32 216, %v4993_v28  ;;  %8746 = vst [vmem:[#allocation22_spill] sm:$0xff] %v5250_v45 }
  0x79   : > { %v1016_v35 = vsel %vm8524_vm0, %v1013_v41, %v1015_v0  ;;  %v451_v34 = vand.u32 15, %v253_v44  ;;  %v5277_v44 = vsel %vm8524_vm0, %v1015_v0, %v1017_v37  ;;  %v1021_v41 = vrot.slane %v5014_v33, 1 }
  0x7a   : > { %v5274_v57 = vsel %vm5255_vm13, %v1016_v35, 0.0  ;;  %8753 = vst [vmem:[#allocation27_spill] sm:$0xff] %v5277_v44  ;;  %v262_v0 = vand.u32 15, %v4993_v28  ;;  %v228_v35 = vadd.s32 16, %v4993_v28  ;;  %vm8610_vm13 = vcmask 1040384  }
  0x7b   : > { %1324 = vrot.lane.b32.xlu1 %v5231_v56, %s4810_s25  ;;  %1326 = vrot.lane.b32.xlu0 %v5234_v58, %s4810_s25  ;;  %v1019_v56 = vrot.slane %v5011_v32, 1  ;;  %v255_v58 = vadd.s32 232, %v4993_v28  ;;  %8752 = vst [vmem:[#allocation26_spill] sm:$0xff] %v5274_v57  ;;  %vm5280_vm14 = vcmp.le.s32.totalorder %v451_v34, 14 }
  0x7c   : > { %v8755_v60 = vsel %vm5280_vm14, 4294967295, %v8754_v60 }
  0x7d   : > { %8756 = vst [vmem:[#allocation28_spill] sm:$0xff] %v8755_v60  ;;  %v1020_v50 = vsel %vm8524_vm0, %v1017_v37, %v1019_v56  ;;  %v5297_v53 = vsel %vm8524_vm0, %v1019_v56, %v1021_v41  ;;  %v771_v37 = vrot.slane %v4871_v2, 7  ;;  %v8765_v56 = vmov 0 }
  0x7e   : > { %v5294_v34 = vsel %vm5280_vm14, %v1020_v50, 0.0  ;;  %8758 = vst [vmem:[#allocation30_spill] sm:$0xff] %v5297_v53  ;;  %v774_v50 = vrot.slane %v4878_v3, 7  ;;  %vm5312_vm14 = vcmp.ge.s32.totalorder %v262_v0, 1 }
  0x7f   : > { %1328 = vrot.lane.b32.xlu1 %v5250_v45, %s4810_s25  ;;  %1330 = vrot.lane.b32.xlu0 %v5253_v42, %s4810_s25  ;;  %v465_v45 = vand.u32 15, %v255_v58  ;;  %8757 = vst [vmem:[#allocation29_spill] sm:$0xff] %v5294_v34  ;;  %v8766_v56 = vsel %vm5312_vm14, 4294967295, %v8765_v56  ;;  %v866_v60 = vsel %vm8610_vm13, 0.0, %v771_v37 }
  0x80   : > { %v5270_v43 = vpop.permute.xlu0 %1157  ;;  %8767 = vst [vmem:[#allocation34_spill] sm:$0xff] %v8766_v56  ;;  %v5333_v61 = vsel %vm5312_vm14, %v866_v60, 0.0  ;;  %v778_v56 = vrot.slane %v4888_v5, 7  ;;  %v232_v60 = vadd.s32 48, %v4993_v28 }
  0x81   : > { %8751 = vst [vmem:[#allocation25_spill] sm:$0xff] %v5270_v43  ;;  %vm5304_vm15 = vcmp.le.s32.totalorder %v465_v45, 14  ;;  %v8761_v43 = vmov 0  ;;  %v276_v45 = vand.u32 15, %v228_v35  ;;  %8771 = vst [vmem:[#allocation38_spill] sm:$0xff] %v5333_v61  ;;  %v776_v35 = vrot.slane %v4881_v4, 7 }
  0x82   : > { %v8762_v43 = vsel %vm5304_vm15, 4294967295, %v8761_v43 }
  0x83   : > { %1332 = vrot.lane.b32.xlu1 %v5274_v57, %s4810_s25  ;;  %1334 = vrot.lane.b32.xlu0 %v5277_v44, %s4810_s25  ;;  %8763 = vst [vmem:[#allocation33_spill] sm:$0xff] %v8762_v43  ;;  %v8764_v57 = vrot.slane %v5264_v59, 1  ;;  %v779_v36 = vsel %vm8610_vm13, %v776_v35, %v778_v56 }
  0x85   : > { %v5299_v58 = vpop.permute.xlu1 %1161  ;;  %v5302_v42 = vpop.permute.xlu0 %1159  ;;  %v1024_v44 = vsel %vm8524_vm0, %v1021_v41, %v8764_v57  ;;  %v772_v57 = vrot.slane %v4868_v1, 7  ;;  %vm5337_vm0 = vcmp.ge.s32.totalorder %v276_v45, 1 }
  0x86   : > { %8759 = vst [vmem:[#allocation31_spill] sm:$0xff] %v5299_v58  ;;  %8760 = vst [vmem:[#allocation32_spill] sm:$0xff] %v5302_v42  ;;  %v230_v42 = vadd.s32 32, %v4993_v28  ;;  %v5325_v41 = vsel %vm5304_vm15, %v1024_v44, 0.0  ;;  %vm8627_vm15 = vcmask 130048  }
  0x87   : > { %1336 = vrot.lane.b32.xlu1 %v5294_v34, %s4810_s25  ;;  %1338 = vrot.lane.b32.xlu0 %v5297_v53, %s4810_s25  ;;  %8768 = vst [vmem:[#allocation35_spill] sm:$0xff] %v5325_v41  ;;  %v775_v34 = vsel %vm8610_vm13, %v772_v57, %v774_v50  ;;  %v8772_v53 = vmov 0  ;;  %v5352_v45 = vsel %vm8610_vm13, %v771_v37, %v772_v57  ;;  %v304_v37 = vand.u32 15, %v232_v60 }
  0x88   : > { %v8773_v53 = vsel %vm5337_vm0, 4294967295, %v8772_v53  ;;  %v290_v44 = vand.u32 15, %v230_v42  ;;  %8777 = vst [vmem:[#allocation42_spill] sm:$0xff] %v5352_v45  ;;  %v8779_v42 = vmov 0 }
  0x89   : > { %v5327_v0 = vpop.permute.xlu1 %1163  ;;  %v5329_v58 = vpop.permute.xlu0 %1165  ;;  %8774 = vst [vmem:[#allocation39_spill] sm:$0xff] %v8773_v53 }
  0x8a   : > { %8769 = vst [vmem:[#allocation36_spill] sm:$0xff] %v5327_v0  ;;  %8770 = vst [vmem:[#allocation37_spill] sm:$0xff] %v5329_v58  ;;  %v5356_v0 = vsel %vm5337_vm0, %v775_v34, 0.0  ;;  %vm5360_vm14 = vcmp.ge.s32.totalorder %v290_v44, 1  ;;  %v234_v34 = vadd.s32 64, %v4993_v28  ;;  %v5375_v44 = vsel %vm8610_vm13, %v774_v50, %v776_v35 }
  0x8b   : > { %1340 = vrot.lane.b32.xlu1 %v5325_v41, %s4810_s25  ;;  %1405 = vrot.lane.b32.xlu0 %v5333_v61, %s4811_s26  ;;  %8778 = vst [vmem:[#allocation43_spill] sm:$0xff] %v5356_v0  ;;  %v780_v41 = vrot.slane %v4891_v6, 7  ;;  %v782_v61 = vrot.slane %v4898_v7, 7  ;;  %v8780_v42 = vsel %vm5360_vm14, 4294967295, %v8779_v42  ;;  %8784 = vst [vmem:[#allocation47_spill] sm:$0xff] %v5375_v44  ;;  %vm5383_vm0 = vcmp.ge.s32.totalorder %v304_v37, 1 }
  0x8c   : > { %8781 = vst [vmem:[#allocation44_spill] sm:$0xff] %v8780_v42  ;;  %v318_v50 = vand.u32 15, %v234_v34  ;;  %v238_v34 = vadd.s32 96, %v4993_v28 }
  0x8d   : > { %v5347_v43 = vpop.permute.xlu1 %1167  ;;  %v5349_v58 = vpop.permute.xlu0 %1169  ;;  %v783_v60 = vsel %vm8610_vm13, %v780_v41, %v782_v61  ;;  %v5398_v37 = vsel %vm8610_vm13, %v778_v56, %v780_v41  ;;  %v790_v41 = vrot.slane %v4918_v11, 7 }
  0x8e   : > { %8775 = vst [vmem:[#allocation40_spill] sm:$0xff] %v5347_v43  ;;  %8776 = vst [vmem:[#allocation41_spill] sm:$0xff] %v5349_v58  ;;  %v5379_v58 = vsel %vm5360_vm14, %v779_v36, 0.0  ;;  %v784_v43 = vrot.slane %v4901_v8, 7  ;;  %v236_v36 = vadd.s32 80, %v4993_v28  ;;  %vm5406_vm14 = vcmp.ge.s32.totalorder %v318_v50, 1 }
  0x8f   : > { %1409 = vrot.lane.b32.xlu0 %v5356_v0, %s4811_s26  ;;  %1407 = vrot.lane.b32.xlu1 %v5352_v45, %s4811_s26  ;;  %8785 = vst [vmem:[#allocation48_spill] sm:$0xff] %v5379_v58  ;;  %v786_v0 = vrot.slane %v4908_v9, 7  ;;  %v8786_v45 = vmov 0  ;;  %8791 = vst [vmem:[#allocation52_spill] sm:$0xff] %v5398_v37 }
  0x90   : > { %v8787_v45 = vsel %vm5383_vm0, 4294967295, %v8786_v45  ;;  %v332_v56 = vand.u32 15, %v236_v36  ;;  %v5421_v50 = vsel %vm8610_vm13, %v782_v61, %v784_v43  ;;  %v8800_v36 = vmov 0 }
  0x91   : > { %v5370_v57 = vpop.permute.xlu1 %1171  ;;  %v5372_v53 = vpop.permute.xlu0 %1173  ;;  %8788 = vst [vmem:[#allocation49_spill] sm:$0xff] %v8787_v45  ;;  %8798 = vst [vmem:[#allocation57_spill] sm:$0xff] %v5421_v50  ;;  %v346_v61 = vand.u32 15, %v238_v34 }
  0x92   : > { %8782 = vst [vmem:[#allocation45_spill] sm:$0xff] %v5370_v57  ;;  %8783 = vst [vmem:[#allocation46_spill] sm:$0xff] %v5372_v53  ;;  %v5402_v53 = vsel %vm5383_vm0, %v783_v60, 0.0  ;;  %v787_v57 = vsel %vm8610_vm13, %v784_v43, %v786_v0  ;;  %vm5429_vm0 = vcmp.ge.s32.totalorder %v332_v56, 1  ;;  %v240_v43 = vadd.s32 112, %v4993_v28 }
  0x93   : > { %1413 = vrot.lane.b32.xlu0 %v5379_v58, %s4811_s26  ;;  %1411 = vrot.lane.b32.xlu1 %v5375_v44, %s4811_s26  ;;  %8792 = vst [vmem:[#allocation53_spill] sm:$0xff] %v5402_v53  ;;  %v788_v58 = vrot.slane %v4911_v10, 7  ;;  %v8793_v44 = vmov 0  ;;  %v8801_v36 = vsel %vm5429_vm0, 4294967295, %v8800_v36 }
  0x94   : > { %v8794_v44 = vsel %vm5406_vm14, 4294967295, %v8793_v44  ;;  %8802 = vst [vmem:[#allocation59_spill] sm:$0xff] %v8801_v36 }
  0x95   : > { %v5393_v35 = vpop.permute.xlu1 %1175  ;;  %v5395_v42 = vpop.permute.xlu0 %1177  ;;  %8795 = vst [vmem:[#allocation54_spill] sm:$0xff] %v8794_v44  ;;  %v5444_v56 = vsel %vm8610_vm13, %v786_v0, %v788_v58  ;;  %v798_v0 = vrot.slane %v4938_v15, 7 }
  0x96   : > { %8789 = vst [vmem:[#allocation50_spill] sm:$0xff] %v5393_v35  ;;  %8790 = vst [vmem:[#allocation51_spill] sm:$0xff] %v5395_v42  ;;  %v5425_v42 = vsel %vm5406_vm14, %v787_v57, 0.0  ;;  %v792_v35 = vrot.slane %v4921_v12, 7  ;;  %vm5452_vm14 = vcmp.ge.s32.totalorder %v346_v61, 1 }
  0x97   : > { %1417 = vrot.lane.b32.xlu0 %v5402_v53, %s4811_s26  ;;  %1415 = vrot.lane.b32.xlu1 %v5398_v37, %s4811_s26  ;;  %8799 = vst [vmem:[#allocation58_spill] sm:$0xff] %v5425_v42  ;;  %v794_v37 = vrot.slane %v4928_v13, 7  ;;  %v791_v53 = vsel %vm8610_vm13, %v788_v58, %v790_v41  ;;  %8805 = vst [vmem:[#allocation62_spill] sm:$0xff] %v5444_v56  ;;  %v360_v58 = vand.u32 15, %v240_v43  ;;  %v8814_v43 = vmov 0 }
  0x98   : > { %v5467_v61 = vsel %vm8610_vm13, %v790_v41, %v792_v35  ;;  %v244_v41 = vadd.s32 144, %v4993_v28 }
  0x99   : > { %v5416_v60 = vpop.permute.xlu1 %1179  ;;  %v5418_v45 = vpop.permute.xlu0 %1181  ;;  %8812 = vst [vmem:[#allocation67_spill] sm:$0xff] %v5467_v61 }
  0x9a   : > { %8796 = vst [vmem:[#allocation55_spill] sm:$0xff] %v5416_v60  ;;  %8797 = vst [vmem:[#allocation56_spill] sm:$0xff] %v5418_v45  ;;  %v5448_v45 = vsel %vm5429_vm0, %v791_v53, 0.0  ;;  %v795_v60 = vsel %vm8610_vm13, %v792_v35, %v794_v37  ;;  %v242_v53 = vadd.s32 128, %v4993_v28  ;;  %vm5475_vm0 = vcmp.ge.s32.totalorder %v360_v58, 1 }
  0x9b   : > { %1421 = vrot.lane.b32.xlu0 %v5425_v42, %s4811_s26  ;;  %1419 = vrot.lane.b32.xlu1 %v5421_v50, %s4811_s26  ;;  %8806 = vst [vmem:[#allocation63_spill] sm:$0xff] %v5448_v45  ;;  %v796_v42 = vrot.slane %v4931_v14, 7  ;;  %v8807_v50 = vmov 0  ;;  %v8815_v43 = vsel %vm5475_vm0, 4294967295, %v8814_v43 }
  0x9c   : > { %v8808_v50 = vsel %vm5452_vm14, 4294967295, %v8807_v50  ;;  %8816 = vst [vmem:[#allocation69_spill] sm:$0xff] %v8815_v43  ;;  %v374_v35 = vand.u32 15, %v242_v53 }
  0x9d   : > { %v5439_v57 = vpop.permute.xlu1 %1183  ;;  %v5441_v44 = vpop.permute.xlu0 %1185  ;;  %8809 = vst [vmem:[#allocation64_spill] sm:$0xff] %v8808_v50  ;;  %v5490_v58 = vsel %vm8610_vm13, %v794_v37, %v796_v42  ;;  %v806_v37 = vrot.slane %v4958_v19, 7 }
  0x9e   : > { %8803 = vst [vmem:[#allocation60_spill] sm:$0xff] %v5439_v57  ;;  %8804 = vst [vmem:[#allocation61_spill] sm:$0xff] %v5441_v44  ;;  %v5471_v44 = vsel %vm5452_vm14, %v795_v60, 0.0  ;;  %v800_v57 = vrot.slane %v4941_v16, 7  ;;  %vm5498_vm14 = vcmp.ge.s32.totalorder %v374_v35, 1 }
  0x9f   : > { %1425 = vrot.lane.b32.xlu0 %v5448_v45, %s4811_s26  ;;  %1423 = vrot.lane.b32.xlu1 %v5444_v56, %s4811_s26  ;;  %8813 = vst [vmem:[#allocation68_spill] sm:$0xff] %v5471_v44  ;;  %v802_v56 = vrot.slane %v4948_v17, 7  ;;  %v799_v45 = vsel %vm8610_vm13, %v796_v42, %v798_v0  ;;  %8819 = vst [vmem:[#allocation72_spill] sm:$0xff] %v5490_v58  ;;  %v388_v42 = vand.u32 15, %v244_v41  ;;  %v8828_v41 = vmov 0 }
  0xa0   : > { %v5513_v35 = vsel %vm8610_vm13, %v798_v0, %v800_v57  ;;  %v248_v0 = vadd.s32 176, %v4993_v28 }
  0xa1   : > { %v5462_v34 = vpop.permute.xlu1 %1187  ;;  %v5464_v36 = vpop.permute.xlu0 %1189  ;;  %8826 = vst [vmem:[#allocation77_spill] sm:$0xff] %v5513_v35 }
  0xa2   : > { %8810 = vst [vmem:[#allocation65_spill] sm:$0xff] %v5462_v34  ;;  %8811 = vst [vmem:[#allocation66_spill] sm:$0xff] %v5464_v36  ;;  %v5494_v36 = vsel %vm5475_vm0, %v799_v45, 0.0  ;;  %v803_v34 = vsel %vm8610_vm13, %v800_v57, %v802_v56  ;;  %v246_v45 = vadd.s32 160, %v4993_v28  ;;  %vm5521_vm0 = vcmp.ge.s32.totalorder %v388_v42, 1 }
  0xa3   : > { %1429 = vrot.lane.b32.xlu0 %v5471_v44, %s4811_s26  ;;  %1427 = vrot.lane.b32.xlu1 %v5467_v61, %s4811_s26  ;;  %8820 = vst [vmem:[#allocation73_spill] sm:$0xff] %v5494_v36  ;;  %v804_v44 = vrot.slane %v4951_v18, 7  ;;  %v8821_v61 = vmov 0  ;;  %v8829_v41 = vsel %vm5521_vm0, 4294967295, %v8828_v41 }
  0xa4   : > { %v8822_v61 = vsel %vm5498_vm14, 4294967295, %v8821_v61  ;;  %8830 = vst [vmem:[#allocation79_spill] sm:$0xff] %v8829_v41  ;;  %v402_v57 = vand.u32 15, %v246_v45 }
  0xa5   : > { %v5485_v60 = vpop.permute.xlu1 %1191  ;;  %v5487_v50 = vpop.permute.xlu0 %1193  ;;  %8823 = vst [vmem:[#allocation74_spill] sm:$0xff] %v8822_v61  ;;  %v5536_v42 = vsel %vm8610_vm13, %v802_v56, %v804_v44  ;;  %v814_v56 = vrot.slane %v4978_v23, 7 }
  0xa6   : > { %8817 = vst [vmem:[#allocation70_spill] sm:$0xff] %v5485_v60  ;;  %8818 = vst [vmem:[#allocation71_spill] sm:$0xff] %v5487_v50  ;;  %v5517_v50 = vsel %vm5498_vm14, %v803_v34, 0.0  ;;  %v808_v60 = vrot.slane %v4961_v20, 7  ;;  %vm5544_vm14 = vcmp.ge.s32.totalorder %v402_v57, 1 }
  0xa7   : > { %1433 = vrot.lane.b32.xlu0 %v5494_v36, %s4811_s26  ;;  %1431 = vrot.lane.b32.xlu1 %v5490_v58, %s4811_s26  ;;  %8827 = vst [vmem:[#allocation78_spill] sm:$0xff] %v5517_v50  ;;  %v810_v58 = vrot.slane %v4968_v21, 7  ;;  %v807_v36 = vsel %vm8610_vm13, %v804_v44, %v806_v37  ;;  %8833 = vst [vmem:[#allocation82_spill] sm:$0xff] %v5536_v42  ;;  %v416_v44 = vand.u32 15, %v248_v0  ;;  %v8842_v0 = vmov 0 }
  0xa8   : > { %v5559_v57 = vsel %vm8610_vm13, %v806_v37, %v808_v60  ;;  %v252_v37 = vadd.s32 208, %v4993_v28 }
  0xa9   : > { %v5508_v53 = vpop.permute.xlu1 %1195  ;;  %v5510_v43 = vpop.permute.xlu0 %1197  ;;  %8840 = vst [vmem:[#allocation87_spill] sm:$0xff] %v5559_v57 }
  0xaa   : > { %8824 = vst [vmem:[#allocation75_spill] sm:$0xff] %v5508_v53  ;;  %8825 = vst [vmem:[#allocation76_spill] sm:$0xff] %v5510_v43  ;;  %v5540_v43 = vsel %vm5521_vm0, %v807_v36, 0.0  ;;  %v811_v53 = vsel %vm8610_vm13, %v808_v60, %v810_v58  ;;  %v250_v36 = vadd.s32 192, %v4993_v28  ;;  %vm5567_vm0 = vcmp.ge.s32.totalorder %v416_v44, 1 }
  0xab   : > { %1437 = vrot.lane.b32.xlu0 %v5517_v50, %s4811_s26  ;;  %1435 = vrot.lane.b32.xlu1 %v5513_v35, %s4811_s26  ;;  %8834 = vst [vmem:[#allocation83_spill] sm:$0xff] %v5540_v43  ;;  %v812_v50 = vrot.slane %v4971_v22, 7  ;;  %v8835_v35 = vmov 0  ;;  %v8843_v0 = vsel %vm5567_vm0, 4294967295, %v8842_v0 }
  0xac   : > { %v8836_v35 = vsel %vm5544_vm14, 4294967295, %v8835_v35  ;;  %8844 = vst [vmem:[#allocation89_spill] sm:$0xff] %v8843_v0  ;;  %v430_v60 = vand.u32 15, %v250_v36 }
  0xad   : > { %v5531_v34 = vpop.permute.xlu1 %1199  ;;  %v5533_v61 = vpop.permute.xlu0 %1201  ;;  %8837 = vst [vmem:[#allocation84_spill] sm:$0xff] %v8836_v35  ;;  %v5582_v44 = vsel %vm8610_vm13, %v810_v58, %v812_v50  ;;  %v822_v58 = vrot.slane %v5000_v29, 7 }
  0xae   : > { %8831 = vst [vmem:[#allocation80_spill] sm:$0xff] %v5531_v34  ;;  %8832 = vst [vmem:[#allocation81_spill] sm:$0xff] %v5533_v61  ;;  %v5563_v61 = vsel %vm5544_vm14, %v811_v53, 0.0  ;;  %v816_v34 = vrot.slane %v4981_v24, 7  ;;  %vm5590_vm14 = vcmp.ge.s32.totalorder %v430_v60, 1  ;;  %v256_v60 = vadd.s32 240, %v4993_v28 }
  0xaf   : > { %1441 = vrot.lane.b32.xlu0 %v5540_v43, %s4811_s26  ;;  %1439 = vrot.lane.b32.xlu1 %v5536_v42, %s4811_s26  ;;  %8841 = vst [vmem:[#allocation88_spill] sm:$0xff] %v5563_v61  ;;  %v818_v42 = vrot.slane %v4988_v26, 7  ;;  %v815_v43 = vsel %vm8610_vm13, %v812_v50, %v814_v56  ;;  %8847 = vst [vmem:[#allocation92_spill] sm:$0xff] %v5582_v44  ;;  %v444_v50 = vand.u32 15, %v252_v37  ;;  %v8856_v37 = vmov 0 }
  0xb1   : > { %v5554_v45 = vpop.permute.xlu1 %1203  ;;  %v5556_v41 = vpop.permute.xlu0 %1205 }
  0xb2   : > { %8838 = vst [vmem:[#allocation85_spill] sm:$0xff] %v5554_v45  ;;  %8839 = vst [vmem:[#allocation86_spill] sm:$0xff] %v5556_v41  ;;  %v5586_v41 = vsel %vm5567_vm0, %v815_v43, 0.0  ;;  %v819_v45 = vsel %vm8610_vm13, %v816_v34, %v818_v42  ;;  %v254_v43 = vadd.s32 224, %v4993_v28  ;;  %vm5613_vm0 = vcmp.ge.s32.totalorder %v444_v50, 1 }
  0xb3   : > { %1445 = vrot.lane.b32.xlu0 %v5563_v61, %s4811_s26  ;;  %1443 = vrot.lane.b32.xlu1 %v5559_v57, %s4811_s26  ;;  %8848 = vst [vmem:[#allocation93_spill] sm:$0xff] %v5586_v41  ;;  %v820_v61 = vrot.slane %v4991_v27, 7  ;;  %v8849_v57 = vmov 0  ;;  %v8857_v37 = vsel %vm5613_vm0, 4294967295, %v8856_v37  ;;  %v472_v50 = vand.u32 15, %v256_v60 }
  0xb4   : > { %v8850_v57 = vsel %vm5590_vm14, 4294967295, %v8849_v57  ;;  %8858 = vst [vmem:[#allocation99_spill] sm:$0xff] %v8857_v37 }
  0xb5   : > { %v5577_v53 = vpop.permute.xlu1 %1207  ;;  %v5579_v35 = vpop.permute.xlu0 %1209  ;;  %8851 = vst [vmem:[#allocation94_spill] sm:$0xff] %v8850_v57 }
  0xb6   : > { %8845 = vst [vmem:[#allocation90_spill] sm:$0xff] %v5577_v53  ;;  %8846 = vst [vmem:[#allocation91_spill] sm:$0xff] %v5579_v35  ;;  %v5606_v35 = vsel %vm8610_vm13, %v814_v56, %v816_v34  ;;  %v5610_v53 = vsel %vm5590_vm14, %v819_v45, 0.0  ;;  %v458_v34 = vand.u32 15, %v254_v43  ;;  %v826_v56 = vrot.slane %v5011_v32, 7 }
  0xb7   : > { %1449 = vrot.lane.b32.xlu0 %v5586_v41, %s4811_s26  ;;  %1447 = vrot.lane.b32.xlu1 %v5582_v44, %s4811_s26  ;;  %8854 = vst [vmem:[#allocation97_spill] sm:$0xff] %v5606_v35  ;;  %8855 = vst [vmem:[#allocation98_spill] sm:$0xff] %v5610_v53  ;;  %v824_v44 = vrot.slane %v5003_v30, 7  ;;  %v823_v41 = vsel %vm8610_vm13, %v820_v61, %v822_v58 }
  0xb8   : > { %vm5635_vm14 = vcmp.ge.s32.totalorder %v458_v34, 1  ;;  %v5655_v34 = vld [vmem:[%s4865_s24 + $0xf8] sm:$0xff] }
  0xb9   : > { %v5600_v36 = vpop.permute.xlu1 %1211  ;;  %v5602_v0 = vpop.permute.xlu0 %1213  ;;  %v827_v43 = vsel %vm8610_vm13, %v824_v44, %v826_v56  ;;  %v5658_v37 = vsel %vm8610_vm13, %v822_v58, %v824_v44 }
  0xba   : > { %8852 = vst [vmem:[#allocation95_spill] sm:$0xff] %v5600_v36  ;;  %8853 = vst [vmem:[#allocation96_spill] sm:$0xff] %v5602_v0  ;;  %v830_v0 = vrot.slane %v5264_v59, 7  ;;  %v5629_v36 = vsel %vm8610_vm13, %v818_v42, %v820_v61 }
  0xbb   : > { %1453 = vrot.lane.b32.xlu0 %v5610_v53, %s4811_s26  ;;  %1451 = vrot.lane.b32.xlu1 %v5606_v35, %s4811_s26  ;;  %8861 = vst [vmem:[#allocation102_spill] sm:$0xff] %v5629_v36  ;;  %v5633_v53 = vsel %vm5613_vm0, %v823_v41, 0.0  ;;  %v8863_v35 = vmov 0  ;;  %vm5649_vm0 = vcmp.ge.s32.totalorder %v472_v50, 1  ;;  %v8868_v41 = vmov 0  ;;  %8871 = vst [vmem:[#allocation108_spill] sm:$0xff] %v5658_v37 }
  0xbc   : > { %8862 = vst [vmem:[#allocation103_spill] sm:$0xff] %v5633_v53  ;;  %v8864_v35 = vsel %vm5635_vm14, 4294967295, %v8863_v35  ;;  %v8869_v41 = vsel %vm5649_vm0, 4294967295, %v8868_v41 }
  0xbd   : > { %v5623_v45 = vpop.permute.xlu1 %1215  ;;  %v5625_v57 = vpop.permute.xlu0 %1217  ;;  %8865 = vst [vmem:[#allocation104_spill] sm:$0xff] %v8864_v35  ;;  %8870 = vst [vmem:[#allocation107_spill] sm:$0xff] %v8869_v41 }
  0xbe   : > { %8859 = vst [vmem:[#allocation100_spill] sm:$0xff] %v5623_v45  ;;  %8860 = vst [vmem:[#allocation101_spill] sm:$0xff] %v5625_v57  ;;  %v828_v45 = vrot.slane %v5014_v33, 7  ;;  %v5662_v57 = vsel %vm5635_vm14, %v827_v43, 0.0 }
  0xbf   : > { %1457 = vrot.lane.b32.xlu0 %v5633_v53, %s4811_s26  ;;  %1455 = vrot.lane.b32.xlu1 %v5629_v36, %s4811_s26  ;;  %8872 = vst [vmem:[#allocation109_spill] sm:$0xff] %v5662_v57 }
  0xc0   : > { %v831_v60 = vsel %vm8610_vm13, %v828_v45, %v830_v0  ;;  %v5678_v58 = vsel %vm8610_vm13, %v826_v56, %v828_v45 }
  0xc1   : > { %v5645_v61 = vpop.permute.xlu1 %1280  ;;  %v5647_v42 = vpop.permute.xlu0 %1282  ;;  %v5670_v50 = vsel %vm5649_vm0, %v831_v60, 0.0  ;;  %8873 = vst [vmem:[#allocation110_spill] sm:$0xff] %v5678_v58 }
  0xc2   : > { %8866 = vst [vmem:[#allocation105_spill] sm:$0xff] %v5645_v61  ;;  %8867 = vst [vmem:[#allocation106_spill] sm:$0xff] %v5647_v42  ;;  %v832_v42 = vrot.slane %v5655_v34, 7 }
  0xc3   : > { %1461 = vrot.lane.b32.xlu0 %v5662_v57, %s4811_s26  ;;  %1459 = vrot.lane.b32.xlu1 %v5658_v37, %s4811_s26 }
  0xc4   : > { %v5685_v43 = vsel %vm8610_vm13, %v830_v0, %v832_v42  ;;  %vm8941_vm13 = vcmask 1046528  }
  0xc5   : > { %v5673_v61 = vpop.permute.xlu1 %1284  ;;  %v5675_v44 = vpop.permute.xlu0 %1286  ;;  %vm8945_vm14 = vmmov %vm8941_vm13 }
  0xc7   : > { %1465 = vrot.lane.b32.xlu0 %v5670_v50, %s4811_s26  ;;  %1463 = vrot.lane.b32.xlu1 %v5678_v58, %s4811_s26 }
  0xc9   : > { %v5687_v60 = vpop.permute.xlu1 %1288  ;;  %v5689_v41 = vpop.permute.xlu0 %1290 }
  0xca   : > { %8874 = vst [vmem:[#allocation111_spill] sm:$0xff] %v5689_v41  ;;  %v8961_v41 = vld [vmem:[#allocation57_spill] sm:$0xff] }
  0xcb   : > { %1501 = vrot.lane.b32.xlu0 %v4871_v2, %s4812_s27  ;;  %1467 = vrot.lane.b32.xlu1 %v5685_v43, %s4811_s26 }
  0xcd   : > { %v5695_v56 = vpop.permute.xlu1 %1292  ;;  %v5697_v45 = vpop.permute.xlu0 %1294 }
  0xce   : > { %8875 = vst [vmem:[#allocation112_spill] sm:$0xff] %v5695_v56  ;;  %8876 = vst [vmem:[#allocation113_spill] sm:$0xff] %v5697_v45  ;;  %v8952_v45 = vld [vmem:[#allocation48_spill] sm:$0xff] }
  0xcf   : > { %1505 = vrot.lane.b32.xlu0 %v4878_v3, %s4812_s27  ;;  %1503 = vrot.lane.b32.xlu1 %v4868_v1, %s4812_s27 }
  0xd1   : > { %v5703_v0 = vpop.permute.xlu1 %1296  ;;  %v5705_v42 = vpop.permute.xlu0 %1298 }
  0xd2   : > { %8877 = vst [vmem:[#allocation114_spill] sm:$0xff] %v5703_v0  ;;  %8878 = vst [vmem:[#allocation115_spill] sm:$0xff] %v5705_v42  ;;  %v8942_v42 = vmov 0 }
  0xd3   : > { %1509 = vrot.lane.b32.xlu0 %v4888_v5, %s4812_s27  ;;  %1507 = vrot.lane.b32.xlu1 %v4881_v4, %s4812_s27 }
  0xd5   : > { %v5711_v2 = vpop.permute.xlu1 %1300  ;;  %v5713_v35 = vpop.permute.xlu0 %1302 }
  0xd6   : > { %8879 = vst [vmem:[#allocation116_spill] sm:$0xff] %v5711_v2  ;;  %8880 = vst [vmem:[#allocation117_spill] sm:$0xff] %v5713_v35  ;;  %v8938_v35 = vld [vmem:[#allocation30_spill] sm:$0xff] }
  0xd7   : > { %1513 = vrot.lane.b32.xlu0 %v4898_v7, %s4812_s27  ;;  %1511 = vrot.lane.b32.xlu1 %v4891_v6, %s4812_s27 }
  0xd9   : > { %v5719_v1 = vpop.permute.xlu1 %1304  ;;  %v5721_v3 = vpop.permute.xlu0 %1306 }
  0xda   : > { %8881 = vst [vmem:[#allocation118_spill] sm:$0xff] %v5719_v1  ;;  %8882 = vst [vmem:[#allocation119_spill] sm:$0xff] %v5721_v3  ;;  %v8936_v3 = vld [vmem:[#allocation27_spill] sm:$0xff] }
  0xdb   : > { %1517 = vrot.lane.b32.xlu0 %v4908_v9, %s4812_s27  ;;  %1515 = vrot.lane.b32.xlu1 %v4901_v8, %s4812_s27 }
  0xdd   : > { %v5727_v4 = vpop.permute.xlu1 %1308  ;;  %v5729_v5 = vpop.permute.xlu0 %1310 }
  0xde   : > { %8883 = vst [vmem:[#allocation120_spill] sm:$0xff] %v5727_v4  ;;  %8884 = vst [vmem:[#allocation121_spill] sm:$0xff] %v5729_v5  ;;  %v8930_v5 = vld [vmem:[#allocation19_spill] sm:$0xff] }
  0xdf   : > { %1521 = vrot.lane.b32.xlu0 %v4918_v11, %s4812_s27  ;;  %1519 = vrot.lane.b32.xlu1 %v4911_v10, %s4812_s27 }
  0xe1   : > { %v5735_v6 = vpop.permute.xlu1 %1312  ;;  %v5737_v7 = vpop.permute.xlu0 %1314 }
  0xe2   : > { %8885 = vst [vmem:[#allocation122_spill] sm:$0xff] %v5735_v6  ;;  %8886 = vst [vmem:[#allocation123_spill] sm:$0xff] %v5737_v7  ;;  %v8922_v7 = vld [vmem:[#allocation13_spill] sm:$0xff] }
  0xe3   : > { %1525 = vrot.lane.b32.xlu0 %v4928_v13, %s4812_s27  ;;  %1523 = vrot.lane.b32.xlu1 %v4921_v12, %s4812_s27 }
  0xe5   : > { %v5743_v8 = vpop.permute.xlu1 %1316  ;;  %v5745_v9 = vpop.permute.xlu0 %1318 }
  0xe6   : > { %8887 = vst [vmem:[#allocation124_spill] sm:$0xff] %v5743_v8  ;;  %8888 = vst [vmem:[#allocation125_spill] sm:$0xff] %v5745_v9  ;;  %v8917_v9 = vld [vmem:[#allocation11_spill] sm:$0xff] }
  0xe7   : > { %1529 = vrot.lane.b32.xlu0 %v4938_v15, %s4812_s27  ;;  %1527 = vrot.lane.b32.xlu1 %v4931_v14, %s4812_s27 }
  0xe9   : > { %v5751_v10 = vpop.permute.xlu1 %1320  ;;  %v5753_v11 = vpop.permute.xlu0 %1322 }
  0xea   : > { %8889 = vst [vmem:[#allocation126_spill] sm:$0xff] %v5751_v10  ;;  %8890 = vst [vmem:[#allocation127_spill] sm:$0xff] %v5753_v11 }
  0xeb   : > { %1533 = vrot.lane.b32.xlu0 %v4948_v17, %s4812_s27  ;;  %1531 = vrot.lane.b32.xlu1 %v4941_v16, %s4812_s27 }
  0xed   : > { %v5759_v12 = vpop.permute.xlu1 %1324  ;;  %v5761_v13 = vpop.permute.xlu0 %1326 }
  0xee   : > { %8891 = vst [vmem:[#allocation128_spill] sm:$0xff] %v5759_v12  ;;  %8892 = vst [vmem:[#allocation129_spill] sm:$0xff] %v5761_v13 }
  0xef   : > { %1537 = vrot.lane.b32.xlu0 %v4958_v19, %s4812_s27  ;;  %1535 = vrot.lane.b32.xlu1 %v4951_v18, %s4812_s27 }
  0xf1   : > { %v5767_v14 = vpop.permute.xlu1 %1328  ;;  %v5769_v15 = vpop.permute.xlu0 %1330 }
  0xf2   : > { %8893 = vst [vmem:[#allocation130_spill] sm:$0xff] %v5767_v14  ;;  %8894 = vst [vmem:[#allocation131_spill] sm:$0xff] %v5769_v15 }
  0xf3   : > { %1541 = vrot.lane.b32.xlu0 %v4968_v21, %s4812_s27  ;;  %1539 = vrot.lane.b32.xlu1 %v4961_v20, %s4812_s27 }
  0xf5   : > { %v5775_v16 = vpop.permute.xlu1 %1332  ;;  %v5777_v17 = vpop.permute.xlu0 %1334 }
  0xf6   : > { %8895 = vst [vmem:[#allocation132_spill] sm:$0xff] %v5775_v16  ;;  %8896 = vst [vmem:[#allocation133_spill] sm:$0xff] %v5777_v17 }
  0xf7   : > { %1545 = vrot.lane.b32.xlu0 %v4978_v23, %s4812_s27  ;;  %1543 = vrot.lane.b32.xlu1 %v4971_v22, %s4812_s27 }
  0xf9   : > { %v5783_v18 = vpop.permute.xlu1 %1336  ;;  %v5785_v19 = vpop.permute.xlu0 %1338 }
  0xfa   : > { %8897 = vst [vmem:[#allocation134_spill] sm:$0xff] %v5783_v18  ;;  %8898 = vst [vmem:[#allocation135_spill] sm:$0xff] %v5785_v19 }
  0xfb   : > { %1549 = vrot.lane.b32.xlu0 %v4988_v26, %s4812_s27  ;;  %1547 = vrot.lane.b32.xlu1 %v4981_v24, %s4812_s27 }
  0xfd   : > { %v5791_v20 = vpop.permute.xlu1 %1340  ;;  %v5793_v21 = vpop.permute.xlu0 %1405 }
  0xfe   : > { %8899 = vst [vmem:[#allocation136_spill] sm:$0xff] %v5791_v20 }
  0xff   : > { %1553 = vrot.lane.b32.xlu0 %v5000_v29, %s4812_s27  ;;  %1551 = vrot.lane.b32.xlu1 %v4991_v27, %s4812_s27 }
 0x101   : > { %v5799_v22 = vpop.permute.xlu0 %1409  ;;  %v5801_v23 = vpop.permute.xlu1 %1407 }
 0x103   : > { %1557 = vrot.lane.b32.xlu0 %v5011_v32, %s4812_s27  ;;  %1555 = vrot.lane.b32.xlu1 %v5003_v30, %s4812_s27 }
 0x105   : > { %v5807_v24 = vpop.permute.xlu0 %1413  ;;  %v5809_v26 = vpop.permute.xlu1 %1411 }
 0x107   : > { %1561 = vrot.lane.b32.xlu0 %v5264_v59, %s4812_s27  ;;  %1559 = vrot.lane.b32.xlu1 %v5014_v33, %s4812_s27 }
 0x109   : > { %v5815_v27 = vpop.permute.xlu0 %1417  ;;  %v5817_v29 = vpop.permute.xlu1 %1415 }
 0x10a   : > { %8900 = vst [vmem:[#allocation137_spill] sm:$0xff] %v5815_v27  ;;  %v8957_v27 = vld [vmem:[#allocation52_spill] sm:$0xff] }
 0x10b   : > { %1599 = vrot.lane.b32.xlu0 %v5025_v39, %s4813_s28  ;;  %1563 = vrot.lane.b32.xlu1 %v5655_v34, %s4812_s27 }
 0x10d   : > { %v5823_v30 = vpop.permute.xlu0 %1421  ;;  %v5825_v32 = vpop.permute.xlu1 %1419 }
 0x10e   : > { %8901 = vst [vmem:[#allocation138_spill] sm:$0xff] %v5823_v30  ;;  %8902 = vst [vmem:[#allocation139_spill] sm:$0xff] %v5825_v32  ;;  %v8956_v32 = vld [vmem:[#allocation53_spill] sm:$0xff] }
 0x10f   : > { %1603 = vrot.lane.b32.xlu0 %v5044_v47, %s4813_s28  ;;  %1601 = vrot.lane.b32.xlu1 %v5041_v46, %s4813_s28 }
 0x111   : > { %v5831_v33 = vpop.permute.xlu0 %1425  ;;  %v5833_v20 = vpop.permute.xlu1 %1423 }
 0x112   : > { %8903 = vst [vmem:[#allocation140_spill] sm:$0xff] %v5831_v33  ;;  %8904 = vst [vmem:[#allocation141_spill] sm:$0xff] %v5833_v20  ;;  %v8946_v20 = vld [vmem:[#allocation35_spill] sm:$0xff] }
 0x113   : > { %1607 = vrot.lane.b32.xlu0 %v5063_v55, %s4813_s28  ;;  %1605 = vrot.lane.b32.xlu1 %v5060_v54, %s4813_s28 }
 0x115   : > { %v5839_v39 = vpop.permute.xlu0 %1429  ;;  %v5841_v19 = vpop.permute.xlu1 %1427 }
 0x116   : > { %8905 = vst [vmem:[#allocation142_spill] sm:$0xff] %v5839_v39  ;;  %8906 = vst [vmem:[#allocation143_spill] sm:$0xff] %v5841_v19 }
 0x117   : > { %1611 = vrot.lane.b32.xlu0 %v5082_v63, %s4813_s28  ;;  %1609 = vrot.lane.b32.xlu1 %v5079_v62, %s4813_s28 }
 0x119   : > { %v5847_v46 = vpop.permute.xlu0 %1433  ;;  %v5849_v18 = vpop.permute.xlu1 %1431 }
 0x11a   : > { %8907 = vst [vmem:[#allocation144_spill] sm:$0xff] %v5847_v46  ;;  %8908 = vst [vmem:[#allocation145_spill] sm:$0xff] %v5849_v18  ;;  %v8934_v46 = vld [vmem:[#allocation22_spill] sm:$0xff] }
 0x11b   : > { %1615 = vrot.lane.b32.xlu0 %v5101_v40, %s4813_s28  ;;  %1613 = vrot.lane.b32.xlu1 %v5098_v38, %s4813_s28  ;;  %v8937_v18 = vld [vmem:[#allocation26_spill] sm:$0xff] }
 0x11d   : > { %v5855_v17 = vpop.permute.xlu0 %1437  ;;  %v5857_v16 = vpop.permute.xlu1 %1435 }
 0x11e   : > { %8909 = vst [vmem:[#allocation146_spill] sm:$0xff] %v5855_v17  ;;  %8910 = vst [vmem:[#allocation147_spill] sm:$0xff] %v5857_v16  ;;  %v8926_v17 = vld [vmem:[#allocation16_spill] sm:$0xff] }
 0x11f   : > { %1619 = vrot.lane.b32.xlu0 %v5120_v52, %s4813_s28  ;;  %1617 = vrot.lane.b32.xlu1 %v5117_v51, %s4813_s28 }
 0x121   : > { %v5863_v15 = vpop.permute.xlu0 %1441  ;;  %v5865_v14 = vpop.permute.xlu1 %1439 }
 0x122   : > { %8911 = vst [vmem:[#allocation148_spill] sm:$0xff] %v5863_v15  ;;  %8912 = vst [vmem:[#allocation149_spill] sm:$0xff] %v5865_v14  ;;  %v8918_v15 = vld [vmem:[#allocation10_spill] sm:$0xff] }
 0x123   : > { %1623 = vrot.lane.b32.xlu0 %v5139_v31, %s4813_s28  ;;  %1621 = vrot.lane.b32.xlu1 %v5136_v25, %s4813_s28 }
 0x125   : > { %v5871_v13 = vpop.permute.xlu0 %1445  ;;  %v5873_v12 = vpop.permute.xlu1 %1443 }
 0x126   : > { %8913 = vst [vmem:[#allocation150_spill] sm:$0xff] %v5871_v13  ;;  %8914 = vst [vmem:[#allocation151_spill] sm:$0xff] %v5873_v12  ;;  %v8921_v12 = vld [vmem:[#allocation14_spill] sm:$0xff] }
 0x127   : > { %1627 = vrot.lane.b32.xlu0 %v5158_v49, %s4813_s28  ;;  %1625 = vrot.lane.b32.xlu1 %v5155_v48, %s4813_s28 }
 0x129   : > { %v5879_v11 = vpop.permute.xlu0 %1449  ;;  %v5881_v10 = vpop.permute.xlu1 %1447 }
 0x12a   : > { %8915 = vst [vmem:[#allocation152_spill] sm:$0xff] %v5879_v11  ;;  %8916 = vst [vmem:[#allocation153_spill] sm:$0xff] %v5881_v10  ;;  %v8925_v10 = vld [vmem:[#allocation17_spill] sm:$0xff] }
 0x12b   : > { %1631 = vrot.lane.b32.xlu0 %v8917_v9, %s4813_s28  ;;  %1629 = vrot.lane.b32.xlu1 %v8918_v15, %s4813_s28 }
 0x12d   : > { %v5887_v8 = vpop.permute.xlu0 %1453  ;;  %v5889_v13 = vpop.permute.xlu1 %1451 }
 0x12e   : > { %8919 = vst [vmem:[#allocation11_spill] sm:$0xff] %v5887_v8  ;;  %8920 = vst [vmem:[#allocation10_spill] sm:$0xff] %v5889_v13  ;;  %v8929_v13 = vld [vmem:[#allocation20_spill] sm:$0xff] }
 0x12f   : > { %1635 = vrot.lane.b32.xlu0 %v8921_v12, %s4813_s28  ;;  %1633 = vrot.lane.b32.xlu1 %v8922_v7, %s4813_s28 }
 0x131   : > { %v5895_v14 = vpop.permute.xlu0 %1457  ;;  %v5897_v11 = vpop.permute.xlu1 %1455 }
 0x132   : > { %8923 = vst [vmem:[#allocation14_spill] sm:$0xff] %v5895_v14  ;;  %8924 = vst [vmem:[#allocation13_spill] sm:$0xff] %v5897_v11  ;;  %v8933_v11 = vld [vmem:[#allocation23_spill] sm:$0xff] }
 0x133   : > { %1639 = vrot.lane.b32.xlu0 %v8925_v10, %s4813_s28  ;;  %1637 = vrot.lane.b32.xlu1 %v8926_v17, %s4813_s28 }
 0x135   : > { %v5903_v6 = vpop.permute.xlu0 %1461  ;;  %v5905_v8 = vpop.permute.xlu1 %1459 }
 0x136   : > { %8927 = vst [vmem:[#allocation17_spill] sm:$0xff] %v5903_v6  ;;  %8928 = vst [vmem:[#allocation16_spill] sm:$0xff] %v5905_v8  ;;  %v257_v8 = vadd.s32 248, %v4993_v28  ;;  %v8940_v28 = vrot.slane %v5264_v59, 1 }
 0x137   : > { %1643 = vrot.lane.b32.xlu0 %v8929_v13, %s4813_s28  ;;  %1641 = vrot.lane.b32.xlu1 %v8930_v5, %s4813_s28 }
 0x138   : > { %v479_v1 = vand.u32 15, %v257_v8 }
 0x139   : > { %v5911_v16 = vpop.permute.xlu0 %1465  ;;  %v5913_v14 = vpop.permute.xlu1 %1463 }
 0x13a   : > { %8931 = vst [vmem:[#allocation20_spill] sm:$0xff] %v5911_v16  ;;  %8932 = vst [vmem:[#allocation19_spill] sm:$0xff] %v5913_v14  ;;  %v1025_v16 = vrot.slane %v5655_v34, 1  ;;  %vm5946_vm0 = vcmp.le.s32.totalorder %v479_v1, 14  ;;  %v8949_v1 = vld [vmem:[#allocation43_spill] sm:$0xff] }
 0x13b   : > { %1647 = vrot.lane.b32.xlu0 %v8933_v11, %s4813_s28  ;;  %1645 = vrot.lane.b32.xlu1 %v8934_v46, %s4813_s28  ;;  %v8943_v42 = vsel %vm5946_vm0, 4294967295, %v8942_v42 }
 0x13c   : > { %v5940_v19 = vsel %vm8941_vm13, %v8940_v28, %v1025_v16  ;;  %8944 = vst [vmem:[#allocation22_spill] sm:$0xff] %v8943_v42  ;;  %v1059_v8 = vsel %vm8945_vm14, %v1025_v16, 0.0  ;;  %vm8617_vm13 = vcmask 1043456   ;;  %vm8623_vm14 = vcmask 31744  }
 0x13d   : > { %v5919_v4 = vpop.permute.xlu0 %1501  ;;  %v5921_v6 = vpop.permute.xlu1 %1467  ;;  %v5957_v59 = vsel %vm5946_vm0, %v1059_v8, 0.0  ;;  %v8953_v8 = vld [vmem:[#allocation47_spill] sm:$0xff]  ;;  %vm8625_vm0 = vcmask 97280  }
 0x13e   : > { %8935 = vst [vmem:[#allocation23_spill] sm:$0xff] %v5921_v6  ;;  %v8939_v6 = vld [vmem:[#allocation29_spill] sm:$0xff] }
 0x13f   : > { %1651 = vrot.lane.b32.xlu0 %v8936_v3, %s4813_s28  ;;  %1649 = vrot.lane.b32.xlu1 %v8937_v18, %s4813_s28 }
 0x141   : > { %v5929_v14 = vpop.permute.xlu0 %1505  ;;  %v5931_v39 = vpop.permute.xlu1 %1503 }
 0x143   : > { %1655 = vrot.lane.b32.xlu0 %v8938_v35, %s4813_s28  ;;  %1653 = vrot.lane.b32.xlu1 %v8939_v6, %s4813_s28 }
 0x145   : > { %v5942_v33 = vpop.permute.xlu0 %1509  ;;  %v5944_v2 = vpop.permute.xlu1 %1507 }
 0x147   : > { %1659 = vrot.lane.b32.xlu0 %v5940_v19, %s4813_s28  ;;  %1657 = vrot.lane.b32.xlu1 %v8946_v20, %s4813_s28 }
 0x149   : > { %v5959_v28 = vpop.permute.xlu0 %1513  ;;  %v5961_v30 = vpop.permute.xlu1 %1511 }
 0x14a   : > { %8947 = vst [vmem:[#allocation27_spill] sm:$0xff] %v5959_v28  ;;  %8948 = vst [vmem:[#allocation26_spill] sm:$0xff] %v5961_v30 }
 0x14b   : > { %1695 = vrot.lane.b32.xlu0 %v8949_v1, %s4814_s29  ;;  %1661 = vrot.lane.b32.xlu1 %v5957_v59, %s4813_s28 }
 0x14d   : > { %v5967_v16 = vpop.permute.xlu0 %1517  ;;  %v5969_v0 = vpop.permute.xlu1 %1515 }
 0x14e   : > { %8950 = vst [vmem:[#allocation30_spill] sm:$0xff] %v5967_v16  ;;  %8951 = vst [vmem:[#allocation29_spill] sm:$0xff] %v5969_v0  ;;  %v8960_v0 = vld [vmem:[#allocation58_spill] sm:$0xff] }
 0x14f   : > { %1699 = vrot.lane.b32.xlu0 %v8952_v45, %s4814_s29  ;;  %1697 = vrot.lane.b32.xlu1 %v8953_v8, %s4814_s29 }
 0x151   : > { %v5975_v42 = vpop.permute.xlu0 %1521  ;;  %v5977_v28 = vpop.permute.xlu1 %1519 }
 0x152   : > { %8954 = vst [vmem:[#allocation35_spill] sm:$0xff] %v5975_v42  ;;  %8955 = vst [vmem:[#allocation43_spill] sm:$0xff] %v5977_v28  ;;  %v8964_v28 = vld [vmem:[#allocation63_spill] sm:$0xff] }
 0x153   : > { %1703 = vrot.lane.b32.xlu0 %v8956_v32, %s4814_s29  ;;  %1701 = vrot.lane.b32.xlu1 %v8957_v27, %s4814_s29  ;;  %v8965_v32 = vld [vmem:[#allocation62_spill] sm:$0xff] }
 0x155   : > { %v5983_v56 = vpop.permute.xlu0 %1525  ;;  %v5985_v16 = vpop.permute.xlu1 %1523 }
 0x156   : > { %8958 = vst [vmem:[#allocation47_spill] sm:$0xff] %v5983_v56  ;;  %8959 = vst [vmem:[#allocation154_spill] sm:$0xff] %v5985_v16  ;;  %v8968_v16 = vld [vmem:[#allocation68_spill] sm:$0xff] }
 0x157   : > { %1707 = vrot.lane.b32.xlu0 %v8960_v0, %s4814_s29  ;;  %1705 = vrot.lane.b32.xlu1 %v8961_v41, %s4814_s29  ;;  %v8969_v0 = vld [vmem:[#allocation67_spill] sm:$0xff] }
 0x159   : > { %v5991_v45 = vpop.permute.xlu0 %1529  ;;  %v5993_v42 = vpop.permute.xlu1 %1527 }
 0x15a   : > { %8962 = vst [vmem:[#allocation155_spill] sm:$0xff] %v5991_v45  ;;  %8963 = vst [vmem:[#allocation156_spill] sm:$0xff] %v5993_v42  ;;  %v8972_v42 = vld [vmem:[#allocation73_spill] sm:$0xff] }
 0x15b   : > { %1711 = vrot.lane.b32.xlu0 %v8964_v28, %s4814_s29  ;;  %1709 = vrot.lane.b32.xlu1 %v8965_v32, %s4814_s29  ;;  %v8973_v28 = vld [vmem:[#allocation72_spill] sm:$0xff] }
 0x15d   : > { %v5999_v27 = vpop.permute.xlu0 %1533  ;;  %v6001_v56 = vpop.permute.xlu1 %1531 }
 0x15e   : > { %8966 = vst [vmem:[#allocation157_spill] sm:$0xff] %v5999_v27  ;;  %8967 = vst [vmem:[#allocation158_spill] sm:$0xff] %v6001_v56  ;;  %v8976_v56 = vld [vmem:[#allocation78_spill] sm:$0xff] }
 0x15f   : > { %1715 = vrot.lane.b32.xlu0 %v8968_v16, %s4814_s29  ;;  %1713 = vrot.lane.b32.xlu1 %v8969_v0, %s4814_s29  ;;  %v8977_v16 = vld [vmem:[#allocation77_spill] sm:$0xff] }
 0x161   : > { %v6007_v41 = vpop.permute.xlu0 %1537  ;;  %v6009_v45 = vpop.permute.xlu1 %1535 }
 0x162   : > { %8970 = vst [vmem:[#allocation159_spill] sm:$0xff] %v6007_v41  ;;  %8971 = vst [vmem:[#allocation160_spill] sm:$0xff] %v6009_v45  ;;  %v8980_v45 = vld [vmem:[#allocation83_spill] sm:$0xff] }
 0x163   : > { %1719 = vrot.lane.b32.xlu0 %v8972_v42, %s4814_s29  ;;  %1717 = vrot.lane.b32.xlu1 %v8973_v28, %s4814_s29  ;;  %v8981_v42 = vld [vmem:[#allocation82_spill] sm:$0xff]  ;;  %v2239_v28 = vld [vmem:[%s8477_s1 + $0x18] sm:$0xff] }
 0x165   : > { %v6015_v32 = vpop.permute.xlu0 %1541  ;;  %v6017_v27 = vpop.permute.xlu1 %1539 }
 0x166   : > { %8974 = vst [vmem:[#allocation161_spill] sm:$0xff] %v6015_v32  ;;  %8975 = vst [vmem:[#allocation162_spill] sm:$0xff] %v6017_v27  ;;  %v2236_v32 = vld [vmem:[%s8477_s1] sm:$0xff]  ;;  %v2237_v27 = vld [vmem:[%s8477_s1 + $0x8] sm:$0xff] }
 0x167   : > { %1723 = vrot.lane.b32.xlu0 %v8976_v56, %s4814_s29  ;;  %1721 = vrot.lane.b32.xlu1 %v8977_v16, %s4814_s29  ;;  %v4706_v56 = vpack.c.bf16 %v2237_v27, %v2236_v32 }
 0x169   : > { %v6023_v0 = vpop.permute.xlu0 %1545  ;;  %v6025_v41 = vpop.permute.xlu1 %1543  ;;  %4707 = vmatprep.subr.bf16.mxu0 %v4706_v56 }
 0x16a   : > { %8978 = vst [vmem:[#allocation163_spill] sm:$0xff] %v6023_v0  ;;  %8979 = vst [vmem:[#allocation164_spill] sm:$0xff] %v6025_v41  ;;  %v8984_v41 = vld [vmem:[#allocation88_spill] sm:$0xff]  ;;  %4709 = vmatpush3.bf16.msra.mxu0 %v4706_v56  ;;  %v2240_v56 = vld [vmem:[%s8477_s1 + $0x20] sm:$0xf] }
 0x16b   : > { %1727 = vrot.lane.b32.xlu0 %v8980_v45, %s4814_s29  ;;  %1725 = vrot.lane.b32.xlu1 %v8981_v42, %s4814_s29  ;;  %v8985_v45 = vld [vmem:[#allocation87_spill] sm:$0xff]  ;;  %v2238_v42 = vld [vmem:[%s8477_s1 + $0x10] sm:$0xff] }
 0x16c   : > { %v4710_v27 = vpack.c.bf16 %v2239_v28, %v2238_v42  ;;  %v8992_v42 = vld [vmem:[#allocation98_spill] sm:$0xff]  ;;  %v8993_v28 = vld [vmem:[#allocation97_spill] sm:$0xff] }
 0x16d   : > { %v6037_v16 = vpop.permute.xlu0 %1549  ;;  %v6039_v0 = vpop.permute.xlu1 %1547 }
 0x16e   : > { %8982 = vst [vmem:[#allocation165_spill] sm:$0xff] %v6037_v16  ;;  %8983 = vst [vmem:[#allocation166_spill] sm:$0xff] %v6039_v0  ;;  %4711 = vmatprep.subr.bf16.mxu0 %v4710_v27  ;;  %v8988_v0 = vld [vmem:[#allocation93_spill] sm:$0xff] }
 0x16f   : > { %1731 = vrot.lane.b32.xlu0 %v8984_v41, %s4814_s29  ;;  %1729 = vrot.lane.b32.xlu1 %v8985_v45, %s4814_s29  ;;  %v8989_v41 = vld [vmem:[#allocation92_spill] sm:$0xff] }
 0x170   : > { %4713 = vmatpush3.bf16.msra.mxu0 %v4710_v27 }
 0x171   : > { %v6051_v32 = vpop.permute.xlu0 %1553  ;;  %v6053_v16 = vpop.permute.xlu1 %1551  ;;  %4598 = vmatprep.subr.msk.mxu0 %vm8617_vm13, %v2240_v56 }
 0x172   : > { %8986 = vst [vmem:[#allocation167_spill] sm:$0xff] %v6051_v32  ;;  %8987 = vst [vmem:[#allocation168_spill] sm:$0xff] %v6053_v16 }
 0x173   : > { %1735 = vrot.lane.b32.xlu0 %v8988_v0, %s4814_s29  ;;  %1733 = vrot.lane.b32.xlu1 %v8989_v41, %s4814_s29 }
 0x174   : > { %4599 = vmatpush3.msk.msra.mxu0 %vm8617_vm13, %v2240_v56  ;;  %v4740_v56 = vld [vmem:[%s4865_s24 + $0x10] sm:$0xff]  ;;  %vm8624_vm13 = vcmask 64512  }
 0x175   : > { %v6059_v45 = vpop.permute.xlu0 %1557  ;;  %v6061_v30 = vpop.permute.xlu1 %1555 }
 0x176   : > { %8990 = vst [vmem:[#allocation169_spill] sm:$0xff] %v6059_v45  ;;  %8991 = vst [vmem:[#allocation170_spill] sm:$0xff] %v6061_v30 }
 0x177   : > { %1739 = vrot.lane.b32.xlu0 %v8992_v42, %s4814_s29  ;;  %1737 = vrot.lane.b32.xlu1 %v8993_v28, %s4814_s29  ;;  %v4739_v42 = vld [vmem:[%s4865_s24 + $0x18] sm:$0xff] }
 0x179   : > { %v6072_v27 = vpop.permute.xlu0 %1561  ;;  %v6074_v45 = vpop.permute.xlu1 %1559 }
 0x17a   : > { %8994 = vst [vmem:[#allocation171_spill] sm:$0xff] %v6072_v27  ;;  %8995 = vst [vmem:[#allocation172_spill] sm:$0xff] %v6074_v45 }
 0x17b   : > { %1743 = vrot.lane.b32.xlu0 %v5633_v53, %s4814_s29  ;;  %1741 = vrot.lane.b32.xlu1 %v5629_v36, %s4814_s29 }
 0x17d   : > { %v6080_v30 = vpop.permute.xlu0 %1599  ;;  %v6082_v32 = vpop.permute.xlu1 %1563 }
 0x17e   : > { %8996 = vst [vmem:[#allocation173_spill] sm:$0xff] %v6082_v32 }
 0x17f   : > { %1790 = vrot.lane.b32.xlu0 %v4739_v42, %s4815_s15  ;;  %1788 = vrot.lane.b32.xlu1 %v4740_v56, %s4815_s15  ;;  %v4741_v42 = vld [vmem:[%s4865_s24 + $0x28] sm:$0xff]  ;;  %v4742_v56 = vld [vmem:[%s4865_s24 + $0x20] sm:$0xff] }
 0x181   : > { %v6088_v27 = vpop.permute.xlu0 %1603  ;;  %v6090_v45 = vpop.permute.xlu1 %1601 }
 0x183   : > { %1883 = vrot.lane.b32.xlu0 %v5060_v54, %s4816_s16  ;;  %1881 = vrot.lane.b32.xlu1 %v5044_v47, %s4816_s16 }
 0x185   : > { %v6096_v32 = vpop.permute.xlu0 %1607  ;;  %v6098_v53 = vpop.permute.xlu1 %1605 }
 0x187   : > { %1794 = vrot.lane.b32.xlu0 %v4741_v42, %s4815_s15  ;;  %1792 = vrot.lane.b32.xlu1 %v4742_v56, %s4815_s15  ;;  %v4743_v42 = vld [vmem:[%s4865_s24 + $0x38] sm:$0xff]  ;;  %v4744_v56 = vld [vmem:[%s4865_s24 + $0x30] sm:$0xff] }
 0x189   : > { %v6104_v36 = vpop.permute.xlu0 %1611  ;;  %v6106_v16 = vpop.permute.xlu1 %1609 }
 0x18b   : > { %1887 = vrot.lane.b32.xlu0 %v5079_v62, %s4816_s16  ;;  %1885 = vrot.lane.b32.xlu1 %v5063_v55, %s4816_s16 }
 0x18d   : > { %v6112_v47 = vpop.permute.xlu0 %1615  ;;  %v6114_v54 = vpop.permute.xlu1 %1613 }
 0x18f   : > { %1798 = vrot.lane.b32.xlu0 %v4743_v42, %s4815_s15  ;;  %1796 = vrot.lane.b32.xlu1 %v4744_v56, %s4815_s15  ;;  %v4745_v42 = vld [vmem:[%s4865_s24 + $0x48] sm:$0xff]  ;;  %v4746_v56 = vld [vmem:[%s4865_s24 + $0x40] sm:$0xff] }
 0x191   : > { %v6120_v28 = vpop.permute.xlu0 %1619  ;;  %v6122_v0 = vpop.permute.xlu1 %1617 }
 0x192   : > { %8997 = vst [vmem:[#allocation174_spill] sm:$0xff] %v6120_v28 }
 0x193   : > { %1891 = vrot.lane.b32.xlu0 %v5098_v38, %s4816_s16  ;;  %1889 = vrot.lane.b32.xlu1 %v5082_v63, %s4816_s16 }
 0x195   : > { %v6128_v55 = vpop.permute.xlu0 %1623  ;;  %v6130_v62 = vpop.permute.xlu1 %1621 }
 0x197   : > { %1802 = vrot.lane.b32.xlu0 %v4745_v42, %s4815_s15  ;;  %1800 = vrot.lane.b32.xlu1 %v4746_v56, %s4815_s15  ;;  %v4747_v42 = vld [vmem:[%s4865_s24 + $0x58] sm:$0xff]  ;;  %v4748_v56 = vld [vmem:[%s4865_s24 + $0x50] sm:$0xff] }
 0x199   : > { %v6136_v41 = vpop.permute.xlu0 %1627  ;;  %v6138_v28 = vpop.permute.xlu1 %1625 }
 0x19a   : > { %8998 = vst [vmem:[#allocation175_spill] sm:$0xff] %v6136_v41  ;;  %8999 = vst [vmem:[#allocation176_spill] sm:$0xff] %v6138_v28 }
 0x19b   : > { %1895 = vrot.lane.b32.xlu0 %v5117_v51, %s4816_s16  ;;  %1893 = vrot.lane.b32.xlu1 %v5101_v40, %s4816_s16 }
 0x19d   : > { %v6144_v63 = vpop.permute.xlu0 %1631  ;;  %v6146_v38 = vpop.permute.xlu1 %1629 }
 0x19f   : > { %1806 = vrot.lane.b32.xlu0 %v4747_v42, %s4815_s15  ;;  %1804 = vrot.lane.b32.xlu1 %v4748_v56, %s4815_s15  ;;  %v4749_v42 = vld [vmem:[%s4865_s24 + $0x68] sm:$0xff]  ;;  %v4750_v56 = vld [vmem:[%s4865_s24 + $0x60] sm:$0xff] }
 0x1a1   : > { %v6152_v41 = vpop.permute.xlu0 %1635  ;;  %v6154_v28 = vpop.permute.xlu1 %1633 }
 0x1a2   : > { %9000 = vst [vmem:[#allocation177_spill] sm:$0xff] %v6152_v41  ;;  %9001 = vst [vmem:[#allocation178_spill] sm:$0xff] %v6154_v28 }
 0x1a3   : > { %1899 = vrot.lane.b32.xlu0 %v5136_v25, %s4816_s16  ;;  %1897 = vrot.lane.b32.xlu1 %v5120_v52, %s4816_s16 }
 0x1a5   : > { %v6160_v40 = vpop.permute.xlu0 %1639  ;;  %v6162_v51 = vpop.permute.xlu1 %1637 }
 0x1a6   : > { %9002 = vst [vmem:[#allocation179_spill] sm:$0xff] %v6160_v40  ;;  %9003 = vst [vmem:[#allocation180_spill] sm:$0xff] %v6162_v51  ;;  %v4763_v51 = vld [vmem:[%s4865_s24 + $0xd0] sm:$0xff] }
 0x1a7   : > { %1810 = vrot.lane.b32.xlu0 %v4749_v42, %s4815_s15  ;;  %1808 = vrot.lane.b32.xlu1 %v4750_v56, %s4815_s15  ;;  %v4751_v42 = vld [vmem:[%s4865_s24 + $0x78] sm:$0xff]  ;;  %v4752_v56 = vld [vmem:[%s4865_s24 + $0x70] sm:$0xff] }
 0x1a9   : > { %v6168_v41 = vpop.permute.xlu0 %1643  ;;  %v6170_v28 = vpop.permute.xlu1 %1641 }
 0x1aa   : > { %9004 = vst [vmem:[#allocation181_spill] sm:$0xff] %v6168_v41  ;;  %9005 = vst [vmem:[#allocation182_spill] sm:$0xff] %v6170_v28 }
 0x1ab   : > { %1903 = vrot.lane.b32.xlu0 %v5155_v48, %s4816_s16  ;;  %1901 = vrot.lane.b32.xlu1 %v5139_v31, %s4816_s16 }
 0x1ad   : > { %v6176_v52 = vpop.permute.xlu0 %1647  ;;  %v6178_v25 = vpop.permute.xlu1 %1645 }
 0x1ae   : > { %9006 = vst [vmem:[#allocation183_spill] sm:$0xff] %v6176_v52  ;;  %9007 = vst [vmem:[#allocation184_spill] sm:$0xff] %v6178_v25  ;;  %v4761_v25 = vld [vmem:[%s4865_s24 + $0xc8] sm:$0xff] }
 0x1af   : > { %1814 = vrot.lane.b32.xlu0 %v4751_v42, %s4815_s15  ;;  %1812 = vrot.lane.b32.xlu1 %v4752_v56, %s4815_s15  ;;  %v4753_v42 = vld [vmem:[%s4865_s24 + $0x88] sm:$0xff]  ;;  %v4754_v56 = vld [vmem:[%s4865_s24 + $0x80] sm:$0xff] }
 0x1b1   : > { %v6184_v41 = vpop.permute.xlu0 %1651  ;;  %v6186_v28 = vpop.permute.xlu1 %1649 }
 0x1b2   : > { %9008 = vst [vmem:[#allocation185_spill] sm:$0xff] %v6184_v41  ;;  %9009 = vst [vmem:[#allocation186_spill] sm:$0xff] %v6186_v28 }
 0x1b3   : > { %1907 = vrot.lane.b32.xlu0 %v8918_v15, %s4816_s16  ;;  %1905 = vrot.lane.b32.xlu1 %v5158_v49, %s4816_s16 }
 0x1b5   : > { %v6192_v31 = vpop.permute.xlu0 %1655  ;;  %v6194_v48 = vpop.permute.xlu1 %1653 }
 0x1b6   : > { %9010 = vst [vmem:[#allocation187_spill] sm:$0xff] %v6192_v31  ;;  %9011 = vst [vmem:[#allocation188_spill] sm:$0xff] %v6194_v48 }
 0x1b7   : > { %1818 = vrot.lane.b32.xlu0 %v4753_v42, %s4815_s15  ;;  %1816 = vrot.lane.b32.xlu1 %v4754_v56, %s4815_s15  ;;  %v4755_v42 = vld [vmem:[%s4865_s24 + $0x98] sm:$0xff]  ;;  %v4756_v56 = vld [vmem:[%s4865_s24 + $0x90] sm:$0xff] }
 0x1b9   : > { %v6200_v41 = vpop.permute.xlu0 %1659  ;;  %v6202_v28 = vpop.permute.xlu1 %1657 }
 0x1ba   : > { %9012 = vst [vmem:[#allocation189_spill] sm:$0xff] %v6200_v41  ;;  %9013 = vst [vmem:[#allocation190_spill] sm:$0xff] %v6202_v28 }
 0x1bb   : > { %1911 = vrot.lane.b32.xlu0 %v8922_v7, %s4816_s16  ;;  %1909 = vrot.lane.b32.xlu1 %v8917_v9, %s4816_s16 }
 0x1bd   : > { %v6208_v49 = vpop.permute.xlu0 %1695  ;;  %v6210_v15 = vpop.permute.xlu1 %1661 }
 0x1be   : > { %9014 = vst [vmem:[#allocation191_spill] sm:$0xff] %v6210_v15 }
 0x1bf   : > { %1822 = vrot.lane.b32.xlu0 %v4755_v42, %s4815_s15  ;;  %1820 = vrot.lane.b32.xlu1 %v4756_v56, %s4815_s15  ;;  %v4757_v42 = vld [vmem:[%s4865_s24 + $0xa8] sm:$0xff]  ;;  %v4758_v56 = vld [vmem:[%s4865_s24 + $0xa0] sm:$0xff] }
 0x1c1   : > { %v6216_v41 = vpop.permute.xlu0 %1699  ;;  %v6218_v28 = vpop.permute.xlu1 %1697 }
 0x1c3   : > { %1915 = vrot.lane.b32.xlu0 %v8926_v17, %s4816_s16  ;;  %1913 = vrot.lane.b32.xlu1 %v8921_v12, %s4816_s16 }
 0x1c5   : > { %v6224_v7 = vpop.permute.xlu0 %1703  ;;  %v6226_v9 = vpop.permute.xlu1 %1701 }
 0x1c7   : > { %1826 = vrot.lane.b32.xlu0 %v4757_v42, %s4815_s15  ;;  %1824 = vrot.lane.b32.xlu1 %v4758_v56, %s4815_s15  ;;  %v4759_v42 = vld [vmem:[%s4865_s24 + $0xb8] sm:$0xff]  ;;  %v4760_v56 = vld [vmem:[%s4865_s24 + $0xb0] sm:$0xff] }
 0x1c9   : > { %v6232_v15 = vpop.permute.xlu0 %1707  ;;  %v6234_v31 = vpop.permute.xlu1 %1705 }
 0x1cb   : > { %1919 = vrot.lane.b32.xlu0 %v8930_v5, %s4816_s16  ;;  %1917 = vrot.lane.b32.xlu1 %v8925_v10, %s4816_s16 }
 0x1cd   : > { %v6240_v12 = vpop.permute.xlu0 %1711  ;;  %v6242_v17 = vpop.permute.xlu1 %1709 }
 0x1cf   : > { %1830 = vrot.lane.b32.xlu0 %v4759_v42, %s4815_s15  ;;  %1828 = vrot.lane.b32.xlu1 %v4760_v56, %s4815_s15  ;;  %v4762_v42 = vld [vmem:[%s4865_s24 + $0xc0] sm:$0xff] }
 0x1d1   : > { %v6248_v48 = vpop.permute.xlu0 %1715  ;;  %v6250_v52 = vpop.permute.xlu1 %1713 }
 0x1d3   : > { %1923 = vrot.lane.b32.xlu0 %v8934_v46, %s4816_s16  ;;  %1921 = vrot.lane.b32.xlu1 %v8929_v13, %s4816_s16 }
 0x1d5   : > { %v6256_v5 = vpop.permute.xlu0 %1719  ;;  %v6258_v10 = vpop.permute.xlu1 %1717 }
 0x1d7   : > { %1834 = vrot.lane.b32.xlu0 %v4761_v25, %s4815_s15  ;;  %1832 = vrot.lane.b32.xlu1 %v4762_v42, %s4815_s15 }
 0x1d9   : > { %v6264_v56 = vpop.permute.xlu0 %1723  ;;  %v6266_v40 = vpop.permute.xlu1 %1721 }
 0x1db   : > { %1927 = vrot.lane.b32.xlu0 %v8937_v18, %s4816_s16  ;;  %1925 = vrot.lane.b32.xlu1 %v8933_v11, %s4816_s16  ;;  %v4764_v18 = vld [vmem:[%s4865_s24 + $0xd8] sm:$0xff] }
 0x1dd   : > { %v6272_v13 = vpop.permute.xlu0 %1727  ;;  %v6274_v46 = vpop.permute.xlu1 %1725 }
 0x1de   : > { %9015 = vst [vmem:[#allocation192_spill] sm:$0xff] %v6272_v13 }
 0x1df   : > { %1836 = vrot.lane.b32.xlu0 %v4763_v51, %s4815_s15  ;;  %1745 = vrot.lane.b32.xlu1 %v5658_v37, %s4814_s29 }
 0x1e1   : > { %v6280_v25 = vpop.permute.xlu0 %1731  ;;  %v6282_v42 = vpop.permute.xlu1 %1729 }
 0x1e2   : > { %9016 = vst [vmem:[#allocation193_spill] sm:$0xff] %v6280_v25  ;;  %v4765_v25 = vld [vmem:[%s4865_s24 + $0xe0] sm:$0xff] }
 0x1e3   : > { %1929 = vrot.lane.b32.xlu0 %v8936_v3, %s4816_s16  ;;  %1838 = vrot.lane.b32.xlu1 %v4764_v18, %s4815_s15 }
 0x1e5   : > { %v6288_v11 = vpop.permute.xlu0 %1735  ;;  %v6290_v13 = vpop.permute.xlu1 %1733 }
 0x1e7   : > { %1747 = vrot.lane.b32.xlu0 %v5662_v57, %s4814_s29  ;;  %1931 = vrot.lane.b32.xlu1 %v8939_v6, %s4816_s16  ;;  %v9021_v57 = vld [vmem:[#allocation25_spill] sm:$0xff] }
 0x1e8   : > { %v1975_v6 = vsel %vm8623_vm14, 0.0, %v9021_v57  ;;  %vm8630_vm14 = vcmask 195584  }
 0x1e9   : > { %v6296_v51 = vpop.permute.xlu0 %1739  ;;  %v6298_v37 = vpop.permute.xlu1 %1737 }
 0x1ea   : > { %9017 = vst [vmem:[#allocation194_spill] sm:$0xff] %v6296_v51  ;;  %9018 = vst [vmem:[#allocation195_spill] sm:$0xff] %v6298_v37  ;;  %v4766_v51 = vld [vmem:[%s4865_s24 + $0xe8] sm:$0xff] }
 0x1eb   : > { %1840 = vrot.lane.b32.xlu0 %v4765_v25, %s4815_s15  ;;  %1749 = vrot.lane.b32.xlu1 %v5678_v58, %s4814_s29  ;;  %v9022_v25 = vld [vmem:[#allocation105_spill] sm:$0xff] }
 0x1ec   : > { %v6316_v58 = vsel %vm8624_vm13, %v1975_v6, %v9022_v25  ;;  %vm8629_vm13 = vcmask 228352  }
 0x1ed   : > { %v6304_v3 = vpop.permute.xlu0 %1743  ;;  %v6306_v18 = vpop.permute.xlu1 %1741  ;;  %v2040_v57 = vsel %vm8625_vm0, %v6316_v58, %v5801_v23 }
 0x1ee   : > { %9019 = vst [vmem:[#allocation196_spill] sm:$0xff] %v6304_v3  ;;  %9020 = vst [vmem:[#allocation197_spill] sm:$0xff] %v6306_v18  ;;  %v2039_v3 = vsel %vm8625_vm0, %v6316_v58, %v5793_v21  ;;  %vm8631_vm0 = vcmask 261120  }
 0x1ef   : > { %1933 = vrot.lane.b32.xlu0 %v8938_v35, %s4816_s16  ;;  %1842 = vrot.lane.b32.xlu1 %v4766_v51, %s4815_s15  ;;  %v2072_v35 = vsel %vm8627_vm15, %v2039_v3, %v5919_v4  ;;  %v2073_v51 = vsel %vm8627_vm15, %v2040_v57, %v5931_v39  ;;  %v9023_v57 = vld [vmem:[#allocation31_spill] sm:$0xff]  ;;  %vm9025_vm15 = vcmask 31744  }
 0x1f0   : > { %v2105_v6 = vsel %vm8626_vm12, %v2072_v35, %v6080_v30  ;;  %v2106_v21 = vsel %vm8626_vm12, %v2073_v51, %v6090_v45  ;;  %vm8633_vm12 = vcmask 293888   ;;  %v9026_v51 = vld [vmem:[#allocation32_spill] sm:$0xff]  ;;  %vm9028_vm11 = vmmov %vm9025_vm15 }
 0x1f1   : > { %v1791_v18 = vpop.permute.xlu0 %1790  ;;  %v1789_v37 = vpop.permute.xlu1 %1788  ;;  %v2138_v4 = vsel %vm8630_vm14, %v2105_v6, %v6208_v49  ;;  %v2139_v23 = vsel %vm8630_vm14, %v2106_v21, %v6218_v28  ;;  %v9027_v49 = vld [vmem:[#allocation38_spill] sm:$0xff]  ;;  %v4767_v28 = vld [vmem:[%s4865_s24 + $0xf0] sm:$0xff] }
 0x1f2   : > { %v2172_v39 = vsel %vm8629_vm13, %v2139_v23, %v1791_v18  ;;  %v2171_v30 = vsel %vm8629_vm13, %v2138_v4, %v1789_v37  ;;  %v1976_v6 = vsel %vm9028_vm11, %v9027_v49, %v9026_v51  ;;  %v9029_v37 = vld [vmem:[#allocation106_spill] sm:$0xff]  ;;  %vm9030_vm13 = vcmask 64512  }
 0x1f3   : > { %1751 = vrot.lane.b32.xlu0 %v5670_v50, %s4814_s29  ;;  %1935 = vrot.lane.b32.xlu1 %v8946_v20, %s4816_s16  ;;  %v9024_v20 = vld [vmem:[#allocation42_spill] sm:$0xff]  ;;  %v2008_v18 = vsel %vm9030_vm13, %v1976_v6, %v9029_v37  ;;  %vm9031_vm14 = vmmov %vm9030_vm13  ;;  %vm9034_vm11 = vcmask 130048  }
 0x1f4   : > { %v1977_v35 = vsel %vm9025_vm15, %v9024_v20, %v9023_v57  ;;  %vm9032_vm15 = vcmask 97280   ;;  %vm9035_vm13 = vmmov %vm9034_vm11  ;;  %v9046_v57 = vld [vmem:[#allocation37_spill] sm:$0xff]  ;;  %v9056_v6 = vld [vmem:[#allocation26_spill] sm:$0xff] }
 0x1f5   : > { %v1884_v3 = vpop.permute.xlu0 %1883  ;;  %v1882_v25 = vpop.permute.xlu1 %1881  ;;  %v2009_v21 = vsel %vm9031_vm14, %v1977_v35, %v5673_v61  ;;  %v2041_v4 = vsel %vm9032_vm15, %v2008_v18, %v5799_v22  ;;  %vm9036_vm14 = vcmask 162816  }
 0x1f6   : > { %v2205_v45 = vsel %vm8631_vm0, %v2172_v39, %v1884_v3  ;;  %v2204_v50 = vsel %vm8631_vm0, %v2171_v30, %v1882_v25  ;;  %vm9033_vm0 = vmmov %vm9032_vm15 }
 0x1f7   : > { %1844 = vrot.lane.b32.xlu0 %v4767_v28, %s4815_s15  ;;  %1753 = vrot.lane.b32.xlu1 %v5685_v43, %s4814_s29  ;;  %v2042_v23 = vsel %vm9033_vm0, %v2009_v21, %v5809_v26  ;;  %v2074_v43 = vsel %vm9034_vm11, %v2041_v4, %v5929_v14  ;;  %vm9037_vm10 = vmmov %vm9036_vm14  ;;  %vm9038_vm0 = vcmask 195584   ;;  %vm9040_vm11 = vcmask 228352   ;;  %v9066_v4 = vld [vmem:[#allocation40_spill] sm:$0xff] }
 0x1f8   : > { %4600 = vmatprep.mubr.msk.f32.mxu0 %vm8633_vm12, %v2204_v50  ;;  %v2075_v3 = vsel %vm9035_vm13, %v2042_v23, %v5944_v2  ;;  %v2107_v61 = vsel %vm9036_vm14, %v2074_v43, %v6088_v27  ;;  %vm9039_vm15 = vmmov %vm9038_vm0  ;;  %vm9042_vm14 = vcmask 261120   ;;  %v9067_v23 = vld [vmem:[#allocation48_spill] sm:$0xff] }
 0x1f9   : > { %4601 = vmatmul.mubr.msk.f32.vlgmr.msra.gmra.mrb[0].mxu0 %vm8633_vm12, %v2205_v45  ;;  %v1795_v39 = vpop.permute.xlu0 %1794  ;;  %v1793_v30 = vpop.permute.xlu1 %1792  ;;  %v2108_v25 = vsel %vm9037_vm10, %v2075_v3, %v6098_v53  ;;  %v2140_v22 = vsel %vm9038_vm0, %v2107_v61, %v6216_v41  ;;  %vm9041_vm13 = vmmov %vm9040_vm11  ;;  %vm9045_vm12 = vcmask 31744   ;;  %v9070_v43 = vld [vmem:[#allocation52_spill] sm:$0xff] }
 0x1fa   : > { %v2141_v14 = vsel %vm9039_vm15, %v2108_v25, %v6226_v9  ;;  %v2173_v26 = vsel %vm9041_vm13, %v2140_v22, %v1793_v30  ;;  %vm9043_vm10 = vmmov %vm9042_vm14  ;;  %v9048_v9 = vmov 0.0   ;;  %vm9049_vm15 = vcmask 64512   ;;  %v9069_v30 = vld [vmem:[#allocation41_spill] sm:$0xff]  ;;  %v9075_v61 = vld [vmem:[#allocation112_spill] sm:$0xff] }
 0x1fb   : > { %1937 = vrot.lane.b32.xlu0 %v5940_v19, %s4816_s16  ;;  %1846 = vrot.lane.b32.xlu1 %v5655_v34, %s4815_s15  ;;  %v2174_v2 = vsel %vm9040_vm11, %v2141_v14, %v1795_v39  ;;  %v9044_v19 = vld [vmem:[#allocation36_spill] sm:$0xff]  ;;  %vm9047_vm0 = vmmov %vm9045_vm12  ;;  %vm9051_vm13 = vcmask 293888   ;;  %v9078_v22 = vld [vmem:[#allocation137_spill] sm:$0xff] }
 0x1fc   : > { %v1978_v34 = vsel %vm9045_vm12, %v8949_v1, %v9044_v19  ;;  %v1979_v41 = vsel %vm9047_vm0, %v8953_v8, %v9046_v57  ;;  %vm9050_vm11 = vmmov %vm9049_vm15  ;;  %vm9052_vm12 = vcmask 97280   ;;  %vm9055_vm0 = vcmask 130048   ;;  %v9084_v19 = vld [vmem:[#allocation29_spill] sm:$0xff] }
 0x1fd   : > { %v1888_v27 = vpop.permute.xlu0 %1887  ;;  %v1886_v45 = vpop.permute.xlu1 %1885  ;;  %v2010_v20 = vsel %vm9049_vm15, %v1978_v34, %v5675_v44  ;;  %v2011_v35 = vsel %vm9050_vm11, %v1979_v41, %v5687_v60  ;;  %vm9057_vm15 = vmmov %vm9055_vm0  ;;  %vm9058_vm11 = vcmask 162816  }
 0x1fe   : > { %v2207_v53 = vsel %vm9042_vm14, %v2174_v2, %v1888_v27  ;;  %v2206_v50 = vsel %vm9043_vm10, %v2173_v26, %v1886_v45  ;;  %v2043_v1 = vsel %vm9052_vm12, %v2010_v20, %v5807_v24  ;;  %vm9053_vm14 = vmmov %vm9052_vm12  ;;  %vm9060_vm12 = vcmask 195584   ;;  %v9080_v2 = vld [vmem:[#allocation139_spill] sm:$0xff] }
 0x1ff   : > { %1755 = vrot.lane.b32.xlu0 %v9048_v9, %s4814_s29  ;;  %1939 = vrot.lane.b32.xlu1 %v5957_v59, %s4816_s16  ;;  %v2044_v8 = vsel %vm9053_vm14, %v2011_v35, %v5817_v29  ;;  %vm9054_vm10 = vmmov %vm9051_vm13  ;;  %v2076_v59 = vsel %vm9055_vm0, %v2043_v1, %v5942_v33 }
 0x200   : > { %4603 = vmatprep.mubr.msk.f32.mxu0 %vm9051_vm13, %v2206_v50  ;;  %v2077_v44 = vsel %vm9057_vm15, %v2044_v8, %v9056_v6  ;;  %v2109_v60 = vsel %vm9058_vm11, %v2076_v59, %v6096_v32  ;;  %vm9059_vm13 = vmmov %vm9058_vm11  ;;  %vm9064_vm15 = vcmask 261120   ;;  %v9095_v6 = vld [vmem:[#allocation53_spill] sm:$0xff] }
 0x201   : > { %4604 = vmatmul.mubr.msk.f32.gmra.mrb[2].mxu0 %vm9054_vm10, %v2207_v53  ;;  %v1799_v51 = vpop.permute.xlu0 %1798  ;;  %v1797_v49 = vpop.permute.xlu1 %1796  ;;  %v2110_v28 = vsel %vm9059_vm13, %v2077_v44, %v6106_v16  ;;  %v2142_v24 = vsel %vm9060_vm12, %v2109_v60, %v6224_v7  ;;  %vm9061_vm14 = vmmov %vm9060_vm12  ;;  %vm9062_vm10 = vcmask 228352   ;;  %vm9068_vm13 = vcmask 31744   ;;  %v9082_v53 = vld [vmem:[#allocation27_spill] sm:$0xff]  ;;  %v9097_v44 = vld [vmem:[#allocation46_spill] sm:$0xff] }
 0x202   : > { %v2143_v29 = vsel %vm9061_vm14, %v2110_v28, %v6234_v31  ;;  %vm9063_vm0 = vmmov %vm9062_vm10  ;;  %v1980_v39 = vsel %vm9068_vm13, %v9067_v23, %v9066_v4  ;;  %v9073_v31 = vld [vmem:[#allocation111_spill] sm:$0xff]  ;;  %vm9074_vm14 = vcmask 64512   ;;  %v9098_v60 = vld [vmem:[#allocation57_spill] sm:$0xff] }
 0x203   : > { %1848 = vrot.lane.b32.xlu1 %v9048_v9, %s4815_s15  ;;  %1941 = vrot.lane.b32.xlu0 %v9048_v9, %s4816_s16  ;;  %v2176_v33 = vsel %vm9062_vm10, %v2143_v29, %v1799_v51  ;;  %v2175_v37 = vsel %vm9063_vm0, %v2142_v24, %v1797_v49  ;;  %vm9065_vm11 = vmmov %vm9064_vm15  ;;  %v2012_v3 = vsel %vm9074_vm14, %v1980_v39, %v9073_v31  ;;  %v9103_v24 = vld [vmem:[#allocation114_spill] sm:$0xff]  ;;  %v9112_v39 = vld [vmem:[#allocation43_spill] sm:$0xff] }
 0x204   : > { %vm9071_vm12 = vmmov %vm9068_vm13  ;;  %vm9083_vm13 = vcmask 130048   ;;  %v9110_v4 = vld [vmem:[#allocation30_spill] sm:$0xff] }
 0x205   : > { %v1892_v32 = vpop.permute.xlu0 %1891  ;;  %v1890_v18 = vpop.permute.xlu1 %1889  ;;  %v1981_v7 = vsel %vm9071_vm12, %v9070_v43, %v9069_v30  ;;  %vm9076_vm10 = vmmov %vm9074_vm14  ;;  %vm9086_vm12 = vcmask 162816  }
 0x206   : > { %v2209_v16 = vsel %vm9064_vm15, %v2176_v33, %v1892_v32  ;;  %v2208_v21 = vsel %vm9065_vm11, %v2175_v37, %v1890_v18  ;;  %v2013_v25 = vsel %vm9076_vm10, %v1981_v7, %v9075_v61  ;;  %vm9077_vm0 = vmmov %vm9072_vm9  ;;  %vm9079_vm15 = vcmask 97280   ;;  %v9106_v33 = vld [vmem:[#allocation138_spill] sm:$0xff]  ;;  %v9108_v32 = vld [vmem:[#allocation141_spill] sm:$0xff] }
 0x207   : > { %4606 = vmatprep.mubr.msk.f32.mxu0 %vm9072_vm9, %v2208_v21  ;;  %v2045_v14 = vsel %vm9079_vm15, %v2012_v3, %v9078_v22  ;;  %vm9081_vm11 = vmmov %vm9079_vm15  ;;  %vm9088_vm10 = vcmask 195584   ;;  %vm9090_vm15 = vcmask 228352  }
 0x208   : > { %4607 = vmatmul.mubr.msk.f32.gmra.mrb[4].mxu0 %vm9077_vm0, %v2209_v16  ;;  %v2046_v26 = vsel %vm9081_vm11, %v2013_v25, %v9080_v2  ;;  %v2078_v50 = vsel %vm9083_vm13, %v2045_v14, %v9082_v53  ;;  %vm9085_vm9 = vmmov %vm9083_vm13  ;;  %vm9092_vm13 = vcmask 261120   ;;  %v9126_v53 = vld [vmem:[#allocation62_spill] sm:$0xff] }
 0x209   : > { %v1803_v27 = vpop.permute.xlu0 %1802  ;;  %v1801_v45 = vpop.permute.xlu1 %1800  ;;  %v2079_v34 = vsel %vm9085_vm9, %v2046_v26, %v9084_v19  ;;  %v2111_v57 = vsel %vm9086_vm12, %v2078_v50, %v6104_v36  ;;  %vm9087_vm14 = vmmov %vm9086_vm12  ;;  %v9094_v36 = vld [vmem:[#allocation45_spill] sm:$0xff]  ;;  %vm9096_vm12 = vcmask 31744   ;;  %v9131_v19 = vld [vmem:[#allocation116_spill] sm:$0xff] }
 0x20a   : > { %v2112_v41 = vsel %vm9087_vm14, %v2079_v34, %v6114_v54  ;;  %v2144_v9 = vsel %vm9088_vm10, %v2111_v57, %v6232_v15  ;;  %vm9089_vm0 = vmmov %vm9088_vm10  ;;  %v1982_v54 = vsel %vm9096_vm12, %v9095_v6, %v9094_v36  ;;  %vm9100_vm10 = vcmask 293888   ;;  %v9134_v57 = vld [vmem:[#allocation140_spill] sm:$0xff]  ;;  %v9142_v36 = vld [vmem:[#allocation174_spill] sm:$0xff] }
 0x20b   : > { %v2145_v20 = vsel %vm9089_vm0, %v2112_v41, %v6242_v17  ;;  %vm9091_vm11 = vmmov %vm9090_vm15  ;;  %v9101_v17 = vld [vmem:[#allocation113_spill] sm:$0xff]  ;;  %vm9102_vm0 = vcmask 64512  }
 0x20c   : > { %v2178_v35 = vsel %vm9090_vm15, %v2145_v20, %v1803_v27  ;;  %v2177_v1 = vsel %vm9091_vm11, %v2144_v9, %v1801_v45  ;;  %vm9093_vm9 = vmmov %vm9092_vm13  ;;  %v2014_v28 = vsel %vm9102_vm0, %v1982_v54, %v9101_v17  ;;  %v9123_v27 = vld [vmem:[#allocation58_spill] sm:$0xff]  ;;  %v9125_v45 = vld [vmem:[#allocation51_spill] sm:$0xff] }
 0x20d   : > { %v1896_v8 = vpop.permute.xlu0 %1895  ;;  %v1894_v51 = vpop.permute.xlu1 %1893  ;;  %vm9099_vm14 = vmmov %vm9096_vm12  ;;  %vm9111_vm12 = vcmask 130048   ;;  %v9136_v9 = vld [vmem:[#allocation143_spill] sm:$0xff] }
 0x20e   : > { %v2211_v49 = vsel %vm9092_vm13, %v2178_v35, %v1896_v8  ;;  %v2210_v59 = vsel %vm9093_vm9, %v2177_v1, %v1894_v51  ;;  %v1983_v15 = vsel %vm9099_vm14, %v9098_v60, %v9097_v44  ;;  %vm9104_vm15 = vmmov %vm9102_vm0  ;;  %vm9107_vm13 = vcmask 97280   ;;  %v9138_v8 = vld [vmem:[#allocation35_spill] sm:$0xff] }
 0x20f   : > { %4609 = vmatprep.mubr.msk.f32.mxu0 %vm9100_vm10, %v2210_v59  ;;  %v2015_v29 = vsel %vm9104_vm15, %v1983_v15, %v9103_v24  ;;  %vm9105_vm11 = vmmov %vm9100_vm10  ;;  %v2047_v37 = vsel %vm9107_vm13, %v2014_v28, %v9106_v33  ;;  %vm9114_vm10 = vcmask 162816   ;;  %vm9116_vm15 = vcmask 195584  }
 0x210   : > { %4610 = vmatmul.mubr.msk.f32.gmra.mrb[6].mxu0 %vm9105_vm11, %v2211_v49  ;;  %vm9109_vm9 = vmmov %vm9107_vm13  ;;  %v2080_v23 = vsel %vm9111_vm12, %v2047_v37, %v9110_v4  ;;  %vm9118_vm13 = vcmask 228352   ;;  %v9140_v49 = vld [vmem:[#allocation154_spill] sm:$0xff]  ;;  %v9151_v37 = vld [vmem:[#allocation55_spill] sm:$0xff] }
 0x211   : > { %v2048_v18 = vsel %vm9109_vm9, %v2015_v29, %v9108_v32  ;;  %v1807_v16 = vpop.permute.xlu0 %1806  ;;  %v1805_v21 = vpop.permute.xlu1 %1804  ;;  %vm9113_vm14 = vmmov %vm9111_vm12  ;;  %v2113_v43 = vsel %vm9114_vm10, %v2080_v23, %v6112_v47  ;;  %vm9120_vm12 = vcmask 261120   ;;  %v9122_v47 = vld [vmem:[#allocation50_spill] sm:$0xff]  ;;  %v9152_v32 = vld [vmem:[#allocation63_spill] sm:$0xff] }
 0x212   : > { %v2081_v30 = vsel %vm9113_vm14, %v2048_v18, %v9112_v39  ;;  %vm9115_vm0 = vmmov %vm9114_vm10  ;;  %v2146_v31 = vsel %vm9116_vm15, %v2113_v43, %v6240_v12  ;;  %vm9124_vm10 = vcmask 31744   ;;  %v9154_v18 = vld [vmem:[#allocation56_spill] sm:$0xff]  ;;  %v9160_v4 = vld [vmem:[#allocation118_spill] sm:$0xff] }
 0x213   : > { %v2114_v7 = vsel %vm9115_vm0, %v2081_v30, %v6122_v0  ;;  %vm9117_vm11 = vmmov %vm9116_vm15  ;;  %v1984_v0 = vsel %vm9124_vm10, %v9123_v27, %v9122_v47  ;;  %vm9128_vm15 = vcmask 293888   ;;  %v9163_v39 = vld [vmem:[#allocation142_spill] sm:$0xff]  ;;  %v9165_v43 = vld [vmem:[#allocation145_spill] sm:$0xff] }
 0x214   : > { %v2147_v3 = vsel %vm9117_vm11, %v2114_v7, %v6250_v52  ;;  %vm9119_vm9 = vmmov %vm9118_vm13  ;;  %v9129_v52 = vld [vmem:[#allocation115_spill] sm:$0xff]  ;;  %vm9130_vm11 = vcmask 64512  }
 0x215   : > { %v2180_v61 = vsel %vm9118_vm13, %v2147_v3, %v1807_v16  ;;  %v2179_v25 = vsel %vm9119_vm9, %v2146_v31, %v1805_v21  ;;  %v1900_v22 = vpop.permute.xlu0 %1899  ;;  %v1898_v14 = vpop.permute.xlu1 %1897  ;;  %vm9121_vm14 = vmmov %vm9120_vm12  ;;  %v2016_v50 = vsel %vm9130_vm11, %v1984_v0, %v9129_v52  ;;  %v9155_v16 = vld [vmem:[#allocation67_spill] sm:$0xff] }
 0x216   : > { %v2213_v2 = vsel %vm9120_vm12, %v2180_v61, %v1900_v22  ;;  %v2212_v26 = vsel %vm9121_vm14, %v2179_v25, %v1898_v14  ;;  %vm9127_vm0 = vmmov %vm9124_vm10  ;;  %vm9135_vm12 = vcmask 97280   ;;  %vm9139_vm10 = vcmask 130048   ;;  %v9167_v61 = vld [vmem:[#allocation47_spill] sm:$0xff]  ;;  %v9169_v22 = vld [vmem:[#allocation156_spill] sm:$0xff] }
 0x217   : > { %v1985_v12 = vsel %vm9127_vm0, %v9126_v53, %v9125_v45  ;;  %4612 = vmatprep.mubr.msk.f32.mxu0 %vm9128_vm15, %v2212_v26  ;;  %vm9132_vm13 = vmmov %vm9130_vm11  ;;  %v2049_v41 = vsel %vm9135_vm12, %v2016_v50, %v9134_v57  ;;  %v9172_v26 = vld [vmem:[#allocation176_spill] sm:$0xff] }
 0x218   : > { %v2017_v34 = vsel %vm9132_vm13, %v1985_v12, %v9131_v19  ;;  %vm9133_vm9 = vmmov %vm9128_vm15  ;;  %v2082_v51 = vsel %vm9139_vm10, %v2049_v41, %v9138_v8  ;;  %vm9143_vm15 = vcmask 162816   ;;  %vm9145_vm13 = vcmask 195584   ;;  %v9183_v41 = vld [vmem:[#allocation61_spill] sm:$0xff]  ;;  %v9192_v8 = vld [vmem:[#allocation144_spill] sm:$0xff] }
 0x219   : > { %4613 = vmatmul.mubr.msk.f32.gmra.mrb[8].mxu0 %vm9133_vm9, %v2213_v2  ;;  %vm9137_vm14 = vmmov %vm9135_vm12  ;;  %v1811_v35 = vpop.permute.xlu0 %1810  ;;  %v1809_v1 = vpop.permute.xlu1 %1808  ;;  %v2115_v6 = vsel %vm9143_vm15, %v2082_v51, %v9142_v36  ;;  %vm9147_vm12 = vcmask 228352  }
 0x21a   : > { %v2050_v20 = vsel %vm9137_vm14, %v2017_v34, %v9136_v9  ;;  %vm9141_vm0 = vmmov %vm9139_vm10  ;;  %v2148_v44 = vsel %vm9145_vm13, %v2115_v6, %v6248_v48  ;;  %vm9149_vm10 = vcmask 261120   ;;  %v9181_v34 = vld [vmem:[#allocation68_spill] sm:$0xff] }
 0x21b   : > { %v2083_v59 = vsel %vm9141_vm0, %v2050_v20, %v9140_v49  ;;  %vm9144_vm11 = vmmov %vm9143_vm15  ;;  %vm9153_vm15 = vcmask 31744   ;;  %v9184_v9 = vld [vmem:[#allocation72_spill] sm:$0xff]  ;;  %v9194_v49 = vld [vmem:[#allocation147_spill] sm:$0xff] }
 0x21c   : > { %v2116_v54 = vsel %vm9144_vm11, %v2083_v59, %v6130_v62  ;;  %vm9146_vm9 = vmmov %vm9145_vm13  ;;  %v1986_v62 = vsel %vm9153_vm15, %v9152_v32, %v9151_v37  ;;  %vm9157_vm13 = vcmask 293888  }
 0x21d   : > { %v2149_v60 = vsel %vm9146_vm9, %v2116_v54, %v6258_v10  ;;  %vm9148_vm14 = vmmov %vm9147_vm12  ;;  %v1904_v28 = vpop.permute.xlu0 %1903  ;;  %v1902_v24 = vpop.permute.xlu1 %1901  ;;  %v9158_v10 = vld [vmem:[#allocation117_spill] sm:$0xff]  ;;  %vm9159_vm9 = vcmask 64512   ;;  %v9196_v54 = vld [vmem:[#allocation155_spill] sm:$0xff] }
 0x21e   : > { %v2182_v15 = vsel %vm9147_vm12, %v2149_v60, %v1811_v35  ;;  %v2181_v17 = vsel %vm9148_vm14, %v2148_v44, %v1809_v1  ;;  %vm9150_vm0 = vmmov %vm9149_vm10  ;;  %v2018_v21 = vsel %vm9159_vm9, %v1986_v62, %v9158_v10  ;;  %v9189_v35 = vld [vmem:[#allocation120_spill] sm:$0xff]  ;;  %v9198_v60 = vld [vmem:[#allocation158_spill] sm:$0xff] }
 0x21f   : > { %v2215_v29 = vsel %vm9149_vm10, %v2182_v15, %v1904_v28  ;;  %v2214_v33 = vsel %vm9150_vm0, %v2181_v17, %v1902_v24  ;;  %vm9156_vm11 = vmmov %vm9153_vm15  ;;  %vm9164_vm10 = vcmask 97280   ;;  %vm9168_vm15 = vcmask 130048   ;;  %v9200_v17 = vld [vmem:[#allocation175_spill] sm:$0xff]  ;;  %v9209_v10 = vld [vmem:[#allocation65_spill] sm:$0xff] }
 0x220   : > { %v1987_v48 = vsel %vm9156_vm11, %v9155_v16, %v9154_v18  ;;  %4615 = vmatprep.mubr.msk.f32.mxu0 %vm9157_vm13, %v2214_v33  ;;  %vm9161_vm12 = vmmov %vm9159_vm9  ;;  %v2051_v30 = vsel %vm9164_vm10, %v2018_v21, %v9163_v39  ;;  %v9210_v21 = vld [vmem:[#allocation73_spill] sm:$0xff] }
 0x221   : > { %v2019_v23 = vsel %vm9161_vm12, %v1987_v48, %v9160_v4  ;;  %vm9162_vm14 = vmmov %vm9157_vm13  ;;  %v1815_v31 = vpop.permute.xlu0 %1814  ;;  %v1813_v3 = vpop.permute.xlu1 %1812  ;;  %v2084_v25 = vsel %vm9168_vm15, %v2051_v30, %v9167_v61  ;;  %vm9171_vm13 = vcmask 162816   ;;  %vm9174_vm12 = vcmask 195584   ;;  %v9212_v4 = vld [vmem:[#allocation66_spill] sm:$0xff] }
 0x222   : > { %4616 = vmatmul.mubr.msk.f32.gmra.mrb[10].mxu0 %vm9162_vm14, %v2215_v29  ;;  %vm9166_vm0 = vmmov %vm9164_vm10  ;;  %v2117_v2 = vsel %vm9171_vm13, %v2084_v25, %v6128_v55  ;;  %vm9176_vm10 = vcmask 228352   ;;  %v9180_v55 = vld [vmem:[#allocation60_spill] sm:$0xff]  ;;  %v9218_v30 = vld [vmem:[#allocation122_spill] sm:$0xff] }
 0x223   : > { %v2052_v7 = vsel %vm9166_vm0, %v2019_v23, %v9165_v43  ;;  %vm9170_vm11 = vmmov %vm9168_vm15  ;;  %v2150_v27 = vsel %vm9174_vm12, %v2117_v2, %v6256_v5  ;;  %vm9178_vm15 = vcmask 261120   ;;  %v9213_v23 = vld [vmem:[#allocation77_spill] sm:$0xff] }
 0x224   : > { %v2085_v14 = vsel %vm9170_vm11, %v2052_v7, %v9169_v22  ;;  %vm9173_vm9 = vmmov %vm9171_vm13  ;;  %vm9182_vm13 = vcmask 31744   ;;  %v9221_v7 = vld [vmem:[#allocation146_spill] sm:$0xff] }
 0x225   : > { %v2118_v47 = vsel %vm9173_vm9, %v2085_v14, %v9172_v26  ;;  %vm9175_vm14 = vmmov %vm9174_vm12  ;;  %v1908_v12 = vpop.permute.xlu0 %1907  ;;  %v1906_v52 = vpop.permute.xlu1 %1905  ;;  %v1988_v57 = vsel %vm9182_vm13, %v9181_v34, %v9180_v55  ;;  %vm9186_vm12 = vcmask 293888   ;;  %v9225_v14 = vld [vmem:[#allocation157_spill] sm:$0xff]  ;;  %v9227_v26 = vld [vmem:[#allocation160_spill] sm:$0xff] }
 0x226   : > { %v2151_v0 = vsel %vm9175_vm14, %v2118_v47, %v6266_v40  ;;  %vm9177_vm0 = vmmov %vm9176_vm10  ;;  %v9187_v40 = vld [vmem:[#allocation119_spill] sm:$0xff]  ;;  %vm9188_vm14 = vcmask 64512  }
 0x227   : > { %v2184_v45 = vsel %vm9176_vm10, %v2151_v0, %v1815_v31  ;;  %v2183_v53 = vsel %vm9177_vm0, %v2150_v27, %v1813_v3  ;;  %vm9179_vm11 = vmmov %vm9178_vm15  ;;  %v2020_v20 = vsel %vm9188_vm14, %v1988_v57, %v9187_v40  ;;  %v9223_v3 = vld [vmem:[#allocation149_spill] sm:$0xff]  ;;  %v9230_v0 = vld [vmem:[#allocation178_spill] sm:$0xff] }
 0x228   : > { %v2217_v50 = vsel %vm9178_vm15, %v2184_v45, %v1908_v12  ;;  %v2216_v19 = vsel %vm9179_vm11, %v2183_v53, %v1906_v52  ;;  %vm9185_vm9 = vmmov %vm9182_vm13  ;;  %vm9193_vm15 = vcmask 97280   ;;  %vm9197_vm13 = vcmask 130048   ;;  %v9232_v53 = vld [vmem:[#allocation192_spill] sm:$0xff]  ;;  %v9242_v40 = vld [vmem:[#allocation71_spill] sm:$0xff] }
 0x229   : > { %v1989_v5 = vsel %vm9185_vm9, %v9184_v9, %v9183_v41  ;;  %4618 = vmatprep.mubr.msk.f32.mxu0 %vm9186_vm12, %v2216_v19  ;;  %vm9190_vm10 = vmmov %vm9188_vm14  ;;  %v2053_v51 = vsel %vm9193_vm15, %v2020_v20, %v9192_v8  ;;  %v1819_v36 = vpop.permute.xlu0 %1818  ;;  %v1817_v6 = vpop.permute.xlu1 %1816  ;;  %v9240_v9 = vld [vmem:[#allocation78_spill] sm:$0xff]  ;;  %v9248_v8 = vld [vmem:[#allocation124_spill] sm:$0xff] }
 0x22a   : > { %v2021_v1 = vsel %vm9190_vm10, %v1989_v5, %v9189_v35  ;;  %vm9191_vm0 = vmmov %vm9186_vm12  ;;  %v2086_v44 = vsel %vm9197_vm13, %v2053_v51, %v9196_v54  ;;  %vm9201_vm12 = vcmask 162816   ;;  %vm9203_vm10 = vcmask 195584   ;;  %v9243_v20 = vld [vmem:[#allocation82_spill] sm:$0xff] }
 0x22b   : > { %4619 = vmatmul.mubr.msk.f32.gmra.mrb[12].mxu0 %vm9191_vm0, %v2217_v50  ;;  %vm9195_vm11 = vmmov %vm9193_vm15  ;;  %v2119_v28 = vsel %vm9201_vm12, %v2086_v44, %v9200_v17  ;;  %vm9205_vm15 = vcmask 228352   ;;  %v9257_v17 = vld [vmem:[#allocation162_spill] sm:$0xff] }
 0x22c   : > { %v2054_v59 = vsel %vm9195_vm11, %v2021_v1, %v9194_v49  ;;  %vm9199_vm9 = vmmov %vm9197_vm13  ;;  %v2152_v29 = vsel %vm9203_vm10, %v2119_v28, %v6264_v56  ;;  %vm9207_vm13 = vcmask 261120   ;;  %v9251_v49 = vld [vmem:[#allocation148_spill] sm:$0xff] }
 0x22d   : > { %v2087_v15 = vsel %vm9199_vm9, %v2054_v59, %v9198_v60  ;;  %vm9202_vm14 = vmmov %vm9201_vm12  ;;  %v1912_v62 = vpop.permute.xlu0 %1911  ;;  %v1910_v18 = vpop.permute.xlu1 %1909  ;;  %vm9211_vm12 = vcmask 31744   ;;  %v9255_v60 = vld [vmem:[#allocation159_spill] sm:$0xff] }
 0x22e   : > { %v2120_v24 = vsel %vm9202_vm14, %v2087_v15, %v6146_v38  ;;  %vm9204_vm0 = vmmov %vm9203_vm10  ;;  %v1990_v38 = vsel %vm9211_vm12, %v9210_v21, %v9209_v10  ;;  %vm9215_vm10 = vcmask 293888  }
 0x22f   : > { %v2153_v33 = vsel %vm9204_vm0, %v2120_v24, %v6274_v46  ;;  %vm9206_vm11 = vmmov %vm9205_vm15  ;;  %v9216_v46 = vld [vmem:[#allocation121_spill] sm:$0xff]  ;;  %vm9217_vm0 = vcmask 64512  }
 0x230   : > { %v2186_v37 = vsel %vm9205_vm15, %v2153_v33, %v1819_v36  ;;  %v2185_v32 = vsel %vm9206_vm11, %v2152_v29, %v1817_v6  ;;  %vm9208_vm9 = vmmov %vm9207_vm13  ;;  %v2022_v39 = vsel %vm9217_vm0, %v1990_v38, %v9216_v46  ;;  %v9253_v36 = vld [vmem:[#allocation151_spill] sm:$0xff]  ;;  %v9259_v24 = vld [vmem:[#allocation177_spill] sm:$0xff] }
 0x231   : > { %v2219_v16 = vsel %vm9207_vm13, %v2186_v37, %v1912_v62  ;;  %v2218_v48 = vsel %vm9208_vm9, %v2185_v32, %v1910_v18  ;;  %vm9214_vm14 = vmmov %vm9211_vm12  ;;  %vm9222_vm13 = vcmask 97280   ;;  %v1823_v25 = vpop.permute.xlu0 %1822  ;;  %v1821_v22 = vpop.permute.xlu1 %1820  ;;  %vm9226_vm12 = vcmask 130048   ;;  %v9261_v33 = vld [vmem:[#allocation180_spill] sm:$0xff]  ;;  %v9263_v32 = vld [vmem:[#allocation193_spill] sm:$0xff] }
 0x232   : > { %v1991_v56 = vsel %vm9214_vm14, %v9213_v23, %v9212_v4  ;;  %4621 = vmatprep.mubr.msk.f32.mxu0 %vm9215_vm10, %v2218_v48  ;;  %vm9219_vm15 = vmmov %vm9217_vm0  ;;  %v2055_v31 = vsel %vm9222_vm13, %v2022_v39, %v9221_v7  ;;  %v9270_v23 = vld [vmem:[#allocation75_spill] sm:$0xff]  ;;  %v9273_v39 = vld [vmem:[#allocation76_spill] sm:$0xff] }
 0x233   : > { %v2023_v43 = vsel %vm9219_vm15, %v1991_v56, %v9218_v30  ;;  %vm9220_vm11 = vmmov %vm9215_vm10  ;;  %v2088_v2 = vsel %vm9226_vm12, %v2055_v31, %v9225_v14  ;;  %vm9229_vm10 = vcmask 162816   ;;  %vm9233_vm15 = vcmask 195584   ;;  %v9271_v56 = vld [vmem:[#allocation83_spill] sm:$0xff]  ;;  %v9279_v31 = vld [vmem:[#allocation126_spill] sm:$0xff] }
 0x234   : > { %4622 = vmatmul.mubr.msk.f32.gmra.mrb[14].mxu0 %vm9220_vm11, %v2219_v16  ;;  %vm9224_vm9 = vmmov %vm9222_vm13  ;;  %v2121_v27 = vsel %vm9229_vm10, %v2088_v2, %v6144_v63  ;;  %vm9235_vm13 = vcmask 228352   ;;  %v9239_v63 = vld [vmem:[#allocation70_spill] sm:$0xff]  ;;  %v9274_v30 = vld [vmem:[#allocation87_spill] sm:$0xff] }
 0x235   : > { %v2056_v61 = vsel %vm9224_vm9, %v2023_v43, %v9223_v3  ;;  %vm9228_vm14 = vmmov %vm9226_vm12  ;;  %v2154_v12 = vsel %vm9233_vm15, %v2121_v27, %v9232_v53  ;;  %v1916_v55 = vpop.permute.xlu0 %1915  ;;  %v1914_v34 = vpop.permute.xlu1 %1913  ;;  %vm9237_vm12 = vcmask 261120   ;;  %v9290_v53 = vld [vmem:[#allocation179_spill] sm:$0xff] }
 0x236   : > { %v2089_v47 = vsel %vm9228_vm14, %v2056_v61, %v9227_v26  ;;  %vm9231_vm0 = vmmov %vm9229_vm10  ;;  %vm9241_vm10 = vcmask 31744   ;;  %v9282_v61 = vld [vmem:[#allocation150_spill] sm:$0xff] }
 0x237   : > { %v2122_v45 = vsel %vm9231_vm0, %v2089_v47, %v9230_v0  ;;  %vm9234_vm11 = vmmov %vm9233_vm15  ;;  %v1992_v5 = vsel %vm9241_vm10, %v9240_v9, %v9239_v63  ;;  %vm9245_vm15 = vcmask 293888   ;;  %v9286_v47 = vld [vmem:[#allocation161_spill] sm:$0xff]  ;;  %v9288_v0 = vld [vmem:[#allocation164_spill] sm:$0xff] }
 0x238   : > { %v2155_v52 = vsel %vm9234_vm11, %v2122_v45, %v6282_v42  ;;  %vm9236_vm9 = vmmov %vm9235_vm13  ;;  %v9246_v42 = vld [vmem:[#allocation123_spill] sm:$0xff]  ;;  %vm9247_vm11 = vcmask 64512  }
 0x239   : > { %v2188_v50 = vsel %vm9235_vm13, %v2155_v52, %v1823_v25  ;;  %v2187_v19 = vsel %vm9236_vm9, %v2154_v12, %v1821_v22  ;;  %vm9238_vm14 = vmmov %vm9237_vm12  ;;  %v2024_v1 = vsel %vm9247_vm11, %v1992_v5, %v9246_v42  ;;  %v1827_v54 = vpop.permute.xlu0 %1826  ;;  %v1825_v44 = vpop.permute.xlu1 %1824  ;;  %v9284_v22 = vld [vmem:[#allocation153_spill] sm:$0xff]  ;;  %v9292_v52 = vld [vmem:[#allocation182_spill] sm:$0xff] }
 0x23a   : > { %v2221_v57 = vsel %vm9237_vm12, %v2188_v50, %v1916_v55  ;;  %v2220_v41 = vsel %vm9238_vm14, %v2187_v19, %v1914_v34  ;;  %vm9244_vm0 = vmmov %vm9241_vm10  ;;  %vm9252_vm12 = vcmask 97280   ;;  %vm9256_vm10 = vcmask 130048   ;;  %v9295_v55 = vld [vmem:[#allocation195_spill] sm:$0xff] }
 0x23b   : > { %v1993_v35 = vsel %vm9244_vm0, %v9243_v20, %v9242_v40  ;;  %4624 = vmatprep.mubr.msk.f32.mxu0 %vm9245_vm15, %v2220_v41  ;;  %vm9249_vm13 = vmmov %vm9247_vm11  ;;  %v2057_v59 = vsel %vm9252_vm12, %v2024_v1, %v9251_v49  ;;  %v9301_v20 = vld [vmem:[#allocation80_spill] sm:$0xff]  ;;  %v9304_v1 = vld [vmem:[#allocation81_spill] sm:$0xff] }
 0x23c   : > { %v2025_v51 = vsel %vm9249_vm13, %v1993_v35, %v9248_v8  ;;  %vm9250_vm9 = vmmov %vm9245_vm15  ;;  %v2090_v15 = vsel %vm9256_vm10, %v2057_v59, %v9255_v60  ;;  %vm9260_vm15 = vcmask 162816   ;;  %vm9264_vm13 = vcmask 195584   ;;  %v9302_v35 = vld [vmem:[#allocation88_spill] sm:$0xff] }
 0x23d   : > { %4625 = vmatmul.mubr.msk.f32.gmra.mrb[16].mxu0 %vm9250_vm9, %v2221_v57  ;;  %vm9254_vm14 = vmmov %vm9252_vm12  ;;  %v2123_v29 = vsel %vm9260_vm15, %v2090_v15, %v9259_v24  ;;  %vm9266_vm12 = vcmask 228352   ;;  %v1920_v10 = vpop.permute.xlu0 %1919  ;;  %v1918_v21 = vpop.permute.xlu1 %1917  ;;  %v9305_v8 = vld [vmem:[#allocation92_spill] sm:$0xff] }
 0x23e   : > { %v2058_v6 = vsel %vm9254_vm14, %v2025_v51, %v9253_v36  ;;  %vm9258_vm0 = vmmov %vm9256_vm10  ;;  %v2156_v62 = vsel %vm9264_vm13, %v2123_v29, %v9263_v32  ;;  %vm9268_vm10 = vcmask 261120   ;;  %v9308_v51 = vld [vmem:[#allocation127_spill] sm:$0xff]  ;;  %v9310_v59 = vld [vmem:[#allocation128_spill] sm:$0xff] }
 0x23f   : > { %v2091_v28 = vsel %vm9258_vm0, %v2058_v6, %v9257_v17  ;;  %vm9262_vm11 = vmmov %vm9260_vm15  ;;  %vm9272_vm15 = vcmask 31744   ;;  %v9313_v6 = vld [vmem:[#allocation152_spill] sm:$0xff]  ;;  %v9319_v29 = vld [vmem:[#allocation166_spill] sm:$0xff] }
 0x240   : > { %v2124_v37 = vsel %vm9262_vm11, %v2091_v28, %v9261_v33  ;;  %vm9265_vm9 = vmmov %vm9264_vm13  ;;  %v1994_v46 = vsel %vm9272_vm15, %v9271_v56, %v9270_v23  ;;  %vm9276_vm13 = vcmask 293888   ;;  %v9317_v28 = vld [vmem:[#allocation163_spill] sm:$0xff] }
 0x241   : > { %v2157_v18 = vsel %vm9265_vm9, %v2124_v37, %v6290_v13  ;;  %vm9267_vm14 = vmmov %vm9266_vm12  ;;  %v9277_v13 = vld [vmem:[#allocation125_spill] sm:$0xff]  ;;  %vm9278_vm9 = vcmask 64512   ;;  %v1831_v2 = vpop.permute.xlu0 %1830  ;;  %v1829_v26 = vpop.permute.xlu1 %1828 }
 0x242   : > { %v2190_v16 = vsel %vm9266_vm12, %v2157_v18, %v1827_v54  ;;  %v2189_v48 = vsel %vm9267_vm14, %v2156_v62, %v1825_v44  ;;  %vm9269_vm0 = vmmov %vm9268_vm10  ;;  %v2026_v7 = vsel %vm9278_vm9, %v1994_v46, %v9277_v13  ;;  %v9315_v44 = vld [vmem:[#allocation10_spill] sm:$0xff]  ;;  %v9321_v37 = vld [vmem:[#allocation181_spill] sm:$0xff] }
 0x243   : > { %v2223_v38 = vsel %vm9268_vm10, %v2190_v16, %v1920_v10  ;;  %v2222_v4 = vsel %vm9269_vm0, %v2189_v48, %v1918_v21  ;;  %vm9275_vm11 = vmmov %vm9272_vm15  ;;  %vm9283_vm10 = vcmask 97280   ;;  %vm9287_vm15 = vcmask 130048   ;;  %v9323_v62 = vld [vmem:[#allocation184_spill] sm:$0xff]  ;;  %v9325_v16 = vld [vmem:[#allocation194_spill] sm:$0xff] }
 0x244   : > { %v1995_v43 = vsel %vm9275_vm11, %v9274_v30, %v9273_v39  ;;  %4627 = vmatprep.mubr.msk.f32.mxu0 %vm9276_vm13, %v2222_v4  ;;  %vm9280_vm12 = vmmov %vm9278_vm9  ;;  %v2059_v25 = vsel %vm9283_vm10, %v2026_v7, %v9282_v61  ;;  %v9327_v10 = vld [vmem:[#allocation197_spill] sm:$0xff] }
 0x245   : > { %v2027_v3 = vsel %vm9280_vm12, %v1995_v43, %v9279_v31  ;;  %vm9281_vm14 = vmmov %vm9276_vm13  ;;  %v2092_v27 = vsel %vm9287_vm15, %v2059_v25, %v9286_v47  ;;  %vm9291_vm13 = vcmask 162816   ;;  %vm9294_vm12 = vcmask 195584   ;;  %v1924_v63 = vpop.permute.xlu0 %1923  ;;  %v1922_v9 = vpop.permute.xlu1 %1921  ;;  %v9333_v30 = vld [vmem:[#allocation85_spill] sm:$0xff] }
 0x246   : > { %4628 = vmatmul.mubr.msk.f32.gmra.mrb[18].mxu0 %vm9281_vm14, %v2223_v38  ;;  %vm9285_vm0 = vmmov %vm9283_vm10  ;;  %v2125_v12 = vsel %vm9291_vm13, %v2092_v27, %v9290_v53  ;;  %vm9297_vm10 = vcmask 228352   ;;  %v9334_v43 = vld [vmem:[#allocation93_spill] sm:$0xff]  ;;  %v9349_v53 = vld [vmem:[#allocation130_spill] sm:$0xff] }
 0x247   : > { %v2060_v14 = vsel %vm9285_vm0, %v2027_v3, %v9284_v22  ;;  %vm9289_vm11 = vmmov %vm9287_vm15  ;;  %v2158_v19 = vsel %vm9294_vm12, %v2125_v12, %v6288_v11  ;;  %vm9299_vm15 = vcmask 261120   ;;  %v9337_v7 = vld [vmem:[#allocation129_spill] sm:$0xff]  ;;  %v9340_v3 = vld [vmem:[#allocation11_spill] sm:$0xff] }
 0x248   : > { %v2093_v45 = vsel %vm9289_vm11, %v2060_v14, %v9288_v0  ;;  %vm9293_vm9 = vmmov %vm9291_vm13  ;;  %vm9303_vm13 = vcmask 31744   ;;  %v9342_v14 = vld [vmem:[#allocation165_spill] sm:$0xff]  ;;  %v9347_v0 = vld [vmem:[#allocation183_spill] sm:$0xff] }
 0x249   : > { %v2126_v50 = vsel %vm9293_vm9, %v2093_v45, %v9292_v52  ;;  %vm9296_vm14 = vmmov %vm9294_vm12  ;;  %v1996_v42 = vsel %vm9303_vm13, %v9302_v35, %v9301_v20  ;;  %vm9307_vm12 = vcmask 293888   ;;  %v1835_v15 = vpop.permute.xlu0 %1834  ;;  %v1833_v17 = vpop.permute.xlu1 %1832  ;;  %v9345_v47 = vld [vmem:[#allocation97_spill] sm:$0xff]  ;;  %v9351_v52 = vld [vmem:[#allocation196_spill] sm:$0xff] }
 0x24a   : > { %v2159_v34 = vsel %vm9296_vm14, %v2126_v50, %v9295_v55  ;;  %vm9298_vm0 = vmmov %vm9297_vm10  ;;  %vm9309_vm14 = vcmask 64512  }
 0x24b   : > { %v2192_v57 = vsel %vm9297_vm10, %v2159_v34, %v1831_v2  ;;  %v2191_v41 = vsel %vm9298_vm0, %v2158_v19, %v1829_v26  ;;  %vm9300_vm11 = vmmov %vm9299_vm15  ;;  %v2028_v49 = vsel %vm9309_vm14, %v1996_v42, %v9308_v51  ;;  %v9344_v26 = vld [vmem:[#allocation86_spill] sm:$0xff]  ;;  %v9353_v19 = vld [vmem:[#allocation13_spill] sm:$0xff] }
 0x24c   : > { %v2225_v5 = vsel %vm9299_vm15, %v2192_v57, %v1924_v63  ;;  %v2224_v40 = vsel %vm9300_vm11, %v2191_v41, %v1922_v9  ;;  %vm9306_vm9 = vmmov %vm9303_vm13  ;;  %vm9314_vm15 = vcmask 97280   ;;  %vm9318_vm13 = vcmask 130048   ;;  %v9356_v63 = vld [vmem:[#allocation168_spill] sm:$0xff]  ;;  %v9365_v51 = vld [vmem:[#allocation90_spill] sm:$0xff] }
 0x24d   : > { %v1997_v11 = vsel %vm9306_vm9, %v9305_v8, %v9304_v1  ;;  %4630 = vmatprep.mubr.msk.f32.mxu0 %vm9307_vm12, %v2224_v40  ;;  %vm9311_vm10 = vmmov %vm9309_vm14  ;;  %v2061_v54 = vsel %vm9314_vm15, %v2028_v49, %v9313_v6  ;;  %v1928_v23 = vpop.permute.xlu0 %1927  ;;  %v1926_v56 = vpop.permute.xlu1 %1925  ;;  %v9359_v40 = vld [vmem:[#allocation186_spill] sm:$0xff] }
 0x24e   : > { %v2029_v36 = vsel %vm9311_vm10, %v1997_v11, %v9310_v59  ;;  %vm9312_vm0 = vmmov %vm9307_vm12  ;;  %v2094_v24 = vsel %vm9318_vm13, %v2061_v54, %v9317_v28  ;;  %vm9322_vm12 = vcmask 162816   ;;  %vm9326_vm10 = vcmask 195584   ;;  %v9366_v49 = vld [vmem:[#allocation98_spill] sm:$0xff] }
 0x24f   : > { %4631 = vmatmul.mubr.msk.f32.gmra.mrb[20].mxu0 %vm9312_vm0, %v2225_v5  ;;  %vm9316_vm11 = vmmov %vm9314_vm15  ;;  %v2127_v32 = vsel %vm9322_vm12, %v2094_v24, %v9321_v37  ;;  %vm9329_vm15 = vcmask 228352   ;;  %v9371_v54 = vld [vmem:[#allocation14_spill] sm:$0xff]  ;;  %v9375_v24 = vld [vmem:[#allocation91_spill] sm:$0xff] }
 0x250   : > { %v2062_v60 = vsel %vm9316_vm11, %v2029_v36, %v9315_v44  ;;  %vm9320_vm9 = vmmov %vm9318_vm13  ;;  %v2160_v48 = vsel %vm9326_vm10, %v2127_v32, %v9325_v16  ;;  %vm9331_vm13 = vcmask 261120   ;;  %v9369_v36 = vld [vmem:[#allocation131_spill] sm:$0xff]  ;;  %v9378_v37 = vld [vmem:[#allocation185_spill] sm:$0xff] }
 0x251   : > { %v2095_v33 = vsel %vm9320_vm9, %v2062_v60, %v9319_v29  ;;  %vm9324_vm14 = vmmov %vm9322_vm12  ;;  %vm9335_vm12 = vcmask 31744   ;;  %v1837_v25 = vpop.permute.xlu0 %1836  ;;  %v1746_v22 = vpop.permute.xlu1 %1745  ;;  %v9376_v29 = vld [vmem:[#allocation102_spill] sm:$0xff] }
 0x252   : > { %v2128_v18 = vsel %vm9324_vm14, %v2095_v33, %v9323_v62  ;;  %vm9328_vm0 = vmmov %vm9326_vm10  ;;  %v1998_v13 = vsel %vm9335_vm12, %v9334_v43, %v9333_v30  ;;  %vm9336_vm14 = vcmask 293888   ;;  %vm9338_vm10 = vcmask 64512   ;;  %v9380_v62 = vld [vmem:[#allocation132_spill] sm:$0xff] }
 0x253   : > { %v2161_v21 = vsel %vm9328_vm0, %v2128_v18, %v9327_v10  ;;  %vm9330_vm11 = vmmov %vm9329_vm15  ;;  %v2030_v31 = vsel %vm9338_vm10, %v1998_v13, %v9337_v7 }
 0x254   : > { %v2194_v38 = vsel %vm9329_vm15, %v2161_v21, %v1835_v15  ;;  %v2193_v4 = vsel %vm9330_vm11, %v2160_v48, %v1833_v17  ;;  %vm9332_vm9 = vmmov %vm9331_vm13  ;;  %vm9341_vm15 = vcmask 97280   ;;  %vm9343_vm11 = vcmask 130048   ;;  %v9373_v17 = vld [vmem:[#allocation167_spill] sm:$0xff]  ;;  %v9383_v48 = vld [vmem:[#allocation16_spill] sm:$0xff] }
 0x255   : > { %v2227_v46 = vsel %vm9331_vm13, %v2194_v38, %v1928_v23  ;;  %v2226_v39 = vsel %vm9332_vm9, %v2193_v4, %v1926_v56  ;;  %vm9339_vm0 = vmmov %vm9336_vm14  ;;  %v2063_v61 = vsel %vm9341_vm15, %v2030_v31, %v9340_v3  ;;  %vm9348_vm9 = vcmask 162816   ;;  %v1930_v57 = vpop.permute.xlu0 %1929  ;;  %v1839_v41 = vpop.permute.xlu1 %1838  ;;  %v9386_v23 = vld [vmem:[#allocation170_spill] sm:$0xff] }
 0x256   : > { %4633 = vmatprep.mubr.msk.f32.mxu0 %vm9336_vm14, %v2226_v39  ;;  %v2096_v2 = vsel %vm9343_vm11, %v2063_v61, %v9342_v14  ;;  %vm9346_vm13 = vmmov %vm9335_vm12  ;;  %vm9352_vm14 = vcmask 195584   ;;  %v9389_v39 = vld [vmem:[#allocation188_spill] sm:$0xff]  ;;  %v9395_v61 = vld [vmem:[#allocation95_spill] sm:$0xff] }
 0x257   : > { %4634 = vmatmul.mubr.msk.f32.gmra.mrb[22].mxu0 %vm9339_vm0, %v2227_v46  ;;  %v1999_v27 = vsel %vm9346_vm13, %v9345_v47, %v9344_v26  ;;  %v2129_v45 = vsel %vm9348_vm9, %v2096_v2, %v9347_v0  ;;  %vm9350_vm12 = vmmov %vm9338_vm10  ;;  %vm9355_vm0 = vcmask 228352   ;;  %v9399_v14 = vld [vmem:[#allocation133_spill] sm:$0xff] }
 0x258   : > { %v2031_v12 = vsel %vm9350_vm12, %v1999_v27, %v9349_v53  ;;  %v2162_v50 = vsel %vm9352_vm14, %v2129_v45, %v9351_v52  ;;  %vm9354_vm10 = vmmov %vm9341_vm15  ;;  %v9401_v26 = vld [vmem:[#allocation17_spill] sm:$0xff]  ;;  %v9406_v52 = vld [vmem:[#allocation108_spill] sm:$0xff] }
 0x259   : > { %v2064_v55 = vsel %vm9354_vm10, %v2031_v12, %v9353_v19  ;;  %v2195_v34 = vsel %vm9355_vm0, %v2162_v50, %v1837_v25  ;;  %vm9357_vm15 = vmmov %vm9343_vm11  ;;  %vm9358_vm11 = vcmask 261120   ;;  %v1748_v1 = vpop.permute.xlu0 %1747  ;;  %v1932_v8 = vpop.permute.xlu1 %1931  ;;  %v9396_v25 = vld [vmem:[#allocation103_spill] sm:$0xff]  ;;  %v9403_v45 = vld [vmem:[#allocation169_spill] sm:$0xff] }
 0x25a   : > { %v2097_v9 = vsel %vm9357_vm15, %v2064_v55, %v9356_v63  ;;  %v2228_v5 = vsel %vm9358_vm11, %v2195_v34, %v1930_v57  ;;  %vm9360_vm13 = vmmov %vm9348_vm9  ;;  %vm9361_vm9 = vcmask 293888   ;;  %v9405_v12 = vld [vmem:[#allocation96_spill] sm:$0xff]  ;;  %v9408_v19 = vld [vmem:[#allocation187_spill] sm:$0xff] }
 0x25b   : > { %v2130_v20 = vsel %vm9360_vm13, %v2097_v9, %v9359_v40  ;;  %4636 = vmatprep.mubr.msk.f32.mxu0 %vm9361_vm9, %v2228_v5  ;;  %vm9362_vm12 = vmmov %vm9352_vm14  ;;  %vm9372_vm13 = vcmask 97280   ;;  %v9410_v34 = vld [vmem:[#allocation134_spill] sm:$0xff]  ;;  %v9413_v63 = vld [vmem:[#allocation19_spill] sm:$0xff] }
 0x25c   : > { %v2163_v35 = vsel %vm9362_vm12, %v2130_v20, %v1746_v22  ;;  %vm9363_vm14 = vmmov %vm9355_vm0  ;;  %vm9367_vm0 = vcmask 31744  }
 0x25d   : > { %v2196_v42 = vsel %vm9363_vm14, %v2163_v35, %v1839_v41  ;;  %vm9364_vm10 = vmmov %vm9358_vm11  ;;  %v2000_v59 = vsel %vm9367_vm0, %v9366_v49, %v9365_v51  ;;  %vm9370_vm11 = vcmask 64512   ;;  %v1841_v60 = vpop.permute.xlu0 %1840  ;;  %v1750_v15 = vpop.permute.xlu1 %1749  ;;  %vm9379_vm14 = vcmask 162816   ;;  %v9416_v35 = vld [vmem:[#allocation172_spill] sm:$0xff]  ;;  %v9423_v49 = vld [vmem:[#allocation109_spill] sm:$0xff] }
 0x25e   : > { %v2229_v11 = vsel %vm9364_vm10, %v2196_v42, %v1932_v8  ;;  %vm9368_vm15 = vmmov %vm9361_vm9  ;;  %v2032_v6 = vsel %vm9370_vm11, %v2000_v59, %v9369_v36  ;;  %vm9374_vm9 = vcmask 130048   ;;  %v9419_v8 = vld [vmem:[#allocation190_spill] sm:$0xff]  ;;  %v9422_v51 = vld [vmem:[#allocation100_spill] sm:$0xff] }
 0x25f   : > { %4637 = vmatmul.mubr.msk.f32.gmra.mrb[24].mxu0 %vm9368_vm15, %v2229_v11  ;;  %v2065_v44 = vsel %vm9372_vm13, %v2032_v6, %v9371_v54  ;;  %vm9377_vm12 = vmmov %vm9367_vm0  ;;  %vm9382_vm0 = vcmask 195584   ;;  %v9425_v36 = vld [vmem:[#allocation101_spill] sm:$0xff]  ;;  %v9426_v6 = vld [vmem:[#allocation110_spill] sm:$0xff] }
 0x260   : > { %v2098_v28 = vsel %vm9374_vm9, %v2065_v44, %v9373_v17  ;;  %v2001_v33 = vsel %vm9377_vm12, %v9376_v29, %v9375_v24  ;;  %vm9381_vm10 = vmmov %vm9370_vm11  ;;  %vm9385_vm11 = vcmask 228352   ;;  %v9431_v17 = vld [vmem:[#allocation136_spill] sm:$0xff] }
 0x261   : > { %v2131_v32 = vsel %vm9379_vm14, %v2098_v28, %v9378_v37  ;;  %v2033_v18 = vsel %vm9381_vm10, %v2001_v33, %v9380_v62  ;;  %vm9384_vm15 = vmmov %vm9372_vm13  ;;  %v1934_v38 = vpop.permute.xlu0 %1933  ;;  %v1843_v4 = vpop.permute.xlu1 %1842  ;;  %v9435_v37 = vld [vmem:[#allocation20_spill] sm:$0xff]  ;;  %v9437_v62 = vld [vmem:[#allocation23_spill] sm:$0xff] }
 0x262   : > { %v2164_v16 = vsel %vm9382_vm0, %v2131_v32, %v1748_v1  ;;  %v2066_v10 = vsel %vm9384_vm15, %v2033_v18, %v9383_v48  ;;  %vm9387_vm13 = vmmov %vm9374_vm9  ;;  %vm9388_vm9 = vcmask 261120   ;;  %v9440_v48 = vld [vmem:[#allocation171_spill] sm:$0xff] }
 0x263   : > { %v2197_v21 = vsel %vm9385_vm11, %v2164_v16, %v1841_v60  ;;  %v2099_v56 = vsel %vm9387_vm13, %v2066_v10, %v9386_v23  ;;  %vm9390_vm12 = vmmov %vm9379_vm14  ;;  %vm9391_vm14 = vcmask 293888   ;;  %v9429_v60 = vld [vmem:[#allocation135_spill] sm:$0xff] }
 0x264   : > { %v2230_v46 = vsel %vm9388_vm9, %v2197_v21, %v1934_v38  ;;  %v2132_v30 = vsel %vm9390_vm12, %v2099_v56, %v9389_v39  ;;  %vm9392_vm10 = vmmov %vm9382_vm0  ;;  %vm9402_vm12 = vcmask 97280   ;;  %v9442_v21 = vld [vmem:[#allocation173_spill] sm:$0xff]  ;;  %v9447_v56 = vld [vmem:[#allocation191_spill] sm:$0xff] }
 0x265   : > { %4639 = vmatprep.mubr.msk.f32.mxu0 %vm9391_vm14, %v2230_v46  ;;  %v2165_v43 = vsel %vm9392_vm10, %v2132_v30, %v1750_v15  ;;  %vm9393_vm0 = vmmov %vm9385_vm11  ;;  %v1752_v7 = vpop.permute.xlu0 %1751  ;;  %v1936_v31 = vpop.permute.xlu1 %1935  ;;  %vm9397_vm11 = vcmask 31744  }
 0x266   : > { %v2198_v13 = vsel %vm9393_vm0, %v2165_v43, %v1843_v4  ;;  %vm9394_vm15 = vmmov %vm9388_vm9  ;;  %v2002_v22 = vsel %vm9397_vm11, %v9396_v25, %v9395_v61  ;;  %vm9400_vm9 = vcmask 64512   ;;  %vm9409_vm0 = vcmask 162816   ;;  %v9445_v4 = vld [vmem:[#allocation189_spill] sm:$0xff]  ;;  %v6850_v25 = vld [vmem:[%s8478_s2] ss:$0 sm:$0xff] }
 0x267   : > { %v2231_v3 = vsel %vm9394_vm15, %v2198_v13, %v1936_v31  ;;  %vm9398_vm13 = vmmov %vm9391_vm14  ;;  %v2034_v2 = vsel %vm9400_vm9, %v2002_v22, %v9399_v14  ;;  %vm9404_vm14 = vcmask 130048  }
 0x268   : > { %4640 = vmatmul.mubr.msk.f32.gmra.mrb[26].mxu0 %vm9398_vm13, %v2231_v3  ;;  %v2067_v47 = vsel %vm9402_vm12, %v2034_v2, %v9401_v26  ;;  %vm9407_vm10 = vmmov %vm9397_vm11  ;;  %vm9412_vm11 = vcmask 195584  }
 0x269   : > { %v1845_v27 = vpop.permute.xlu0 %1844  ;;  %v1754_v0 = vpop.permute.xlu1 %1753  ;;  %v2100_v53 = vsel %vm9404_vm14, %v2067_v47, %v9403_v45  ;;  %v2003_v50 = vsel %vm9407_vm10, %v9406_v52, %v9405_v12  ;;  %vm9411_vm15 = vmmov %vm9400_vm9  ;;  %vm9415_vm9 = vcmask 228352  }
 0x26a   : > { %v2133_v55 = vsel %vm9409_vm0, %v2100_v53, %v9408_v19  ;;  %v2035_v57 = vsel %vm9411_vm15, %v2003_v50, %v9410_v34  ;;  %vm9414_vm13 = vmmov %vm9402_vm12  ;;  %vm9424_vm15 = vcmask 31744  }
 0x26b   : > { %v2166_v41 = vsel %vm9412_vm11, %v2133_v55, %v1752_v7  ;;  %v2068_v9 = vsel %vm9414_vm13, %v2035_v57, %v9413_v63  ;;  %vm9417_vm12 = vmmov %vm9404_vm14  ;;  %vm9418_vm14 = vcmask 261120   ;;  %v2004_v59 = vsel %vm9424_vm15, %v9423_v49, %v9422_v51 }
 0x26c   : > { %v2199_v5 = vsel %vm9415_vm9, %v2166_v41, %v1845_v27  ;;  %v2101_v42 = vsel %vm9417_vm12, %v2068_v9, %v9416_v35  ;;  %vm9420_vm10 = vmmov %vm9409_vm0  ;;  %vm9421_vm0 = vcmask 293888   ;;  %vm9428_vm13 = vcmask 195584  }
 0x26d   : > { %v1938_v40 = vpop.permute.xlu0 %1937  ;;  %v1847_v20 = vpop.permute.xlu1 %1846  ;;  %v2134_v11 = vsel %vm9420_vm10, %v2101_v42, %v9419_v8  ;;  %vm9427_vm11 = vmmov %vm9424_vm15  ;;  %vm9430_vm9 = vcmask 64512   ;;  %vm9436_vm10 = vcmask 97280   ;;  %vm9439_vm15 = vcmask 261120  }
 0x26e   : > { %v2232_v1 = vsel %vm9418_vm14, %v2199_v5, %v1938_v40  ;;  %v2005_v54 = vsel %vm9427_vm11, %v9426_v6, %v9425_v36  ;;  %v2167_v44 = vsel %vm9428_vm13, %v2134_v11, %v1754_v0  ;;  %v2036_v15 = vsel %vm9430_vm9, %v2004_v59, %v9429_v60  ;;  %vm9432_vm12 = vmmov %vm9430_vm9 }
 0x26f   : > { %4642 = vmatprep.mubr.msk.f32.mxu0 %vm9421_vm0, %v2232_v1  ;;  %v2037_v28 = vsel %vm9432_vm12, %v2005_v54, %v9431_v17  ;;  %vm9433_vm14 = vcmask 228352   ;;  %v2069_v32 = vsel %vm9436_vm10, %v2036_v15, %v9435_v37  ;;  %vm9438_vm0 = vmmov %vm9436_vm10  ;;  %vm9441_vm11 = vcmask 130048  }
 0x270   : > { %v2200_v24 = vsel %vm9433_vm14, %v2167_v44, %v1847_v20  ;;  %v2070_v18 = vsel %vm9438_vm0, %v2037_v28, %v9437_v62  ;;  %v2102_v10 = vsel %vm9441_vm11, %v2069_v32, %v9440_v48  ;;  %vm9443_vm13 = vmmov %vm9441_vm11  ;;  %vm9444_vm9 = vcmask 293888  }
 0x271   : > { %v6813_v29 = vpop.permute.xlu0 %1755  ;;  %v1940_v33 = vpop.permute.xlu1 %1939  ;;  %v2103_v38 = vsel %vm9443_vm13, %v2070_v18, %v9442_v21  ;;  %vm9446_vm12 = vcmask 162816   ;;  %vm9451_vm10 = vcmask 195584   ;;  %vm9455_vm13 = vcmask 261120  }
 0x272   : > { %9434 = vst [vmem:[#allocation25_spill] sm:$0xff] %v6813_v29  ;;  %v2233_v16 = vsel %vm9439_vm15, %v2200_v24, %v1940_v33  ;;  %v2135_v23 = vsel %vm9446_vm12, %v2102_v10, %v9445_v4  ;;  %vm9448_vm14 = vmmov %vm9446_vm12  ;;  %vm9453_vm15 = vcmask 228352   ;;  %vm9457_vm12 = vcmask 293888  }
 0x273   : > { %4643 = vmatmul.mubr.msk.f32.gmra.mrb[28].mxu0 %vm9444_vm9, %v2233_v16  ;;  %v2136_v46 = vsel %vm9448_vm14, %v2103_v38, %v9447_v56  ;;  %v2168_v43 = vsel %vm9451_vm10, %v2135_v23, %v6813_v29  ;;  %vm9452_vm0 = vmmov %vm9451_vm10  ;;  %vm9470_vm10 = vcmask 1046528  }
 0x274   : > { %v2169_v13 = vsel %vm9452_vm0, %v2136_v46, %v6813_v29  ;;  %vm9454_vm11 = vmmov %vm9453_vm15 }
 0x275   : > { %v6829_v39 = vpop.permute.xlu1 %1848  ;;  %v6831_v30 = vpop.permute.xlu0 %1941  ;;  %vm9456_vm9 = vmmov %vm9455_vm13 }
 0x276   : > { %9449 = vst [vmem:[#allocation105_spill] sm:$0xff] %v6829_v39  ;;  %9450 = vst [vmem:[#allocation31_spill] sm:$0xff] %v6831_v30  ;;  %v2201_v7 = vsel %vm9453_vm15, %v2168_v43, %v6829_v39  ;;  %v2202_v31 = vsel %vm9454_vm11, %v2169_v13, %v6829_v39  ;;  %v9503_v39 = vld [vmem:[#allocation15_spill] sm:$0xff] }
 0x277   : > { %v2234_v3 = vsel %vm9455_vm13, %v2201_v7, %v6831_v30  ;;  %v2235_v61 = vsel %vm9456_vm9, %v2202_v31, %v6831_v30  ;;  %vm9458_vm14 = vmmov %vm9457_vm12 }
 0x278   : > { %4645 = vmatprep.mubr.msk.f32.mxu0 %vm9457_vm12, %v2234_v3  ;;  %vm9473_vm0 = vmmov %vm9470_vm10 }
 0x279   : > { %4646 = vmatmul.mubr.msk.f32.gmra.mrb[30].mxu0 %vm9458_vm14, %v2235_v61  ;;  %vm9474_vm15 = vmmov %vm9473_vm0 }
 0x27a   : > { %vm9478_vm11 = vmmov %vm9473_vm0 }
 0x27b   : > { %vm9482_vm13 = vmmov %vm9473_vm0 }
 0x27c   : > { %vm9483_vm9 = vmmov %vm9473_vm0 }
 0x27d   : > { %vm9486_vm12 = vmmov %vm9473_vm0 }
 0x27e   : > { %vm9489_vm14 = vmmov %vm9473_vm0 }
 0x2cc   : > { %v4602_v22 = vpop.f32.mrb[0].mxu0 }
 0x2cd   : > { %v2421_v14 = vadd.f32 %v4602_v22, %v6850_v25  ;;  %v2415_v2 = vpop.f32.mrb[1].mxu0 }
 0x2ce   : > { %v2416_v26 = vadd.f32 %v6850_v25, %v2415_v2 }
 0x2cf   : > { %v6854_v47 = vmax.f32 %v2421_v14, 0.0 }
 0x2d0   : > { %v6856_v27 = vmax.f32 %v2416_v26, 0.0 }
 0x2d1   : > { %2896 = vrot.lane.b32.xlu0 %v6854_v47, %s4809_s20 }
 0x2d2   : > { %2894 = vrot.lane.b32.xlu1 %v6856_v27, %s4809_s20 }
 0x2d4   : > { %v4605_v0 = vpop.f32.mrb[2].mxu0 }
 0x2d5   : > { %v2431_v45 = vadd.f32 %v4605_v0, %v6850_v25  ;;  %v2425_v53 = vpop.f32.mrb[3].mxu0 }
 0x2d6   : > { %v2426_v12 = vadd.f32 %v6850_v25, %v2425_v53 }
 0x2d7   : > { %v6864_v52 = vmax.f32 %v2431_v45, 0.0 }
 0x2d8   : > { %v6866_v50 = vmax.f32 %v2426_v12, 0.0 }
 0x2d9   : > { %2900 = vrot.lane.b32.xlu0 %v6864_v52, %s4809_s20 }
 0x2da   : > { %2898 = vrot.lane.b32.xlu1 %v6866_v50, %s4809_s20 }
 0x2db   : > { %v4608_v19 = vpop.f32.mrb[4].mxu0 }
 0x2dc   : > { %v2441_v55 = vadd.f32 %v4608_v19, %v6850_v25  ;;  %v2435_v34 = vpop.f32.mrb[5].mxu0 }
 0x2dd   : > { %v2436_v57 = vadd.f32 %v6850_v25, %v2435_v34 }
 0x2de   : > { %v6874_v41 = vmax.f32 %v2441_v55, 0.0 }
 0x2df   : > { %v6876_v63 = vmax.f32 %v2436_v57, 0.0 }
 0x2e0   : > { %2904 = vrot.lane.b32.xlu0 %v6874_v41, %s4809_s20 }
 0x2e1   : > { %2902 = vrot.lane.b32.xlu1 %v6876_v63, %s4809_s20 }
 0x2e3   : > { %v4611_v9 = vpop.f32.mrb[6].mxu0 }
 0x2e4   : > { %v2451_v5 = vadd.f32 %v4611_v9, %v6850_v25  ;;  %v2445_v40 = vpop.f32.mrb[7].mxu0 }
 0x2e5   : > { %v2446_v20 = vadd.f32 %v6850_v25, %v2445_v40 }
 0x2e6   : > { %v6884_v35 = vmax.f32 %v2451_v5, 0.0 }
 0x2e7   : > { %v6886_v42 = vmax.f32 %v2446_v20, 0.0 }
 0x2e8   : > { %2908 = vrot.lane.b32.xlu0 %v6884_v35, %s4809_s20 }
 0x2e9   : > { %2906 = vrot.lane.b32.xlu1 %v6886_v42, %s4809_s20 }
 0x2ec   : > { %v4614_v1 = vpop.f32.mrb[8].mxu0 }
 0x2ed   : > { %v2461_v8 = vadd.f32 %v4614_v1, %v6850_v25  ;;  %v2455_v11 = vpop.f32.mrb[9].mxu0 }
 0x2ee   : > { %v2456_v51 = vadd.f32 %v6850_v25, %v2455_v11 }
 0x2ef   : > { %v6894_v49 = vmax.f32 %v2461_v8, 0.0 }
 0x2f0   : > { %v6896_v59 = vmax.f32 %v2456_v51, 0.0 }
 0x2f1   : > { %2912 = vrot.lane.b32.xlu0 %v6894_v49, %s4809_s20 }
 0x2f2   : > { %2910 = vrot.lane.b32.xlu1 %v6896_v59, %s4809_s20 }
 0x2f5   : > { %v4617_v36 = vpop.f32.mrb[10].mxu0 }
 0x2f6   : > { %v2471_v6 = vadd.f32 %v4617_v36, %v6850_v25  ;;  %v2465_v54 = vpop.f32.mrb[11].mxu0 }
 0x2f7   : > { %v2466_v44 = vadd.f32 %v6850_v25, %v2465_v54 }
 0x2f8   : > { %v6904_v60 = vmax.f32 %v2471_v6, 0.0 }
 0x2f9   : > { %v6906_v15 = vmax.f32 %v2466_v44, 0.0 }
 0x2fa   : > { %2916 = vrot.lane.b32.xlu0 %v6904_v60, %s4809_s20 }
 0x2fb   : > { %2914 = vrot.lane.b32.xlu1 %v6906_v15, %s4809_s20 }
 0x2fe   : > { %v4620_v17 = vpop.f32.mrb[12].mxu0 }
 0x2ff   : > { %v2481_v28 = vadd.f32 %v4620_v17, %v6850_v25  ;;  %v2475_v24 = vpop.f32.mrb[13].mxu0 }
 0x300   : > { %v2476_v33 = vadd.f32 %v6850_v25, %v2475_v24 }
 0x301   : > { %v6914_v37 = vmax.f32 %v2481_v28, 0.0 }
 0x302   : > { %v6916_v32 = vmax.f32 %v2476_v33, 0.0 }
 0x303   : > { %2920 = vrot.lane.b32.xlu0 %v6914_v37, %s4809_s20 }
 0x304   : > { %2918 = vrot.lane.b32.xlu1 %v6916_v32, %s4809_s20 }
 0x307   : > { %v4623_v62 = vpop.f32.mrb[14].mxu0 }
 0x308   : > { %v2491_v18 = vadd.f32 %v4623_v62, %v6850_v25  ;;  %v2485_v16 = vpop.f32.mrb[15].mxu0  ;;  %v2769_v62 = vrot.slane %v6866_v50, 1 }
 0x309   : > { %v2486_v48 = vadd.f32 %v6850_v25, %v2485_v16 }
 0x30a   : > { %v6924_v10 = vmax.f32 %v2491_v18, 0.0 }
 0x30b   : > { %v6926_v21 = vmax.f32 %v2486_v48, 0.0  ;;  %v2767_v48 = vrot.slane %v6854_v47, 1 }
 0x30c   : > { %2924 = vrot.lane.b32.xlu0 %v6924_v10, %s4809_s20 }
 0x30d   : > { %2922 = vrot.lane.b32.xlu1 %v6926_v21, %s4809_s20 }
 0x310   : > { %v4626_v38 = vpop.f32.mrb[16].mxu0 }
 0x311   : > { %v2501_v4 = vadd.f32 %v4626_v38, %v6850_v25  ;;  %v2495_v23 = vpop.f32.mrb[17].mxu0 }
 0x312   : > { %v2496_v56 = vadd.f32 %v6850_v25, %v2495_v23  ;;  %v2766_v23 = vrot.slane %v6856_v27, 1 }
 0x313   : > { %v6934_v46 = vmax.f32 %v2501_v4, 0.0  ;;  %v2770_v4 = vsel %vm9470_vm10, %v2767_v48, %v2769_v62  ;;  %vm9492_vm10 = vmmov %vm9473_vm0 }
 0x314   : > { %v6936_v43 = vmax.f32 %v2496_v56, 0.0  ;;  %v2773_v56 = vrot.slane %v6876_v63, 1 }
 0x315   : > { %2928 = vrot.lane.b32.xlu0 %v6934_v46, %s4809_s20 }
 0x316   : > { %2926 = vrot.lane.b32.xlu1 %v6936_v43, %s4809_s20 }
 0x319   : > { %v4629_v13 = vpop.f32.mrb[18].mxu0 }
 0x31a   : > { %v2511_v7 = vadd.f32 %v4629_v13, %v6850_v25  ;;  %v2505_v31 = vpop.f32.mrb[19].mxu0 }
 0x31b   : > { %v2506_v3 = vadd.f32 %v6850_v25, %v2505_v31 }
 0x31c   : > { %v6944_v61 = vmax.f32 %v2511_v7, 0.0 }
 0x31d   : > { %v6946_v22 = vmax.f32 %v2506_v3, 0.0  ;;  %v2771_v3 = vrot.slane %v6864_v52, 1 }
 0x31e   : > { %9459 = vst [vmem:[#allocation42_spill] sm:$0xff] %v6944_v61  ;;  %2932 = vrot.lane.b32.xlu0 %v6944_v61, %s4809_s20 }
 0x31f   : > { %2930 = vrot.lane.b32.xlu1 %v6946_v22, %s4809_s20 }
 0x322   : > { %v4632_v14 = vpop.f32.mrb[20].mxu0 }
 0x323   : > { %v2521_v2 = vadd.f32 %v4632_v14, %v6850_v25  ;;  %v2515_v26 = vpop.f32.mrb[21].mxu0 }
 0x324   : > { %v2516_v0 = vadd.f32 %v6850_v25, %v2515_v26  ;;  %v7012_v26 = vsel %vm5029_vm1, %v2770_v4, 0.0  ;;  %vm9477_vm1 = vmmov %vm9473_vm0  ;;  %v2783_v4 = vrot.slane %v6894_v49, 1 }
 0x325   : > { %v6954_v45 = vmax.f32 %v2521_v2, 0.0 }
 0x326   : > { %v6956_v53 = vmax.f32 %v2516_v0, 0.0 }
 0x327   : > { %9460 = vst [vmem:[#allocation32_spill] sm:$0xff] %v6954_v45  ;;  %2936 = vrot.lane.b32.xlu0 %v6954_v45, %s4809_s20  ;;  %v2807_v30 = vrot.slane %v6954_v45, 1  ;;  %v2653_v45 = vrot.slane %v6896_v59, 7 }
 0x328   : > { %9461 = vst [vmem:[#allocation38_spill] sm:$0xff] %v6956_v53  ;;  %2934 = vrot.lane.b32.xlu1 %v6956_v53, %s4809_s20 }
 0x32a   : > { %v4635_v12 = vpop.f32.mrb[22].mxu0 }
 0x32b   : > { %v2531_v19 = vadd.f32 %v4635_v12, %v6850_v25  ;;  %v2525_v55 = vpop.f32.mrb[23].mxu0  ;;  %v7019_v12 = vsel %vm9473_vm0, %v2766_v23, %v2767_v48  ;;  %v2785_v48 = vrot.slane %v6906_v15, 1 }
 0x32c   : > { %v2526_v34 = vadd.f32 %v6850_v25, %v2525_v55  ;;  %v2777_v55 = vrot.slane %v6886_v42, 1 }
 0x32d   : > { %v6964_v57 = vmax.f32 %v2531_v19, 0.0  ;;  %v2774_v19 = vsel %vm9474_vm15, %v2771_v3, %v2773_v56  ;;  %vm9497_vm15 = vmmov %vm9473_vm0 }
 0x32e   : > { %v6966_v9 = vmax.f32 %v2526_v34, 0.0 }
 0x32f   : > { %9462 = vst [vmem:[#allocation106_spill] sm:$0xff] %v6964_v57  ;;  %2940 = vrot.lane.b32.xlu0 %v6964_v57, %s4809_s20  ;;  %v2811_v29 = vrot.slane %v6964_v57, 1  ;;  %v2649_v57 = vrot.slane %v6886_v42, 7 }
 0x330   : > { %9463 = vst [vmem:[#allocation36_spill] sm:$0xff] %v6966_v9  ;;  %2938 = vrot.lane.b32.xlu1 %v6966_v9, %s4809_s20 }
 0x332   : > { %v4638_v5 = vpop.f32.mrb[24].mxu0 }
 0x333   : > { %v2541_v40 = vadd.f32 %v4638_v5, %v6850_v25  ;;  %v2535_v20 = vpop.f32.mrb[25].mxu0 }
 0x334   : > { %v2536_v1 = vadd.f32 %v6850_v25, %v2535_v20  ;;  %v7031_v20 = vsel %vm5048_vm2, %v2774_v19, 0.0  ;;  %vm9479_vm2 = vmmov %vm9473_vm0 }
 0x335   : > { %v6974_v8 = vmax.f32 %v2541_v40, 0.0  ;;  %v2791_v40 = vrot.slane %v6914_v37, 1 }
 0x336   : > { %v6976_v11 = vmax.f32 %v2536_v1, 0.0 }
 0x337   : > { %9464 = vst [vmem:[#allocation37_spill] sm:$0xff] %v6974_v8  ;;  %2944 = vrot.lane.b32.xlu0 %v6974_v8, %s4809_s20 }
 0x338   : > { %9465 = vst [vmem:[#allocation26_spill] sm:$0xff] %v6976_v11  ;;  %2942 = vrot.lane.b32.xlu1 %v6976_v11, %s4809_s20 }
 0x33b   : > { %v4641_v51 = vpop.f32.mrb[26].mxu0 }
 0x33c   : > { %v2551_v36 = vadd.f32 %v4641_v51, %v6850_v25  ;;  %v2545_v6 = vpop.f32.mrb[27].mxu0  ;;  %v7037_v51 = vsel %vm9477_vm1, %v2769_v62, %v2771_v3  ;;  %v2787_v3 = vrot.slane %v6904_v60, 1 }
 0x33d   : > { %v2546_v54 = vadd.f32 %v6850_v25, %v2545_v6  ;;  %v2781_v6 = vrot.slane %v6896_v59, 1 }
 0x33e   : > { %v6984_v44 = vmax.f32 %v2551_v36, 0.0 }
 0x33f   : > { %v6986_v17 = vmax.f32 %v2546_v54, 0.0  ;;  %v2779_v54 = vrot.slane %v6884_v35, 1 }
 0x340   : > { %9466 = vst [vmem:[#allocation40_spill] sm:$0xff] %v6984_v44  ;;  %2948 = vrot.lane.b32.xlu0 %v6984_v44, %s4809_s20 }
 0x341   : > { %9467 = vst [vmem:[#allocation48_spill] sm:$0xff] %v6986_v17  ;;  %2946 = vrot.lane.b32.xlu1 %v6986_v17, %s4809_s20 }
 0x346   : > { %v4644_v28 = vpop.f32.mrb[28].mxu0 }
 0x347   : > { %v2561_v24 = vadd.f32 %v4644_v28, %v6850_v25  ;;  %v2555_v33 = vpop.f32.mrb[29].mxu0 }
 0x348   : > { %v2556_v18 = vadd.f32 %v6850_v25, %v2555_v33 }
 0x349   : > { %v6995_v16 = vmax.f32 %v2561_v24, 0.0 }
 0x34a   : > { %v6998_v38 = vmax.f32 %v2556_v18, 0.0  ;;  %v2782_v18 = vsel %vm9483_vm9, %v2779_v54, %v2781_v6  ;;  %vm9508_vm9 = vmmov %vm9473_vm0 }
 0x34b   : > { %9468 = vst [vmem:[#allocation41_spill] sm:$0xff] %v6995_v16  ;;  %2952 = vrot.lane.b32.xlu0 %v6995_v16, %s4809_s20 }
 0x34c   : > { %9469 = vst [vmem:[#allocation52_spill] sm:$0xff] %v6998_v38  ;;  %v4647_v13 = vpop.f32.mrb[30].mxu0  ;;  %2950 = vrot.lane.b32.xlu1 %v6998_v38, %s4809_s20 }
 0x34d   : > { %v2571_v7 = vadd.f32 %v4647_v13, %v6850_v25  ;;  %v2565_v31 = vpop.f32.mrb[31].mxu0  ;;  %v7067_v13 = vsel %vm5086_vm4, %v2782_v18, 0.0  ;;  %vm9488_vm4 = vmmov %vm9473_vm0  ;;  %v2797_v18 = vrot.slane %v6936_v43, 1 }
 0x34e   : > { %v2566_v14 = vadd.f32 %v6850_v25, %v2565_v31  ;;  %v2775_v25 = vrot.slane %v6874_v41, 1  ;;  %v2789_v31 = vrot.slane %v6916_v32, 1  ;;  %v7086_v19 = vsel %vm9488_vm4, %v2781_v6, %v2783_v4  ;;  %vm9514_vm4 = vmmov %vm9473_vm0 }
 0x34f   : > { %v7014_v0 = vmax.f32 %v2571_v7, 0.0  ;;  %3016 = vrot.lane.b32.xlu0 %v7012_v26, %s4810_s25 }
 0x350   : > { %v7023_v34 = vmax.f32 %v2566_v14, 0.0  ;;  %3014 = vrot.lane.b32.xlu1 %v7019_v12, %s4810_s25  ;;  %v2778_v36 = vsel %vm9478_vm11, %v2775_v25, %v2777_v55  ;;  %v7058_v62 = vsel %vm9482_vm13, %v2773_v56, %v2775_v25  ;;  %v2786_v56 = vsel %vm9486_vm12, %v2783_v4, %v2785_v48  ;;  %vm9502_vm11 = vmmov %vm9473_vm0 }
 0x351   : > { %9472 = vst [vmem:[#allocation111_spill] sm:$0xff] %v7014_v0  ;;  %v8635_v5 = vrot.slane %v7014_v0, 1  ;;  %v7053_v33 = vsel %vm5067_vm3, %v2778_v36, 0.0  ;;  %vm9485_vm3 = vmmov %vm9473_vm0  ;;  %v7081_v2 = vsel %vm5105_vm5, %v2786_v56, 0.0  ;;  %v2793_v25 = vrot.slane %v6926_v21, 1 }
 0x352   : > { %9475 = vst [vmem:[#allocation112_spill] sm:$0xff] %v7023_v34  ;;  %v8636_v1 = vrot.slane %v7023_v34, 1  ;;  %v7072_v7 = vsel %vm9485_vm3, %v2777_v55, %v2779_v54  ;;  %v2790_v55 = vsel %vm9489_vm14, %v2787_v3, %v2789_v31  ;;  %vm9491_vm5 = vmmov %vm9473_vm0  ;;  %v2795_v4 = vrot.slane %v6924_v10, 1 }
 0x353   : > { %3020 = vrot.lane.b32.xlu0 %v7031_v20, %s4810_s25  ;;  %v7095_v54 = vsel %vm5124_vm6, %v2790_v55, 0.0  ;;  %v7100_v24 = vsel %vm9491_vm5, %v2785_v48, %v2787_v3  ;;  %v2794_v6 = vsel %vm9492_vm10, %v2791_v40, %v2793_v25  ;;  %vm9494_vm6 = vmmov %vm9473_vm0  ;;  %v2801_v3 = vrot.slane %v6946_v22, 1 }
 0x354   : > { %3018 = vrot.lane.b32.xlu1 %v7037_v51, %s4810_s25  ;;  %v7049_v28 = vsel %vm9479_vm2, %v8636_v1, %v8635_v5  ;;  %v7109_v56 = vsel %vm5142_vm7, %v2794_v6, 0.0  ;;  %v7114_v14 = vsel %vm9494_vm6, %v2789_v31, %v2791_v40  ;;  %v2798_v48 = vsel %vm9473_vm0, %v2795_v4, %v2797_v18  ;;  %vm9496_vm7 = vmmov %vm9473_vm0  ;;  %v9498_v1 = vld [vmem:[#allocation12_spill] sm:$0xff] }
 0x355   : > { %9480 = vst [vmem:[#allocation137_spill] sm:$0xff] %v7049_v28  ;;  %v2799_v55 = vrot.slane %v6934_v46, 1  ;;  %v7123_v23 = vsel %vm5160_vm8, %v2798_v48, 0.0  ;;  %v7128_v6 = vsel %vm9496_vm7, %v2793_v25, %v2795_v4  ;;  %v2805_v40 = vrot.slane %v6956_v53, 1  ;;  %vm9501_vm8 = vmmov %vm9473_vm0  ;;  %v9509_v28 = vld [vmem:[#allocation18_spill] sm:$0xff] }
 0x356   : > { %v2803_v5 = vrot.slane %v6944_v61, 1  ;;  %vm9499_vm1 = vnez %v9498_v1  ;;  %v2809_v4 = vrot.slane %v6966_v9, 1  ;;  %vm9504_vm2 = vnez %v9503_v39  ;;  %vm9506_vm13 = vmmov %vm9473_vm0 }
 0x357   : > { %3024 = vrot.lane.b32.xlu0 %v7053_v33, %s4810_s25  ;;  %v2802_v31 = vsel %vm9497_vm15, %v2799_v55, %v2801_v3  ;;  %v7142_v48 = vsel %vm9501_vm8, %v2797_v18, %v2799_v55  ;;  %v2813_v55 = vrot.slane %v6976_v11, 1  ;;  %vm9510_vm3 = vnez %v9509_v28  ;;  %vm9512_vm12 = vmmov %vm9473_vm0  ;;  %v9515_v11 = vld [vmem:[#allocation21_spill] sm:$0xff] }
 0x358   : > { %3022 = vrot.lane.b32.xlu1 %v7058_v62, %s4810_s25  ;;  %v7137_v36 = vsel %vm9499_vm1, %v2802_v31, 0.0  ;;  %v2806_v25 = vsel %vm9502_vm11, %v2803_v5, %v2805_v40  ;;  %v7156_v31 = vsel %vm9506_vm13, %v2801_v3, %v2803_v5  ;;  %v2810_v18 = vsel %vm9508_vm9, %v2807_v30, %v2809_v4  ;;  %vm9518_vm5 = vmmov %vm9473_vm0 }
 0x359   : > { %9500 = vst [vmem:[#allocation139_spill] sm:$0xff] %v7137_v36  ;;  %v7151_v1 = vsel %vm9504_vm2, %v2806_v25, 0.0  ;;  %9507 = vst [vmem:[#allocation29_spill] sm:$0xff] %v7156_v31  ;;  %v7165_v39 = vsel %vm9510_vm3, %v2810_v18, 0.0  ;;  %v7170_v25 = vsel %vm9512_vm12, %v2805_v40, %v2807_v30  ;;  %v2814_v5 = vsel %vm9514_vm4, %v2811_v29, %v2813_v55 }
 0x35a   : > { %9505 = vst [vmem:[#allocation27_spill] sm:$0xff] %v7151_v1  ;;  %9511 = vst [vmem:[#allocation45_spill] sm:$0xff] %v7165_v39  ;;  %v2817_v3 = vrot.slane %v6986_v17, 1  ;;  %v2815_v0 = vrot.slane %v6974_v8, 1  ;;  %vm9516_vm14 = vnez %v9515_v11  ;;  %v7184_v18 = vsel %vm9518_vm5, %v2809_v4, %v2811_v29  ;;  %v9521_v8 = vld [vmem:[#allocation24_spill] sm:$0xff] }
 0x35b   : > { %3028 = vrot.lane.b32.xlu0 %v7067_v13, %s4810_s25  ;;  %9513 = vst [vmem:[#allocation53_spill] sm:$0xff] %v7170_v25  ;;  %v7179_v28 = vsel %vm9516_vm14, %v2814_v5, 0.0  ;;  %9519 = vst [vmem:[#allocation57_spill] sm:$0xff] %v7184_v18  ;;  %v2821_v40 = vrot.slane %v6998_v38, 1  ;;  %v2819_v17 = vrot.slane %v6984_v44, 1  ;;  %vm9522_vm6 = vnez %v9521_v8  ;;  %v9526_v38 = vld [vmem:[#allocation28_spill] sm:$0xff] }
 0x35c   : > { %3026 = vrot.lane.b32.xlu1 %v7072_v7, %s4810_s25  ;;  %9517 = vst [vmem:[#allocation46_spill] sm:$0xff] %v7179_v28  ;;  %vm9520_vm10 = vmmov %vm9473_vm0  ;;  %v7198_v5 = vsel %vm9473_vm0, %v2813_v55, %v2815_v0  ;;  %v2823_v4 = vrot.slane %v6995_v16, 1  ;;  %vm9527_vm15 = vnez %v9526_v38  ;;  %v7219_v16 = vpop.permute.xlu0 %2896  ;;  %v2639_v38 = vrot.slane %v6854_v47, 7 }
 0x35d   : > { %v2818_v30 = vsel %vm9520_vm10, %v2815_v0, %v2817_v3  ;;  %9524 = vst [vmem:[#allocation114_spill] sm:$0xff] %v7198_v5  ;;  %vm9525_vm7 = vmmov %vm9473_vm0  ;;  %v9531_v0 = vrot.slane %v7023_v34, 1  ;;  %vm9538_vm13 = vcmask 1040384   ;;  %v2651_v9 = vrot.slane %v6884_v35, 7 }
 0x35e   : > { %v7193_v11 = vsel %vm9522_vm6, %v2818_v30, 0.0  ;;  %v2822_v29 = vsel %vm9525_vm7, %v2819_v17, %v2821_v40  ;;  %vm9529_vm1 = vmmov %vm9473_vm0  ;;  %v2638_v30 = vrot.slane %v6856_v27, 7  ;;  %v2657_v53 = vrot.slane %v6906_v15, 7 }
 0x35f   : > { %3032 = vrot.lane.b32.xlu0 %v7081_v2, %s4810_s25  ;;  %9523 = vst [vmem:[#allocation113_spill] sm:$0xff] %v7193_v11  ;;  %v7206_v44 = vsel %vm9527_vm15, %v2822_v29, 0.0  ;;  %v7211_v8 = vsel %vm9529_vm1, %v2817_v3, %v2819_v17  ;;  %vm9532_vm8 = vmmov %vm9473_vm0  ;;  %v7222_v29 = vpop.permute.xlu1 %2894  ;;  %v8696_v61 = vrot.slane %v6926_v21, 7 }
 0x360   : > { %3030 = vrot.lane.b32.xlu1 %v7086_v19, %s4810_s25  ;;  %9528 = vst [vmem:[#allocation138_spill] sm:$0xff] %v7206_v44  ;;  %9530 = vst [vmem:[#allocation141_spill] sm:$0xff] %v7211_v8  ;;  %v2826_v55 = vsel %vm9532_vm8, %v2823_v4, %v9531_v0  ;;  %v2733_v3 = vsel %vm9538_vm13, 0.0, %v2638_v30  ;;  %v2641_v0 = vrot.slane %v6866_v50, 7  ;;  %v7237_v34 = vpop.permute.xlu0 %2900 }
 0x361   : > { %vm9536_vm2 = vmmov %vm9473_vm0 }
 0x362   : > { %v7231_v17 = vsel %vm9536_vm2, %v2821_v40, %v2823_v4  ;;  %vm9539_vm9 = vmmov %vm9538_vm13 }
 0x363   : > { %3036 = vrot.lane.b32.xlu0 %v7095_v54, %s4810_s25  ;;  %9537 = vst [vmem:[#allocation43_spill] sm:$0xff] %v7231_v17  ;;  %vm9542_vm12 = vmmov %vm9539_vm9 }
 0x364   : > { %3034 = vrot.lane.b32.xlu1 %v7100_v24, %s4810_s25  ;;  %v2642_v4 = vsel %vm9542_vm12, %v2639_v38, %v2641_v0  ;;  %vm9544_vm4 = vmmov %vm9539_vm9 }
 0x365   : > { %vm9548_vm5 = vmmov %vm9544_vm4 }
 0x366   : > { %vm9550_vm10 = vmmov %vm9544_vm4 }
 0x367   : > { %3040 = vrot.lane.b32.xlu0 %v7109_v56, %s4810_s25  ;;  %vm9554_vm0 = vmmov %vm9544_vm4 }
 0x368   : > { %3038 = vrot.lane.b32.xlu1 %v7114_v14, %s4810_s25  ;;  %vm9556_vm7 = vmmov %vm9554_vm0 }
 0x369   : > { %vm9560_vm1 = vmmov %vm9554_vm0 }
 0x36a   : > { %vm9562_vm8 = vmmov %vm9554_vm0 }
 0x36b   : > { %3044 = vrot.lane.b32.xlu0 %v7123_v23, %s4810_s25  ;;  %vm9566_vm2 = vmmov %vm9554_vm0 }
 0x36c   : > { %3042 = vrot.lane.b32.xlu1 %v7128_v6, %s4810_s25  ;;  %vm9568_vm13 = vmmov %vm9554_vm0 }
 0x36d   : > { %vm9576_vm12 = vmmov %vm9554_vm0 }
 0x36f   : > { %3048 = vrot.lane.b32.xlu0 %v7137_v36, %s4810_s25  ;;  %v9585_v36 = vld [vmem:[#allocation69_spill] sm:$0xff] }
 0x370   : > { %3046 = vrot.lane.b32.xlu1 %v7142_v48, %s4810_s25 }
 0x373   : > { %3052 = vrot.lane.b32.xlu0 %v7151_v1, %s4810_s25 }
 0x374   : > { %3050 = vrot.lane.b32.xlu1 %v7156_v31, %s4810_s25 }
 0x377   : > { %3056 = vrot.lane.b32.xlu0 %v7165_v39, %s4810_s25 }
 0x378   : > { %3054 = vrot.lane.b32.xlu1 %v7170_v25, %s4810_s25 }
 0x37b   : > { %3060 = vrot.lane.b32.xlu0 %v7179_v28, %s4810_s25  ;;  %v2647_v28 = vrot.slane %v6874_v41, 7 }
 0x37c   : > { %3058 = vrot.lane.b32.xlu1 %v7184_v18, %s4810_s25 }
 0x37f   : > { %3064 = vrot.lane.b32.xlu0 %v7193_v11, %s4810_s25  ;;  %v9533_v11 = vld [vmem:[#allocation33_spill] sm:$0xff] }
 0x380   : > { %3062 = vrot.lane.b32.xlu1 %v7198_v5, %s4810_s25  ;;  %vm9534_vm11 = vnez %v9533_v11  ;;  %v2643_v11 = vrot.slane %v6864_v52, 7 }
 0x382   : > { %v7258_v5 = vsel %vm9544_vm4, %v2641_v0, %v2643_v11 }
 0x383   : > { %3068 = vrot.lane.b32.xlu0 %v7206_v44, %s4810_s25  ;;  %v7226_v44 = vsel %vm9534_vm11, %v2826_v55, 0.0  ;;  %v7243_v55 = vpop.permute.xlu1 %2898 }
 0x384   : > { %3066 = vrot.lane.b32.xlu1 %v7211_v8, %s4810_s25  ;;  %9535 = vst [vmem:[#allocation30_spill] sm:$0xff] %v7226_v44  ;;  %v7240_v8 = vsel %vm9539_vm9, %v2638_v30, %v2639_v38  ;;  %v7255_v30 = vpop.permute.xlu0 %2904 }
 0x385   : > { %9543 = vst [vmem:[#allocation50_spill] sm:$0xff] %v7255_v30 }
 0x387   : > { %3072 = vrot.lane.b32.xlu0 %v7226_v44, %s4810_s25  ;;  %v9540_v44 = vld [vmem:[#allocation34_spill] sm:$0xff] }
 0x388   : > { %3070 = vrot.lane.b32.xlu1 %v7231_v17, %s4810_s25  ;;  %vm9541_vm3 = vnez %v9540_v44  ;;  %v2645_v17 = vrot.slane %v6876_v63, 7  ;;  %v7261_v44 = vpop.permute.xlu1 %2902  ;;  %v7273_v0 = vpop.permute.xlu0 %2908 }
 0x389   : > { %v7247_v40 = vsel %vm9541_vm3, %v2733_v3, 0.0  ;;  %9545 = vst [vmem:[#allocation58_spill] sm:$0xff] %v7261_v44  ;;  %v9546_v3 = vld [vmem:[#allocation39_spill] sm:$0xff]  ;;  %9549 = vst [vmem:[#allocation51_spill] sm:$0xff] %v7273_v0  ;;  %v7294_v0 = vsel %vm9556_vm7, %v2649_v57, %v2651_v9  ;;  %v2661_v44 = vrot.slane %v6916_v32, 7 }
 0x38a   : > { %vm9547_vm14 = vnez %v9546_v3  ;;  %v2646_v38 = vsel %vm9548_vm5, %v2643_v11, %v2645_v17  ;;  %v7276_v39 = vsel %vm9550_vm10, %v2645_v17, %v2647_v28  ;;  %v2650_v11 = vsel %vm9554_vm0, %v2647_v28, %v2649_v57  ;;  %vm9574_vm3 = vmmov %vm9554_vm0 }
 0x38b   : > { %3138 = vrot.lane.b32.xlu0 %v7240_v8, %s4811_s26  ;;  %v7265_v18 = vsel %vm9547_vm14, %v2642_v4, 0.0  ;;  %v9552_v4 = vld [vmem:[#allocation44_spill] sm:$0xff]  ;;  %v2654_v28 = vsel %vm9560_vm1, %v2651_v9, %v2653_v45  ;;  %vm9582_vm14 = vmmov %vm9554_vm0  ;;  %vm9586_vm5 = vnez %v9585_v36  ;;  %vm9593_vm10 = vcmask 1043456  }
 0x38c   : > { %3136 = vrot.lane.b32.xlu1 %v7247_v40, %s4811_s26  ;;  %v7279_v3 = vpop.permute.xlu1 %2906  ;;  %vm9553_vm6 = vnez %v9552_v4  ;;  %v7291_v17 = vpop.permute.xlu0 %2912  ;;  %vm9625_vm0 = vcmask 97280   ;;  %vm9627_vm7 = vmmov %vm9560_vm1  ;;  %vm9629_vm1 = vcmask 162816  }
 0x38d   : > { %9551 = vst [vmem:[#allocation62_spill] sm:$0xff] %v7279_v3  ;;  %v7283_v25 = vsel %vm9553_vm6, %v2646_v38, 0.0  ;;  %9555 = vst [vmem:[#allocation115_spill] sm:$0xff] %v7291_v17  ;;  %v2655_v3 = vrot.slane %v6894_v49, 7  ;;  %v9558_v38 = vld [vmem:[#allocation49_spill] sm:$0xff] }
 0x38e   : > { %vm9559_vm15 = vnez %v9558_v38  ;;  %vm9595_vm6 = vmmov %vm9593_vm10 }
 0x38f   : > { %3142 = vrot.lane.b32.xlu0 %v7258_v5, %s4811_s26  ;;  %v7301_v1 = vsel %vm9559_vm15, %v2650_v11, 0.0  ;;  %v7312_v17 = vsel %vm9562_vm8, %v2653_v45, %v2655_v3  ;;  %v9564_v11 = vld [vmem:[#allocation54_spill] sm:$0xff]  ;;  %v2658_v9 = vsel %vm9566_vm2, %v2655_v3, %v2657_v53  ;;  %vm9628_vm15 = vcmask 130048   ;;  %vm9630_vm8 = vmmov %vm9625_vm0 }
 0x390   : > { %3140 = vrot.lane.b32.xlu1 %v7265_v18, %s4811_s26  ;;  %v7297_v4 = vpop.permute.xlu1 %2910  ;;  %v7309_v57 = vpop.permute.xlu0 %2916  ;;  %vm9565_vm11 = vnez %v9564_v11  ;;  %vm9632_vm2 = vmmov %vm9628_vm15 }
 0x391   : > { %9557 = vst [vmem:[#allocation116_spill] sm:$0xff] %v7297_v4  ;;  %9561 = vst [vmem:[#allocation140_spill] sm:$0xff] %v7309_v57  ;;  %v2659_v4 = vrot.slane %v6904_v60, 7  ;;  %v7319_v30 = vsel %vm9565_vm11, %v2654_v28, 0.0  ;;  %v9571_v28 = vld [vmem:[#allocation59_spill] sm:$0xff]  ;;  %vm9631_vm11 = vcmask 195584  }
 0x392   : > { %vm9572_vm9 = vnez %v9571_v28  ;;  %v9579_v28 = vld [vmem:[#allocation64_spill] sm:$0xff] }
 0x393   : > { %3146 = vrot.lane.b32.xlu0 %v7276_v39, %s4811_s26  ;;  %v7330_v57 = vsel %vm9568_vm13, %v2657_v53, %v2659_v4  ;;  %v7337_v31 = vsel %vm9572_vm9, %v2658_v9, 0.0  ;;  %v2662_v3 = vsel %vm9574_vm3, %v2659_v4, %v2661_v44  ;;  %vm9580_vm4 = vnez %v9579_v28  ;;  %vm9634_vm9 = vmmov %vm9629_vm1 }
 0x394   : > { %3144 = vrot.lane.b32.xlu1 %v7283_v25, %s4811_s26  ;;  %v7315_v38 = vpop.permute.xlu1 %2914  ;;  %v7327_v45 = vpop.permute.xlu0 %2920  ;;  %9569 = vst [vmem:[#allocation154_spill] sm:$0xff] %v7330_v57  ;;  %9573 = vst [vmem:[#allocation55_spill] sm:$0xff] %v7337_v31  ;;  %v7354_v9 = vsel %vm9580_vm4, %v2662_v3, 0.0  ;;  %v3949_v3 = vld [vmem:[%s8479_s3 + $0x8] sm:$0xff]  ;;  %vm9633_vm13 = vcmask 228352   ;;  %vm9635_vm3 = vcmask 261120  }
 0x395   : > { %9563 = vst [vmem:[#allocation143_spill] sm:$0xff] %v7315_v38  ;;  %9567 = vst [vmem:[#allocation35_spill] sm:$0xff] %v7327_v45  ;;  %v2663_v38 = vrot.slane %v6914_v37, 7  ;;  %vm9637_vm4 = vcmask 293888  }
 0x396   : > { %9581 = vst [vmem:[#allocation117_spill] sm:$0xff] %v7354_v9 }
 0x397   : > { %3150 = vrot.lane.b32.xlu0 %v7294_v0, %s4811_s26  ;;  %v7348_v45 = vsel %vm9576_vm12, %v2661_v44, %v2663_v38  ;;  %v2666_v4 = vsel %vm9582_vm14, %v2663_v38, %v8696_v61  ;;  %v3948_v38 = vld [vmem:[%s8479_s3] sm:$0xff]  ;;  %vm9636_vm12 = vmmov %vm9631_vm11 }
 0x398   : > { %3148 = vrot.lane.b32.xlu1 %v7301_v1, %s4811_s26  ;;  %v7333_v11 = vpop.permute.xlu1 %2918  ;;  %v7345_v53 = vpop.permute.xlu0 %2924  ;;  %9577 = vst [vmem:[#allocation56_spill] sm:$0xff] %v7348_v45  ;;  %v4714_v61 = vpack.c.bf16 %v3949_v3, %v3948_v38  ;;  %vm9638_vm14 = vmmov %vm9633_vm13 }
 0x399   : > { %9570 = vst [vmem:[#allocation174_spill] sm:$0xff] %v7333_v11  ;;  %9575 = vst [vmem:[#allocation63_spill] sm:$0xff] %v7345_v53 }
 0x39a   : > { %4715 = vmatprep.subr.bf16.mxu1 %v4714_v61 }
 0x39b   : > { %3154 = vrot.lane.b32.xlu0 %v7312_v17, %s4811_s26  ;;  %4717 = vmatpush3.bf16.msra.mxu1 %v4714_v61 }
 0x39c   : > { %3152 = vrot.lane.b32.xlu1 %v7319_v30, %s4811_s26  ;;  %v7350_v11 = vpop.permute.xlu1 %2922  ;;  %v7363_v53 = vpop.permute.xlu0 %2928 }
 0x39d   : > { %9578 = vst [vmem:[#allocation67_spill] sm:$0xff] %v7350_v11  ;;  %9583 = vst [vmem:[#allocation118_spill] sm:$0xff] %v7363_v53  ;;  %v7369_v11 = vsel %vm9586_vm5, %v2666_v4, 0.0  ;;  %v3951_v4 = vld [vmem:[%s8479_s3 + $0x18] sm:$0xff] }
 0x39e   : > { %9587 = vst [vmem:[#allocation145_spill] sm:$0xff] %v7369_v11  ;;  %vm9639_vm5 = vmmov %vm9635_vm3 }
 0x39f   : > { %3158 = vrot.lane.b32.xlu0 %v7330_v57, %s4811_s26 }
 0x3a0   : > { %3156 = vrot.lane.b32.xlu1 %v7337_v31, %s4811_s26  ;;  %v7365_v44 = vpop.permute.xlu1 %2926  ;;  %v7381_v28 = vpop.permute.xlu0 %2932 }
 0x3a1   : > { %9584 = vst [vmem:[#allocation142_spill] sm:$0xff] %v7365_v44  ;;  %9588 = vst [vmem:[#allocation47_spill] sm:$0xff] %v7381_v28 }
 0x3a3   : > { %3162 = vrot.lane.b32.xlu0 %v7348_v45, %s4811_s26 }
 0x3a4   : > { %3160 = vrot.lane.b32.xlu1 %v7354_v9, %s4811_s26  ;;  %v7383_v36 = vpop.permute.xlu1 %2930  ;;  %v7395_v28 = vpop.permute.xlu0 %2936 }
 0x3a5   : > { %9589 = vst [vmem:[#allocation156_spill] sm:$0xff] %v7383_v36  ;;  %9590 = vst [vmem:[#allocation176_spill] sm:$0xff] %v7395_v28 }
 0x3a7   : > { %3232 = vrot.lane.b32.xlu0 %v6856_v27, %s4812_s27  ;;  %v3950_v27 = vld [vmem:[%s8479_s3 + $0x10] sm:$0xff] }
 0x3a8   : > { %3164 = vrot.lane.b32.xlu1 %v7369_v11, %s4811_s26  ;;  %v4718_v38 = vpack.c.bf16 %v3951_v4, %v3950_v27  ;;  %v7397_v3 = vpop.permute.xlu1 %2934  ;;  %v7406_v61 = vpop.permute.xlu0 %2940 }
 0x3a9   : > { %9591 = vst [vmem:[#allocation60_spill] sm:$0xff] %v7397_v3  ;;  %9592 = vst [vmem:[#allocation68_spill] sm:$0xff] %v7406_v61 }
 0x3aa   : > { %4719 = vmatprep.subr.bf16.mxu1 %v4718_v38 }
 0x3ab   : > { %3330 = vrot.lane.b32.xlu0 %v7019_v12, %s4813_s28  ;;  %4721 = vmatpush3.bf16.msra.mxu1 %v4718_v38 }
 0x3ac   : > { %3234 = vrot.lane.b32.xlu1 %v6854_v47, %s4812_s27  ;;  %v3952_v47 = vld [vmem:[%s8479_s3 + $0x20] sm:$0xf]  ;;  %v7409_v12 = vpop.permute.xlu1 %2938 }
 0x3ad   : > { %4656 = vmatprep.subr.msk.mxu1 %vm9593_vm10, %v3952_v47  ;;  %9594 = vst [vmem:[#allocation61_spill] sm:$0xff] %v7409_v12  ;;  %vm9640_vm10 = vmmov %vm9637_vm4 }
 0x3af   : > { %3426 = vrot.lane.b32.xlu0 %v7265_v18, %s4814_s29  ;;  %4657 = vmatpush3.msk.msra.mxu1 %vm9595_vm6, %v3952_v47  ;;  %vm9641_vm6 = vmmov %vm9627_vm7 }
 0x3b0   : > { %3332 = vrot.lane.b32.xlu1 %v7012_v26, %s4813_s28  ;;  %v7416_v26 = vpop.permute.xlu0 %2944  ;;  %v7418_v27 = vpop.permute.xlu1 %2942 }
 0x3b1   : > { %9596 = vst [vmem:[#allocation72_spill] sm:$0xff] %v7416_v26  ;;  %9597 = vst [vmem:[#allocation119_spill] sm:$0xff] %v7418_v27 }
 0x3b3   : > { %3516 = vrot.lane.b32.xlu0 %v6866_v50, %s4815_s15 }
 0x3b4   : > { %3428 = vrot.lane.b32.xlu1 %v7258_v5, %s4814_s29  ;;  %v7424_v4 = vpop.permute.xlu0 %2948  ;;  %v7426_v38 = vpop.permute.xlu1 %2946 }
 0x3b5   : > { %9598 = vst [vmem:[#allocation120_spill] sm:$0xff] %v7424_v4  ;;  %9599 = vst [vmem:[#allocation144_spill] sm:$0xff] %v7426_v38 }
 0x3b7   : > { %3518 = vrot.lane.b32.xlu0 %v6864_v52, %s4815_s15 }
 0x3b8   : > { %3236 = vrot.lane.b32.xlu1 %v6866_v50, %s4812_s27 }
 0x3bb   : > { %3238 = vrot.lane.b32.xlu0 %v6864_v52, %s4812_s27 }
 0x3bc   : > { %3606 = vrot.lane.b32.xlu1 %v7037_v51, %s4816_s16 }
 0x3bd   : > { %v7432_v47 = vpop.permute.xlu0 %2952 }
 0x3be   : > { %9600 = vst [vmem:[#allocation147_spill] sm:$0xff] %v7432_v47  ;;  %v7434_v26 = vpop.permute.xlu1 %2950 }
 0x3bf   : > { %9601 = vst [vmem:[#allocation155_spill] sm:$0xff] %v7434_v26  ;;  %3608 = vrot.lane.b32.xlu0 %v7031_v20, %s4816_s16 }
 0x3c0   : > { %3334 = vrot.lane.b32.xlu1 %v7037_v51, %s4813_s28 }
 0x3c1   : > { %v7440_v50 = vpop.permute.xlu0 %3016 }
 0x3c2   : > { %v7442_v4 = vpop.permute.xlu1 %3014 }
 0x3c3   : > { %3430 = vrot.lane.b32.xlu0 %v7283_v25, %s4814_s29 }
 0x3c4   : > { %3336 = vrot.lane.b32.xlu1 %v7031_v20, %s4813_s28 }
 0x3c5   : > { %v7448_v52 = vpop.permute.xlu0 %3020 }
 0x3c6   : > { %v7450_v47 = vpop.permute.xlu1 %3018 }
 0x3c7   : > { %3520 = vrot.lane.b32.xlu0 %v6876_v63, %s4815_s15 }
 0x3c8   : > { %3432 = vrot.lane.b32.xlu1 %v7276_v39, %s4814_s29 }
 0x3c9   : > { %v7456_v51 = vpop.permute.xlu0 %3024 }
 0x3ca   : > { %v7458_v26 = vpop.permute.xlu1 %3022 }
 0x3cb   : > { %3522 = vrot.lane.b32.xlu0 %v6874_v41, %s4815_s15 }
 0x3cc   : > { %3240 = vrot.lane.b32.xlu1 %v6876_v63, %s4812_s27 }
 0x3cd   : > { %v7464_v20 = vpop.permute.xlu0 %3028 }
 0x3ce   : > { %v7466_v38 = vpop.permute.xlu1 %3026 }
 0x3cf   : > { %3242 = vrot.lane.b32.xlu0 %v6874_v41, %s4812_s27 }
 0x3d0   : > { %3610 = vrot.lane.b32.xlu1 %v7058_v62, %s4816_s16 }
 0x3d1   : > { %v7472_v27 = vpop.permute.xlu0 %3032 }
 0x3d2   : > { %v7474_v61 = vpop.permute.xlu1 %3030 }
 0x3d3   : > { %3612 = vrot.lane.b32.xlu0 %v7053_v33, %s4816_s16 }
 0x3d4   : > { %3338 = vrot.lane.b32.xlu1 %v7058_v62, %s4813_s28 }
 0x3d5   : > { %v7480_v63 = vpop.permute.xlu0 %3036 }
 0x3d6   : > { %9602 = vst [vmem:[#allocation158_spill] sm:$0xff] %v7480_v63  ;;  %v7482_v12 = vpop.permute.xlu1 %3034  ;;  %v9626_v63 = vrot.slane %v6926_v21, 7 }
 0x3d7   : > { %9603 = vst [vmem:[#allocation175_spill] sm:$0xff] %v7482_v12  ;;  %3434 = vrot.lane.b32.xlu0 %v7301_v1, %s4814_s29 }
 0x3d8   : > { %3340 = vrot.lane.b32.xlu1 %v7053_v33, %s4813_s28 }
 0x3d9   : > { %v7488_v41 = vpop.permute.xlu0 %3040 }
 0x3da   : > { %9604 = vst [vmem:[#allocation65_spill] sm:$0xff] %v7488_v41  ;;  %v7490_v28 = vpop.permute.xlu1 %3038 }
 0x3db   : > { %9605 = vst [vmem:[#allocation73_spill] sm:$0xff] %v7490_v28  ;;  %3524 = vrot.lane.b32.xlu0 %v6886_v42, %s4815_s15 }
 0x3dc   : > { %3436 = vrot.lane.b32.xlu1 %v7294_v0, %s4814_s29 }
 0x3dd   : > { %v7496_v62 = vpop.permute.xlu0 %3044 }
 0x3de   : > { %9606 = vst [vmem:[#allocation66_spill] sm:$0xff] %v7496_v62  ;;  %v7498_v3 = vpop.permute.xlu1 %3042 }
 0x3df   : > { %9607 = vst [vmem:[#allocation77_spill] sm:$0xff] %v7498_v3  ;;  %3526 = vrot.lane.b32.xlu0 %v6884_v35, %s4815_s15 }
 0x3e0   : > { %3244 = vrot.lane.b32.xlu1 %v6886_v42, %s4812_s27 }
 0x3e1   : > { %v7504_v33 = vpop.permute.xlu0 %3048 }
 0x3e2   : > { %9608 = vst [vmem:[#allocation121_spill] sm:$0xff] %v7504_v33  ;;  %v7506_v36 = vpop.permute.xlu1 %3046 }
 0x3e3   : > { %9609 = vst [vmem:[#allocation122_spill] sm:$0xff] %v7506_v36  ;;  %3246 = vrot.lane.b32.xlu0 %v6884_v35, %s4812_s27 }
 0x3e4   : > { %3614 = vrot.lane.b32.xlu1 %v7072_v7, %s4816_s16 }
 0x3e5   : > { %v7512_v53 = vpop.permute.xlu0 %3052 }
 0x3e6   : > { %9610 = vst [vmem:[#allocation146_spill] sm:$0xff] %v7512_v53  ;;  %v7514_v44 = vpop.permute.xlu1 %3050 }
 0x3e7   : > { %9611 = vst [vmem:[#allocation149_spill] sm:$0xff] %v7514_v44  ;;  %3616 = vrot.lane.b32.xlu0 %v7067_v13, %s4816_s16 }
 0x3e8   : > { %3342 = vrot.lane.b32.xlu1 %v7072_v7, %s4813_s28 }
 0x3e9   : > { %v7520_v42 = vpop.permute.xlu0 %3056 }
 0x3ea   : > { %9612 = vst [vmem:[#allocation157_spill] sm:$0xff] %v7520_v42  ;;  %v7522_v33 = vpop.permute.xlu1 %3054 }
 0x3eb   : > { %9613 = vst [vmem:[#allocation160_spill] sm:$0xff] %v7522_v33  ;;  %3438 = vrot.lane.b32.xlu0 %v7319_v30, %s4814_s29 }
 0x3ec   : > { %3344 = vrot.lane.b32.xlu1 %v7067_v13, %s4813_s28 }
 0x3ed   : > { %v7528_v35 = vpop.permute.xlu0 %3060 }
 0x3ee   : > { %9614 = vst [vmem:[#allocation178_spill] sm:$0xff] %v7528_v35  ;;  %v7530_v53 = vpop.permute.xlu1 %3058 }
 0x3ef   : > { %9615 = vst [vmem:[#allocation192_spill] sm:$0xff] %v7530_v53  ;;  %3528 = vrot.lane.b32.xlu0 %v6896_v59, %s4815_s15 }
 0x3f0   : > { %3440 = vrot.lane.b32.xlu1 %v7312_v17, %s4814_s29 }
 0x3f1   : > { %v7536_v7 = vpop.permute.xlu0 %3064 }
 0x3f2   : > { %9616 = vst [vmem:[#allocation70_spill] sm:$0xff] %v7536_v7  ;;  %v7538_v42 = vpop.permute.xlu1 %3062 }
 0x3f3   : > { %9617 = vst [vmem:[#allocation78_spill] sm:$0xff] %v7538_v42  ;;  %3530 = vrot.lane.b32.xlu0 %v6894_v49, %s4815_s15 }
 0x3f4   : > { %3248 = vrot.lane.b32.xlu1 %v6896_v59, %s4812_s27 }
 0x3f5   : > { %v7544_v13 = vpop.permute.xlu0 %3068 }
 0x3f6   : > { %9618 = vst [vmem:[#allocation71_spill] sm:$0xff] %v7544_v13  ;;  %v7546_v35 = vpop.permute.xlu1 %3066 }
 0x3f7   : > { %9619 = vst [vmem:[#allocation82_spill] sm:$0xff] %v7546_v35  ;;  %3250 = vrot.lane.b32.xlu0 %v6894_v49, %s4812_s27 }
 0x3f8   : > { %3618 = vrot.lane.b32.xlu1 %v7086_v19, %s4816_s16 }
 0x3f9   : > { %v7552_v53 = vpop.permute.xlu0 %3072 }
 0x3fa   : > { %9620 = vst [vmem:[#allocation123_spill] sm:$0xff] %v7552_v53  ;;  %v7554_v7 = vpop.permute.xlu1 %3070 }
 0x3fb   : > { %9621 = vst [vmem:[#allocation124_spill] sm:$0xff] %v7554_v7  ;;  %3620 = vrot.lane.b32.xlu0 %v7081_v2, %s4816_s16 }
 0x3fc   : > { %3346 = vrot.lane.b32.xlu1 %v7086_v19, %s4813_s28 }
 0x3fd   : > { %v3139_v59 = vpop.permute.xlu0 %3138 }
 0x3fe   : > { %v3137_v13 = vpop.permute.xlu1 %3136 }
 0x3ff   : > { %3442 = vrot.lane.b32.xlu0 %v7337_v31, %s4814_s29 }
 0x400   : > { %3348 = vrot.lane.b32.xlu1 %v7081_v2, %s4813_s28 }
 0x401   : > { %v7564_v49 = vpop.permute.xlu0 %3142 }
 0x402   : > { %v7566_v35 = vpop.permute.xlu1 %3140 }
 0x403   : > { %3532 = vrot.lane.b32.xlu0 %v6906_v15, %s4815_s15 }
 0x404   : > { %3444 = vrot.lane.b32.xlu1 %v7330_v57, %s4814_s29 }
 0x405   : > { %v7572_v53 = vpop.permute.xlu0 %3146 }
 0x406   : > { %v7574_v19 = vpop.permute.xlu1 %3144 }
 0x407   : > { %3534 = vrot.lane.b32.xlu0 %v6904_v60, %s4815_s15 }
 0x408   : > { %3252 = vrot.lane.b32.xlu1 %v6906_v15, %s4812_s27 }
 0x409   : > { %v7580_v2 = vpop.permute.xlu0 %3150 }
 0x40a   : > { %v7582_v7 = vpop.permute.xlu1 %3148 }
 0x40b   : > { %3254 = vrot.lane.b32.xlu0 %v6904_v60, %s4812_s27 }
 0x40c   : > { %3622 = vrot.lane.b32.xlu1 %v7100_v24, %s4816_s16 }
 0x40d   : > { %v7588_v42 = vpop.permute.xlu0 %3154 }
 0x40e   : > { %v7590_v33 = vpop.permute.xlu1 %3152 }
 0x40f   : > { %3624 = vrot.lane.b32.xlu0 %v7095_v54, %s4816_s16 }
 0x410   : > { %3350 = vrot.lane.b32.xlu1 %v7100_v24, %s4813_s28 }
 0x411   : > { %v7596_v15 = vpop.permute.xlu0 %3158 }
 0x412   : > { %v7598_v44 = vpop.permute.xlu1 %3156 }
 0x413   : > { %3446 = vrot.lane.b32.xlu0 %v7354_v9, %s4814_s29  ;;  %v3756_v9 = vsel %vm9625_vm0, %v6316_v58, %v3137_v13  ;;  %vm9642_vm0 = vcmask 31744  }
 0x414   : > { %3352 = vrot.lane.b32.xlu1 %v7095_v54, %s4813_s28 }
 0x415   : > { %v7604_v60 = vpop.permute.xlu0 %3162 }
 0x416   : > { %9622 = vst [vmem:[#allocation148_spill] sm:$0xff] %v7604_v60  ;;  %v7606_v36 = vpop.permute.xlu1 %3160 }
 0x417   : > { %9623 = vst [vmem:[#allocation151_spill] sm:$0xff] %v7606_v36  ;;  %3536 = vrot.lane.b32.xlu0 %v6916_v32, %s4815_s15 }
 0x418   : > { %3448 = vrot.lane.b32.xlu1 %v7348_v45, %s4814_s29 }
 0x419   : > { %v3233_v24 = vpop.permute.xlu0 %3232 }
 0x41a   : > { %v7612_v62 = vpop.permute.xlu1 %3164 }
 0x41b   : > { %9624 = vst [vmem:[#allocation159_spill] sm:$0xff] %v7612_v62  ;;  %3538 = vrot.lane.b32.xlu0 %v6914_v37, %s4815_s15 }
 0x41c   : > { %3256 = vrot.lane.b32.xlu1 %v6916_v32, %s4812_s27  ;;  %v2667_v32 = vrot.slane %v6924_v10, 7 }
 0x41d   : > { %v3331_v54 = vpop.permute.xlu0 %3330 }
 0x41e   : > { %v3235_v3 = vpop.permute.xlu1 %3234  ;;  %v7636_v57 = vsel %vm9627_vm7, %v9626_v63, %v2667_v32  ;;  %vm9643_vm7 = vcmask 64512  }
 0x41f   : > { %3258 = vrot.lane.b32.xlu0 %v6914_v37, %s4812_s27 }
 0x420   : > { %3626 = vrot.lane.b32.xlu1 %v7114_v14, %s4816_s16 }
 0x421   : > { %v3427_v41 = vpop.permute.xlu0 %3426 }
 0x422   : > { %v3333_v28 = vpop.permute.xlu1 %3332 }
 0x423   : > { %3628 = vrot.lane.b32.xlu0 %v7109_v56, %s4816_s16 }
 0x424   : > { %3354 = vrot.lane.b32.xlu1 %v7114_v14, %s4813_s28  ;;  %v3788_v14 = vsel %vm9628_vm15, %v3756_v9, %v3233_v24 }
 0x425   : > { %v3517_v45 = vpop.permute.xlu0 %3516 }
 0x426   : > { %v3429_v62 = vpop.permute.xlu1 %3428 }
 0x427   : > { %3450 = vrot.lane.b32.xlu0 %v7369_v11, %s4814_s29  ;;  %v3820_v11 = vsel %vm9629_vm1, %v3788_v14, %v3331_v54  ;;  %v9644_v14 = vld [vmem:[#allocation74_spill] sm:$0xff]  ;;  %vm9646_vm1 = vmmov %vm9630_vm8 }
 0x428   : > { %3356 = vrot.lane.b32.xlu1 %v7109_v56, %s4813_s28  ;;  %v3757_v56 = vsel %vm9630_vm8, %v6316_v58, %v3139_v59  ;;  %v3852_v13 = vsel %vm9631_vm11, %v3820_v11, %v3427_v41  ;;  %v3696_v59 = vsel %vm9642_vm0, %v7247_v40, %v7222_v29  ;;  %vm9645_vm15 = vnez %v9644_v14  ;;  %vm9647_vm8 = vmmov %vm9642_vm0 }
 0x429   : > { %v3519_v37 = vpop.permute.xlu0 %3518  ;;  %v3789_v12 = vsel %vm9632_vm2, %v3757_v56, %v3235_v3  ;;  %v3884_v63 = vsel %vm9633_vm13, %v3852_v13, %v3517_v45  ;;  %v3697_v13 = vsel %vm9647_vm8, %v7240_v8, %v7219_v16  ;;  %v2671_v29 = vrot.slane %v6934_v46, 7  ;;  %vm9648_vm11 = vmmov %vm9632_vm2 }
 0x42a   : > { %v3237_v60 = vpop.permute.xlu1 %3236  ;;  %v3821_v9 = vsel %vm9634_vm9, %v3789_v12, %v3333_v28  ;;  %v2669_v28 = vrot.slane %v6936_v43, 7  ;;  %vm9649_vm2 = vmmov %vm9643_vm7  ;;  %vm9659_vm0 = vcmask 293888  }
 0x42b   : > { %3540 = vrot.lane.b32.xlu0 %v6926_v21, %s4815_s15  ;;  %v3853_v54 = vsel %vm9636_vm12, %v3821_v9, %v3429_v62  ;;  %v3727_v40 = vsel %vm9649_vm2, %v3697_v13, %v7440_v50  ;;  %vm9650_vm13 = vmmov %vm9634_vm9 }
 0x42c   : > { %3452 = vrot.lane.b32.xlu1 %v7636_v57, %s4814_s29  ;;  %v3885_v58 = vsel %vm9638_vm14, %v3853_v54, %v3519_v37  ;;  %v2670_v62 = vsel %vm9641_vm6, %v2667_v32, %v2669_v28  ;;  %vm9651_vm9 = vmmov %vm9646_vm1 }
 0x42d   : > { %v3239_v36 = vpop.permute.xlu0 %3238 }
 0x42e   : > { %v3607_v31 = vpop.permute.xlu1 %3606 }
 0x42f   : > { %3260 = vrot.lane.b32.xlu0 %v6926_v21, %s4812_s27  ;;  %v3916_v24 = vsel %vm9635_vm3, %v3884_v63, %v3607_v31  ;;  %vm9652_vm3 = vmmov %vm9636_vm12 }
 0x430   : > { %3166 = vrot.lane.b32.xlu1 %v7636_v57, %s4811_s26  ;;  %4658 = vmatprep.mubr.msk.f32.mxu1 %vm9637_vm4, %v3916_v24  ;;  %vm9653_vm12 = vmmov %vm9648_vm11 }
 0x431   : > { %v3609_v11 = vpop.permute.xlu0 %3608  ;;  %vm9654_vm4 = vmmov %vm9638_vm14 }
 0x432   : > { %v3917_v45 = vsel %vm9639_vm5, %v3885_v58, %v3609_v11  ;;  %v3335_v3 = vpop.permute.xlu1 %3334  ;;  %vm9655_vm14 = vmmov %vm9641_vm6 }
 0x433   : > { %3630 = vrot.lane.b32.xlu0 %v7128_v6, %s4816_s16  ;;  %4659 = vmatmul.mubr.msk.f32.vlgmr.msra.gmra.mrb[0].mxu1 %vm9640_vm10, %v3917_v45  ;;  %v7703_v24 = vsel %vm9655_vm14, %v2669_v28, %v2671_v29  ;;  %vm9656_vm5 = vmmov %vm9650_vm13  ;;  %vm9657_vm10 = vcmask 261120  }
 0x434   : > { %3542 = vrot.lane.b32.xlu1 %v6924_v10, %s4815_s15  ;;  %vm9658_vm6 = vmmov %vm9652_vm3 }
 0x435   : > { %v3431_v21 = vpop.permute.xlu0 %3430 }
 0x436   : > { %v3337_v31 = vpop.permute.xlu1 %3336 }
 0x437   : > { %3358 = vrot.lane.b32.xlu0 %v7128_v6, %s4813_s28  ;;  %v3726_v6 = vsel %vm9643_vm7, %v3696_v59, %v7442_v4  ;;  %vm9660_vm7 = vmmov %vm9654_vm4 }
 0x438   : > { %3262 = vrot.lane.b32.xlu1 %v6924_v10, %s4812_s27  ;;  %v7681_v10 = vsel %vm9645_vm15, %v2670_v62, 0.0  ;;  %v3758_v32 = vsel %vm9646_vm1, %v3726_v6, %v7566_v35  ;;  %v3759_v35 = vsel %vm9651_vm9, %v3727_v40, %v7564_v49  ;;  %vm9661_vm15 = vmmov %vm9657_vm10 }
 0x439   : > { %v3521_v12 = vpop.permute.xlu0 %3520  ;;  %v3791_v63 = vsel %vm9653_vm12, %v3759_v35, %v3239_v36  ;;  %vm9662_vm1 = vmmov %vm9659_vm0 }
 0x43a   : > { %v3433_v41 = vpop.permute.xlu1 %3432  ;;  %v3823_v50 = vsel %vm9656_vm5, %v3791_v63, %v3337_v31 }
 0x43b   : > { %3360 = vrot.lane.b32.xlu0 %v7123_v23, %s4813_s28  ;;  %v3855_v49 = vsel %vm9658_vm6, %v3823_v50, %v3433_v41 }
 0x43c   : > { %3632 = vrot.lane.b32.xlu1 %v7123_v23, %s4816_s16  ;;  %v3790_v23 = vsel %vm9648_vm11, %v3758_v32, %v3237_v60  ;;  %vm9663_vm11 = vmmov %vm9649_vm2 }
 0x43d   : > { %v3523_v37 = vpop.permute.xlu0 %3522  ;;  %v3822_v4 = vsel %vm9650_vm13, %v3790_v23, %v3335_v3  ;;  %vm9664_vm2 = vmmov %vm9651_vm9 }
 0x43e   : > { %v3241_v56 = vpop.permute.xlu1 %3240  ;;  %v3854_v16 = vsel %vm9652_vm3, %v3822_v4, %v3431_v21  ;;  %v3887_v36 = vsel %vm9660_vm7, %v3855_v49, %v3523_v37  ;;  %vm9665_vm13 = vmmov %vm9647_vm8 }
 0x43f   : > { %3168 = vrot.lane.b32.xlu0 %v7681_v10, %s4811_s26  ;;  %v3886_v60 = vsel %vm9654_vm4, %v3854_v16, %v3521_v12  ;;  %v2673_v12 = vrot.slane %v6946_v22, 7  ;;  %v3699_v37 = vsel %vm9665_vm13, %v7258_v5, %v7237_v34  ;;  %vm9666_vm9 = vmmov %vm9655_vm14 }
 0x440   : > { %3454 = vrot.lane.b32.xlu1 %v7681_v10, %s4814_s29  ;;  %vm9667_vm3 = vmmov %vm9653_vm12 }
 0x441   : > { %v3243_v8 = vpop.permute.xlu0 %3242  ;;  %vm9669_vm12 = vmmov %vm9663_vm11 }
 0x442   : > { %v3611_v9 = vpop.permute.xlu1 %3610  ;;  %vm9670_vm4 = vmmov %vm9656_vm5 }
 0x443   : > { %v3918_v54 = vsel %vm9657_vm10, %v3886_v60, %v3611_v9  ;;  %3544 = vrot.lane.b32.xlu0 %v6936_v43, %s4815_s15  ;;  %vm9671_vm14 = vmmov %vm9664_vm2 }
 0x444   : > { %3456 = vrot.lane.b32.xlu1 %v7703_v24, %s4814_s29  ;;  %4661 = vmatprep.mubr.msk.f32.mxu1 %vm9659_vm0, %v3918_v54  ;;  %vm9672_vm5 = vmmov %vm9658_vm6 }
 0x445   : > { %v3613_v58 = vpop.permute.xlu0 %3612  ;;  %vm9675_vm6 = vmmov %vm9667_vm3 }
 0x446   : > { %v3919_v11 = vsel %vm9661_vm15, %v3887_v36, %v3613_v58  ;;  %v3339_v45 = vpop.permute.xlu1 %3338  ;;  %vm9676_vm0 = vmmov %vm9660_vm7  ;;  %v9685_v36 = vld [vmem:[#allocation29_spill] sm:$0xff]  ;;  %v9686_v58 = vld [vmem:[#allocation58_spill] sm:$0xff] }
 0x447   : > { %3264 = vrot.lane.b32.xlu0 %v6936_v43, %s4812_s27  ;;  %4662 = vmatmul.mubr.msk.f32.gmra.mrb[2].mxu1 %vm9662_vm1, %v3919_v11  ;;  %v3698_v43 = vsel %vm9647_vm8, %v7265_v18, %v7243_v55  ;;  %v9668_v18 = vld [vmem:[#allocation139_spill] sm:$0xff]  ;;  %vm9678_vm7 = vmmov %vm9670_vm4  ;;  %vm9680_vm8 = vcmask 293888  }
 0x448   : > { %3170 = vrot.lane.b32.xlu1 %v7703_v24, %s4811_s26  ;;  %v3728_v41 = vsel %vm9663_vm11, %v3698_v43, %v7450_v47  ;;  %vm9679_vm1 = vmmov %vm9672_vm5 }
 0x449   : > { %v3435_v3 = vpop.permute.xlu0 %3434  ;;  %v3760_v59 = vsel %vm9664_vm2, %v3728_v41, %v7574_v19  ;;  %v9673_v19 = vld [vmem:[#allocation79_spill] sm:$0xff]  ;;  %vm9681_vm11 = vmmov %vm9676_vm0 }
 0x44a   : > { %v3341_v21 = vpop.permute.xlu1 %3340  ;;  %v3792_v14 = vsel %vm9667_vm3, %v3760_v59, %v3241_v56  ;;  %vm9674_vm10 = vnez %v9673_v19  ;;  %vm9682_vm2 = vmmov %vm9661_vm15  ;;  %vm9687_vm3 = vcmask 31744  }
 0x44b   : > { %3634 = vrot.lane.b32.xlu0 %v7142_v48, %s4816_s16  ;;  %v3824_v55 = vsel %vm9670_vm4, %v3792_v14, %v3339_v45  ;;  %vm9683_vm13 = vmmov %vm9666_vm9  ;;  %v3700_v11 = vsel %vm9687_vm3, %v7283_v25, %v9686_v58 }
 0x44c   : > { %3546 = vrot.lane.b32.xlu1 %v6934_v46, %s4815_s15  ;;  %v3856_v34 = vsel %vm9672_vm5, %v3824_v55, %v3435_v3  ;;  %v3730_v45 = vsel %vm9669_vm12, %v3700_v11, %v7458_v26  ;;  %vm9688_vm4 = vmmov %vm9671_vm14 }
 0x44d   : > { %v3525_v31 = vpop.permute.xlu0 %3524  ;;  %vm9692_vm5 = vmmov %vm9675_vm6 }
 0x44e   : > { %v3437_v28 = vpop.permute.xlu1 %3436  ;;  %v3888_v13 = vsel %vm9676_vm0, %v3856_v34, %v3525_v31  ;;  %v9689_v31 = vld [vmem:[#allocation50_spill] sm:$0xff]  ;;  %vm9695_vm0 = vmmov %vm9688_vm4 }
 0x44f   : > { %3362 = vrot.lane.b32.xlu0 %v7142_v48, %s4813_s28  ;;  %v2674_v48 = vsel %vm9666_vm9, %v2671_v29, %v2673_v12  ;;  %v9677_v29 = vld [vmem:[#allocation42_spill] sm:$0xff]  ;;  %vm9684_vm9 = vmmov %vm9680_vm8 }
 0x450   : > { %3266 = vrot.lane.b32.xlu1 %v6934_v46, %s4812_s27  ;;  %v3729_v46 = vsel %vm9669_vm12, %v3699_v37, %v7448_v52  ;;  %v7753_v32 = vsel %vm9674_vm10, %v2674_v48, 0.0  ;;  %v2675_v23 = vrot.slane %v9677_v29, 7  ;;  %vm9693_vm10 = vmmov %vm9669_vm12 }
 0x451   : > { %v3527_v62 = vpop.permute.xlu0 %3526  ;;  %v3761_v47 = vsel %vm9671_vm14, %v3729_v46, %v7572_v53  ;;  %vm9690_vm14 = vmmov %vm9687_vm3 }
 0x452   : > { %v3245_v6 = vpop.permute.xlu1 %3244  ;;  %v3793_v56 = vsel %vm9675_vm6, %v3761_v47, %v3243_v8  ;;  %v7769_v60 = vsel %vm9683_vm13, %v2673_v12, %v2675_v23  ;;  %v9691_v12 = vld [vmem:[#allocation38_spill] sm:$0xff]  ;;  %vm9694_vm6 = vmmov %vm9678_vm7  ;;  %v9704_v47 = vld [vmem:[#allocation84_spill] sm:$0xff] }
 0x453   : > { %3364 = vrot.lane.b32.xlu0 %v9668_v18, %s4813_s28  ;;  %v3825_v40 = vsel %vm9678_vm7, %v3793_v56, %v3341_v21  ;;  %v2677_v43 = vrot.slane %v9691_v12, 7  ;;  %vm9696_vm7 = vmmov %vm9679_vm1  ;;  %vm9705_vm12 = vnez %v9704_v47  ;;  %v9707_v56 = vld [vmem:[#allocation32_spill] sm:$0xff] }
 0x454   : > { %3636 = vrot.lane.b32.xlu1 %v9668_v18, %s4816_s16  ;;  %v3857_v53 = vsel %vm9679_vm1, %v3825_v40, %v3437_v28  ;;  %v3701_v28 = vsel %vm9690_vm14, %v7276_v39, %v9689_v31  ;;  %vm9698_vm1 = vmmov %vm9681_vm11  ;;  %v9701_v18 = vld [vmem:[#allocation27_spill] sm:$0xff] }
 0x455   : > { %v3247_v5 = vpop.permute.xlu0 %3246  ;;  %v3889_v35 = vsel %vm9681_vm11, %v3857_v53, %v3527_v62  ;;  %v3731_v25 = vsel %vm9693_vm10, %v3701_v28, %v7456_v51  ;;  %vm9700_vm11 = vmmov %vm9694_vm6  ;;  %v9710_v53 = vld [vmem:[#allocation62_spill] sm:$0xff]  ;;  %vm9711_vm10 = vcmask 31744  }
 0x456   : > { %v3615_v52 = vpop.permute.xlu1 %3614  ;;  %vm9703_vm3 = vmmov %vm9698_vm1 }
 0x457   : > { %v3920_v4 = vsel %vm9661_vm15, %v3888_v13, %v3615_v52  ;;  %3172 = vrot.lane.b32.xlu0 %v7753_v32, %s4811_s26  ;;  %vm9697_vm15 = vmmov %vm9692_vm5  ;;  %v2679_v13 = vrot.slane %v9707_v56, 7 }
 0x458   : > { %3458 = vrot.lane.b32.xlu1 %v7753_v32, %s4814_s29  ;;  %4664 = vmatprep.mubr.msk.f32.mxu1 %vm9680_vm8, %v3920_v4  ;;  %vm9699_vm8 = vmmov %vm9683_vm13 }
 0x459   : > { %v3617_v16 = vpop.permute.xlu0 %3616  ;;  %v2678_v48 = vsel %vm9699_vm8, %v2675_v23, %v2677_v43  ;;  %vm9702_vm13 = vmmov %vm9696_vm7 }
 0x45a   : > { %v3921_v8 = vsel %vm9682_vm2, %v3889_v35, %v3617_v16  ;;  %v3343_v63 = vpop.permute.xlu1 %3342  ;;  %v7820_v34 = vsel %vm9705_vm12, %v2678_v48, 0.0  ;;  %vm9708_vm14 = vmmov %vm9684_vm9  ;;  %v3702_v35 = vsel %vm9711_vm10, %v7301_v1, %v9710_v53 }
 0x45b   : > { %3548 = vrot.lane.b32.xlu0 %v6946_v22, %s4815_s15  ;;  %4665 = vmatmul.mubr.msk.f32.gmra.mrb[4].mxu1 %vm9684_vm9, %v3921_v8 }
 0x45c   : > { %3460 = vrot.lane.b32.xlu1 %v7769_v60, %s4814_s29 }
 0x45d   : > { %v3439_v9 = vpop.permute.xlu0 %3438 }
 0x45e   : > { %v3345_v50 = vpop.permute.xlu1 %3344 }
 0x45f   : > { %3268 = vrot.lane.b32.xlu0 %v6946_v22, %s4812_s27  ;;  %v3762_v22 = vsel %vm9688_vm4, %v3730_v45, %v7582_v7  ;;  %v3763_v7 = vsel %vm9695_vm0, %v3731_v25, %v7580_v2  ;;  %vm9706_vm4 = vmmov %vm9682_vm2 }
 0x460   : > { %3174 = vrot.lane.b32.xlu1 %v7769_v60, %s4811_s26  ;;  %v3794_v41 = vsel %vm9692_vm5, %v3762_v22, %v3245_v6  ;;  %v3795_v59 = vsel %vm9697_vm15, %v3763_v7, %v3247_v5  ;;  %vm9709_vm5 = vmmov %vm9699_vm8  ;;  %v9722_v22 = vld [vmem:[#allocation36_spill] sm:$0xff] }
 0x461   : > { %v3529_v54 = vpop.permute.xlu0 %3528  ;;  %v3826_v26 = vsel %vm9694_vm6, %v3794_v41, %v3343_v63  ;;  %v3827_v51 = vsel %vm9700_vm11, %v3795_v59, %v3345_v50  ;;  %v7830_v23 = vsel %vm9709_vm5, %v2677_v43, %v2679_v13  ;;  %vm9712_vm6 = vcmask 64512   ;;  %v9713_v50 = vld [vmem:[#allocation51_spill] sm:$0xff]  ;;  %vm9717_vm8 = vmmov %vm9700_vm11 }
 0x462   : > { %v3441_v49 = vpop.permute.xlu1 %3440  ;;  %v3858_v39 = vsel %vm9696_vm7, %v3826_v26, %v3439_v9  ;;  %v3732_v16 = vsel %vm9712_vm6, %v3702_v35, %v7466_v38  ;;  %vm9714_vm7 = vmmov %vm9711_vm10  ;;  %v9729_v26 = vld [vmem:[#allocation45_spill] sm:$0xff] }
 0x463   : > { %3638 = vrot.lane.b32.xlu0 %v9685_v36, %s4816_s16  ;;  %v3890_v6 = vsel %vm9698_vm1, %v3858_v39, %v3529_v54  ;;  %v3859_v46 = vsel %vm9702_vm13, %v3827_v51, %v3441_v49  ;;  %v3764_v63 = vsel %vm9695_vm0, %v3732_v16, %v7590_v33  ;;  %v3703_v54 = vsel %vm9714_vm7, %v7294_v0, %v9713_v50  ;;  %vm9716_vm1 = vmmov %vm9712_vm6  ;;  %v9731_v39 = vld [vmem:[#allocation89_spill] sm:$0xff]  ;;  %v9750_v50 = vld [vmem:[#allocation26_spill] sm:$0xff] }
 0x464   : > { %3550 = vrot.lane.b32.xlu1 %v9677_v29, %s4815_s15  ;;  %v3733_v1 = vsel %vm9716_vm1, %v3703_v54, %v7464_v20  ;;  %vm9718_vm11 = vmmov %vm9695_vm0  ;;  %vm9728_vm6 = vcmask 1040384   ;;  %vm9732_vm7 = vnez %v9731_v39  ;;  %vm9736_vm1 = vcmask 31744   ;;  %v9745_v35 = vld [vmem:[#allocation57_spill] sm:$0xff] }
 0x465   : > { %v3531_v3 = vpop.permute.xlu0 %3530  ;;  %v3765_v38 = vsel %vm9718_vm11, %v3733_v1, %v7588_v42  ;;  %vm9724_vm12 = vmmov %vm9706_vm4  ;;  %v2685_v54 = vrot.slane %v9750_v50, 7 }
 0x466   : > { %v3249_v21 = vpop.permute.xlu1 %3248  ;;  %v3891_v2 = vsel %vm9703_vm3, %v3859_v46, %v3531_v3  ;;  %vm9727_vm10 = vmmov %vm9724_vm12 }
 0x467   : > { %3366 = vrot.lane.b32.xlu0 %v9685_v36, %s4813_s28  ;;  %v3796_v49 = vsel %vm9697_vm15, %v3764_v63, %v3249_v21  ;;  %v9715_v36 = vld [vmem:[#allocation53_spill] sm:$0xff]  ;;  %v2681_v21 = vrot.slane %v9722_v22, 7  ;;  %vm9730_vm0 = vmmov %vm9708_vm14 }
 0x468   : > { %3270 = vrot.lane.b32.xlu1 %v9677_v29, %s4812_s27 }
 0x469   : > { %v3251_v62 = vpop.permute.xlu0 %3250  ;;  %v2682_v25 = vsel %vm9728_vm6, %v2679_v13, %v2681_v21 }
 0x46a   : > { %v3619_v37 = vpop.permute.xlu1 %3618 }
 0x46b   : > { %v3922_v14 = vsel %vm9682_vm2, %v3890_v6, %v3619_v37  ;;  %3368 = vrot.lane.b32.xlu0 %v9701_v18, %s4813_s28  ;;  %vm9719_vm2 = vmmov %vm9702_vm13  ;;  %v9733_v6 = vld [vmem:[#allocation106_spill] sm:$0xff] }
 0x46c   : > { %3640 = vrot.lane.b32.xlu1 %v9701_v18, %s4816_s16  ;;  %4667 = vmatprep.mubr.msk.f32.mxu1 %vm9684_vm9, %v3922_v14  ;;  %vm9720_vm13 = vmmov %vm9697_vm15  ;;  %v2683_v37 = vrot.slane %v9733_v6, 7  ;;  %v9735_v18 = vld [vmem:[#allocation116_spill] sm:$0xff] }
 0x46d   : > { %v3621_v55 = vpop.permute.xlu0 %3620  ;;  %v3797_v0 = vsel %vm9720_vm13, %v3765_v38, %v3251_v62  ;;  %vm9721_vm9 = vmmov %vm9703_vm3  ;;  %v7882_v62 = vsel %vm9732_vm7, %v2682_v25, 0.0  ;;  %v3704_v46 = vsel %vm9736_vm1, %v7319_v30, %v9735_v18  ;;  %vm9747_vm7 = vcmask 293888   ;;  %v9771_v18 = vld [vmem:[#allocation154_spill] sm:$0xff] }
 0x46e   : > { %v3923_v5 = vsel %vm9706_vm4, %v3891_v2, %v3621_v55  ;;  %v3347_v19 = vpop.permute.xlu1 %3346  ;;  %vm9723_vm3 = vmmov %vm9717_vm8 }
 0x46f   : > { %3176 = vrot.lane.b32.xlu0 %v7820_v34, %s4811_s26  ;;  %4668 = vmatmul.mubr.msk.f32.gmra.mrb[6].mxu1 %vm9708_vm14, %v3923_v5  ;;  %v3828_v58 = vsel %vm9717_vm8, %v3796_v49, %v3347_v19  ;;  %vm9725_vm4 = vmmov %vm9719_vm2  ;;  %vm9737_vm8 = vcmask 64512   ;;  %v9738_v19 = vld [vmem:[#allocation115_spill] sm:$0xff] }
 0x470   : > { %3462 = vrot.lane.b32.xlu1 %v7820_v34, %s4814_s29  ;;  %vm9726_vm5 = vmmov %vm9721_vm9  ;;  %v3734_v2 = vsel %vm9737_vm8, %v3704_v46, %v7474_v61 }
 0x471   : > { %v3443_v52 = vpop.permute.xlu0 %3442  ;;  %vm9734_vm15 = vmmov %vm9728_vm6  ;;  %v3766_v47 = vsel %vm9718_vm11, %v3734_v2, %v7598_v44  ;;  %vm9744_vm6 = vcmask 261120   ;;  %v9773_v2 = vld [vmem:[#allocation158_spill] sm:$0xff] }
 0x472   : > { %v3349_v29 = vpop.permute.xlu1 %3348  ;;  %v3860_v33 = vsel %vm9719_vm2, %v3828_v58, %v3443_v52  ;;  %v7890_v14 = vsel %vm9734_vm15, %v2681_v21, %v2683_v37  ;;  %vm9739_vm2 = vmmov %vm9736_vm1  ;;  %v9753_v58 = vld [vmem:[#allocation46_spill] sm:$0xff]  ;;  %v9759_v21 = vld [vmem:[#allocation37_spill] sm:$0xff] }
 0x473   : > { %3552 = vrot.lane.b32.xlu0 %v9691_v12, %s4815_s15  ;;  %v3829_v20 = vsel %vm9723_vm3, %v3797_v0, %v3349_v29  ;;  %vm9748_vm15 = vmmov %vm9726_vm5 }
 0x474   : > { %3464 = vrot.lane.b32.xlu1 %v7830_v23, %s4814_s29  ;;  %vm9749_vm1 = vmmov %vm9744_vm6 }
 0x475   : > { %v3533_v40 = vpop.permute.xlu0 %3532 }
 0x476   : > { %v3445_v4 = vpop.permute.xlu1 %3444  ;;  %v3892_v45 = vsel %vm9721_vm9, %v3860_v33, %v3533_v40  ;;  %vm9740_vm9 = vmmov %vm9737_vm8  ;;  %v9754_v33 = vld [vmem:[#allocation94_spill] sm:$0xff] }
 0x477   : > { %3272 = vrot.lane.b32.xlu0 %v9691_v12, %s4812_s27  ;;  %v3861_v28 = vsel %vm9725_vm4, %v3829_v20, %v3445_v4  ;;  %vm9751_vm8 = vmmov %vm9747_vm7  ;;  %v2687_v20 = vrot.slane %v9759_v21, 7 }
 0x478   : > { %3178 = vrot.lane.b32.xlu1 %v7830_v23, %s4811_s26 }
 0x479   : > { %v3535_v8 = vpop.permute.xlu0 %3534 }
 0x47a   : > { %v3253_v9 = vpop.permute.xlu1 %3252  ;;  %v3893_v42 = vsel %vm9726_vm5, %v3861_v28, %v3535_v8 }
 0x47b   : > { %3642 = vrot.lane.b32.xlu0 %v9715_v36, %s4816_s16  ;;  %v3798_v13 = vsel %vm9720_vm13, %v3766_v47, %v3253_v9 }
 0x47c   : > { %3554 = vrot.lane.b32.xlu1 %v9707_v56, %s4815_s15 }
 0x47d   : > { %v3255_v11 = vpop.permute.xlu0 %3254 }
 0x47e   : > { %v3623_v3 = vpop.permute.xlu1 %3622 }
 0x47f   : > { %v3924_v31 = vsel %vm9724_vm12, %v3892_v45, %v3623_v3  ;;  %3370 = vrot.lane.b32.xlu0 %v9715_v36, %s4813_s28  ;;  %vm9741_vm12 = vmmov %vm9718_vm11  ;;  %vm9752_vm11 = vcmask 1040384   ;;  %v9756_v45 = vld [vmem:[#allocation143_spill] sm:$0xff] }
 0x480   : > { %3274 = vrot.lane.b32.xlu1 %v9707_v56, %s4812_s27  ;;  %4670 = vmatprep.mubr.msk.f32.mxu1 %vm9708_vm14, %v3924_v31  ;;  %v3705_v56 = vsel %vm9739_vm2, %v7312_v17, %v9738_v19  ;;  %vm9742_vm14 = vmmov %vm9720_vm13  ;;  %v2686_v1 = vsel %vm9752_vm11, %v2683_v37, %v2685_v54  ;;  %vm9755_vm2 = vnez %v9754_v33  ;;  %v9757_v3 = vld [vmem:[#allocation55_spill] sm:$0xff]  ;;  %vm9758_vm13 = vcmask 31744  }
 0x481   : > { %v3625_v12 = vpop.permute.xlu0 %3624  ;;  %v3735_v30 = vsel %vm9740_vm9, %v3705_v56, %v7472_v27  ;;  %v9760_v31 = vld [vmem:[#allocation175_spill] sm:$0xff] }
 0x482   : > { %v3925_v43 = vsel %vm9727_vm10, %v3893_v42, %v3625_v12  ;;  %v3351_v41 = vpop.permute.xlu1 %3350  ;;  %v3767_v44 = vsel %vm9741_vm12, %v3735_v30, %v7596_v15  ;;  %vm9743_vm10 = vmmov %vm9723_vm3  ;;  %v9761_v42 = vld [vmem:[#allocation151_spill] sm:$0xff]  ;;  %v9778_v30 = vld [vmem:[#allocation114_spill] sm:$0xff] }
 0x483   : > { %3372 = vrot.lane.b32.xlu0 %v9729_v26, %s4813_s28  ;;  %4671 = vmatmul.mubr.msk.f32.gmra.mrb[8].mxu1 %vm9730_vm0, %v3925_v43  ;;  %v3830_v52 = vsel %vm9723_vm3, %v3798_v13, %v3351_v41  ;;  %v3799_v17 = vsel %vm9742_vm14, %v3767_v44, %v3255_v11  ;;  %vm9746_vm0 = vmmov %vm9725_vm4  ;;  %v7942_v11 = vsel %vm9755_vm2, %v2686_v1, 0.0  ;;  %v9792_v1 = vld [vmem:[#allocation40_spill] sm:$0xff] }
 0x484   : > { %3644 = vrot.lane.b32.xlu1 %v9729_v26, %s4816_s16  ;;  %vm9762_vm3 = vmmov %vm9741_vm12 }
 0x485   : > { %v3447_v7 = vpop.permute.xlu0 %3446  ;;  %vm9763_vm12 = vmmov %vm9742_vm14 }
 0x486   : > { %v3353_v59 = vpop.permute.xlu1 %3352  ;;  %v3862_v61 = vsel %vm9725_vm4, %v3830_v52, %v3447_v7  ;;  %vm9764_vm4 = vmmov %vm9752_vm11 }
 0x487   : > { %3180 = vrot.lane.b32.xlu0 %v7882_v62, %s4811_s26  ;;  %v3831_v53 = vsel %vm9743_vm10, %v3799_v17, %v3353_v59  ;;  %v7960_v26 = vsel %vm9764_vm4, %v2685_v54, %v2687_v20  ;;  %vm9765_vm14 = vmmov %vm9743_vm10  ;;  %v9789_v54 = vld [vmem:[#allocation174_spill] sm:$0xff] }
 0x488   : > { %3466 = vrot.lane.b32.xlu1 %v7882_v62, %s4814_s29  ;;  %vm9767_vm10 = vmmov %vm9748_vm15 }
 0x489   : > { %v3537_v48 = vpop.permute.xlu0 %3536  ;;  %vm9779_vm11 = vmmov %vm9765_vm14 }
 0x48a   : > { %v3449_v51 = vpop.permute.xlu1 %3448  ;;  %v3894_v40 = vsel %vm9726_vm5, %v3862_v61, %v3537_v48  ;;  %vm9766_vm5 = vmmov %vm9746_vm0 }
 0x48b   : > { %3556 = vrot.lane.b32.xlu0 %v9722_v22, %s4815_s15  ;;  %v3863_v16 = vsel %vm9746_vm0, %v3831_v53, %v3449_v51  ;;  %vm9769_vm0 = vmmov %vm9747_vm7  ;;  %v9770_v51 = vld [vmem:[#allocation140_spill] sm:$0xff] }
 0x48c   : > { %3468 = vrot.lane.b32.xlu1 %v7890_v14, %s4814_s29  ;;  %vm9780_vm2 = vmmov %vm9766_vm5 }
 0x48d   : > { %v3539_v55 = vpop.permute.xlu0 %3538 }
 0x48e   : > { %v3257_v5 = vpop.permute.xlu1 %3256  ;;  %v3895_v15 = vsel %vm9748_vm15, %v3863_v16, %v3539_v55  ;;  %vm9774_vm15 = vmmov %vm9740_vm9 }
 0x48f   : > { %3276 = vrot.lane.b32.xlu0 %v9722_v22, %s4812_s27  ;;  %v3706_v22 = vsel %vm9758_vm13, %v9757_v3, %v9756_v45 }
 0x490   : > { %3182 = vrot.lane.b32.xlu1 %v7890_v14, %s4811_s26  ;;  %v3736_v28 = vsel %vm9740_vm9, %v3706_v22, %v9760_v31 }
 0x491   : > { %v3259_v29 = vpop.permute.xlu0 %3258  ;;  %v3768_v12 = vsel %vm9762_vm3, %v3736_v28, %v9761_v42 }
 0x492   : > { %v3627_v4 = vpop.permute.xlu1 %3626  ;;  %v3800_v41 = vsel %vm9763_vm12, %v3768_v12, %v3257_v5  ;;  %v9775_v5 = vld [vmem:[#allocation148_spill] sm:$0xff] }
 0x493   : > { %v3926_v27 = vsel %vm9744_vm6, %v3894_v40, %v3627_v4  ;;  %3646 = vrot.lane.b32.xlu0 %v9745_v35, %s4816_s16  ;;  %vm9768_vm6 = vmmov %vm9749_vm1  ;;  %v9782_v4 = vld [vmem:[#allocation48_spill] sm:$0xff] }
 0x494   : > { %3558 = vrot.lane.b32.xlu1 %v9733_v6, %s4815_s15  ;;  %4673 = vmatprep.mubr.msk.f32.mxu1 %vm9747_vm7, %v3926_v27  ;;  %vm9772_vm7 = vmmov %vm9758_vm13  ;;  %v2689_v53 = vrot.slane %v9782_v4, 7 }
 0x495   : > { %v3629_v8 = vpop.permute.xlu0 %3628  ;;  %v3707_v46 = vsel %vm9772_vm7, %v9771_v18, %v9770_v51  ;;  %vm9781_vm13 = vmmov %vm9767_vm10 }
 0x496   : > { %v3927_v63 = vsel %vm9749_vm1, %v3895_v15, %v3629_v8  ;;  %v3355_v9 = vpop.permute.xlu1 %3354  ;;  %v3737_v55 = vsel %vm9774_vm15, %v3707_v46, %v9773_v2  ;;  %vm9776_vm1 = vmmov %vm9762_vm3  ;;  %v9786_v15 = vld [vmem:[#allocation113_spill] sm:$0xff] }
 0x497   : > { %3374 = vrot.lane.b32.xlu0 %v9745_v35, %s4813_s28  ;;  %4674 = vmatmul.mubr.msk.f32.gmra.mrb[10].mxu1 %vm9751_vm8, %v3927_v63  ;;  %v3832_v7 = vsel %vm9765_vm14, %v3800_v41, %v3355_v9  ;;  %v3769_v19 = vsel %vm9776_vm1, %v3737_v55, %v9775_v5  ;;  %vm9777_vm8 = vmmov %vm9763_vm12  ;;  %v9787_v63 = vld [vmem:[#allocation99_spill] sm:$0xff]  ;;  %v9811_v2 = vld [vmem:[#allocation141_spill] sm:$0xff] }
 0x498   : > { %3278 = vrot.lane.b32.xlu1 %v9733_v6, %s4812_s27  ;;  %v3801_v13 = vsel %vm9777_vm8, %v3769_v19, %v3259_v29  ;;  %vm9783_vm9 = vmmov %vm9768_vm6 }
 0x499   : > { %v3451_v49 = vpop.permute.xlu0 %3450  ;;  %vm9784_vm3 = vmmov %vm9769_vm0 }
 0x49a   : > { %v3357_v36 = vpop.permute.xlu1 %3356  ;;  %v3864_v39 = vsel %vm9766_vm5, %v3832_v7, %v3451_v49  ;;  %vm9785_vm12 = vmmov %vm9764_vm4  ;;  %vm9788_vm4 = vnez %v9787_v63  ;;  %v9790_v49 = vld [vmem:[#allocation117_spill] sm:$0xff]  ;;  %v9804_v7 = vld [vmem:[#allocation35_spill] sm:$0xff] }
 0x49b   : > { %3376 = vrot.lane.b32.xlu0 %v9753_v58, %s4813_s28  ;;  %v3833_v52 = vsel %vm9779_vm11, %v3801_v13, %v3357_v36  ;;  %v2690_v16 = vsel %vm9785_vm12, %v2687_v20, %v2689_v53  ;;  %vm9791_vm14 = vmmov %vm9772_vm7 }
 0x49c   : > { %3648 = vrot.lane.b32.xlu1 %v9753_v58, %s4816_s16  ;;  %v8004_v9 = vsel %vm9788_vm4, %v2690_v16, 0.0  ;;  %v3708_v36 = vsel %vm9791_vm14, %v9790_v49, %v9789_v54  ;;  %v2691_v58 = vrot.slane %v9792_v1, 7  ;;  %vm9794_vm5 = vmmov %vm9774_vm15  ;;  %v9823_v16 = vld [vmem:[#allocation145_spill] sm:$0xff] }
 0x49d   : > { %v3541_v38 = vpop.permute.xlu0 %3540  ;;  %vm9799_vm7 = vmmov %vm9779_vm11 }
 0x49e   : > { %v3453_v0 = vpop.permute.xlu1 %3452  ;;  %v3896_v59 = vsel %vm9767_vm10, %v3864_v39, %v3541_v38  ;;  %v9793_v38 = vld [vmem:[#allocation73_spill] sm:$0xff]  ;;  %vm9796_vm10 = vmmov %vm9776_vm1  ;;  %v9805_v39 = vld [vmem:[#allocation56_spill] sm:$0xff] }
 0x49f   : > { %3184 = vrot.lane.b32.xlu0 %v7942_v11, %s4811_s26  ;;  %v3865_v44 = vsel %vm9780_vm2, %v3833_v52, %v3453_v0  ;;  %v3738_v33 = vsel %vm9794_vm5, %v3708_v36, %v9793_v38  ;;  %v9795_v0 = vld [vmem:[#allocation159_spill] sm:$0xff]  ;;  %vm9800_vm15 = vmmov %vm9780_vm2 }
 0x4a0   : > { %3470 = vrot.lane.b32.xlu1 %v7942_v11, %s4814_s29  ;;  %v3770_v45 = vsel %vm9796_vm10, %v3738_v33, %v9795_v0  ;;  %vm9801_vm1 = vmmov %vm9781_vm13 }
 0x4a1   : > { %v3261_v43 = vpop.permute.xlu0 %3260  ;;  %vm9803_vm11 = vmmov %vm9784_vm3 }
 0x4a2   : > { %v7957_v25 = vpop.permute.xlu1 %3166  ;;  %vm9806_vm2 = vmmov %vm9791_vm14 }
 0x4a3   : > { %3560 = vrot.lane.b32.xlu0 %v9750_v50, %s4815_s15  ;;  %vm9813_vm4 = vmmov %vm9800_vm15 }
 0x4a4   : > { %3472 = vrot.lane.b32.xlu1 %v7960_v26, %s4814_s29  ;;  %vm9814_vm14 = vmmov %vm9801_vm1 }
 0x4a5   : > { %v3631_v6 = vpop.permute.xlu0 %3630 }
 0x4a6   : > { %v3928_v37 = vsel %vm9768_vm6, %v3896_v59, %v3631_v6  ;;  %v3543_v48 = vpop.permute.xlu1 %3542  ;;  %vm9797_vm6 = vmmov %vm9777_vm8  ;;  %v3709_v59 = vsel %vm9806_vm2, %v9805_v39, %v9804_v7  ;;  %v9807_v6 = vld [vmem:[#allocation65_spill] sm:$0xff] }
 0x4a7   : > { %3280 = vrot.lane.b32.xlu0 %v9750_v50, %s4812_s27  ;;  %4676 = vmatprep.mubr.msk.f32.mxu1 %vm9769_vm0, %v3928_v37  ;;  %v3897_v17 = vsel %vm9781_vm13, %v3865_v44, %v3543_v48  ;;  %v3802_v22 = vsel %vm9797_vm6, %v3770_v45, %v3261_v43  ;;  %vm9798_vm0 = vmmov %vm9785_vm12 }
 0x4a8   : > { %3186 = vrot.lane.b32.xlu1 %v7960_v26, %s4811_s26  ;;  %v8022_v20 = vsel %vm9798_vm0, %v2689_v53, %v2691_v58  ;;  %vm9802_vm8 = vmmov %vm9783_vm9 }
 0x4a9   : > { %v3359_v47 = vpop.permute.xlu0 %3358  ;;  %vm9808_vm13 = vmmov %vm9794_vm5 }
 0x4aa   : > { %v3263_v56 = vpop.permute.xlu1 %3262  ;;  %v3834_v31 = vsel %vm9799_vm7, %v3802_v22, %v3359_v47  ;;  %v3739_v37 = vsel %vm9808_vm13, %v3709_v59, %v9807_v6  ;;  %vm9812_vm12 = vmmov %vm9799_vm7  ;;  %v9842_v59 = vld [vmem:[#allocation43_spill] sm:$0xff] }
 0x4ab   : > { %3650 = vrot.lane.b32.xlu0 %v9778_v30, %s4816_s16  ;;  %vm9816_vm5 = vmmov %vm9802_vm8 }
 0x4ac   : > { %3562 = vrot.lane.b32.xlu1 %v9759_v21, %s4815_s15  ;;  %vm9824_vm7 = vmmov %vm9806_vm2 }
 0x4ad   : > { %v3361_v61 = vpop.permute.xlu0 %3360  ;;  %vm9831_vm2 = vmmov %vm9812_vm12 }
 0x4ae   : > { %v3633_v40 = vpop.permute.xlu1 %3632 }
 0x4af   : > { %v3929_v27 = vsel %vm9783_vm9, %v3897_v17, %v3633_v40  ;;  %3378 = vrot.lane.b32.xlu0 %v9778_v30, %s4813_s28  ;;  %vm9809_vm9 = vmmov %vm9796_vm10  ;;  %v9815_v30 = vld [vmem:[#allocation52_spill] sm:$0xff]  ;;  %v9819_v17 = vld [vmem:[#allocation138_spill] sm:$0xff] }
 0x4b0   : > { %3282 = vrot.lane.b32.xlu1 %v9759_v21, %s4812_s27  ;;  %4677 = vmatmul.mubr.msk.f32.gmra.mrb[12].mxu1 %vm9784_vm3, %v3929_v27  ;;  %v3771_v51 = vsel %vm9809_vm9, %v3739_v37, %v7957_v25  ;;  %vm9810_vm3 = vmmov %vm9797_vm6  ;;  %v2693_v52 = vrot.slane %v9815_v30, 7 }
 0x4b1   : > { %v3169_v29 = vpop.permute.xlu0 %3168  ;;  %v3803_v46 = vsel %vm9810_vm3, %v3771_v51, %v3263_v56  ;;  %vm9817_vm10 = vmmov %vm9803_vm11 }
 0x4b2   : > { %v3455_v35 = vpop.permute.xlu1 %3454  ;;  %v3835_v55 = vsel %vm9812_vm12, %v3803_v46, %v3361_v61  ;;  %vm9818_vm6 = vmmov %vm9798_vm0 }
 0x4b3   : > { %3380 = vrot.lane.b32.xlu0 %v9786_v15, %s4813_s28  ;;  %v3866_v28 = vsel %vm9800_vm15, %v3834_v31, %v3455_v35  ;;  %v2694_v61 = vsel %vm9818_vm6, %v2691_v58, %v2693_v52  ;;  %v9822_v35 = vld [vmem:[#allocation67_spill] sm:$0xff]  ;;  %vm9827_vm15 = vmmov %vm9808_vm13 }
 0x4b4   : > { %3652 = vrot.lane.b32.xlu1 %v9786_v15, %s4816_s16  ;;  %v3710_v15 = vsel %vm9824_vm7, %v9823_v16, %v9822_v35  ;;  %vm9832_vm13 = vmmov %vm9813_vm4  ;;  %v9836_v31 = vld [vmem:[#allocation63_spill] sm:$0xff] }
 0x4b5   : > { %v3545_v8 = vpop.permute.xlu0 %3544  ;;  %vm9835_vm12 = vmmov %vm9817_vm10 }
 0x4b6   : > { %v3457_v50 = vpop.permute.xlu1 %3456  ;;  %v3898_v42 = vsel %vm9801_vm1, %v3866_v28, %v3545_v8  ;;  %v9825_v8 = vld [vmem:[#allocation41_spill] sm:$0xff]  ;;  %vm9828_vm1 = vmmov %vm9809_vm9 }
 0x4b7   : > { %3188 = vrot.lane.b32.xlu0 %v8004_v9, %s4811_s26  ;;  %v3867_v47 = vsel %vm9813_vm4, %v3835_v55, %v3457_v50  ;;  %v2695_v63 = vrot.slane %v9825_v8, 7  ;;  %v9826_v50 = vld [vmem:[#allocation77_spill] sm:$0xff]  ;;  %vm9833_vm9 = vmmov %vm9814_vm14 }
 0x4b8   : > { %3474 = vrot.lane.b32.xlu1 %v8004_v9, %s4814_s29  ;;  %v3740_v54 = vsel %vm9827_vm15, %v3710_v15, %v9826_v50  ;;  %vm9837_vm4 = vmmov %vm9824_vm7 }
 0x4b9   : > { %v3265_v3 = vpop.permute.xlu0 %3264  ;;  %v3772_v49 = vsel %vm9828_vm1, %v3740_v54, %v3169_v29  ;;  %v3711_v28 = vsel %vm9837_vm4, %v7636_v57, %v9836_v31  ;;  %vm9845_vm7 = vmmov %vm9833_vm9  ;;  %v9872_v31 = vld [vmem:[#allocation137_spill] sm:$0xff] }
 0x4ba   : > { %v8019_v21 = vpop.permute.xlu1 %3170 }
 0x4bb   : > { %3564 = vrot.lane.b32.xlu0 %v9782_v4, %s4815_s15 }
 0x4bc   : > { %3476 = vrot.lane.b32.xlu1 %v8022_v20, %s4814_s29 }
 0x4bd   : > { %v3635_v12 = vpop.permute.xlu0 %3634 }
 0x4be   : > { %v3930_v43 = vsel %vm9802_vm8, %v3898_v42, %v3635_v12  ;;  %v3547_v41 = vpop.permute.xlu1 %3546  ;;  %vm9829_vm8 = vmmov %vm9810_vm3  ;;  %v9838_v42 = vld [vmem:[#allocation66_spill] sm:$0xff] }
 0x4bf   : > { %3284 = vrot.lane.b32.xlu0 %v9782_v4, %s4812_s27  ;;  %4679 = vmatprep.mubr.msk.f32.mxu1 %vm9803_vm11, %v3930_v43  ;;  %v3899_v19 = vsel %vm9814_vm14, %v3867_v47, %v3547_v41  ;;  %v9820_v4 = vld [vmem:[#allocation104_spill] sm:$0xff]  ;;  %vm9830_vm11 = vmmov %vm9818_vm6  ;;  %v9849_v47 = vld [vmem:[#allocation30_spill] sm:$0xff] }
 0x4c0   : > { %3190 = vrot.lane.b32.xlu1 %v8022_v20, %s4811_s26  ;;  %vm9821_vm0 = vnez %v9820_v4  ;;  %v8083_v38 = vsel %vm9830_vm11, %v2693_v52, %v2695_v63  ;;  %vm9834_vm3 = vmmov %vm9816_vm5 }
 0x4c1   : > { %v3363_v48 = vpop.permute.xlu0 %3362  ;;  %v8066_v53 = vsel %vm9821_vm0, %v2694_v61, 0.0  ;;  %vm9839_vm14 = vmmov %vm9827_vm15  ;;  %v9855_v61 = vld [vmem:[#allocation111_spill] sm:$0xff] }
 0x4c2   : > { %v3267_v18 = vpop.permute.xlu1 %3266  ;;  %v3741_v12 = vsel %vm9839_vm14, %v3711_v28, %v9838_v42  ;;  %vm9843_vm6 = vmmov %vm9831_vm2 }
 0x4c3   : > { %3654 = vrot.lane.b32.xlu0 %v9811_v2, %s4816_s16  ;;  %vm9844_vm0 = vmmov %vm9832_vm13 }
 0x4c4   : > { %3566 = vrot.lane.b32.xlu1 %v9792_v1, %s4815_s15  ;;  %vm9846_vm15 = vmmov %vm9834_vm3 }
 0x4c5   : > { %v3365_v5 = vpop.permute.xlu0 %3364 }
 0x4c6   : > { %v3637_v13 = vpop.permute.xlu1 %3636 }
 0x4c7   : > { %v3931_v25 = vsel %vm9816_vm5, %v3899_v19, %v3637_v13  ;;  %3382 = vrot.lane.b32.xlu0 %v9811_v2, %s4813_s28  ;;  %vm9840_vm5 = vmmov %vm9828_vm1 }
 0x4c8   : > { %3286 = vrot.lane.b32.xlu1 %v9792_v1, %s4812_s27  ;;  %4680 = vmatmul.mubr.msk.f32.gmra.mrb[14].mxu1 %vm9817_vm10, %v3931_v25  ;;  %v3804_v1 = vsel %vm9829_vm8, %v3772_v49, %v3265_v3  ;;  %v3773_v41 = vsel %vm9840_vm5, %v3741_v12, %v8019_v21  ;;  %vm9841_vm10 = vmmov %vm9829_vm8  ;;  %v9847_v21 = vld [vmem:[#allocation112_spill] sm:$0xff]  ;;  %v9853_v25 = vld [vmem:[#allocation142_spill] sm:$0xff] }
 0x4c9   : > { %v3173_v56 = vpop.permute.xlu0 %3172  ;;  %v3836_v33 = vsel %vm9831_vm2, %v3804_v1, %v3363_v48  ;;  %v3805_v39 = vsel %vm9841_vm10, %v3773_v41, %v3267_v18  ;;  %v2697_v18 = vrot.slane %v9847_v21, 7  ;;  %vm9848_vm1 = vmmov %vm9835_vm12 }
 0x4ca   : > { %v3459_v44 = vpop.permute.xlu1 %3458  ;;  %v3837_v6 = vsel %vm9843_vm6, %v3805_v39, %v3365_v5  ;;  %vm9850_vm8 = vmmov %vm9830_vm11 }
 0x4cb   : > { %3384 = vrot.lane.b32.xlu0 %v9819_v17, %s4813_s28  ;;  %v3868_v0 = vsel %vm9832_vm13, %v3836_v33, %v3459_v44  ;;  %v2698_v5 = vsel %vm9850_vm8, %v2695_v63, %v2697_v18  ;;  %vm9854_vm2 = vmmov %vm9837_vm4  ;;  %v9868_v33 = vld [vmem:[#allocation121_spill] sm:$0xff] }
 0x4cc   : > { %3656 = vrot.lane.b32.xlu1 %v9819_v17, %s4816_s16  ;;  %v3712_v44 = vsel %vm9854_vm2, %v7681_v10, %v9853_v25  ;;  %v2699_v17 = vrot.slane %v9855_v61, 7  ;;  %vm9857_vm13 = vmmov %vm9839_vm14 }
 0x4cd   : > { %v3549_v40 = vpop.permute.xlu0 %3548  ;;  %vm9861_vm4 = vmmov %vm9850_vm8 }
 0x4ce   : > { %v3461_v27 = vpop.permute.xlu1 %3460  ;;  %v3900_v29 = vsel %vm9833_vm9, %v3868_v0, %v3549_v40  ;;  %v9856_v40 = vld [vmem:[#allocation122_spill] sm:$0xff]  ;;  %vm9858_vm9 = vmmov %vm9840_vm5  ;;  %v2700_v10 = vsel %vm9861_vm4, %v2697_v18, %v2699_v17 }
 0x4cf   : > { %3192 = vrot.lane.b32.xlu0 %v8066_v53, %s4811_s26  ;;  %v3869_v57 = vsel %vm9844_vm0, %v3837_v6, %v3461_v27  ;;  %v3742_v4 = vsel %vm9857_vm13, %v3712_v44, %v9856_v40  ;;  %vm9862_vm14 = vmmov %vm9844_vm0  ;;  %v9880_v6 = vld [vmem:[#allocation22_spill] sm:$0xff] }
 0x4d0   : > { %3478 = vrot.lane.b32.xlu1 %v8066_v53, %s4814_s29  ;;  %v3774_v27 = vsel %vm9858_vm9, %v3742_v4, %v3173_v56  ;;  %vm9863_vm5 = vmmov %vm9845_vm7  ;;  %v9893_v4 = vld [vmem:[#allocation47_spill] sm:$0xff] }
 0x4d1   : > { %v3269_v36 = vpop.permute.xlu0 %3268  ;;  %vm9867_vm0 = vmmov %vm9854_vm2 }
 0x4d2   : > { %v8080_v58 = vpop.permute.xlu1 %3174  ;;  %vm9875_vm2 = vmmov %vm9863_vm5 }
 0x4d3   : > { %3568 = vrot.lane.b32.xlu0 %v9815_v30, %s4815_s15  ;;  %vm9883_vm4 = vmmov %vm9867_vm0 }
 0x4d4   : > { %3480 = vrot.lane.b32.xlu1 %v8083_v38, %s4814_s29 }
 0x4d5   : > { %v3639_v45 = vpop.permute.xlu0 %3638 }
 0x4d6   : > { %v3932_v3 = vsel %vm9834_vm3, %v3900_v29, %v3639_v45  ;;  %v3551_v22 = vpop.permute.xlu1 %3550  ;;  %vm9859_vm3 = vmmov %vm9841_vm10 }
 0x4d7   : > { %3288 = vrot.lane.b32.xlu0 %v9815_v30, %s4812_s27  ;;  %4682 = vmatprep.mubr.msk.f32.mxu1 %vm9835_vm12, %v3932_v3  ;;  %v3901_v48 = vsel %vm9845_vm7, %v3869_v57, %v3551_v22  ;;  %v9851_v30 = vld [vmem:[#allocation107_spill] sm:$0xff]  ;;  %v3806_v16 = vsel %vm9859_vm3, %v3774_v27, %v3269_v36  ;;  %vm9860_vm12 = vmmov %vm9843_vm6  ;;  %v9866_v36 = vld [vmem:[#allocation118_spill] sm:$0xff] }
 0x4d8   : > { %3194 = vrot.lane.b32.xlu1 %v8083_v38, %s4811_s26  ;;  %vm9852_vm11 = vnez %v9851_v30  ;;  %vm9864_vm10 = vmmov %vm9846_vm15  ;;  %v3713_v1 = vsel %vm9867_vm0, %v7703_v24, %v9866_v36 }
 0x4d9   : > { %v3367_v43 = vpop.permute.xlu0 %3366  ;;  %v2764_v52 = vsel %vm9852_vm11, %v2698_v5, 0.0  ;;  %vm9865_vm6 = vmmov %vm9848_vm1 }
 0x4da   : > { %v3271_v7 = vpop.permute.xlu1 %3270  ;;  %vm9869_vm7 = vmmov %vm9857_vm13 }
 0x4db   : > { %3658 = vrot.lane.b32.xlu0 %v9842_v59, %s4816_s16  ;;  %v3743_v0 = vsel %vm9869_vm7, %v3713_v1, %v9868_v33  ;;  %vm9873_vm8 = vmmov %vm9860_vm12 }
 0x4dc   : > { %3570 = vrot.lane.b32.xlu1 %v9825_v8, %s4815_s15  ;;  %vm9874_vm11 = vmmov %vm9862_vm14 }
 0x4dd   : > { %v3369_v37 = vpop.permute.xlu0 %3368  ;;  %vm9876_vm13 = vmmov %vm9864_vm10 }
 0x4de   : > { %v3641_v51 = vpop.permute.xlu1 %3640  ;;  %vm9889_vm0 = vmmov %vm9874_vm11 }
 0x4df   : > { %v3933_v46 = vsel %vm9846_vm15, %v3901_v48, %v3641_v51  ;;  %3386 = vrot.lane.b32.xlu0 %v9842_v59, %s4813_s28  ;;  %vm9870_vm15 = vmmov %vm9858_vm9  ;;  %vm9878_vm9 = vcmask 1046528   ;;  %v9882_v51 = vld [vmem:[#allocation156_spill] sm:$0xff] }
 0x4e0   : > { %3290 = vrot.lane.b32.xlu1 %v9825_v8, %s4812_s27  ;;  %4683 = vmatmul.mubr.msk.f32.gmra.mrb[16].mxu1 %vm9848_vm1, %v3933_v46  ;;  %v3838_v8 = vsel %vm9860_vm12, %v3806_v16, %v3367_v43  ;;  %v3775_v45 = vsel %vm9870_vm15, %v3743_v0, %v8080_v58  ;;  %vm9871_vm1 = vmmov %vm9859_vm3  ;;  %v9877_v58 = vrot.slane %v9855_v61, 1  ;;  %vm9881_vm12 = vnez %v9880_v6  ;;  %v9895_v16 = vld [vmem:[#allocation146_spill] sm:$0xff] }
 0x4e1   : > { %v3177_v2 = vpop.permute.xlu0 %3176  ;;  %v3807_v22 = vsel %vm9871_vm1, %v3775_v45, %v3271_v7  ;;  %vm9879_vm3 = vmmov %vm9865_vm6  ;;  %v3714_v46 = vsel %vm9883_vm4, %v7753_v32, %v9882_v51 }
 0x4e2   : > { %v3463_v55 = vpop.permute.xlu1 %3462  ;;  %v3839_v28 = vsel %vm9873_vm8, %v3807_v22, %v3369_v37  ;;  %v2861_v7 = vsel %vm9878_vm9, %v9877_v58, 0.0 }
 0x4e3   : > { %3388 = vrot.lane.b32.xlu0 %v9849_v47, %s4813_s28  ;;  %v3870_v63 = vsel %vm9862_vm14, %v3838_v8, %v3463_v55  ;;  %v2893_v57 = vsel %vm9881_vm12, %v2861_v7, 0.0  ;;  %vm9885_vm14 = vmmov %vm9869_vm7 }
 0x4e4   : > { %3660 = vrot.lane.b32.xlu1 %v9849_v47, %s4816_s16  ;;  %vm9890_vm7 = vmmov %vm9875_vm2 }
 0x4e5   : > { %v3553_v19 = vpop.permute.xlu0 %3552  ;;  %vm9901_vm12 = vmmov %vm9883_vm4 }
 0x4e6   : > { %v3465_v13 = vpop.permute.xlu1 %3464  ;;  %v3902_v50 = vsel %vm9863_vm5, %v3870_v63, %v3553_v19  ;;  %vm9886_vm5 = vmmov %vm9870_vm15 }
 0x4e7   : > { %3196 = vrot.lane.b32.xlu0 %v2764_v52, %s4811_s26  ;;  %v3871_v24 = vsel %vm9874_vm11, %v3839_v28, %v3465_v13  ;;  %vm9891_vm15 = vmmov %vm9876_vm13 }
 0x4e8   : > { %3482 = vrot.lane.b32.xlu1 %v2764_v52, %s4814_s29  ;;  %v8191_v52 = vld [vmem:[%s8480_s4] ss:$0 sm:$0xff]  ;;  %vm9896_vm11 = vmmov %vm9885_vm14 }
 0x4e9   : > { %v3273_v35 = vpop.permute.xlu0 %3272 }
 0x4ea   : > { %v3179_v15 = vpop.permute.xlu1 %3178 }
 0x4eb   : > { %3572 = vrot.lane.b32.xlu0 %v9847_v21, %s4815_s15 }
 0x4ec   : > { %3484 = vrot.lane.b32.xlu1 %v2700_v10, %s4814_s29 }
 0x4ed   : > { %v3643_v54 = vpop.permute.xlu0 %3642 }
 0x4ee   : > { %v3934_v56 = vsel %vm9864_vm10, %v3902_v50, %v3643_v54  ;;  %v3555_v49 = vpop.permute.xlu1 %3554  ;;  %vm9887_vm10 = vmmov %vm9871_vm1 }
 0x4ef   : > { %3292 = vrot.lane.b32.xlu0 %v9847_v21, %s4812_s27  ;;  %4685 = vmatprep.mubr.msk.f32.mxu1 %vm9865_vm6, %v3934_v56  ;;  %v3903_v12 = vsel %vm9875_vm2, %v3871_v24, %v3555_v49  ;;  %v9884_v21 = vld [vmem:[#allocation149_spill] sm:$0xff]  ;;  %vm9888_vm6 = vmmov %vm9873_vm8  ;;  %v4769_v56 = vld [vmem:[%s4865_s24] sm:$0xff] }
 0x4f0   : > { %3198 = vrot.lane.b32.xlu1 %v2700_v10, %s4811_s26  ;;  %v3744_v18 = vsel %vm9885_vm14, %v3714_v46, %v9884_v21  ;;  %vm9892_vm1 = vmmov %vm9879_vm3  ;;  %v4768_v10 = vld [vmem:[%s4865_s24 + $0x8] sm:$0xff] }
 0x4f1   : > { %v3371_v29 = vpop.permute.xlu0 %3370  ;;  %v3776_v55 = vsel %vm9886_vm5, %v3744_v18, %v3177_v2  ;;  %vm9894_vm8 = vmmov %vm9883_vm4 }
 0x4f2   : > { %v3275_v3 = vpop.permute.xlu1 %3274  ;;  %v3808_v5 = vsel %vm9887_vm10, %v3776_v55, %v3273_v35  ;;  %v3715_v27 = vsel %vm9894_vm8, %v7769_v60, %v9893_v4  ;;  %vm9897_vm2 = vmmov %vm9886_vm5 }
 0x4f3   : > { %3662 = vrot.lane.b32.xlu0 %v9872_v31, %s4816_s16  ;;  %v3840_v13 = vsel %vm9888_vm6, %v3808_v5, %v3371_v29  ;;  %v3745_v8 = vsel %vm9896_vm11, %v3715_v27, %v9895_v16  ;;  %vm9899_vm9 = vmmov %vm9888_vm6 }
 0x4f4   : > { %3574 = vrot.lane.b32.xlu1 %v9855_v61, %s4815_s15  ;;  %v3777_v54 = vsel %vm9897_vm2, %v3745_v8, %v3179_v15  ;;  %vm9902_vm4 = vmmov %vm9890_vm7 }
 0x4f5   : > { %v3373_v42 = vpop.permute.xlu0 %3372  ;;  %vm9903_vm14 = vmmov %vm9894_vm8 }
 0x4f6   : > { %v3645_v43 = vpop.permute.xlu1 %3644  ;;  %vm9904_vm5 = vmmov %vm9891_vm15 }
 0x4f7   : > { %v3935_v41 = vsel %vm9876_vm13, %v3903_v12, %v3645_v43  ;;  %3390 = vrot.lane.b32.xlu0 %v9872_v31, %s4813_s28  ;;  %vm9898_vm13 = vmmov %vm9887_vm10  ;;  %v9906_v12 = vld [vmem:[#allocation60_spill] sm:$0xff] }
 0x4f8   : > { %3294 = vrot.lane.b32.xlu1 %v9855_v61, %s4812_s27  ;;  %4686 = vmatmul.mubr.msk.f32.gmra.mrb[18].mxu1 %vm9879_vm3, %v3935_v41  ;;  %v3809_v36 = vsel %vm9898_vm13, %v3777_v54, %v3275_v3  ;;  %vm9900_vm3 = vmmov %vm9889_vm0  ;;  %v9908_v41 = vld [vmem:[#allocation160_spill] sm:$0xff] }
 0x4f9   : > { %v3181_v39 = vpop.permute.xlu0 %3180  ;;  %v3841_v33 = vsel %vm9899_vm9, %v3809_v36, %v3373_v42  ;;  %vm9905_vm10 = vmmov %vm9892_vm1 }
 0x4fa   : > { %v3467_v59 = vpop.permute.xlu1 %3466  ;;  %vm9907_vm6 = vmmov %vm9894_vm8 }
 0x4fb   : > { %3392 = vrot.lane.b32.xlu0 %v2893_v57, %s4813_s28  ;;  %v3872_v30 = vsel %vm9889_vm0, %v3840_v13, %v3467_v59  ;;  %v3716_v43 = vsel %vm9907_vm6, %v7820_v34, %v9906_v12  ;;  %vm9909_vm0 = vmmov %vm9896_vm11 }
 0x4fc   : > { %3664 = vrot.lane.b32.xlu1 %v2893_v57, %s4816_s16  ;;  %v3746_v58 = vsel %vm9909_vm0, %v3716_v43, %v9908_v41  ;;  %vm9913_vm8 = vmmov %vm9900_vm3  ;;  %v4773_v43 = vld [vmem:[%s4865_s24 + $0x20] sm:$0xff] }
 0x4fd   : > { %v3557_v37 = vpop.permute.xlu0 %3556  ;;  %vm9914_vm11 = vmmov %vm9902_vm4 }
 0x4fe   : > { %v3469_v48 = vpop.permute.xlu1 %3468  ;;  %v3904_v32 = vsel %vm9890_vm7, %v3872_v30, %v3557_v37  ;;  %vm9910_vm7 = vmmov %vm9897_vm2 }
 0x4ff   : > { %v3873_v29 = vsel %vm9900_vm3, %v3841_v33, %v3469_v48  ;;  %v3778_v7 = vsel %vm9910_vm7, %v3746_v58, %v3181_v39  ;;  %v4770_v39 = vld [vmem:[%s4865_s24 + $0x18] sm:$0xff]  ;;  %vm9915_vm2 = vmmov %vm9904_vm5 }
 0x500   : > { %vm9920_vm3 = vmmov %vm9909_vm0 }
 0x501   : > { %v3277_v47 = vpop.permute.xlu0 %3276  ;;  %vm9927_vm0 = vmmov %vm9914_vm11 }
 0x502   : > { %v8184_v19 = vpop.permute.xlu1 %3182 }
 0x505   : > { %v3647_v2 = vpop.permute.xlu0 %3646 }
 0x506   : > { %v3936_v25 = vsel %vm9891_vm15, %v3904_v32, %v3647_v2  ;;  %v4660_v44 = vpop.f32.mrb[0].mxu1  ;;  %v3559_v61 = vpop.permute.xlu1 %3558  ;;  %vm9911_vm15 = vmmov %vm9898_vm13 }
 0x507   : > { %v4131_v17 = vadd.f32 %v4660_v44, %v8191_v52  ;;  %v4125_v40 = vpop.f32.mrb[1].mxu1  ;;  %4688 = vmatprep.mubr.msk.f32.mxu1 %vm9892_vm1, %v3936_v25  ;;  %v3905_v45 = vsel %vm9902_vm4, %v3873_v29, %v3559_v61  ;;  %v3810_v6 = vsel %vm9911_vm15, %v3778_v7, %v3277_v47  ;;  %vm9912_vm1 = vmmov %vm9899_vm9  ;;  %v4771_v47 = vld [vmem:[%s4865_s24 + $0x10] sm:$0xff] }
 0x508   : > { %v4126_v35 = vadd.f32 %v8191_v52, %v4125_v40  ;;  %vm9916_vm13 = vmmov %vm9905_vm10  ;;  %v9917_v25 = vld [vmem:[#allocation176_spill] sm:$0xff] }
 0x509   : > { %v4285_v63 = vadd.f32 %v4768_v10, %v4131_v17  ;;  %v3375_v50 = vpop.permute.xlu0 %3374  ;;  %vm9918_vm9 = vmmov %vm9907_vm6  ;;  %v9919_v17 = vld [vmem:[#allocation157_spill] sm:$0xff] }
 0x50a   : > { %v4284_v60 = vadd.f32 %v4769_v56, %v4126_v35  ;;  %v3279_v49 = vpop.permute.xlu1 %3278  ;;  %v3842_v48 = vsel %vm9912_vm1, %v3810_v6, %v3375_v50  ;;  %v3717_v44 = vsel %vm9918_vm9, %v7830_v23, %v9917_v25  ;;  %vm9922_vm4 = vmmov %vm9910_vm7 }
 0x50b   : > { %v4317_v1 = vmax.f32 %v4285_v63, 0.0  ;;  %v3747_v40 = vsel %vm9920_vm3, %v3717_v44, %v9919_v17  ;;  %vm9928_vm7 = vmmov %vm9915_vm2 }
 0x50c   : > { %v4316_v0 = vmax.f32 %v4284_v60, 0.0  ;;  %v3779_v27 = vsel %vm9922_vm4, %v3747_v40, %v8184_v19 }
 0x50d   : > { %4349 = vst.msk [vmem:[%s8210_s12 + $0x8] sm:$0xff] %vm9901_vm12, %v4317_v1  ;;  %v3377_v15 = vpop.permute.xlu0 %3376  ;;  %vm9921_vm12 = vmmov %vm9907_vm6 }
 0x50e   : > { %4348 = vst.msk [vmem:[%s8210_s12] sm:$0xff] %vm9903_vm14, %v4316_v0  ;;  %v3649_v22 = vpop.permute.xlu1 %3648  ;;  %vm9923_vm14 = vmmov %vm9907_vm6 }
 0x50f   : > { %v3937_v31 = vsel %vm9904_vm5, %v3905_v45, %v3649_v22  ;;  %vm9924_vm5 = vmmov %vm9911_vm15 }
 0x510   : > { %4689 = vmatmul.mubr.msk.f32.gmra.mrb[20].mxu1 %vm9905_vm10, %v3937_v31  ;;  %v3811_v16 = vsel %vm9924_vm5, %v3779_v27, %v3279_v49  ;;  %vm9925_vm10 = vmmov %vm9912_vm1  ;;  %v9930_v49 = vld [vmem:[#allocation61_spill] sm:$0xff] }
 0x511   : > { %v3185_v28 = vpop.permute.xlu0 %3184  ;;  %v3843_v8 = vsel %vm9925_vm10, %v3811_v16, %v3377_v15  ;;  %vm9926_vm6 = vmmov %vm9913_vm8  ;;  %v9932_v15 = vld [vmem:[#allocation192_spill] sm:$0xff]  ;;  %v4774_v27 = vld [vmem:[%s4865_s24 + $0x38] sm:$0xff] }
 0x512   : > { %v3471_v3 = vpop.permute.xlu1 %3470  ;;  %vm9929_vm15 = vmmov %vm9916_vm13 }
 0x513   : > { %v3874_v34 = vsel %vm9913_vm8, %v3842_v48, %v3471_v3  ;;  %vm9931_vm1 = vmmov %vm9918_vm9  ;;  %v4772_v3 = vld [vmem:[%s4865_s24 + $0x28] sm:$0xff] }
 0x514   : > { %v3718_v33 = vsel %vm9931_vm1, %v7882_v62, %v9930_v49  ;;  %vm9933_vm8 = vmmov %vm9920_vm3 }
 0x515   : > { %v3561_v24 = vpop.permute.xlu0 %3560  ;;  %v3748_v45 = vsel %vm9933_vm8, %v3718_v33, %v9932_v15  ;;  %vm9937_vm9 = vmmov %vm9926_vm6 }
 0x516   : > { %v3473_v42 = vpop.permute.xlu1 %3472  ;;  %v3906_v18 = vsel %vm9914_vm11, %v3874_v34, %v3561_v24  ;;  %vm9934_vm11 = vmmov %vm9922_vm4 }
 0x517   : > { %v3875_v10 = vsel %vm9926_vm6, %v3843_v8, %v3473_v42  ;;  %v3780_v31 = vsel %vm9934_vm11, %v3748_v45, %v3185_v28  ;;  %vm9938_vm3 = vmmov %vm9927_vm0  ;;  %v4775_v8 = vld [vmem:[%s4865_s24 + $0x30] sm:$0xff] }
 0x518   : > { %vm9940_vm4 = vmmov %vm9931_vm1 }
 0x519   : > { %v3281_v59 = vpop.permute.xlu0 %3280  ;;  %vm9946_vm6 = vmmov %vm9933_vm8 }
 0x51a   : > { %v4663_v57 = vpop.f32.mrb[2].mxu1  ;;  %v8230_v37 = vpop.permute.xlu1 %3186  ;;  %vm9951_vm8 = vmmov %vm9938_vm3 }
 0x51b   : > { %v4141_v51 = vadd.f32 %v4663_v57, %v8191_v52  ;;  %v4135_v46 = vpop.f32.mrb[3].mxu1 }
 0x51c   : > { %v4136_v21 = vadd.f32 %v8191_v52, %v4135_v46 }
 0x51d   : > { %v4287_v55 = vadd.f32 %v4770_v39, %v4141_v51  ;;  %v3651_v5 = vpop.permute.xlu0 %3650 }
 0x51e   : > { %v4286_v13 = vadd.f32 %v4771_v47, %v4136_v21  ;;  %v3938_v30 = vsel %vm9915_vm2, %v3906_v18, %v3651_v5  ;;  %v3563_v32 = vpop.permute.xlu1 %3562  ;;  %vm9935_vm2 = vmmov %vm9924_vm5  ;;  %v9945_v21 = vld [vmem:[#allocation178_spill] sm:$0xff] }
 0x51f   : > { %v4319_v2 = vmax.f32 %v4287_v55, 0.0  ;;  %4691 = vmatprep.mubr.msk.f32.mxu1 %vm9916_vm13, %v3938_v30  ;;  %v3907_v63 = vsel %vm9927_vm0, %v3875_v10, %v3563_v32  ;;  %v3812_v12 = vsel %vm9935_vm2, %v3780_v31, %v3281_v59  ;;  %vm9936_vm13 = vmmov %vm9925_vm10  ;;  %v9943_v59 = vld [vmem:[#allocation68_spill] sm:$0xff] }
 0x520   : > { %v4318_v61 = vmax.f32 %v4286_v13, 0.0  ;;  %vm9942_vm5 = vmmov %vm9929_vm15 }
 0x521   : > { %4351 = vst.msk [vmem:[%s8210_s12 + $0x18] sm:$0xff] %vm9921_vm12, %v4319_v2  ;;  %v3379_v4 = vpop.permute.xlu0 %3378  ;;  %vm9939_vm12 = vmmov %vm9931_vm1 }
 0x522   : > { %4350 = vst.msk [vmem:[%s8210_s12 + $0x10] sm:$0xff] %vm9923_vm14, %v4318_v61  ;;  %v3283_v35 = vpop.permute.xlu1 %3282  ;;  %v3844_v58 = vsel %vm9936_vm13, %v3812_v12, %v3379_v4  ;;  %vm9941_vm14 = vmmov %vm9928_vm7 }
 0x523   : > { %vm9944_vm10 = vmmov %vm9931_vm1 }
 0x524   : > { %v3719_v34 = vsel %vm9944_vm10, %v7890_v14, %v9943_v59  ;;  %vm9947_vm0 = vmmov %vm9934_vm11 }
 0x525   : > { %v3381_v23 = vpop.permute.xlu0 %3380  ;;  %v3749_v18 = vsel %vm9946_vm6, %v3719_v34, %v9945_v21  ;;  %vm9950_vm1 = vmmov %vm9937_vm9  ;;  %v4776_v34 = vld [vmem:[%s4865_s24 + $0x48] sm:$0xff] }
 0x526   : > { %v3653_v50 = vpop.permute.xlu1 %3652  ;;  %v3781_v55 = vsel %vm9947_vm0, %v3749_v18, %v8230_v37  ;;  %vm9952_vm11 = vmmov %vm9941_vm14 }
 0x527   : > { %v3939_v54 = vsel %vm9928_vm7, %v3907_v63, %v3653_v50  ;;  %vm9948_vm7 = vmmov %vm9935_vm2  ;;  %v9954_v63 = vld [vmem:[#allocation119_spill] sm:$0xff] }
 0x528   : > { %4692 = vmatmul.mubr.msk.f32.gmra.mrb[22].mxu1 %vm9929_vm15, %v3939_v54  ;;  %v3813_v47 = vsel %vm9948_vm7, %v3781_v55, %v3283_v35  ;;  %vm9949_vm15 = vmmov %vm9936_vm13 }
 0x529   : > { %v3189_v19 = vpop.permute.xlu0 %3188  ;;  %v3845_v13 = vsel %vm9949_vm15, %v3813_v47, %v3381_v23  ;;  %vm9953_vm2 = vmmov %vm9942_vm5 }
 0x52a   : > { %v3475_v56 = vpop.permute.xlu1 %3474  ;;  %vm9955_vm13 = vmmov %vm9940_vm4 }
 0x52b   : > { %v3876_v6 = vsel %vm9937_vm9, %v3844_v58, %v3475_v56  ;;  %v3720_v50 = vsel %vm9955_vm13, %v7942_v11, %v9954_v63  ;;  %v9956_v56 = vld [vmem:[#allocation78_spill] sm:$0xff]  ;;  %vm9957_vm9 = vmmov %vm9946_vm6 }
 0x52c   : > { %vm9964_vm6 = vmmov %vm9951_vm8 }
 0x52d   : > { %v3565_v60 = vpop.permute.xlu0 %3564 }
 0x52e   : > { %v3477_v36 = vpop.permute.xlu1 %3476  ;;  %v4666_v1 = vpop.f32.mrb[4].mxu1  ;;  %v3908_v48 = vsel %vm9938_vm3, %v3876_v6, %v3565_v60  ;;  %v3750_v60 = vsel %vm9957_vm9, %v3720_v50, %v9956_v56  ;;  %vm9958_vm3 = vmmov %vm9947_vm0  ;;  %v9992_v50 = vld [vmem:[#allocation124_spill] sm:$0xff] }
 0x52f   : > { %v4151_v0 = vadd.f32 %v4666_v1, %v8191_v52  ;;  %v4145_v29 = vpop.f32.mrb[5].mxu1  ;;  %v3877_v30 = vsel %vm9950_vm1, %v3845_v13, %v3477_v36  ;;  %v3782_v1 = vsel %vm9958_vm3, %v3750_v60, %v3189_v19  ;;  %vm9965_vm0 = vmmov %vm9952_vm11  ;;  %v9967_v19 = vld [vmem:[#allocation72_spill] sm:$0xff] }
 0x530   : > { %v4146_v22 = vadd.f32 %v8191_v52, %v4145_v29 }
 0x531   : > { %v4289_v24 = vadd.f32 %v4772_v3, %v4151_v0  ;;  %v3285_v42 = vpop.permute.xlu0 %3284 }
 0x532   : > { %v4288_v41 = vadd.f32 %v4773_v43, %v4146_v22  ;;  %v3191_v62 = vpop.permute.xlu1 %3190 }
 0x533   : > { %v4321_v7 = vmax.f32 %v4289_v24, 0.0  ;;  %v9969_v24 = vld [vmem:[#allocation70_spill] sm:$0xff] }
 0x534   : > { %v4320_v57 = vmax.f32 %v4288_v41, 0.0 }
 0x535   : > { %4353 = vst.msk [vmem:[%s8210_s12 + $0x28] sm:$0xff] %vm9939_vm12, %v4321_v7  ;;  %v3655_v51 = vpop.permute.xlu0 %3654  ;;  %vm9959_vm12 = vmmov %vm9940_vm4 }
 0x536   : > { %4352 = vst.msk [vmem:[%s8210_s12 + $0x20] sm:$0xff] %vm9940_vm4, %v4320_v57  ;;  %v3940_v28 = vsel %vm9941_vm14, %v3908_v48, %v3655_v51  ;;  %v3567_v46 = vpop.permute.xlu1 %3566  ;;  %vm9960_vm4 = vmmov %vm9948_vm7 }
 0x537   : > { %4694 = vmatprep.mubr.msk.f32.mxu1 %vm9942_vm5, %v3940_v28  ;;  %v3909_v2 = vsel %vm9951_vm8, %v3877_v30, %v3567_v46  ;;  %v3814_v33 = vsel %vm9960_vm4, %v3782_v1, %v3285_v42  ;;  %vm9961_vm14 = vmmov %vm9944_vm10 }
 0x538   : > { %vm9962_vm5 = vmmov %vm9949_vm15 }
 0x539   : > { %v3383_v39 = vpop.permute.xlu0 %3382  ;;  %vm9963_vm10 = vmmov %vm9950_vm1 }
 0x53a   : > { %v3287_v5 = vpop.permute.xlu1 %3286  ;;  %v3846_v29 = vsel %vm9962_vm5, %v3814_v33, %v3383_v39  ;;  %vm9966_vm7 = vmmov %vm9953_vm2  ;;  %v4777_v39 = vld [vmem:[%s4865_s24 + $0x40] sm:$0xff]  ;;  %v10001_v33 = vld [vmem:[#allocation147_spill] sm:$0xff] }
 0x53b   : > { %vm9968_vm15 = vmmov %vm9959_vm12 }
 0x53c   : > { %v3721_v3 = vsel %vm9968_vm15, %v7960_v26, %v9967_v19  ;;  %vm9970_vm1 = vmmov %vm9957_vm9 }
 0x53d   : > { %v3385_v32 = vpop.permute.xlu0 %3384  ;;  %v3751_v42 = vsel %vm9970_vm1, %v3721_v3, %v9969_v24  ;;  %vm9971_vm8 = vmmov %vm9958_vm3  ;;  %v10007_v3 = vld [vmem:[#allocation25_spill] sm:$0xff] }
 0x53e   : > { %v3657_v14 = vpop.permute.xlu1 %3656  ;;  %v3783_v43 = vsel %vm9971_vm8, %v3751_v42, %v3191_v62  ;;  %vm9974_vm13 = vmmov %vm9963_vm10 }
 0x53f   : > { %v3941_v25 = vsel %vm9952_vm11, %v3909_v2, %v3657_v14  ;;  %vm9972_vm11 = vmmov %vm9960_vm4  ;;  %v9980_v2 = vld [vmem:[#allocation144_spill] sm:$0xff] }
 0x540   : > { %4695 = vmatmul.mubr.msk.f32.gmra.mrb[24].mxu1 %vm9953_vm2, %v3941_v25  ;;  %v3815_v58 = vsel %vm9972_vm11, %v3783_v43, %v3287_v5  ;;  %vm9973_vm2 = vmmov %vm9962_vm5  ;;  %v9982_v25 = vld [vmem:[#allocation82_spill] sm:$0xff] }
 0x541   : > { %v3193_v44 = vpop.permute.xlu0 %3192  ;;  %v3847_v7 = vsel %vm9973_vm2, %v3815_v58, %v3385_v32  ;;  %vm9975_vm9 = vmmov %vm9964_vm6 }
 0x542   : > { %v3479_v61 = vpop.permute.xlu1 %3478  ;;  %v4669_v37 = vpop.f32.mrb[6].mxu1  ;;  %vm9976_vm3 = vmmov %vm9965_vm0 }
 0x543   : > { %v4161_v17 = vadd.f32 %v4669_v37, %v8191_v52  ;;  %v4155_v40 = vpop.f32.mrb[7].mxu1  ;;  %v3878_v15 = vsel %vm9963_vm10, %v3846_v29, %v3479_v61  ;;  %vm9978_vm4 = vmmov %vm9961_vm14 }
 0x544   : > { %v4156_v4 = vadd.f32 %v8191_v52, %v4155_v40  ;;  %vm9981_vm5 = vmmov %vm9978_vm4 }
 0x545   : > { %v4291_v35 = vadd.f32 %v4774_v27, %v4161_v17  ;;  %v3569_v16 = vpop.permute.xlu0 %3568  ;;  %v3722_v14 = vsel %vm9981_vm5, %v8004_v9, %v9980_v2  ;;  %vm9983_vm10 = vmmov %vm9970_vm1 }
 0x546   : > { %v4290_v10 = vadd.f32 %v4775_v8, %v4156_v4  ;;  %v3481_v23 = vpop.permute.xlu1 %3480  ;;  %v3910_v11 = vsel %vm9964_vm6, %v3878_v15, %v3569_v16  ;;  %v3752_v61 = vsel %vm9983_vm10, %v3722_v14, %v9982_v25  ;;  %vm9984_vm6 = vmmov %vm9971_vm8  ;;  %v4780_v25 = vld [vmem:[%s4865_s24 + $0x68] sm:$0xff] }
 0x547   : > { %v4323_v54 = vmax.f32 %v4291_v35, 0.0  ;;  %v3879_v6 = vsel %vm9974_vm13, %v3847_v7, %v3481_v23  ;;  %v3784_v37 = vsel %vm9984_vm6, %v3752_v61, %v3193_v44  ;;  %vm9987_vm15 = vmmov %vm9974_vm13 }
 0x548   : > { %v4322_v36 = vmax.f32 %v4290_v10, 0.0  ;;  %vm9988_vm1 = vmmov %vm9975_vm9  ;;  %v9989_v10 = vld [vmem:[#allocation155_spill] sm:$0xff] }
 0x549   : > { %4355 = vst.msk [vmem:[%s8210_s12 + $0x38] sm:$0xff] %vm9959_vm12, %v4323_v54  ;;  %v3289_v49 = vpop.permute.xlu0 %3288  ;;  %vm9977_vm12 = vmmov %vm9966_vm7  ;;  %v9995_v54 = vld [vmem:[#allocation120_spill] sm:$0xff] }
 0x54a   : > { %4354 = vst.msk [vmem:[%s8210_s12 + $0x30] sm:$0xff] %vm9961_vm14, %v4322_v36  ;;  %v3195_v0 = vpop.permute.xlu1 %3194  ;;  %vm9979_vm14 = vmmov %vm9978_vm4  ;;  %v9998_v36 = vld [vmem:[#allocation71_spill] sm:$0xff] }
 0x54b   : > { %vm9990_vm8 = vmmov %vm9978_vm4 }
 0x54c   : > { %v3724_v9 = vsel %vm9990_vm8, %v8066_v53, %v9989_v10  ;;  %vm9994_vm13 = vmmov %vm9977_vm12  ;;  %v4782_v10 = vld [vmem:[%s4865_s24 + $0x78] sm:$0xff] }
 0x54d   : > { %v3659_v45 = vpop.permute.xlu0 %3658 }
 0x54e   : > { %v3942_v22 = vsel %vm9965_vm0, %v3910_v11, %v3659_v45  ;;  %v3571_v31 = vpop.permute.xlu1 %3570  ;;  %vm9985_vm0 = vmmov %vm9972_vm11 }
 0x54f   : > { %4697 = vmatprep.mubr.msk.f32.mxu1 %vm9966_vm7, %v3942_v22  ;;  %v3911_v48 = vsel %vm9975_vm9, %v3879_v6, %v3571_v31  ;;  %v3816_v40 = vsel %vm9985_vm0, %v3784_v37, %v3289_v49  ;;  %vm9986_vm7 = vmmov %vm9973_vm2  ;;  %v4778_v6 = vld [vmem:[%s4865_s24 + $0x58] sm:$0xff]  ;;  %v4781_v37 = vld [vmem:[%s4865_s24 + $0x60] sm:$0xff] }
 0x550   : > { %vm9991_vm11 = vmmov %vm9976_vm3 }
 0x551   : > { %v3387_v12 = vpop.permute.xlu0 %3386  ;;  %vm9993_vm2 = vmmov %vm9983_vm10 }
 0x552   : > { %v3291_v41 = vpop.permute.xlu1 %3290  ;;  %v3848_v27 = vsel %vm9986_vm7, %v3816_v40, %v3387_v12  ;;  %v3754_v44 = vsel %vm9993_vm2, %v3724_v9, %v9992_v50  ;;  %vm9996_vm9 = vmmov %vm9978_vm4 }
 0x553   : > { %v3723_v56 = vsel %vm9996_vm9, %v8022_v20, %v9995_v54  ;;  %vm10004_vm10 = vmmov %vm9986_vm7  ;;  %v10005_v20 = vld [vmem:[#allocation123_spill] sm:$0xff] }
 0x554   : > { %vm10008_vm7 = vmmov %vm9987_vm15 }
 0x555   : > { %v3389_v57 = vpop.permute.xlu0 %3388  ;;  %vm10011_vm8 = vmmov %vm10008_vm7 }
 0x556   : > { %v3661_v26 = vpop.permute.xlu1 %3660  ;;  %v4672_v51 = vpop.f32.mrb[8].mxu1  ;;  %vm10016_vm9 = vmmov %vm10004_vm10 }
 0x557   : > { %v3943_v28 = vsel %vm9976_vm3, %v3911_v48, %v3661_v26  ;;  %v4171_v46 = vadd.f32 %v4672_v51, %v8191_v52  ;;  %v4165_v62 = vpop.f32.mrb[9].mxu1  ;;  %vm9997_vm3 = vmmov %vm9984_vm6  ;;  %v10013_v26 = vld [vmem:[#allocation105_spill] sm:$0xff] }
 0x558   : > { %v4166_v59 = vadd.f32 %v8191_v52, %v4165_v62  ;;  %4698 = vmatmul.mubr.msk.f32.gmra.mrb[26].mxu1 %vm9977_vm12, %v3943_v28  ;;  %vm9999_vm12 = vmmov %vm9993_vm2 }
 0x559   : > { %v4293_v21 = vadd.f32 %v4776_v34, %v4171_v46  ;;  %v3197_v18 = vpop.permute.xlu0 %3196  ;;  %v3753_v1 = vsel %vm9999_vm12, %v3723_v56, %v9998_v36  ;;  %vm10006_vm6 = vmmov %vm9993_vm2  ;;  %vm10014_vm2 = vcmask 228352   ;;  %v4779_v46 = vld [vmem:[%s4865_s24 + $0x50] sm:$0xff]  ;;  %vm10018_vm12 = vcmask 261120  }
 0x55a   : > { %v4292_v55 = vadd.f32 %v4777_v39, %v4166_v59  ;;  %v3483_v5 = vpop.permute.xlu1 %3482  ;;  %v3786_v60 = vsel %vm9997_vm3, %v3754_v44, %v3197_v18 }
 0x55b   : > { %v4325_v47 = vmax.f32 %v4293_v21, 0.0  ;;  %v3880_v35 = vsel %vm9987_vm15, %v3848_v27, %v3483_v5  ;;  %vm10009_vm15 = vmmov %vm10004_vm10 }
 0x55c   : > { %v4324_v13 = vmax.f32 %v4292_v55, 0.0  ;;  %v10020_v55 = vld [vmem:[#allocation31_spill] sm:$0xff] }
 0x55d   : > { %4357 = vst.msk [vmem:[%s8210_s12 + $0x48] sm:$0xff] %vm9978_vm4, %v4325_v47  ;;  %v3573_v30 = vpop.permute.xlu0 %3572  ;;  %vm10000_vm4 = vmmov %vm9985_vm0 }
 0x55e   : > { %4356 = vst.msk [vmem:[%s8210_s12 + $0x40] sm:$0xff] %vm9979_vm14, %v4324_v13  ;;  %v3485_v32 = vpop.permute.xlu1 %3484  ;;  %v3912_v16 = vsel %vm9988_vm1, %v3880_v35, %v3573_v30  ;;  %vm10002_vm14 = vmmov %vm9981_vm5 }
 0x55f   : > { %v3725_v29 = vsel %vm10002_vm14, %v8083_v38, %v10001_v33  ;;  %vm10003_vm5 = vmmov %vm9997_vm3 }
 0x560   : > { %v3785_v15 = vsel %vm10003_vm5, %v3753_v1, %v3195_v0  ;;  %v3755_v31 = vsel %vm10006_vm6, %v3725_v29, %v10005_v20  ;;  %vm10010_vm1 = vmmov %vm9997_vm3  ;;  %v4784_v1 = vld [vmem:[%s4865_s24 + $0x88] sm:$0xff] }
 0x561   : > { %v3293_v17 = vpop.permute.xlu0 %3292  ;;  %v3817_v19 = vsel %vm9985_vm0, %v3785_v15, %v3291_v41  ;;  %vm10017_vm3 = vmmov %vm10008_vm7 }
 0x562   : > { %v3199_v4 = vpop.permute.xlu1 %3198  ;;  %v3818_v49 = vsel %vm10000_vm4, %v3786_v60, %v3293_v17  ;;  %v3849_v38 = vsel %vm10009_vm15, %v3817_v19, %v3389_v57  ;;  %vm10019_vm4 = vcmask 293888   ;;  %vm10021_vm14 = vmmov %vm10018_vm12 }
 0x563   : > { %v3787_v0 = vsel %vm10010_vm1, %v3755_v31, %v3199_v4  ;;  %v3881_v58 = vsel %vm10011_vm8, %v3849_v38, %v3485_v32  ;;  %vm10022_vm5 = vmmov %vm10014_vm2  ;;  %v4786_v31 = vld [vmem:[%s4865_s24 + $0x98] sm:$0xff] }
 0x564   : > { %vm10024_vm6 = vmmov %vm10019_vm4 }
 0x565   : > { %v3663_v8 = vpop.permute.xlu0 %3662  ;;  %vm10027_vm15 = vmmov %vm10019_vm4 }
 0x566   : > { %v3944_v23 = vsel %vm9991_vm11, %v3912_v16, %v3663_v8  ;;  %v3575_v63 = vpop.permute.xlu1 %3574  ;;  %vm10012_vm11 = vmmov %vm9985_vm0 }
 0x567   : > { %4700 = vmatprep.mubr.msk.f32.mxu1 %vm9994_vm13, %v3944_v23  ;;  %vm10015_vm13 = vmmov %vm10014_vm2  ;;  %v4783_v23 = vld [vmem:[%s4865_s24 + $0x70] sm:$0xff] }
 0x568   : > { %v3913_v28 = vsel %vm10015_vm13, %v3881_v58, %v3575_v63 }
 0x569   : > { %v3391_v53 = vpop.permute.xlu0 %3390 }
 0x56a   : > { %v3850_v11 = vsel %vm10004_vm10, %v3818_v49, %v3391_v53  ;;  %v3295_v45 = vpop.permute.xlu1 %3294  ;;  %v4675_v22 = vpop.f32.mrb[10].mxu1  ;;  %vm10023_vm10 = vcmask 31744   ;;  %v4785_v53 = vld [vmem:[%s4865_s24 + $0x80] sm:$0xff] }
 0x56b   : > { %v3882_v24 = vsel %vm10008_vm7, %v3850_v11, %v10007_v3  ;;  %v4181_v42 = vadd.f32 %v4675_v22, %v8191_v52  ;;  %v4175_v12 = vpop.f32.mrb[11].mxu1  ;;  %v3819_v7 = vsel %vm10012_vm11, %v3787_v0, %v3295_v45  ;;  %vm10025_vm0 = vmmov %vm10023_vm10 }
 0x56c   : > { %v4176_v43 = vadd.f32 %v8191_v52, %v4175_v12  ;;  %v3914_v51 = vsel %vm10014_vm2, %v3882_v24, %v10013_v26  ;;  %vm10026_vm7 = vmmov %vm10018_vm12 }
 0x56d   : > { %v4295_v48 = vadd.f32 %v4778_v6, %v4181_v42  ;;  %v3393_v41 = vpop.permute.xlu0 %3392  ;;  %v3946_v5 = vsel %vm10021_vm14, %v3914_v51, %v10020_v55  ;;  %vm10028_vm1 = vmmov %vm10025_vm0 }
 0x56e   : > { %v4294_v57 = vadd.f32 %v4779_v46, %v4176_v43  ;;  %v3851_v62 = vsel %vm10016_vm9, %v3819_v7, %v3393_v41  ;;  %v3665_v59 = vpop.permute.xlu1 %3664  ;;  %vm10029_vm8 = vmmov %vm10025_vm0  ;;  %v4788_v7 = vld [vmem:[%s4865_s24 + $0xa8] sm:$0xff] }
 0x56f   : > { %v4327_v34 = vmax.f32 %v4295_v48, 0.0  ;;  %v3883_v21 = vsel %vm10017_vm3, %v3851_v62, %v10007_v3  ;;  %v3945_v18 = vsel %vm10018_vm12, %v3913_v28, %v3665_v59  ;;  %vm10030_vm11 = vmmov %vm10025_vm0  ;;  %v4787_v3 = vld [vmem:[%s4865_s24 + $0x90] sm:$0xff]  ;;  %v4789_v48 = vld [vmem:[%s4865_s24 + $0xa0] sm:$0xff] }
 0x570   : > { %v4326_v39 = vmax.f32 %v4294_v57, 0.0  ;;  %4701 = vmatmul.mubr.msk.f32.gmra.mrb[28].mxu1 %vm10019_vm4, %v3945_v18  ;;  %v3915_v47 = vsel %vm10022_vm5, %v3883_v21, %v10013_v26  ;;  %vm10031_vm2 = vmmov %vm10025_vm0  ;;  %v4790_v59 = vld [vmem:[%s4865_s24 + $0xb8] sm:$0xff]  ;;  %v4791_v21 = vld [vmem:[%s4865_s24 + $0xb0] sm:$0xff] }
 0x571   : > { %4359 = vst.msk [vmem:[%s8210_s12 + $0x58] sm:$0xff] %vm10023_vm10, %v4327_v34  ;;  %4703 = vmatprep.mubr.msk.f32.mxu1 %vm10024_vm6, %v3946_v5  ;;  %v3947_v13 = vsel %vm10026_vm7, %v3915_v47, %v10020_v55  ;;  %vm10032_vm13 = vmmov %vm10025_vm0 }
 0x572   : > { %4358 = vst.msk [vmem:[%s8210_s12 + $0x50] sm:$0xff] %vm10025_vm0, %v4326_v39  ;;  %vm10033_vm9 = vmmov %vm10025_vm0 }
 0x573   : > { %vm10034_vm3 = vmmov %vm10025_vm0 }
 0x574   : > { %4704 = vmatmul.mubr.msk.f32.gmra.mrb[30].mxu1 %vm10027_vm15, %v3947_v13  ;;  %vm10035_vm12 = vmmov %vm10025_vm0 }
 0x575   : > { %vm10036_vm4 = vmmov %vm10025_vm0 }
 0x576   : > { %vm10037_vm14 = vmmov %vm10025_vm0 }
 0x577   : > { %vm10038_vm5 = vmmov %vm10025_vm0 }
 0x578   : > { %vm10039_vm10 = vmmov %vm10025_vm0 }
 0x579   : > { %vm10040_vm6 = vmmov %vm10025_vm0 }
 0x57a   : > { %vm10041_vm7 = vmmov %vm10025_vm0 }
 0x57b   : > { %vm10042_vm15 = vmmov %vm10025_vm0 }
 0x583   : > { %v4678_v30 = vpop.f32.mrb[12].mxu1 }
 0x584   : > { %v4191_v32 = vadd.f32 %v4678_v30, %v8191_v52  ;;  %v4185_v2 = vpop.f32.mrb[13].mxu1 }
 0x585   : > { %v4186_v14 = vadd.f32 %v8191_v52, %v4185_v2 }
 0x586   : > { %v4297_v61 = vadd.f32 %v4780_v25, %v4191_v32  ;;  %v4792_v32 = vld [vmem:[%s4865_s24 + $0xc8] sm:$0xff] }
 0x587   : > { %v4296_v17 = vadd.f32 %v4781_v37, %v4186_v14  ;;  %v4793_v14 = vld [vmem:[%s4865_s24 + $0xc0] sm:$0xff] }
 0x588   : > { %v4329_v40 = vmax.f32 %v4297_v61, 0.0 }
 0x589   : > { %v4328_v4 = vmax.f32 %v4296_v17, 0.0 }
 0x58a   : > { %4361 = vst.msk [vmem:[%s8210_s12 + $0x68] sm:$0xff] %vm10028_vm1, %v4329_v40  ;;  %vm10043_vm1 = vmmov %vm10025_vm0 }
 0x58b   : > { %4360 = vst.msk [vmem:[%s8210_s12 + $0x60] sm:$0xff] %vm10029_vm8, %v4328_v4  ;;  %vm10044_vm8 = vmmov %vm10025_vm0 }
 0x59b   : > { %v4681_v27 = vpop.f32.mrb[14].mxu1 }
 0x59c   : > { %v4201_v35 = vadd.f32 %v4681_v27, %v8191_v52  ;;  %v4195_v16 = vpop.f32.mrb[15].mxu1 }
 0x59d   : > { %v4196_v8 = vadd.f32 %v8191_v52, %v4195_v16 }
 0x59e   : > { %v4299_v9 = vadd.f32 %v4782_v10, %v4201_v35  ;;  %v4794_v35 = vld [vmem:[%s4865_s24 + $0xd8] sm:$0xff] }
 0x59f   : > { %v4298_v63 = vadd.f32 %v4783_v23, %v4196_v8  ;;  %v4795_v8 = vld [vmem:[%s4865_s24 + $0xd0] sm:$0xff] }
 0x5a0   : > { %v4331_v50 = vmax.f32 %v4299_v9, 0.0 }
 0x5a1   : > { %v4330_v44 = vmax.f32 %v4298_v63, 0.0 }
 0x5a2   : > { %4363 = vst.msk [vmem:[%s8210_s12 + $0x78] sm:$0xff] %vm10030_vm11, %v4331_v50  ;;  %vm10045_vm11 = vmmov %vm10025_vm0 }
 0x5a3   : > { %4362 = vst.msk [vmem:[%s8210_s12 + $0x70] sm:$0xff] %vm10031_vm2, %v4330_v44  ;;  %vm10046_vm2 = vmmov %vm10025_vm0 }
 0x5b3   : > { %v4684_v54 = vpop.f32.mrb[16].mxu1 }
 0x5b4   : > { %v4211_v56 = vadd.f32 %v4684_v54, %v8191_v52  ;;  %v4205_v60 = vpop.f32.mrb[17].mxu1 }
 0x5b5   : > { %v4206_v36 = vadd.f32 %v8191_v52, %v4205_v60 }
 0x5b6   : > { %v4301_v49 = vadd.f32 %v4784_v1, %v4211_v56  ;;  %v4796_v56 = vld [vmem:[%s4865_s24 + $0xe8] sm:$0xff] }
 0x5b7   : > { %v4300_v33 = vadd.f32 %v4785_v53, %v4206_v36  ;;  %v4797_v36 = vld [vmem:[%s4865_s24 + $0xe0] sm:$0xff] }
 0x5b8   : > { %v4333_v29 = vmax.f32 %v4301_v49, 0.0 }
 0x5b9   : > { %v4332_v15 = vmax.f32 %v4300_v33, 0.0 }
 0x5ba   : > { %4365 = vst.msk [vmem:[%s8210_s12 + $0x88] sm:$0xff] %vm10032_vm13, %v4333_v29 }
 0x5bb   : > { %4364 = vst.msk [vmem:[%s8210_s12 + $0x80] sm:$0xff] %vm10033_vm9, %v4332_v15 }
 0x5cb   : > { %v4687_v11 = vpop.f32.mrb[18].mxu1 }
 0x5cc   : > { %v4221_v45 = vadd.f32 %v4687_v11, %v8191_v52  ;;  %v4215_v22 = vpop.f32.mrb[19].mxu1 }
 0x5cd   : > { %v4216_v20 = vadd.f32 %v8191_v52, %v4215_v22 }
 0x5ce   : > { %v4303_v19 = vadd.f32 %v4786_v31, %v4221_v45  ;;  %v4798_v45 = vld [vmem:[%s4865_s24 + $0xf8] sm:$0xff] }
 0x5cf   : > { %v4302_v24 = vadd.f32 %v4787_v3, %v4216_v20  ;;  %v4799_v20 = vld [vmem:[%s4865_s24 + $0xf0] sm:$0xff] }
 0x5d0   : > { %v4335_v42 = vmax.f32 %v4303_v19, 0.0 }
 0x5d1   : > { %v4334_v12 = vmax.f32 %v4302_v24, 0.0 }
 0x5d2   : > { %4367 = vst.msk [vmem:[%s8210_s12 + $0x98] sm:$0xff] %vm10034_vm3, %v4335_v42 }
 0x5d3   : > { %4366 = vst.msk [vmem:[%s8210_s12 + $0x90] sm:$0xff] %vm10035_vm12, %v4334_v12 }
 0x5e3   : > { %v4690_v38 = vpop.f32.mrb[20].mxu1 }
 0x5e4   : > { %v4231_v0 = vadd.f32 %v4690_v38, %v8191_v52  ;;  %v4225_v43 = vpop.f32.mrb[21].mxu1 }
 0x5e5   : > { %v4226_v58 = vadd.f32 %v8191_v52, %v4225_v43 }
 0x5e6   : > { %v4305_v6 = vadd.f32 %v4788_v7, %v4231_v0 }
 0x5e7   : > { %v4304_v41 = vadd.f32 %v4789_v48, %v4226_v58 }
 0x5e8   : > { %v4337_v26 = vmax.f32 %v4305_v6, 0.0 }
 0x5e9   : > { %v4336_v51 = vmax.f32 %v4304_v41, 0.0 }
 0x5ea   : > { %4369 = vst.msk [vmem:[%s8210_s12 + $0xa8] sm:$0xff] %vm10036_vm4, %v4337_v26 }
 0x5eb   : > { %4368 = vst.msk [vmem:[%s8210_s12 + $0xa0] sm:$0xff] %vm10037_vm14, %v4336_v51 }
 0x5fb   : > { %v4693_v28 = vpop.f32.mrb[22].mxu1 }
 0x5fc   : > { %v4241_v46 = vadd.f32 %v4693_v28, %v8191_v52  ;;  %v4235_v57 = vpop.f32.mrb[23].mxu1 }
 0x5fd   : > { %v4236_v62 = vadd.f32 %v8191_v52, %v4235_v57 }
 0x5fe   : > { %v4307_v34 = vadd.f32 %v4790_v59, %v4241_v46 }
 0x5ff   : > { %v4306_v18 = vadd.f32 %v4791_v21, %v4236_v62 }
 0x600   : > { %v4339_v39 = vmax.f32 %v4307_v34, 0.0 }
 0x601   : > { %v4338_v55 = vmax.f32 %v4306_v18, 0.0 }
 0x602   : > { %4371 = vst.msk [vmem:[%s8210_s12 + $0xb8] sm:$0xff] %vm10038_vm5, %v4339_v39 }
 0x603   : > { %4370 = vst.msk [vmem:[%s8210_s12 + $0xb0] sm:$0xff] %vm10039_vm10, %v4338_v55 }
 0x613   : > { %v4696_v5 = vpop.f32.mrb[24].mxu1 }
 0x614   : > { %v4251_v47 = vadd.f32 %v4696_v5, %v8191_v52  ;;  %v4245_v13 = vpop.f32.mrb[25].mxu1 }
 0x615   : > { %v4246_v30 = vadd.f32 %v8191_v52, %v4245_v13 }
 0x616   : > { %v4309_v2 = vadd.f32 %v4792_v32, %v4251_v47 }
 0x617   : > { %v4308_v25 = vadd.f32 %v4793_v14, %v4246_v30 }
 0x618   : > { %v4341_v61 = vmax.f32 %v4309_v2, 0.0 }
 0x619   : > { %v4340_v37 = vmax.f32 %v4308_v25, 0.0 }
 0x61a   : > { %4373 = vst.msk [vmem:[%s8210_s12 + $0xc8] sm:$0xff] %vm10040_vm6, %v4341_v61 }
 0x61b   : > { %4372 = vst.msk [vmem:[%s8210_s12 + $0xc0] sm:$0xff] %vm10025_vm0, %v4340_v37 }
 0x62b   : > { %v4699_v17 = vpop.f32.mrb[26].mxu1 }
 0x62c   : > { %v4261_v40 = vadd.f32 %v4699_v17, %v8191_v52  ;;  %v4255_v4 = vpop.f32.mrb[27].mxu1 }
 0x62d   : > { %v4256_v27 = vadd.f32 %v8191_v52, %v4255_v4 }
 0x62e   : > { %v4311_v16 = vadd.f32 %v4794_v35, %v4261_v40 }
 0x62f   : > { %v4310_v10 = vadd.f32 %v4795_v8, %v4256_v27 }
 0x630   : > { %v4343_v9 = vmax.f32 %v4311_v16, 0.0 }
 0x631   : > { %v4342_v23 = vmax.f32 %v4310_v10, 0.0 }
 0x632   : > { %4375 = vst.msk [vmem:[%s8210_s12 + $0xd8] sm:$0xff] %vm10041_vm7, %v4343_v9 }
 0x633   : > { %4374 = vst.msk [vmem:[%s8210_s12 + $0xd0] sm:$0xff] %vm10042_vm15, %v4342_v23 }
 0x643   : > { %v4702_v63 = vpop.f32.mrb[28].mxu1 }
 0x644   : > { %v4271_v50 = vadd.f32 %v4702_v63, %v8191_v52  ;;  %v4265_v44 = vpop.f32.mrb[29].mxu1 }
 0x645   : > { %v4266_v54 = vadd.f32 %v8191_v52, %v4265_v44 }
 0x646   : > { %v4313_v60 = vadd.f32 %v4796_v56, %v4271_v50 }
 0x647   : > { %v4312_v1 = vadd.f32 %v4797_v36, %v4266_v54  ;;  %v4705_v49 = vpop.f32.mrb[30].mxu1 }
 0x648   : > { %v4345_v53 = vmax.f32 %v4313_v60, 0.0  ;;  %v4281_v33 = vadd.f32 %v4705_v49, %v8191_v52  ;;  %v4275_v29 = vpop.f32.mrb[31].mxu1 }
 0x649   : > { %v4344_v15 = vmax.f32 %v4312_v1, 0.0  ;;  %v4276_v11 = vadd.f32 %v8191_v52, %v4275_v29 }
 0x64a   : > { %4377 = vst.msk [vmem:[%s8210_s12 + $0xe8] sm:$0xff] %vm10043_vm1, %v4345_v53  ;;  %v4315_v22 = vadd.f32 %v4798_v45, %v4281_v33 }
 0x64b   : > { %4376 = vst.msk [vmem:[%s8210_s12 + $0xe0] sm:$0xff] %vm10044_vm8, %v4344_v15  ;;  %v4314_v31 = vadd.f32 %v4799_v20, %v4276_v11 }
 0x64c   : > { %v4347_v19 = vmax.f32 %v4315_v22, 0.0 }
 0x64d   : > { %v4346_v3 = vmax.f32 %v4314_v31, 0.0 }
 0x64e   : > { %4379 = vst.msk [vmem:[%s8210_s12 + $0xf8] sm:$0xff] %vm10045_vm11, %v4347_v19 }
 0x64f   : > { %4378 = vst.msk [vmem:[%s8210_s12 + $0xf0] sm:$0xff] %vm10046_vm2, %v4346_v3 }
 0x650 PF: > { %s15_s18 = sadd.s32 1, %s4806_s18  }
 0x651   : > { %p12_p4 = scmp.ge.s32.totalorder %s15_s18, 4  }
 0x653   :  { %14 = sbr.rel (!%p12_p4) target bundleno = 1 (0x1), region = 70 }

</bundles_post_ra>
